<compile_context>
chip_gen: v7x
topology: tpu7x:2x2x1
jax: 0.10.0
libtpu: 0.0.40
codegen_flags: <defaults>
</compile_context>

<pallas_src>
import jax
import jax.numpy as jnp
from jax.experimental import pallas as pl
from jax.experimental.pallas import tpu as pltpu


def _upsample2x_kernel(x_ref, o_ref):
    """x_ref: (B, TH, W)  ->  o_ref: (B, 2*TH, 2*W), nearest-neighbor 2x."""
    x = x_ref[...]
    B, TH, TW = x.shape
    # (a) repeat rows (sublane axis) - cheap, no cross-lane movement.
    xh = jnp.broadcast_to(x[:, :, None, :], (B, TH, 2, TW)).reshape(B, 2 * TH, TW)
    # (b) repeat columns (lane axis) - the only cross-lane (XLU) work here.
    o_ref[...] = jnp.broadcast_to(
        xh[:, :, :, None], (B, 2 * TH, TW, 2)
    ).reshape(B, 2 * TH, 2 * TW)
    # TODO(synk): for bf16/fp16 inputs, the lane interleave could be replaced by
    # the (b << 16) | b widen + pltpu.bitcast trick (pure VPU, no XLU shuffle).


def _choose_tiles(num_planes, H, W, itemsize):
    """Pick (planes_per_block, rows_per_block) targeting ~2 MiB input / block.

    Double-buffered in + out costs ~2 * (X + 4X) = 10X VMEM for an X-byte input
    tile, so 2 MiB input tiles -> ~20 MiB pipelined VMEM, which fits under a
    32 MiB scoped VMEM limit on all of v5e / v6e / v7x.
    """
    target_in_bytes = 2 * 1024 * 1024
    sublane = {4: 8, 2: 16, 1: 32}.get(itemsize, 8)
    plane_bytes = H * W * itemsize

    if plane_bytes <= target_in_bytes:
        # Small planes: pack many (N*C) planes per block; keep full (H, W) so
        # the last two block dims equal the array dims (always layout-legal)
        # and the output tile is as lane-dense as the problem allows.
        bp = max(1, min(num_planes, target_in_bytes // plane_bytes))
        while num_planes % bp != 0:  # exact blocks only (no ragged plane tiles)
            bp -= 1
        return bp, H

    # Large planes: one plane per block, tile along H (sublane axis) in
    # sublane multiples; keep W full so the output last dim (2W) stays
    # lane-dense for unmasked stores.
    rows = max(1, target_in_bytes // (W * itemsize))
    th = max(sublane, (rows // sublane) * sublane)
    th = min(th, H)
    return 1, th


def upsampling_block(x):
    """Nearest-neighbor 2x spatial upsample of an NCHW tensor via Pallas TPU."""
    N, C, H, W = x.shape
    P = N * C
    itemsize = jnp.dtype(x.dtype).itemsize
    bp, th = _choose_tiles(P, H, W, itemsize)

    grid = (pl.cdiv(P, bp), pl.cdiv(H, th))
    x3 = x.reshape(P, H, W)  # collapse N, C -> one plane axis (free, contiguous)

    out3 = pl.pallas_call(
        _upsample2x_kernel,
        out_shape=jax.ShapeDtypeStruct((P, 2 * H, 2 * W), x.dtype),
        grid_spec=pl.GridSpec(
            grid=grid,
            in_specs=[pl.BlockSpec((bp, th, W), lambda p, h: (p, h, 0))],
            out_specs=pl.BlockSpec((bp, 2 * th, 2 * W), lambda p, h: (p, h, 0)),
        ),
        compiler_params=pltpu.CompilerParams(
            # Every block is independent; a parallel leading axis lets v7x's
            # two TensorCores each take half of the bandwidth-bound grid.
            dimension_semantics=("parallel", "parallel"),
            # Explicit limit: safe on v7x (64 MiB physical) and lifts v5e's
            # 16 MiB default so 2 MiB input tiles (~20 MiB pipelined) fit.
            vmem_limit_bytes=32 * 1024 * 1024,
        ),
    )(x3)

    return out3.reshape(N, C, 2 * H, 2 * W)


if __name__ == "__main__":
    key = jax.random.PRNGKey(0)
    N, C, H, W = 2, 4, 16, 16
    x = jax.random.normal(key, (N, C, H, W), dtype=jnp.float32)

    out = upsampling_block(x)
    out = jax.block_until_ready(out)

    # Reference: nearest-neighbor 2x (== torch F.interpolate(scale_factor=2)).
    ref = jnp.repeat(jnp.repeat(x, 2, axis=2), 2, axis=3)

    assert out.shape == (N, C, 2 * H, 2 * W), out.shape
    assert out.dtype == x.dtype
    assert jnp.array_equal(out, ref), "mismatch vs nearest-neighbor reference"

    print("KERNEL_OK")
</pallas_src>

<mosaic_0001>
module attributes {stable_mosaic.version = 11 : i64} {
  func.func @_upsample2x_kernel(%arg0: i32, %arg1: i32, %arg2: memref<8x16x16xf32, #tpu.memory_space<vmem>>, %arg3: memref<8x32x32xf32, #tpu.memory_space<vmem>>) attributes {dimension_semantics = [#tpu.dimension_semantics<parallel>, #tpu.dimension_semantics<parallel>], iteration_bounds = array<i64: 1, 1>, scalar_prefetch = 0 : i64, scratch_operands = 0 : i64, tpu.core_type = #tpu.core_type<tc>, window_params = [{transform_indices = @transform_0, window_bounds = array<i64: 8, 16, 16>}, {transform_indices = @transform_1, window_bounds = array<i64: 8, 32, 32>}]} {
    %c0 = arith.constant 0 : index
    %c0_0 = arith.constant 0 : index
    %c0_1 = arith.constant 0 : index
    %0 = vector.load %arg2[%c0, %c0_0, %c0_1] : memref<8x16x16xf32, #tpu.memory_space<vmem>>, vector<8x16x16xf32>
    %1 = vector.shape_cast %0 : vector<8x16x16xf32> to vector<8x16x1x16xf32>
    %2 = vector.shape_cast %1 : vector<8x16x1x16xf32> to vector<8x16x1x16xf32>
    %3 = vector.broadcast %2 : vector<8x16x1x16xf32> to vector<8x16x2x16xf32>
    %4 = vector.shape_cast %3 : vector<8x16x2x16xf32> to vector<8x32x16xf32>
    %5 = vector.shape_cast %4 : vector<8x32x16xf32> to vector<8x32x16x1xf32>
    %6 = vector.shape_cast %5 : vector<8x32x16x1xf32> to vector<8x32x16x1xf32>
    %7 = vector.broadcast %6 : vector<8x32x16x1xf32> to vector<8x32x16x2xf32>
    %8 = vector.shape_cast %7 : vector<8x32x16x2xf32> to vector<8x32x32xf32>
    %c0_2 = arith.constant 0 : index
    %c0_3 = arith.constant 0 : index
    %c0_4 = arith.constant 0 : index
    %9 = vector.load %arg3[%c0_2, %c0_3, %c0_4] : memref<8x32x32xf32, #tpu.memory_space<vmem>>, vector<8x32x32xf32>
    tpu.vector_store %arg3[%c0_2, %c0_3, %c0_4], %8 {strides = array<i32>} : memref<8x32x32xf32, #tpu.memory_space<vmem>>, vector<8x32x32xf32>,
    return
  }
  func.func @transform_0(%arg0: i32, %arg1: i32) -> (i32, i32, i32) {
    %c0_i32 = arith.constant 0 : i32
    %c0_i32_0 = arith.constant 0 : i32
    return %arg0, %arg1, %c0_i32 : i32, i32, i32
  }
  func.func @transform_1(%arg0: i32, %arg1: i32) -> (i32, i32, i32) {
    %c0_i32 = arith.constant 0 : i32
    %c0_i32_0 = arith.constant 0 : i32
    return %arg0, %arg1, %c0_i32 : i32, i32, i32
  }
}

</mosaic_0001>

<bundles_post_ra>
// kernel: tpu_custom_call.1
= control target key start
LH: loop header
LB: loop body
LE: loop exit
PB: predicated region body
PF: predicated region fallthrough
CT: control target
= control target key end

     0   :  { %6 = vsyncpa [#allocation3], 0  ;;  %s20031_s0 = inlined_call_operand.hbm [shape: f32[8,16,16], index: 0, kind: input, shape index: {}]   ;;  %s20032_s1 = inlined_call_operand.hbm [shape: f32[8,32,32], index: 1, kind: output, shape index: {}]  }
   0x1   :  { %7 = vsyncpa [#allocation4], 0  ;;  %s11581_s6 = smov [#allocation2]   ;;  %s11533_s10 = scalar_lea.hbm %s20031_s0, 2048 }
   0x2   :  { %s13_s7 = sshll.u32 %s11581_s6, 4  ;;  %p11534_p0 = scmp.ne.s32.totalorder %s20031_s0, %s11533_s10  ;;  %s14_s7 = int_to_ptr.vmem [resolvable:$true] %s13_s7 }
   0x3   :  { %p11537_p1 = scmp.lt.u32.totalorder %s11533_s10, %s20031_s0 }
   0x5   :  { %p11539_p2 = pnand %p11537_p1, %p11534_p0 }
   0x7   :  { %11542 = shalt.err (!%p11539_p2)
}
   0x8   :  { %s11543_s15 = scalar_lea.vmem %s14_s7, 2048  ;;  %p11548_p4 = scmp.lt.s32.totalorder %s14_s7, %s14_s7 }
   0x9   :  { %p11544_p3 = scmp.ne.s32.totalorder %s14_s7, %s11543_s15  ;;  %p11549_p5 = scmp.lt.s32.totalorder %s11543_s15, %s11543_s15 }
   0xb   :  { %p11550_p6 = por %p11549_p5, %p11548_p4 }
   0xd   :  { %p11551_p7 = pnand %p11550_p6, %p11544_p3 }
   0xf   :  { %11554 = shalt.err (!%p11551_p7)
}
  0x10   :  { %s11582_s16 = smov 128   ;;  %s11583_s17 = smov 8  }
  0x11   :  { %19 = dma.hbm_to_vmem [thread:$0]  %s20031_s0, 2048, %s14_s7, [#allocation3], %s11582_s16, %s11582_s16, %s11583_s17  }
  0x12   :  { %11577 = dma.done.wait [#allocation3], 2048  }
  0x13   :  { %11578 = vsyncadd [#allocation3], 4294965248  ;;  %v59_v0 = vlaneseq  ;;  %v11584_v1 = vmov 1966171168   ;;  %v23_v6 = vld [vmem:[#allocation2] sm:$0xff]  ;;  %v24_v26 = vld [vmem:[#allocation2 + $0x8] sm:$0xff] }
  0x14   :  { %v57_v2 = vunpack.c.l.s4 %v11584_v1  ;;  %v55_v11 = vcombine.high %v23_v6, %v23_v6  ;;  %v104_v37 = vcombine.high %v24_v26, %v24_v26  ;;  %v25_v48 = vld [vmem:[#allocation2 + $0x10] sm:$0xff]  ;;  %s11587_s0 = smov 2   ;;  %s11588_s20 = smov 4   ;;  %vm10951_vm0 = vcmask 15360  }
  0x15   :  { %v11627_v3 = vshrl.u32 %v59_v0, 7  ;;  %v153_v59 = vcombine.high %v25_v48, %v25_v48  ;;  %s11589_s21 = smov 6   ;;  %s11590_s22 = smov 10   ;;  %vm10984_vm1 = vcmask 31744   ;;  %vm11017_vm2 = vcmask 48128  }
  0x16   :  { %v58_v4 = vunpack.c.0.s8 %v57_v2  ;;  %s11591_s23 = smov 12   ;;  %s11592_s24 = smov 14   ;;  %vm11050_vm3 = vcmask 64512   ;;  %vm11083_vm4 = vcmask 80896   ;;  %vm11116_vm5 = vcmask 97280  }
  0x17   :  { %v11634_v8 = vsub.s32 0, %v11627_v3  ;;  %s11593_s25 = smov 16   ;;  %s11594_s26 = smov 18   ;;  %vm11149_vm6 = vcmask 113664   ;;  %vm11182_vm7 = vcmask 130048   ;;  %vm11215_vm8 = vcmask 146432  }
  0x18   :  { %v11630_v5 = vsub.s32 %v58_v4, %v11627_v3  ;;  %s11595_s27 = smov 20   ;;  %s11596_s28 = smov 22   ;;  %vm11248_vm9 = vcmask 162816   ;;  %vm11281_vm10 = vcmask 179200   ;;  %vm11314_vm11 = vcmask 195584  }
  0x19   :  { %s11597_s29 = smov 24   ;;  %s11598_s30 = smov 26   ;;  %vm11347_vm12 = vcmask 211968   ;;  %vm11380_vm13 = vcmask 228352   ;;  %vm11413_vm14 = vcmask 244736   ;;  %vm11446_vm15 = vcmask 261120  }
  0x1a   :  { %v62_v7 = vrot.slane %v23_v6, %v11630_v5  ;;  %v69_v16 = vrot.slane %v55_v11, %v11630_v5  ;;  %v111_v29 = vrot.slane %v24_v26, %v11630_v5  ;;  %v118_v40 = vrot.slane %v104_v37, %v11630_v5  ;;  %s11599_s2 = smov 28   ;;  %s11600_s3 = smov 30  }
  0x1b   :  { %v160_v51 = vrot.slane %v25_v48, %v11630_v5  ;;  %v167_v62 = vrot.slane %v153_v59, %v11630_v5  ;;  %s11601_s4 = smov [#allocation5]  }
  0x1c   :  { %v78_v9 = vrot.slane %v62_v7, %v11630_v5  ;;  %v70_v10 = vcombine.high %v62_v7, %v62_v7  ;;  %v85_v18 = vrot.slane %v69_v16, %v11630_v5  ;;  %v71_v21 = vcombine.high %v69_v16, %v69_v16  ;;  %s11484_s5 = sshll.u32 %s11601_s4, 4  ;;  %s11485_s5 = int_to_ptr.vmem [resolvable:$true] %s11484_s5 }
  0x1d   :  { %v127_v31 = vrot.slane %v111_v29, %v11630_v5  ;;  %v119_v32 = vcombine.high %v111_v29, %v111_v29  ;;  %v134_v42 = vrot.slane %v118_v40, %v11630_v5  ;;  %v120_v43 = vcombine.high %v118_v40, %v118_v40  ;;  %s11555_s6 = scalar_lea.vmem %s11485_s5, 4096  ;;  %p11560_p9 = scmp.lt.s32.totalorder %s11485_s5, %s11485_s5 }
  0x1e   :  { %v842_v12 = vrot.slane %v78_v9, %v11634_v8  ;;  %v92_v13 = vrot.slane %v70_v10, %v11630_v5  ;;  %v100_v15 = vcombine.high %v78_v9, %v78_v9  ;;  %v858_v19 = vrot.slane %v85_v18, %v11634_v8  ;;  %v26_v9 = vld [vmem:[#allocation2 + $0x18] sm:$0xff]  ;;  %p11556_p8 = scmp.ne.s32.totalorder %s11485_s5, %s11555_s6  ;;  %p11561_p10 = scmp.lt.s32.totalorder %s11555_s6, %s11555_s6 }
  0x1f   :  { %v99_v23 = vrot.slane %v71_v21, %v11630_v5  ;;  %v101_v25 = vcombine.high %v85_v18, %v85_v18  ;;  %v874_v33 = vrot.slane %v127_v31, %v11634_v8  ;;  %v141_v34 = vrot.slane %v119_v32, %v11630_v5 }
  0x20   :  { %1480 = vbcast.lane.b32.xlu0 %v842_v12, 256  ;;  %v846_v14 = vrot.slane %v92_v13, %v11634_v8  ;;  %v850_v17 = vrot.slane %v100_v15, %v11634_v8  ;;  %v102_v20 = vcombine.high %v92_v13, %v92_v13  ;;  %v149_v36 = vcombine.high %v127_v31, %v127_v31  ;;  %v27_v31 = vld [vmem:[#allocation2 + $0x20] sm:$0xff]  ;;  %p11562_p11 = por %p11561_p10, %p11560_p9 }
  0x21   :  { %v862_v24 = vrot.slane %v99_v23, %v11634_v8  ;;  %v866_v27 = vrot.slane %v101_v25, %v11634_v8  ;;  %v103_v28 = vcombine.high %v99_v23, %v99_v23  ;;  %v878_v35 = vrot.slane %v141_v34, %v11634_v8 }
  0x22   :  { %1487 = vbcast.lane.b32.xlu1 %v846_v14, 256  ;;  %v854_v22 = vrot.slane %v102_v20, %v11634_v8  ;;  %v882_v38 = vrot.slane %v149_v36, %v11634_v8  ;;  %v151_v39 = vcombine.high %v141_v34, %v141_v34  ;;  %v890_v44 = vrot.slane %v134_v42, %v11634_v8  ;;  %p11563_p12 = pnand %p11562_p11, %p11556_p8 }
  0x23   :  { %v870_v30 = vrot.slane %v103_v28, %v11634_v8  ;;  %v148_v45 = vrot.slane %v120_v43, %v11630_v5  ;;  %v150_v47 = vcombine.high %v134_v42, %v134_v42  ;;  %v176_v53 = vrot.slane %v160_v51, %v11630_v5 }
  0x24   :  { %1484 = vbcast.lane.b32.xlu0 %v842_v12, 264  ;;  %v886_v41 = vrot.slane %v151_v39, %v11634_v8  ;;  %v168_v54 = vcombine.high %v160_v51, %v160_v51  ;;  %v183_v0 = vrot.slane %v167_v62, %v11630_v5  ;;  %v169_v1 = vcombine.high %v167_v62, %v167_v62 }
  0x25   :  { %v894_v46 = vrot.slane %v148_v45, %v11634_v8  ;;  %v898_v49 = vrot.slane %v150_v47, %v11634_v8  ;;  %v152_v50 = vcombine.high %v148_v45, %v148_v45  ;;  %v906_v55 = vrot.slane %v176_v53, %v11634_v8 }
  0x26   :  { %1491 = vbcast.lane.b32.xlu1 %v846_v14, 264  ;;  %v190_v56 = vrot.slane %v168_v54, %v11630_v5  ;;  %v198_v58 = vcombine.high %v176_v53, %v176_v53  ;;  %v922_v2 = vrot.slane %v183_v0, %v11634_v8  ;;  %v197_v4 = vrot.slane %v169_v1, %v11630_v5 }
  0x27   :  { %v902_v52 = vrot.slane %v152_v50, %v11634_v8  ;;  %v199_v7 = vcombine.high %v183_v0, %v183_v0  ;;  %v209_v12 = vrot.slane %v26_v9, %v11630_v5  ;;  %v202_v20 = vcombine.high %v26_v9, %v26_v9 }
  0x28   :  { %1494 = vbcast.lane.b32.xlu0 %v850_v17, 256  ;;  %v910_v57 = vrot.slane %v190_v56, %v11634_v8  ;;  %v914_v60 = vrot.slane %v198_v58, %v11634_v8  ;;  %v200_v61 = vcombine.high %v190_v56, %v190_v56  ;;  %v926_v6 = vrot.slane %v197_v4, %v11634_v8 }
  0x29   :  { %v930_v10 = vrot.slane %v199_v7, %v11634_v8  ;;  %v201_v11 = vcombine.high %v197_v4, %v197_v4  ;;  %v225_v14 = vrot.slane %v209_v12, %v11630_v5  ;;  %v217_v15 = vcombine.high %v209_v12, %v209_v12 }
  0x2a   :  { %1498 = vbcast.lane.b32.xlu1 %v850_v17, 264  ;;  %v918_v63 = vrot.slane %v200_v61, %v11634_v8  ;;  %v216_v23 = vrot.slane %v202_v20, %v11630_v5  ;;  %v258_v36 = vrot.slane %v27_v31, %v11630_v5  ;;  %v11585_v42 = vmov 1983009808  }
  0x2b   :  { %v934_v13 = vrot.slane %v201_v11, %v11634_v8  ;;  %v938_v16 = vrot.slane %v225_v14, %v11634_v8  ;;  %v239_v17 = vrot.slane %v217_v15, %v11630_v5  ;;  %v2378_v43 = vunpack.c.l.s4 %v11585_v42 }
  0x2c   :  { %1508 = vbcast.lane.b32.xlu0 %v858_v19, 256  ;;  %v232_v25 = vrot.slane %v216_v23, %v11630_v5  ;;  %v218_v26 = vcombine.high %v216_v23, %v216_v23  ;;  %v274_v40 = vrot.slane %v258_v36, %v11630_v5  ;;  %v251_v53 = vcombine.high %v27_v31, %v27_v31 }
  0x2d   :  { %v942_v18 = vrot.slane %v239_v17, %v11634_v8  ;;  %v2379_v48 = vunpack.c.0.s8 %v2378_v43  ;;  %v11586_v54 = vmov 1934713408  }
  0x2e   :  { %1512 = vbcast.lane.b32.xlu1 %v858_v19, 264  ;;  %v247_v19 = vcombine.high %v225_v14, %v225_v14  ;;  %v246_v28 = vrot.slane %v218_v26, %v11630_v5 }
  0x2f   :  { %v11711_v56 = vsub.s32 %v2379_v48, %v11627_v3 }
  0x30   :  { %1501 = vbcast.lane.b32.xlu0 %v854_v22, 256  ;;  %v946_v21 = vrot.slane %v247_v19, %v11634_v8  ;;  %v958_v29 = vrot.slane %v246_v28, %v11634_v8 }
  0x32   :  { %1505 = vbcast.lane.b32.xlu1 %v854_v22, 264  ;;  %v249_v22 = vcombine.high %v239_v17, %v239_v17 }
  0x34   :  { %1515 = vbcast.lane.b32.xlu0 %v862_v24, 256 }
  0x36   :  { %1519 = vbcast.lane.b32.xlu1 %v862_v24, 264  ;;  %v950_v24 = vrot.slane %v249_v22, %v11634_v8 }
  0x38   :  { %1522 = vbcast.lane.b32.xlu0 %v866_v27, 256 }
  0x3a   :  { %1526 = vbcast.lane.b32.xlu1 %v866_v27, 264  ;;  %v954_v27 = vrot.slane %v232_v25, %v11634_v8 }
  0x3c   :  { %1529 = vbcast.lane.b32.xlu0 %v870_v30, 256 }
  0x3e   :  { %1533 = vbcast.lane.b32.xlu1 %v870_v30, 264  ;;  %v248_v30 = vcombine.high %v232_v25, %v232_v25 }
  0x40   :  { %1536 = vbcast.lane.b32.xlu0 %v874_v33, 256  ;;  %v962_v34 = vrot.slane %v248_v30, %v11634_v8 }
  0x42   :  { %1540 = vbcast.lane.b32.xlu1 %v874_v33, 264 }
  0x44   :  { %1543 = vbcast.lane.b32.xlu0 %v878_v35, 256 }
  0x46   :  { %1547 = vbcast.lane.b32.xlu1 %v878_v35, 264  ;;  %v250_v35 = vcombine.high %v246_v28, %v246_v28 }
  0x48   :  { %1550 = vbcast.lane.b32.xlu0 %v882_v38, 256  ;;  %v966_v39 = vrot.slane %v250_v35, %v11634_v8  ;;  %v11757_v35 = vld [vmem:[#allocation2 + $0x28] sm:$0xff] }
  0x4a   :  { %1554 = vbcast.lane.b32.xlu1 %v882_v38, 264 }
  0x4c   :  { %1557 = vbcast.lane.b32.xlu0 %v886_v41, 256 }
  0x4e   :  { %1561 = vbcast.lane.b32.xlu1 %v886_v41, 264  ;;  %v266_v41 = vcombine.high %v258_v36, %v258_v36 }
  0x50   :  { %1564 = vbcast.lane.b32.xlu0 %v890_v44, 256  ;;  %v288_v47 = vrot.slane %v266_v41, %v11630_v5 }
  0x52   :  { %1568 = vbcast.lane.b32.xlu1 %v890_v44, 264  ;;  %v974_v51 = vrot.slane %v288_v47, %v11634_v8  ;;  %v298_v62 = vcombine.high %v288_v47, %v288_v47 }
  0x54   :  { %1571 = vbcast.lane.b32.xlu0 %v894_v46, 256  ;;  %v982_v11 = vrot.slane %v298_v62, %v11634_v8 }
  0x56   :  { %1575 = vbcast.lane.b32.xlu1 %v894_v46, 264  ;;  %v970_v46 = vrot.slane %v274_v40, %v11634_v8 }
  0x58   :  { %1578 = vbcast.lane.b32.xlu0 %v898_v49, 256 }
  0x5a   :  { %1582 = vbcast.lane.b32.xlu1 %v898_v49, 264 }
  0x5c   :  { %1585 = vbcast.lane.b32.xlu0 %v902_v52, 256 }
  0x5e   :  { %1589 = vbcast.lane.b32.xlu1 %v902_v52, 264  ;;  %v296_v52 = vcombine.high %v274_v40, %v274_v40 }
  0x60   :  { %1592 = vbcast.lane.b32.xlu0 %v906_v55, 256  ;;  %v978_v61 = vrot.slane %v296_v52, %v11634_v8 }
  0x62   :  { %1596 = vbcast.lane.b32.xlu1 %v906_v55, 264  ;;  %v2410_v55 = vunpack.c.l.s4 %v11586_v54 }
  0x64   :  { %1599 = vbcast.lane.b32.xlu0 %v910_v57, 256  ;;  %v2411_v0 = vunpack.c.0.s8 %v2410_v55 }
  0x66   :  { %1603 = vbcast.lane.b32.xlu1 %v910_v57, 264 }
  0x68   :  { %1606 = vbcast.lane.b32.xlu0 %v914_v60, 256 }
  0x6a   :  { %1610 = vbcast.lane.b32.xlu1 %v914_v60, 264 }
  0x6c   :  { %1613 = vbcast.lane.b32.xlu0 %v918_v63, 256 }
  0x6e   :  { %1617 = vbcast.lane.b32.xlu1 %v918_v63, 264  ;;  %v265_v63 = vrot.slane %v251_v53, %v11630_v5 }
  0x70   :  { %1620 = vbcast.lane.b32.xlu0 %v922_v2, 256  ;;  %v281_v12 = vrot.slane %v265_v63, %v11630_v5 }
  0x72   :  { %1624 = vbcast.lane.b32.xlu1 %v922_v2, 264  ;;  %v986_v22 = vrot.slane %v281_v12, %v11634_v8 }
  0x74   :  { %1627 = vbcast.lane.b32.xlu0 %v926_v6, 256 }
  0x76   :  { %1631 = vbcast.lane.b32.xlu1 %v926_v6, 264  ;;  %v267_v6 = vcombine.high %v265_v63, %v265_v63 }
  0x78   :  { %1634 = vbcast.lane.b32.xlu0 %v930_v10, 256  ;;  %v295_v19 = vrot.slane %v267_v6, %v11630_v5 }
  0x7a   :  { %1638 = vbcast.lane.b32.xlu1 %v930_v10, 264  ;;  %v990_v31 = vrot.slane %v295_v19, %v11634_v8  ;;  %v299_v42 = vcombine.high %v295_v19, %v295_v19 }
  0x7c   :  { %1641 = vbcast.lane.b32.xlu0 %v934_v13, 256  ;;  %v998_v6 = vrot.slane %v299_v42, %v11634_v8 }
  0x7e   :  { %1645 = vbcast.lane.b32.xlu1 %v934_v13, 264  ;;  %v11726_v13 = vsub.s32 %v2411_v0, %v11627_v3 }
  0x80   :  { %1648 = vbcast.lane.b32.xlu0 %v938_v16, 256 }
  0x82   :  { %1652 = vbcast.lane.b32.xlu1 %v938_v16, 264 }
  0x84   :  { %1655 = vbcast.lane.b32.xlu0 %v942_v18, 256 }
  0x86   :  { %1659 = vbcast.lane.b32.xlu1 %v942_v18, 264 }
  0x88   :  { %1662 = vbcast.lane.b32.xlu0 %v946_v21, 256 }
  0x8a   :  { %1666 = vbcast.lane.b32.xlu1 %v946_v21, 264 }
  0x8c   :  { %1669 = vbcast.lane.b32.xlu0 %v950_v24, 256 }
  0x8e   :  { %1673 = vbcast.lane.b32.xlu1 %v950_v24, 264 }
  0x90   :  { %1676 = vbcast.lane.b32.xlu0 %v954_v27, 256 }
  0x92   :  { %v11689_v32 = vpop.permute.xlu0 %1480  ;;  %1680 = vbcast.lane.b32.xlu1 %v954_v27, 264 }
  0x94   :  { %v11691_v33 = vpop.permute.xlu1 %1487  ;;  %1683 = vbcast.lane.b32.xlu0 %v958_v29, 256 }
  0x95   :  { %v2375_v57 = vcombine.low %v11689_v32, %v11691_v33  ;;  %v2376_v20 = vcombine.high %v11689_v32, %v11691_v33 }
  0x96   :  { %v11695_v37 = vpop.permute.xlu0 %1484  ;;  %1687 = vbcast.lane.b32.xlu1 %v958_v29, 264 }
  0x97   :  { %v2383_v2 = vrot.slane %v2375_v57, %v11711_v56  ;;  %v11753_v32 = vrot.slane %v2376_v20, %v11711_v56 }
  0x98   :  { %v11697_v38 = vpop.permute.xlu1 %1491  ;;  %1690 = vbcast.lane.b32.xlu0 %v962_v34, 256 }
  0x99   :  { %v2407_v14 = vcombine.low %v2383_v2, %v2383_v2  ;;  %v2408_v15 = vcombine.high %v2383_v2, %v2383_v2  ;;  %v2423_v54 = vcombine.low %v11753_v32, %v11753_v32 }
  0x9a   :  { %v1495_v44 = vpop.permute.xlu0 %1494  ;;  %1694 = vbcast.lane.b32.xlu1 %v962_v34, 264  ;;  %v297_v34 = vcombine.high %v281_v12, %v281_v12 }
  0x9b   :  { %v11746_v27 = vrot.slane %v2407_v14, %v11726_v13  ;;  %v11749_v28 = vrot.slane %v2408_v15, %v11726_v13  ;;  %v11808_v15 = vrot.slane %v2423_v54, %v11726_v13 }
  0x9c   :  { %v11701_v45 = vpop.permute.xlu1 %1498  ;;  %1697 = vbcast.lane.b32.xlu0 %v966_v39, 256  ;;  %v994_v57 = vrot.slane %v297_v34, %v11634_v8 }
  0x9d   :  { %21232 = vst [vmem:[#allocation10_spill] sm:$0xff] %v11746_v27  ;;  %21233 = vst [vmem:[#allocation11_spill] sm:$0xff] %v11749_v28 }
  0x9e   :  { %v11705_v49 = vpop.permute.xlu0 %1508  ;;  %1701 = vbcast.lane.b32.xlu1 %v966_v39, 264  ;;  %21239 = vst [vmem:[#allocation17_spill] sm:$0xff] %v11808_v15 }
  0xa0   :  { %v11707_v50 = vpop.permute.xlu1 %1512  ;;  %1704 = vbcast.lane.b32.xlu0 %v970_v46, 256 }
  0xa2   :  { %v1502_v58 = vpop.permute.xlu0 %1501  ;;  %1708 = vbcast.lane.b32.xlu1 %v970_v46, 264 }
  0xa3   :  { %v2391_v59 = vcombine.low %v1495_v44, %v1502_v58  ;;  %v2392_v16 = vcombine.high %v1495_v44, %v1502_v58 }
  0xa4   :  { %v11715_v60 = vpop.permute.xlu1 %1505  ;;  %1711 = vbcast.lane.b32.xlu0 %v974_v51, 256 }
  0xa5   :  { %v2399_v1 = vrot.slane %v2391_v59, %v11711_v56  ;;  %v11742_v24 = vrot.slane %v2392_v16, %v11711_v56 }
  0xa6   :  { %v1516_v4 = vpop.permute.xlu0 %1515  ;;  %1715 = vbcast.lane.b32.xlu1 %v974_v51, 264 }
  0xa7   :  { %v2439_v7 = vcombine.low %v2399_v1, %v2399_v1  ;;  %v2440_v9 = vcombine.high %v2399_v1, %v2399_v1  ;;  %v2479_v17 = vcombine.low %v11705_v49, %v1516_v4  ;;  %v2480_v40 = vcombine.high %v11705_v49, %v1516_v4 }
  0xa8   :  { %v11721_v10 = vpop.permute.xlu1 %1519  ;;  %1718 = vbcast.lane.b32.xlu0 %v978_v61, 256  ;;  %v2455_v43 = vcombine.low %v11742_v24, %v11742_v24  ;;  %v307_v49 = vrot.slane %v11757_v35, %v11630_v5 }
  0xa9   :  { %v11736_v3 = vrot.slane %v2439_v7, %v11726_v13  ;;  %v11739_v23 = vrot.slane %v2440_v9, %v11726_v13  ;;  %v2487_v25 = vrot.slane %v2479_v17, %v11711_v56  ;;  %v2494_v58 = vrot.slane %v2480_v40, %v11711_v56 }
  0xaa   :  { %v1523_v18 = vpop.permute.xlu0 %1522  ;;  %1722 = vbcast.lane.b32.xlu1 %v978_v61, 264  ;;  %v315_v63 = vcombine.high %v307_v49, %v307_v49  ;;  %v11793_v2 = vrot.slane %v2455_v43, %v11726_v13  ;;  %v323_v7 = vrot.slane %v307_v49, %v11630_v5 }
  0xab   :  { %21230 = vst [vmem:[#allocation8_spill] sm:$0xff] %v11736_v3  ;;  %21231 = vst [vmem:[#allocation9_spill] sm:$0xff] %v11739_v23  ;;  %v2511_v44 = vcombine.low %v2487_v25, %v2487_v25  ;;  %v2512_v46 = vcombine.high %v2487_v25, %v2487_v25  ;;  %v2527_v16 = vcombine.low %v2494_v58, %v2494_v58 }
  0xac   :  { %v11732_v21 = vpop.permute.xlu1 %1526  ;;  %1725 = vbcast.lane.b32.xlu0 %v982_v11, 256  ;;  %21238 = vst [vmem:[#allocation16_spill] sm:$0xff] %v11793_v2  ;;  %v337_v19 = vrot.slane %v315_v63, %v11630_v5  ;;  %v2424_v25 = vcombine.high %v11753_v32, %v11753_v32  ;;  %v345_v49 = vcombine.high %v323_v7, %v323_v7 }
  0xad   :  { %v11787_v0 = vrot.slane %v2511_v44, %v11726_v13  ;;  %v11790_v1 = vrot.slane %v2512_v46, %v11726_v13  ;;  %v11825_v40 = vrot.slane %v2527_v16, %v11726_v13  ;;  %v300_v46 = vcombine.high %v11757_v35, %v11757_v35 }
  0xae   :  { %1729 = vbcast.lane.b32.xlu1 %v982_v11, 264  ;;  %v1530_v26 = vpop.permute.xlu0 %1529  ;;  %v1006_v43 = vrot.slane %v337_v19, %v11634_v8 }
  0xaf   :  { %v2495_v29 = vcombine.low %v1523_v18, %v1530_v26  ;;  %v2496_v30 = vcombine.high %v1523_v18, %v1530_v26  ;;  %21236 = vst [vmem:[#allocation14_spill] sm:$0xff] %v11787_v0  ;;  %21237 = vst [vmem:[#allocation15_spill] sm:$0xff] %v11790_v1  ;;  %v2456_v26 = vcombine.high %v11742_v24, %v11742_v24 }
  0xb0   :  { %v11755_v33 = vpop.permute.xlu1 %1533  ;;  %1732 = vbcast.lane.b32.xlu0 %v986_v22, 256  ;;  %21241 = vst [vmem:[#allocation19_spill] sm:$0xff] %v11825_v40 }
  0xb1   :  { %v2503_v41 = vrot.slane %v2495_v29, %v11711_v56  ;;  %v11770_v51 = vrot.slane %v2496_v30, %v11711_v56  ;;  %v11841_v54 = vrot.slane %v2456_v26, %v11726_v13  ;;  %v314_v26 = vrot.slane %v300_v46, %v11630_v5 }
  0xb2   :  { %1736 = vbcast.lane.b32.xlu1 %v986_v22, 264  ;;  %v1537_v47 = vpop.permute.xlu0 %1536 }
  0xb3   :  { %v2543_v52 = vcombine.low %v2503_v41, %v2503_v41  ;;  %v2544_v53 = vcombine.high %v2503_v41, %v2503_v41  ;;  %v2559_v4 = vcombine.low %v11770_v51, %v11770_v51  ;;  %v2528_v41 = vcombine.high %v2494_v58, %v2494_v58  ;;  %21243 = vst [vmem:[#allocation21_spill] sm:$0xff] %v11841_v54 }
  0xb4   :  { %v11776_v55 = vpop.permute.xlu1 %1540  ;;  %1739 = vbcast.lane.b32.xlu0 %v990_v31, 256  ;;  %v2560_v42 = vcombine.high %v11770_v51, %v11770_v51  ;;  %v11838_v51 = vrot.slane %v2424_v25, %v11726_v13  ;;  %v316_v11 = vcombine.high %v314_v26, %v314_v26 }
  0xb5   :  { %v11781_v59 = vrot.slane %v2543_v52, %v11726_v13  ;;  %v11784_v61 = vrot.slane %v2544_v53, %v11726_v13  ;;  %v11814_v22 = vrot.slane %v2559_v4, %v11726_v13 }
  0xb6   :  { %1743 = vbcast.lane.b32.xlu1 %v990_v31, 264  ;;  %v1544_v62 = vpop.permute.xlu0 %1543  ;;  %v1002_v31 = vrot.slane %v323_v7, %v11634_v8  ;;  %21242 = vst [vmem:[#allocation20_spill] sm:$0xff] %v11838_v51  ;;  %v11848_v7 = vrot.slane %v2528_v41, %v11726_v13  ;;  %v11851_v16 = vrot.slane %v2560_v42, %v11726_v13 }
  0xb7   :  { %21234 = vst [vmem:[#allocation12_spill] sm:$0xff] %v11781_v59  ;;  %21235 = vst [vmem:[#allocation13_spill] sm:$0xff] %v11784_v61  ;;  %v2583_v17 = vcombine.low %v1537_v47, %v1544_v62  ;;  %v2584_v29 = vcombine.high %v1537_v47, %v1544_v62  ;;  %v347_v62 = vcombine.high %v337_v19, %v337_v19 }
  0xb8   :  { %v11799_v9 = vpop.permute.xlu1 %1547  ;;  %1746 = vbcast.lane.b32.xlu0 %v994_v57, 256  ;;  %21240 = vst [vmem:[#allocation18_spill] sm:$0xff] %v11814_v22  ;;  %21244 = vst [vmem:[#allocation22_spill] sm:$0xff] %v11848_v7  ;;  %v1010_v19 = vrot.slane %v345_v49, %v11634_v8 }
  0xb9   :  { %v2591_v34 = vrot.slane %v2583_v17, %v11711_v56  ;;  %v2598_v52 = vrot.slane %v2584_v29, %v11711_v56  ;;  %21245 = vst [vmem:[#allocation23_spill] sm:$0xff] %v11851_v16 }
  0xba   :  { %1750 = vbcast.lane.b32.xlu1 %v994_v57, 264  ;;  %v1551_v18 = vpop.permute.xlu0 %1550 }
  0xbb   :  { %v2615_v57 = vcombine.low %v2591_v34, %v2591_v34  ;;  %v2616_v63 = vcombine.high %v2591_v34, %v2591_v34  ;;  %v2631_v29 = vcombine.low %v2598_v52, %v2598_v52 }
  0xbc   :  { %v11820_v30 = vpop.permute.xlu1 %1554  ;;  %1753 = vbcast.lane.b32.xlu0 %v998_v6, 256 }
  0xbd   :  { %v11869_v46 = vrot.slane %v2616_v63, %v11726_v13 }
  0xbe   :  { %1757 = vbcast.lane.b32.xlu1 %v998_v6, 264  ;;  %v1558_v32 = vpop.permute.xlu0 %1557  ;;  %v344_v6 = vrot.slane %v316_v11, %v11630_v5 }
  0xbf   :  { %v2599_v24 = vcombine.low %v1551_v18, %v1558_v32  ;;  %v2600_v44 = vcombine.high %v1551_v18, %v1558_v32  ;;  %21249 = vst [vmem:[#allocation27_spill] sm:$0xff] %v11869_v46 }
  0xc0   :  { %v11835_v53 = vpop.permute.xlu1 %1561  ;;  %1760 = vbcast.lane.b32.xlu0 %v1002_v31, 256  ;;  %v1022_v11 = vrot.slane %v344_v6, %v11634_v8 }
  0xc1   :  { %v2607_v58 = vrot.slane %v2599_v24, %v11711_v56  ;;  %v2614_v35 = vrot.slane %v2600_v44, %v11711_v56  ;;  %v11866_v44 = vrot.slane %v2615_v57, %v11726_v13 }
  0xc2   :  { %1764 = vbcast.lane.b32.xlu1 %v1002_v31, 264  ;;  %v1565_v4 = vpop.permute.xlu0 %1564 }
  0xc3   :  { %v2647_v17 = vcombine.low %v2607_v58, %v2607_v58  ;;  %v2648_v18 = vcombine.high %v2607_v58, %v2607_v58  ;;  %v2663_v25 = vcombine.low %v2614_v35, %v2614_v35  ;;  %v2664_v34 = vcombine.high %v2614_v35, %v2614_v35  ;;  %21248 = vst [vmem:[#allocation26_spill] sm:$0xff] %v11866_v44 }
  0xc4   :  { %v11854_v32 = vpop.permute.xlu1 %1568  ;;  %1767 = vbcast.lane.b32.xlu0 %v1006_v43, 256  ;;  %v2632_v58 = vcombine.high %v2598_v52, %v2598_v52  ;;  %v1014_v35 = vrot.slane %v347_v62, %v11634_v8 }
  0xc5   :  { %v11860_v41 = vrot.slane %v2647_v17, %v11726_v13  ;;  %v11863_v42 = vrot.slane %v2648_v18, %v11726_v13  ;;  %v11872_v49 = vrot.slane %v2663_v25, %v11726_v13  ;;  %v330_v17 = vrot.slane %v314_v26, %v11630_v5 }
  0xc6   :  { %1771 = vbcast.lane.b32.xlu1 %v1006_v43, 264  ;;  %v1572_v24 = vpop.permute.xlu0 %1571  ;;  %v11885_v18 = vrot.slane %v2631_v29, %v11726_v13  ;;  %v11888_v52 = vrot.slane %v2664_v34, %v11726_v13  ;;  %v11894_v57 = vrot.slane %v2632_v58, %v11726_v13  ;;  %v11904_v58 = vld [vmem:[#allocation2 + $0x30] sm:$0xff] }
  0xc7   :  { %21246 = vst [vmem:[#allocation24_spill] sm:$0xff] %v11860_v41  ;;  %21247 = vst [vmem:[#allocation25_spill] sm:$0xff] %v11863_v42  ;;  %v2687_v62 = vcombine.low %v1565_v4, %v1572_v24  ;;  %v2688_v25 = vcombine.high %v1565_v4, %v1572_v24  ;;  %v1018_v29 = vrot.slane %v330_v17, %v11634_v8 }
  0xc8   :  { %21250 = vst [vmem:[#allocation28_spill] sm:$0xff] %v11872_v49  ;;  %v11876_v39 = vpop.permute.xlu1 %1575  ;;  %1774 = vbcast.lane.b32.xlu0 %v1010_v19, 256  ;;  %21251 = vst [vmem:[#allocation29_spill] sm:$0xff] %v11885_v18  ;;  %v346_v63 = vcombine.high %v330_v17, %v330_v17  ;;  %v356_v17 = vrot.slane %v11904_v58, %v11630_v5 }
  0xc9   :  { %21252 = vst [vmem:[#allocation30_spill] sm:$0xff] %v11888_v52  ;;  %21253 = vst [vmem:[#allocation31_spill] sm:$0xff] %v11894_v57  ;;  %v2695_v4 = vrot.slane %v2687_v62, %v11711_v56 }
  0xca   :  { %1778 = vbcast.lane.b32.xlu1 %v1010_v19, 264  ;;  %v1579_v26 = vpop.permute.xlu0 %1578  ;;  %v2702_v19 = vrot.slane %v2688_v25, %v11711_v56 }
  0xcb   :  { %v2719_v34 = vcombine.low %v2695_v4, %v2695_v4  ;;  %v2720_v12 = vcombine.high %v2695_v4, %v2695_v4 }
  0xcc   :  { %v11896_v47 = vpop.permute.xlu1 %1582  ;;  %1781 = vbcast.lane.b32.xlu0 %v1014_v35, 256  ;;  %v2735_v43 = vcombine.low %v2702_v19, %v2702_v19  ;;  %v2736_v52 = vcombine.high %v2702_v19, %v2702_v19 }
  0xcd   :  { %21254 = vst [vmem:[#allocation32_spill] sm:$0xff] %v11896_v47  ;;  %v11928_v4 = vrot.slane %v2719_v34, %v11726_v13 }
  0xce   :  { %1785 = vbcast.lane.b32.xlu1 %v1014_v35, 264  ;;  %v1586_v24 = vpop.permute.xlu0 %1585 }
  0xcf   :  { %v2703_v31 = vcombine.low %v1579_v26, %v1586_v24  ;;  %v2704_v20 = vcombine.high %v1579_v26, %v1586_v24  ;;  %v348_v24 = vcombine.high %v344_v6, %v344_v6  ;;  %21259 = vst [vmem:[#allocation37_spill] sm:$0xff] %v11928_v4 }
  0xd0   :  { %v11906_v14 = vpop.permute.xlu1 %1589  ;;  %1788 = vbcast.lane.b32.xlu0 %v1018_v29, 256 }
  0xd1   :  { %21255 = vst [vmem:[#allocation33_spill] sm:$0xff] %v11906_v14  ;;  %v2711_v25 = vrot.slane %v2703_v31, %v11711_v56  ;;  %v2718_v26 = vrot.slane %v2704_v20, %v11711_v56  ;;  %v1026_v31 = vrot.slane %v346_v63, %v11634_v8  ;;  %v364_v63 = vcombine.high %v356_v17, %v356_v17 }
  0xd2   :  { %1792 = vbcast.lane.b32.xlu1 %v1018_v29, 264  ;;  %v1593_v36 = vpop.permute.xlu0 %1592 }
  0xd3   :  { %v2751_v48 = vcombine.low %v2711_v25, %v2711_v25  ;;  %v2752_v54 = vcombine.high %v2711_v25, %v2711_v25  ;;  %v2767_v51 = vcombine.low %v2718_v26, %v2718_v26  ;;  %v2768_v62 = vcombine.high %v2718_v26, %v2718_v26 }
  0xd4   :  { %v11918_v57 = vpop.permute.xlu1 %1596  ;;  %1795 = vbcast.lane.b32.xlu0 %v1022_v11, 256  ;;  %v11931_v25 = vrot.slane %v2720_v12, %v11726_v13  ;;  %v386_v34 = vrot.slane %v364_v63, %v11630_v5 }
  0xd5   :  { %21256 = vst [vmem:[#allocation34_spill] sm:$0xff] %v11918_v57  ;;  %v11922_v20 = vrot.slane %v2751_v48, %v11726_v13  ;;  %v11925_v6 = vrot.slane %v2752_v54, %v11726_v13  ;;  %v11934_v19 = vrot.slane %v2767_v51, %v11726_v13  ;;  %v11937_v26 = vrot.slane %v2768_v62, %v11726_v13 }
  0xd6   :  { %1799 = vbcast.lane.b32.xlu1 %v1022_v11, 264  ;;  %v1600_v29 = vpop.permute.xlu0 %1599  ;;  %21260 = vst [vmem:[#allocation38_spill] sm:$0xff] %v11931_v25  ;;  %v1030_v48 = vrot.slane %v348_v24, %v11634_v8  ;;  %v372_v54 = vrot.slane %v356_v17, %v11630_v5  ;;  %v11942_v11 = vrot.slane %v2735_v43, %v11726_v13 }
  0xd7   :  { %21257 = vst [vmem:[#allocation35_spill] sm:$0xff] %v11922_v20  ;;  %21258 = vst [vmem:[#allocation36_spill] sm:$0xff] %v11925_v6  ;;  %v11953_v62 = vrot.slane %v2736_v52, %v11726_v13  ;;  %v3207_v24 = vcombine.low %v1593_v36, %v1600_v29  ;;  %v3208_v7 = vcombine.high %v1593_v36, %v1600_v29 }
  0xd8   :  { %21261 = vst [vmem:[#allocation39_spill] sm:$0xff] %v11934_v19  ;;  %21262 = vst [vmem:[#allocation40_spill] sm:$0xff] %v11937_v26  ;;  %v11944_v35 = vpop.permute.xlu1 %1603  ;;  %1802 = vbcast.lane.b32.xlu0 %v1026_v31, 256  ;;  %v1034_v51 = vrot.slane %v372_v54, %v11634_v8  ;;  %v349_v43 = vcombine.high %v11904_v58, %v11904_v58  ;;  %v1038_v63 = vrot.slane %v386_v34, %v11634_v8 }
  0xd9   :  { %21263 = vst [vmem:[#allocation41_spill] sm:$0xff] %v11942_v11  ;;  %21264 = vst [vmem:[#allocation42_spill] sm:$0xff] %v11944_v35  ;;  %v3215_v52 = vrot.slane %v3207_v24, %v11711_v56  ;;  %v3222_v36 = vrot.slane %v3208_v7, %v11711_v56  ;;  %v394_v11 = vcombine.high %v372_v54, %v372_v54 }
  0xda   :  { %21265 = vst [vmem:[#allocation43_spill] sm:$0xff] %v11953_v62  ;;  %1806 = vbcast.lane.b32.xlu1 %v1026_v31, 264  ;;  %v1607_v17 = vpop.permute.xlu0 %1606  ;;  %v396_v58 = vcombine.high %v386_v34, %v386_v34  ;;  %v363_v7 = vrot.slane %v349_v43, %v11630_v5 }
  0xdb   :  { %v3239_v19 = vcombine.low %v3215_v52, %v3215_v52  ;;  %v3255_v26 = vcombine.low %v3222_v36, %v3222_v36  ;;  %v1042_v54 = vrot.slane %v394_v11, %v11634_v8 }
  0xdc   :  { %v11959_v12 = vpop.permute.xlu1 %1610  ;;  %1809 = vbcast.lane.b32.xlu0 %v1030_v48, 256  ;;  %v1046_v11 = vrot.slane %v396_v58, %v11634_v8 }
  0xdd   :  { %21266 = vst [vmem:[#allocation44_spill] sm:$0xff] %v11959_v12  ;;  %v11985_v34 = vrot.slane %v3239_v19, %v11726_v13  ;;  %v12012_v19 = vld [vmem:[#allocation2 + $0x38] sm:$0xff] }
  0xde   :  { %1813 = vbcast.lane.b32.xlu1 %v1030_v48, 264  ;;  %v1614_v40 = vpop.permute.xlu0 %1613  ;;  %v405_v6 = vrot.slane %v12012_v19, %v11630_v5 }
  0xdf   :  { %v3223_v31 = vcombine.low %v1607_v17, %v1614_v40  ;;  %v3224_v22 = vcombine.high %v1607_v17, %v1614_v40  ;;  %v3240_v40 = vcombine.high %v3215_v52, %v3215_v52  ;;  %21271 = vst [vmem:[#allocation49_spill] sm:$0xff] %v11985_v34 }
  0xe0   :  { %v11969_v29 = vpop.permute.xlu1 %1617  ;;  %1816 = vbcast.lane.b32.xlu0 %v1034_v51, 256 }
  0xe1   :  { %21267 = vst [vmem:[#allocation45_spill] sm:$0xff] %v11969_v29  ;;  %v3231_v24 = vrot.slane %v3223_v31, %v11711_v56  ;;  %v3238_v48 = vrot.slane %v3224_v22, %v11711_v56  ;;  %v11988_v43 = vrot.slane %v3240_v40, %v11726_v13 }
  0xe2   :  { %1820 = vbcast.lane.b32.xlu1 %v1034_v51, 264  ;;  %v1621_v17 = vpop.permute.xlu0 %1620 }
  0xe3   :  { %v3271_v18 = vcombine.low %v3231_v24, %v3231_v24  ;;  %v3272_v49 = vcombine.high %v3231_v24, %v3231_v24  ;;  %v3287_v16 = vcombine.low %v3238_v48, %v3238_v48  ;;  %v3288_v15 = vcombine.high %v3238_v48, %v3238_v48  ;;  %21272 = vst [vmem:[#allocation50_spill] sm:$0xff] %v11988_v43 }
  0xe4   :  { %v11975_v62 = vpop.permute.xlu1 %1624  ;;  %1823 = vbcast.lane.b32.xlu0 %v1038_v63, 256  ;;  %v3256_v24 = vcombine.high %v3222_v36, %v3222_v36  ;;  %v365_v48 = vcombine.high %v363_v7, %v363_v7 }
  0xe5   :  { %21268 = vst [vmem:[#allocation46_spill] sm:$0xff] %v11975_v62  ;;  %v11979_v31 = vrot.slane %v3271_v18, %v11726_v13  ;;  %v11982_v22 = vrot.slane %v3272_v49, %v11726_v13  ;;  %v11991_v52 = vrot.slane %v3287_v16, %v11726_v13  ;;  %v379_v18 = vrot.slane %v363_v7, %v11630_v5 }
  0xe6   :  { %1827 = vbcast.lane.b32.xlu1 %v1038_v63, 264  ;;  %v1628_v51 = vpop.permute.xlu0 %1627  ;;  %v12004_v16 = vrot.slane %v3255_v26, %v11726_v13  ;;  %v12007_v36 = vrot.slane %v3288_v15, %v11726_v13  ;;  %v393_v49 = vrot.slane %v365_v48, %v11630_v5  ;;  %v12015_v63 = vrot.slane %v3256_v24, %v11726_v13 }
  0xe7   :  { %21269 = vst [vmem:[#allocation47_spill] sm:$0xff] %v11979_v31  ;;  %21270 = vst [vmem:[#allocation48_spill] sm:$0xff] %v11982_v22  ;;  %v3311_v40 = vcombine.low %v1621_v17, %v1628_v51  ;;  %v3312_v58 = vcombine.high %v1621_v17, %v1628_v51  ;;  %v395_v25 = vcombine.high %v379_v18, %v379_v18 }
  0xe8   :  { %21273 = vst [vmem:[#allocation51_spill] sm:$0xff] %v11991_v52  ;;  %v11995_v2 = vpop.permute.xlu1 %1631  ;;  %1830 = vbcast.lane.b32.xlu0 %v1042_v54, 256  ;;  %21274 = vst [vmem:[#allocation52_spill] sm:$0xff] %v12004_v16  ;;  %v1050_v15 = vrot.slane %v379_v18, %v11634_v8  ;;  %v1054_v52 = vrot.slane %v393_v49, %v11634_v8  ;;  %v2791_v18 = vcombine.low %v11695_v37, %v11697_v38 }
  0xe9   :  { %21275 = vst [vmem:[#allocation53_spill] sm:$0xff] %v12007_v36  ;;  %21276 = vst [vmem:[#allocation54_spill] sm:$0xff] %v12015_v63  ;;  %v3326_v51 = vrot.slane %v3312_v58, %v11711_v56  ;;  %v1058_v61 = vrot.slane %v395_v25, %v11634_v8  ;;  %v413_v17 = vcombine.high %v405_v6, %v405_v6 }
  0xea   :  { %1834 = vbcast.lane.b32.xlu1 %v1042_v54, 264  ;;  %v1635_v7 = vpop.permute.xlu0 %1634  ;;  %v3319_v54 = vrot.slane %v3311_v40, %v11711_v56  ;;  %v397_v40 = vcombine.high %v393_v49, %v393_v49  ;;  %v2807_v58 = vcombine.low %v11701_v45, %v11715_v60  ;;  %v3015_v22 = vcombine.low %v11820_v30, %v11835_v53 }
  0xeb   :  { %v3359_v49 = vcombine.low %v3326_v51, %v3326_v51  ;;  %v3360_v28 = vcombine.high %v3326_v51, %v3326_v51  ;;  %v435_v31 = vrot.slane %v413_v17, %v11630_v5 }
  0xec   :  { %v12017_v26 = vpop.permute.xlu1 %1638  ;;  %1837 = vbcast.lane.b32.xlu0 %v1046_v11, 256  ;;  %v3343_v43 = vcombine.low %v3319_v54, %v3319_v54  ;;  %v3344_v42 = vcombine.high %v3319_v54, %v3319_v54  ;;  %v12048_v4 = vrot.slane %v2807_v58, %v11711_v56 }
  0xed   :  { %21277 = vst [vmem:[#allocation55_spill] sm:$0xff] %v12017_v26 }
  0xee   :  { %1841 = vbcast.lane.b32.xlu1 %v1046_v11, 264  ;;  %v1642_v48 = vpop.permute.xlu0 %1641 }
  0xef   :  { %v3327_v16 = vcombine.low %v1635_v7, %v1642_v48  ;;  %v3328_v24 = vcombine.high %v1635_v7, %v1642_v48  ;;  %v2999_v7 = vcombine.low %v11776_v55, %v11799_v9 }
  0xf0   :  { %v12030_v1 = vpop.permute.xlu1 %1645  ;;  %1844 = vbcast.lane.b32.xlu0 %v1050_v15, 256 }
  0xf1   :  { %21278 = vst [vmem:[#allocation56_spill] sm:$0xff] %v12030_v1  ;;  %v3335_v48 = vrot.slane %v3327_v16, %v11711_v56  ;;  %v3342_v25 = vrot.slane %v3328_v24, %v11711_v56  ;;  %v1062_v16 = vrot.slane %v397_v40, %v11634_v8  ;;  %v421_v24 = vrot.slane %v405_v6, %v11630_v5 }
  0xf2   :  { %1848 = vbcast.lane.b32.xlu1 %v1050_v15, 264  ;;  %v1649_v46 = vpop.permute.xlu0 %1648  ;;  %v398_v15 = vcombine.high %v12012_v19, %v12012_v19  ;;  %v12059_v40 = vrot.slane %v3343_v43, %v11726_v13  ;;  %v12062_v6 = vrot.slane %v3344_v42, %v11726_v13  ;;  %v12074_v19 = vrot.slane %v2999_v7, %v11711_v56 }
  0xf3   :  { %v3375_v23 = vcombine.low %v3335_v48, %v3335_v48  ;;  %v3376_v11 = vcombine.high %v3335_v48, %v3335_v48  ;;  %v3391_v36 = vcombine.low %v3342_v25, %v3342_v25  ;;  %v3392_v63 = vcombine.high %v3342_v25, %v3342_v25 }
  0xf4   :  { %v12042_v34 = vpop.permute.xlu1 %1652  ;;  %1851 = vbcast.lane.b32.xlu0 %v1054_v52, 256  ;;  %21282 = vst [vmem:[#allocation60_spill] sm:$0xff] %v12059_v40  ;;  %21283 = vst [vmem:[#allocation61_spill] sm:$0xff] %v12062_v6  ;;  %v12080_v43 = vrot.slane %v3359_v49, %v11726_v13  ;;  %v445_v7 = vcombine.high %v435_v31, %v435_v31  ;;  %v412_v25 = vrot.slane %v398_v15, %v11630_v5 }
  0xf5   :  { %21279 = vst [vmem:[#allocation57_spill] sm:$0xff] %v12042_v34  ;;  %v12053_v54 = vrot.slane %v3375_v23, %v11726_v13  ;;  %v12056_v51 = vrot.slane %v3376_v11, %v11726_v13  ;;  %v12065_v17 = vrot.slane %v3391_v36, %v11726_v13  ;;  %v12068_v58 = vrot.slane %v3392_v63, %v11726_v13 }
  0xf6   :  { %1855 = vbcast.lane.b32.xlu1 %v1054_v52, 264  ;;  %v1656_v48 = vpop.permute.xlu0 %1655  ;;  %v12071_v23 = vrot.slane %v2791_v18, %v11711_v56  ;;  %v12077_v52 = vrot.slane %v3015_v22, %v11711_v56  ;;  %21286 = vst [vmem:[#allocation64_spill] sm:$0xff] %v12080_v43  ;;  %v12091_v11 = vrot.slane %v3360_v28, %v11726_v13 }
  0xf7   :  { %21280 = vst [vmem:[#allocation58_spill] sm:$0xff] %v12053_v54  ;;  %21281 = vst [vmem:[#allocation59_spill] sm:$0xff] %v12056_v51  ;;  %v443_v22 = vcombine.high %v421_v24, %v421_v24  ;;  %v2855_v49 = vcombine.low %v12048_v4, %v12048_v4  ;;  %v3415_v20 = vcombine.low %v1649_v46, %v1656_v48 }
  0xf8   :  { %21284 = vst [vmem:[#allocation62_spill] sm:$0xff] %v12065_v17  ;;  %21285 = vst [vmem:[#allocation63_spill] sm:$0xff] %v12068_v58  ;;  %v12082_v42 = vpop.permute.xlu1 %1659  ;;  %1858 = vbcast.lane.b32.xlu0 %v1058_v61, 256  ;;  %v3416_v18 = vcombine.high %v1649_v46, %v1656_v48  ;;  %v2823_v28 = vcombine.low %v12071_v23, %v12071_v23  ;;  %v3031_v51 = vcombine.low %v12074_v19, %v12074_v19 }
  0xf9   :  { %21287 = vst [vmem:[#allocation65_spill] sm:$0xff] %v12082_v42  ;;  %21288 = vst [vmem:[#allocation66_spill] sm:$0xff] %v12091_v11  ;;  %v3063_v15 = vcombine.low %v12077_v52, %v12077_v52  ;;  %v1070_v36 = vrot.slane %v435_v31, %v11634_v8  ;;  %v12111_v43 = vrot.slane %v443_v22, %v11634_v8 }
  0xfa   :  { %1862 = vbcast.lane.b32.xlu1 %v1058_v61, 264  ;;  %v1663_v44 = vpop.permute.xlu0 %1662  ;;  %v1066_v61 = vrot.slane %v421_v24, %v11634_v8  ;;  %v3423_v46 = vrot.slane %v3415_v20, %v11711_v56  ;;  %v12115_v63 = vrot.slane %v445_v7, %v11634_v8  ;;  %v12118_v17 = vrot.slane %v412_v25, %v11630_v5 }
  0xfb   :  { %v12121_v40 = vrot.slane %v2855_v49, %v11726_v13  ;;  %v12124_v24 = vrot.slane %v3416_v18, %v11711_v56  ;;  %v12131_v7 = vrot.slane %v2823_v28, %v11726_v13  ;;  %v12134_v41 = vrot.slane %v3031_v51, %v11726_v13 }
  0xfc   :  { %v12106_v6 = vpop.permute.xlu1 %1666  ;;  %1865 = vbcast.lane.b32.xlu0 %v1062_v16, 256  ;;  %v12137_v49 = vrot.slane %v3063_v15, %v11726_v13  ;;  %v3623_v18 = vcombine.low %v11918_v57, %v11944_v35  ;;  %v3448_v58 = vcombine.high %v3423_v46, %v3423_v46  ;;  %v3831_v28 = vcombine.low %v12042_v34, %v12082_v42  ;;  %v12172_v34 = vld [vmem:[#allocation2 + $0x40] sm:$0xff] }
  0xfd   :  { %21289 = vst [vmem:[#allocation67_spill] sm:$0xff] %v12106_v6  ;;  %21290 = vst [vmem:[#allocation68_spill] sm:$0xff] %v12121_v40  ;;  %v3463_v11 = vcombine.low %v12124_v24, %v12124_v24 }
  0xfe   :  { %1869 = vbcast.lane.b32.xlu1 %v1062_v16, 264  ;;  %v1670_v48 = vpop.permute.xlu0 %1669  ;;  %v414_v16 = vcombine.high %v412_v25, %v412_v25  ;;  %21292 = vst [vmem:[#allocation70_spill] sm:$0xff] %v12131_v7  ;;  %21293 = vst [vmem:[#allocation71_spill] sm:$0xff] %v12134_v41  ;;  %v3447_v25 = vcombine.low %v3423_v46, %v3423_v46  ;;  %v12161_v7 = vrot.slane %v3623_v18, %v11711_v56 }
  0xff   :  { %v3431_v31 = vcombine.low %v1663_v44, %v1670_v48  ;;  %v3432_v54 = vcombine.high %v1663_v44, %v1670_v48  ;;  %21294 = vst [vmem:[#allocation72_spill] sm:$0xff] %v12137_v49  ;;  %v3639_v44 = vcombine.low %v11959_v12, %v11969_v29  ;;  %v12178_v18 = vrot.slane %v3448_v58, %v11726_v13 }
 0x100   :  { %v12128_v20 = vpop.permute.xlu1 %1673  ;;  %1872 = vbcast.lane.b32.xlu0 %v1066_v61, 256  ;;  %v442_v46 = vrot.slane %v414_v16, %v11630_v5  ;;  %21296 = vst [vmem:[#allocation74_spill] sm:$0xff] %v12161_v7  ;;  %v12175_v42 = vrot.slane %v3447_v25, %v11726_v13 }
 0x101   :  { %21291 = vst [vmem:[#allocation69_spill] sm:$0xff] %v12128_v20  ;;  %v3439_v48 = vrot.slane %v3431_v31, %v11711_v56  ;;  %v3446_v22 = vrot.slane %v3432_v54, %v11711_v56  ;;  %v3847_v31 = vcombine.low %v12106_v6, %v12128_v20  ;;  %v12170_v20 = vrot.slane %v3639_v44, %v11711_v56 }
 0x102   :  { %1876 = vbcast.lane.b32.xlu1 %v1066_v61, 264  ;;  %v1677_v51 = vpop.permute.xlu0 %1676  ;;  %v444_v61 = vcombine.high %v12118_v17, %v12118_v17  ;;  %21300 = vst [vmem:[#allocation78_spill] sm:$0xff] %v12175_v42  ;;  %21301 = vst [vmem:[#allocation79_spill] sm:$0xff] %v12178_v18  ;;  %v446_v44 = vcombine.high %v442_v46, %v442_v46  ;;  %v2911_v18 = vcombine.low %v11732_v21, %v11755_v33 }
 0x103   :  { %v3479_v57 = vcombine.low %v3439_v48, %v3439_v48  ;;  %v3480_v35 = vcombine.high %v3439_v48, %v3439_v48  ;;  %v3495_v12 = vcombine.low %v3446_v22, %v3446_v22  ;;  %v3496_v40 = vcombine.high %v3446_v22, %v3446_v22  ;;  %21299 = vst [vmem:[#allocation77_spill] sm:$0xff] %v12170_v20 }
 0x104   :  { %v12153_v54 = vpop.permute.xlu1 %1680  ;;  %1879 = vbcast.lane.b32.xlu0 %v1070_v36, 256  ;;  %v12192_v15 = vrot.slane %v3847_v31, %v11711_v56  ;;  %v12209_v31 = vrot.slane %v12172_v34, %v11630_v5  ;;  %v1082_v42 = vrot.slane %v12118_v17, %v11634_v8 }
 0x105   :  { %21295 = vst [vmem:[#allocation73_spill] sm:$0xff] %v12153_v54  ;;  %v12164_v48 = vrot.slane %v3479_v57, %v11726_v13  ;;  %v12167_v6 = vrot.slane %v3480_v35, %v11726_v13  ;;  %v12181_v22 = vrot.slane %v3495_v12, %v11726_v13  ;;  %v3464_v57 = vcombine.high %v12124_v24, %v12124_v24 }
 0x106   :  { %1883 = vbcast.lane.b32.xlu1 %v1070_v36, 264  ;;  %v1684_v16 = vpop.permute.xlu0 %1683  ;;  %v12186_v35 = vrot.slane %v3831_v28, %v11711_v56  ;;  %v12189_v36 = vrot.slane %v3463_v11, %v11726_v13  ;;  %21305 = vst [vmem:[#allocation83_spill] sm:$0xff] %v12192_v15  ;;  %v2895_v11 = vcombine.low %v11707_v50, %v11721_v10 }
 0x107   :  { %21297 = vst [vmem:[#allocation75_spill] sm:$0xff] %v12164_v48  ;;  %21298 = vst [vmem:[#allocation76_spill] sm:$0xff] %v12167_v6  ;;  %v3655_v28 = vcombine.low %v12161_v7, %v12161_v7  ;;  %v12212_v41 = vrot.slane %v3496_v40, %v11726_v13  ;;  %v3687_v12 = vcombine.low %v12170_v20, %v12170_v20 }
 0x108   :  { %21302 = vst [vmem:[#allocation80_spill] sm:$0xff] %v12181_v22  ;;  %21303 = vst [vmem:[#allocation81_spill] sm:$0xff] %v12186_v35  ;;  %v12194_v25 = vpop.permute.xlu1 %1687  ;;  %1886 = vbcast.lane.b32.xlu0 %v12111_v43, 256  ;;  %v3519_v58 = vcombine.low %v1677_v51, %v1684_v16  ;;  %v3520_v49 = vcombine.high %v1677_v51, %v1684_v16  ;;  %v12224_v40 = vrot.slane %v3464_v57, %v11726_v13 }
 0x109   :  { %21304 = vst [vmem:[#allocation82_spill] sm:$0xff] %v12189_v36  ;;  %21306 = vst [vmem:[#allocation84_spill] sm:$0xff] %v12194_v25  ;;  %v3863_v48 = vcombine.low %v12186_v35, %v12186_v35  ;;  %v3895_v51 = vcombine.low %v12192_v15, %v12192_v15  ;;  %v1086_v16 = vrot.slane %v442_v46, %v11634_v8 }
 0x10a   :  { %21307 = vst [vmem:[#allocation85_spill] sm:$0xff] %v12212_v41  ;;  %1890 = vbcast.lane.b32.xlu1 %v12111_v43, 264  ;;  %v1691_v24 = vpop.permute.xlu0 %1690  ;;  %21308 = vst [vmem:[#allocation86_spill] sm:$0xff] %v12224_v40  ;;  %v12235_v6 = vrot.slane %v444_v61, %v11634_v8  ;;  %v12238_v17 = vrot.slane %v2895_v11, %v11711_v56  ;;  %v12241_v57 = vrot.slane %v446_v44, %v11634_v8 }
 0x10b   :  { %v12245_v36 = vrot.slane %v12209_v31, %v11630_v5  ;;  %v3527_v15 = vrot.slane %v3519_v58, %v11711_v56  ;;  %v3534_v46 = vrot.slane %v3520_v49, %v11711_v56  ;;  %v12253_v11 = vrot.slane %v3655_v28, %v11726_v13 }
 0x10c   :  { %v12230_v43 = vpop.permute.xlu1 %1694  ;;  %1893 = vbcast.lane.b32.xlu0 %v12115_v63, 256  ;;  %v12256_v44 = vrot.slane %v3687_v12, %v11726_v13  ;;  %v12259_v35 = vrot.slane %v2911_v18, %v11711_v56  ;;  %v3103_v20 = vcombine.low %v11854_v32, %v11876_v39  ;;  %v3119_v49 = vcombine.low %v11896_v47, %v11906_v14 }
 0x10d   :  { %21309 = vst [vmem:[#allocation87_spill] sm:$0xff] %v12230_v43  ;;  %21310 = vst [vmem:[#allocation88_spill] sm:$0xff] %v12253_v11  ;;  %v12270_v12 = vrot.slane %v3863_v48, %v11726_v13  ;;  %v12273_v18 = vrot.slane %v3895_v51, %v11726_v13  ;;  %v3727_v28 = vcombine.low %v11975_v62, %v11995_v2 }
 0x10e   :  { %1897 = vbcast.lane.b32.xlu1 %v12115_v63, 264  ;;  %v1698_v61 = vpop.permute.xlu0 %1697  ;;  %21311 = vst [vmem:[#allocation89_spill] sm:$0xff] %v12256_v44  ;;  %v3551_v47 = vcombine.low %v3527_v15, %v3527_v15  ;;  %v3552_v14 = vcombine.high %v3527_v15, %v3527_v15  ;;  %v3567_v0 = vcombine.low %v3534_v46, %v3534_v46 }
 0x10f   :  { %v3535_v22 = vcombine.low %v1691_v24, %v1698_v61  ;;  %v3536_v7 = vcombine.high %v1691_v24, %v1698_v61  ;;  %21313 = vst [vmem:[#allocation91_spill] sm:$0xff] %v12270_v12  ;;  %21314 = vst [vmem:[#allocation92_spill] sm:$0xff] %v12273_v18  ;;  %v3743_v24 = vcombine.low %v12017_v26, %v12030_v1 }
 0x110   :  { %v12265_v58 = vpop.permute.xlu1 %1701  ;;  %1900 = vbcast.lane.b32.xlu0 %v1082_v42, 256  ;;  %v2927_v62 = vcombine.low %v12238_v17, %v12238_v17  ;;  %v3568_v26 = vcombine.high %v3534_v46, %v3534_v46  ;;  %v12292_v15 = vrot.slane %v3103_v20, %v11711_v56  ;;  %v12304_v48 = vrot.slane %v3551_v47, %v11726_v13 }
 0x111   :  { %21312 = vst [vmem:[#allocation90_spill] sm:$0xff] %v12265_v58  ;;  %v3543_v61 = vrot.slane %v3535_v22, %v11711_v56  ;;  %v3550_v29 = vrot.slane %v3536_v7, %v11711_v56  ;;  %v462_v7 = vcombine.high %v12209_v31, %v12209_v31  ;;  %v12295_v22 = vrot.slane %v3119_v49, %v11711_v56 }
 0x112   :  { %1904 = vbcast.lane.b32.xlu1 %v1082_v42, 264  ;;  %v1705_v63 = vpop.permute.xlu0 %1704  ;;  %21318 = vst [vmem:[#allocation96_spill] sm:$0xff] %v12304_v48  ;;  %v12307_v31 = vrot.slane %v3552_v14, %v11726_v13  ;;  %v12324_v47 = vrot.slane %v3567_v0, %v11726_v13  ;;  %v12336_v42 = vrot.slane %v3568_v26, %v11726_v13 }
 0x113   :  { %v3583_v51 = vcombine.low %v3543_v61, %v3543_v61  ;;  %v3584_v41 = vcombine.high %v3543_v61, %v3543_v61  ;;  %v3599_v40 = vcombine.low %v3550_v29, %v3550_v29  ;;  %v3600_v59 = vcombine.high %v3550_v29, %v3550_v29 }
 0x114   :  { %v12285_v1 = vpop.permute.xlu1 %1708  ;;  %1907 = vbcast.lane.b32.xlu0 %v1086_v16, 256  ;;  %21319 = vst [vmem:[#allocation97_spill] sm:$0xff] %v12307_v31  ;;  %21323 = vst [vmem:[#allocation101_spill] sm:$0xff] %v12324_v47  ;;  %v3135_v0 = vcombine.low %v12292_v15, %v12292_v15  ;;  %v492_v12 = vcombine.high %v12245_v36, %v12245_v36  ;;  %v447_v44 = vcombine.high %v12172_v34, %v12172_v34 }
 0x115   :  { %21315 = vst [vmem:[#allocation93_spill] sm:$0xff] %v12285_v1  ;;  %v12298_v29 = vrot.slane %v3583_v51, %v11726_v13  ;;  %v12301_v46 = vrot.slane %v3584_v41, %v11726_v13  ;;  %v12310_v20 = vrot.slane %v3599_v40, %v11726_v13  ;;  %v12313_v49 = vrot.slane %v3600_v59, %v11726_v13 }
 0x116   :  { %1911 = vbcast.lane.b32.xlu1 %v1086_v16, 264  ;;  %v1712_v61 = vpop.permute.xlu0 %1711  ;;  %v2959_v51 = vcombine.low %v12259_v35, %v12259_v35  ;;  %v12318_v41 = vrot.slane %v3727_v28, %v11711_v56  ;;  %v12321_v16 = vrot.slane %v3743_v24, %v11711_v56  ;;  %21325 = vst [vmem:[#allocation103_spill] sm:$0xff] %v12336_v42 }
 0x117   :  { %21316 = vst [vmem:[#allocation94_spill] sm:$0xff] %v12298_v29  ;;  %21317 = vst [vmem:[#allocation95_spill] sm:$0xff] %v12301_v46  ;;  %v484_v24 = vrot.slane %v462_v7, %v11630_v5  ;;  %v3167_v59 = vcombine.low %v12295_v22, %v12295_v22  ;;  %v4039_v18 = vcombine.low %v1705_v63, %v1712_v61 }
 0x118   :  { %21320 = vst [vmem:[#allocation98_spill] sm:$0xff] %v12310_v20  ;;  %21321 = vst [vmem:[#allocation99_spill] sm:$0xff] %v12313_v49  ;;  %v12326_v14 = vpop.permute.xlu1 %1715  ;;  %1914 = vbcast.lane.b32.xlu0 %v12235_v6, 256  ;;  %v4040_v11 = vcombine.high %v1705_v63, %v1712_v61  ;;  %v1098_v7 = vrot.slane %v12245_v36, %v11634_v8  ;;  %v3759_v46 = vcombine.low %v12318_v41, %v12318_v41 }
 0x119   :  { %21322 = vst [vmem:[#allocation100_spill] sm:$0xff] %v12321_v16  ;;  %21324 = vst [vmem:[#allocation102_spill] sm:$0xff] %v12326_v14  ;;  %v12362_v28 = vrot.slane %v2927_v62, %v11726_v13  ;;  %v12365_v63 = vrot.slane %v2959_v51, %v11726_v13  ;;  %v1102_v36 = vrot.slane %v484_v24, %v11634_v8 }
 0x11a   :  { %1918 = vbcast.lane.b32.xlu1 %v12235_v6, 264  ;;  %v1719_v40 = vpop.permute.xlu0 %1718  ;;  %v3791_v6 = vcombine.low %v12321_v16, %v12321_v16  ;;  %v1106_v34 = vrot.slane %v492_v12, %v11634_v8  ;;  %v4047_v61 = vrot.slane %v4039_v18, %v11711_v56  ;;  %v494_v47 = vcombine.high %v484_v24, %v484_v24 }
 0x11b   :  { %21327 = vst [vmem:[#allocation105_spill] sm:$0xff] %v12362_v28  ;;  %21328 = vst [vmem:[#allocation106_spill] sm:$0xff] %v12365_v63  ;;  %v12372_v20 = vrot.slane %v3135_v0, %v11726_v13  ;;  %v12375_v48 = vrot.slane %v3167_v59, %v11726_v13  ;;  %v4054_v62 = vrot.slane %v4040_v11, %v11711_v56 }
 0x11c   :  { %v12358_v31 = vpop.permute.xlu1 %1722  ;;  %1921 = vbcast.lane.b32.xlu0 %v12241_v57, 256  ;;  %v12384_v18 = vrot.slane %v3759_v46, %v11726_v13  ;;  %v12387_v0 = vrot.slane %v3791_v6, %v11726_v13  ;;  %v3935_v11 = vcombine.low %v12153_v54, %v12194_v25  ;;  %v4072_v16 = vcombine.high %v4047_v61, %v4047_v61 }
 0x11d   :  { %21326 = vst [vmem:[#allocation104_spill] sm:$0xff] %v12358_v31  ;;  %21329 = vst [vmem:[#allocation107_spill] sm:$0xff] %v12372_v20  ;;  %v4455_v46 = vcombine.low %v12285_v1, %v12326_v14  ;;  %v4087_v28 = vcombine.low %v4054_v62, %v4054_v62 }
 0x11e   :  { %1925 = vbcast.lane.b32.xlu1 %v12241_v57, 264  ;;  %v1726_v26 = vpop.permute.xlu0 %1725  ;;  %21330 = vst [vmem:[#allocation108_spill] sm:$0xff] %v12375_v48  ;;  %v461_v57 = vrot.slane %v447_v44, %v11630_v5  ;;  %21332 = vst [vmem:[#allocation110_spill] sm:$0xff] %v12384_v18  ;;  %v4071_v44 = vcombine.low %v4047_v61, %v4047_v61 }
 0x11f   :  { %v4055_v51 = vcombine.low %v1719_v40, %v1726_v26  ;;  %v4056_v29 = vcombine.high %v1719_v40, %v1726_v26  ;;  %21333 = vst [vmem:[#allocation111_spill] sm:$0xff] %v12387_v0  ;;  %v3951_v40 = vcombine.low %v12230_v43, %v12265_v58  ;;  %v12418_v48 = vrot.slane %v4455_v46, %v11711_v56 }
 0x120   :  { %v12380_v12 = vpop.permute.xlu1 %1729  ;;  %1928 = vbcast.lane.b32.xlu0 %v1098_v7, 256  ;;  %v12407_v61 = vrot.slane %v461_v57, %v11630_v5  ;;  %v463_v59 = vcombine.high %v461_v57, %v461_v57  ;;  %v4088_v57 = vcombine.high %v4054_v62, %v4054_v62  ;;  %v12436_v46 = vrot.slane %v4087_v28, %v11726_v13 }
 0x121   :  { %21331 = vst [vmem:[#allocation109_spill] sm:$0xff] %v12380_v12  ;;  %v4063_v24 = vrot.slane %v4055_v51, %v11711_v56  ;;  %v4070_v26 = vrot.slane %v4056_v29, %v11711_v56  ;;  %v4471_v43 = vcombine.low %v12358_v31, %v12380_v12  ;;  %v1110_v29 = vrot.slane %v494_v47, %v11634_v8 }
 0x122   :  { %1932 = vbcast.lane.b32.xlu1 %v1098_v7, 264  ;;  %v1733_v6 = vpop.permute.xlu0 %1732  ;;  %21337 = vst [vmem:[#allocation115_spill] sm:$0xff] %v12418_v48  ;;  %v12421_v47 = vrot.slane %v4071_v44, %v11726_v13  ;;  %v12424_v12 = vrot.slane %v4072_v16, %v11726_v13  ;;  %21341 = vst [vmem:[#allocation119_spill] sm:$0xff] %v12436_v46  ;;  %v491_v18 = vrot.slane %v463_v59, %v11630_v5  ;;  %v12470_v59 = vld [vmem:[#allocation2 + $0x48] sm:$0xff] }
 0x123   :  { %v4103_v63 = vcombine.low %v4063_v24, %v4063_v24  ;;  %v4104_v49 = vcombine.high %v4063_v24, %v4063_v24  ;;  %v4119_v42 = vcombine.low %v4070_v26, %v4070_v26  ;;  %v4120_v1 = vcombine.high %v4070_v26, %v4070_v26 }
 0x124   :  { %v12403_v51 = vpop.permute.xlu1 %1736  ;;  %1935 = vbcast.lane.b32.xlu0 %v1102_v36, 256  ;;  %21338 = vst [vmem:[#allocation116_spill] sm:$0xff] %v12421_v47  ;;  %21339 = vst [vmem:[#allocation117_spill] sm:$0xff] %v12424_v12  ;;  %v12458_v16 = vrot.slane %v4088_v57, %v11726_v13  ;;  %v495_v14 = vcombine.high %v491_v18, %v491_v18 }
 0x125   :  { %21334 = vst [vmem:[#allocation112_spill] sm:$0xff] %v12403_v51  ;;  %v12412_v20 = vrot.slane %v4103_v63, %v11726_v13  ;;  %v12415_v24 = vrot.slane %v4104_v49, %v11726_v13  ;;  %v12427_v26 = vrot.slane %v4119_v42, %v11726_v13  ;;  %v12430_v63 = vrot.slane %v3935_v11, %v11711_v56 }
 0x126   :  { %1939 = vbcast.lane.b32.xlu1 %v1102_v36, 264  ;;  %v1740_v31 = vpop.permute.xlu0 %1739  ;;  %v12433_v49 = vrot.slane %v3951_v40, %v11711_v56  ;;  %v12439_v36 = vrot.slane %v4471_v43, %v11711_v56  ;;  %v12450_v62 = vrot.slane %v4120_v1, %v11726_v13  ;;  %v4487_v43 = vcombine.low %v12418_v48, %v12418_v48 }
 0x127   :  { %21335 = vst [vmem:[#allocation113_spill] sm:$0xff] %v12412_v20  ;;  %21336 = vst [vmem:[#allocation114_spill] sm:$0xff] %v12415_v24  ;;  %v4143_v40 = vcombine.low %v1733_v6, %v1740_v31  ;;  %v4144_v28 = vcombine.high %v1733_v6, %v1740_v31  ;;  %v3967_v11 = vcombine.low %v12430_v63, %v12430_v63 }
 0x128   :  { %21340 = vst [vmem:[#allocation118_spill] sm:$0xff] %v12427_v26  ;;  %21342 = vst [vmem:[#allocation120_spill] sm:$0xff] %v12439_v36  ;;  %v12441_v44 = vpop.permute.xlu1 %1743  ;;  %1942 = vbcast.lane.b32.xlu0 %v1106_v34, 256  ;;  %v3999_v1 = vcombine.low %v12433_v49, %v12433_v49  ;;  %v4519_v0 = vcombine.low %v12439_v36, %v12439_v36  ;;  %v1118_v26 = vrot.slane %v491_v18, %v11634_v8 }
 0x129   :  { %21343 = vst [vmem:[#allocation121_spill] sm:$0xff] %v12441_v44  ;;  %21344 = vst [vmem:[#allocation122_spill] sm:$0xff] %v12450_v62  ;;  %v4151_v6 = vrot.slane %v4143_v40, %v11711_v56  ;;  %v4158_v42 = vrot.slane %v4144_v28, %v11711_v56  ;;  %v493_v24 = vcombine.high %v12407_v61, %v12407_v61 }
 0x12a   :  { %1946 = vbcast.lane.b32.xlu1 %v1106_v34, 264  ;;  %v1747_v7 = vpop.permute.xlu0 %1746  ;;  %21345 = vst [vmem:[#allocation123_spill] sm:$0xff] %v12458_v16  ;;  %v1114_v34 = vrot.slane %v12407_v61, %v11634_v8  ;;  %v12480_v12 = vrot.slane %v4487_v43, %v11726_v13  ;;  %v503_v40 = vrot.slane %v12470_v59, %v11630_v5 }
 0x12b   :  { %v12489_v28 = vrot.slane %v4519_v0, %v11726_v13  ;;  %v12492_v61 = vrot.slane %v3967_v11, %v11726_v13  ;;  %v12495_v43 = vrot.slane %v3999_v1, %v11726_v13  ;;  %v4559_v18 = vcombine.low %v12403_v51, %v12441_v44 }
 0x12c   :  { %v12466_v31 = vpop.permute.xlu1 %1750  ;;  %1949 = vbcast.lane.b32.xlu0 %v1110_v29, 256  ;;  %21347 = vst [vmem:[#allocation125_spill] sm:$0xff] %v12480_v12  ;;  %v4176_v54 = vcombine.high %v4151_v6, %v4151_v6  ;;  %v4191_v25 = vcombine.low %v4158_v42, %v4158_v42 }
 0x12d   :  { %21346 = vst [vmem:[#allocation124_spill] sm:$0xff] %v12466_v31  ;;  %21349 = vst [vmem:[#allocation127_spill] sm:$0xff] %v12489_v28 }
 0x12e   :  { %1953 = vbcast.lane.b32.xlu1 %v1110_v29, 264  ;;  %v1754_v46 = vpop.permute.xlu0 %1753  ;;  %21350 = vst [vmem:[#allocation128_spill] sm:$0xff] %v12492_v61  ;;  %21351 = vst [vmem:[#allocation129_spill] sm:$0xff] %v12495_v43  ;;  %v4192_v29 = vcombine.high %v4158_v42, %v4158_v42  ;;  %v12511_v42 = vrot.slane %v4559_v18, %v11711_v56  ;;  %v496_v43 = vcombine.high %v12470_v59, %v12470_v59 }
 0x12f   :  { %v4159_v47 = vcombine.low %v1747_v7, %v1754_v46  ;;  %v4160_v20 = vcombine.high %v1747_v7, %v1754_v46  ;;  %v4175_v7 = vcombine.low %v4151_v6, %v4151_v6 }
 0x130   :  { %v12484_v58 = vpop.permute.xlu1 %1757  ;;  %1956 = vbcast.lane.b32.xlu0 %v1114_v34, 256 }
 0x131   :  { %21348 = vst [vmem:[#allocation126_spill] sm:$0xff] %v12484_v58  ;;  %v4167_v46 = vrot.slane %v4159_v47, %v11711_v56  ;;  %v4174_v57 = vrot.slane %v4160_v20, %v11711_v56  ;;  %v4575_v48 = vcombine.low %v12466_v31, %v12484_v58  ;;  %v1122_v20 = vrot.slane %v493_v24, %v11634_v8 }
 0x132   :  { %1960 = vbcast.lane.b32.xlu1 %v1114_v34, 264  ;;  %v1761_v0 = vpop.permute.xlu0 %1760  ;;  %v1126_v34 = vrot.slane %v495_v14, %v11634_v8  ;;  %v12521_v11 = vrot.slane %v4175_v7, %v11726_v13  ;;  %v12524_v24 = vrot.slane %v4176_v54, %v11726_v13  ;;  %v519_v14 = vrot.slane %v503_v40, %v11630_v5 }
 0x133   :  { %v4207_v62 = vcombine.low %v4167_v46, %v4167_v46  ;;  %v4208_v16 = vcombine.high %v4167_v46, %v4167_v46  ;;  %v4223_v1 = vcombine.low %v4174_v57, %v4174_v57  ;;  %v4224_v36 = vcombine.high %v4174_v57, %v4174_v57 }
 0x134   :  { %v12505_v51 = vpop.permute.xlu1 %1764  ;;  %1963 = vbcast.lane.b32.xlu0 %v1118_v26, 256  ;;  %21355 = vst [vmem:[#allocation133_spill] sm:$0xff] %v12521_v11  ;;  %21356 = vst [vmem:[#allocation134_spill] sm:$0xff] %v12524_v24  ;;  %v12540_v7 = vrot.slane %v4575_v48, %v11711_v56  ;;  %v1130_v28 = vrot.slane %v519_v14, %v11634_v8 }
 0x135   :  { %21352 = vst [vmem:[#allocation130_spill] sm:$0xff] %v12505_v51  ;;  %v12515_v6 = vrot.slane %v4207_v62, %v11726_v13  ;;  %v12518_v57 = vrot.slane %v4208_v16, %v11726_v13  ;;  %v12527_v47 = vrot.slane %v4223_v1, %v11726_v13  ;;  %v12530_v18 = vrot.slane %v4224_v36, %v11726_v13 }
 0x136   :  { %1967 = vbcast.lane.b32.xlu1 %v1118_v26, 264  ;;  %v1768_v46 = vpop.permute.xlu0 %1767  ;;  %v511_v62 = vcombine.high %v503_v40, %v503_v40  ;;  %v12534_v16 = vrot.slane %v4191_v25, %v11726_v13  ;;  %v12537_v26 = vrot.slane %v4192_v29, %v11726_v13  ;;  %v2824_v25 = vcombine.high %v12071_v23, %v12071_v23 }
 0x137   :  { %21353 = vst [vmem:[#allocation131_spill] sm:$0xff] %v12515_v6  ;;  %21354 = vst [vmem:[#allocation132_spill] sm:$0xff] %v12518_v57  ;;  %v4591_v29 = vcombine.low %v12511_v42, %v12511_v42  ;;  %v4247_v48 = vcombine.low %v1761_v0, %v1768_v46  ;;  %v4248_v12 = vcombine.high %v1761_v0, %v1768_v46 }
 0x138   :  { %21357 = vst [vmem:[#allocation135_spill] sm:$0xff] %v12527_v47  ;;  %21358 = vst [vmem:[#allocation136_spill] sm:$0xff] %v12530_v18  ;;  %v12542_v54 = vpop.permute.xlu1 %1771  ;;  %1970 = vbcast.lane.b32.xlu0 %v1122_v20, 256  ;;  %v2856_v36 = vcombine.high %v12048_v4, %v12048_v4  ;;  %v4623_v40 = vcombine.low %v12540_v7, %v12540_v7  ;;  %v2792_v1 = vcombine.high %v11695_v37, %v11697_v38 }
 0x139   :  { %21359 = vst [vmem:[#allocation137_spill] sm:$0xff] %v12534_v16  ;;  %21360 = vst [vmem:[#allocation138_spill] sm:$0xff] %v12537_v26  ;;  %v4255_v0 = vrot.slane %v4247_v48, %v11711_v56  ;;  %v12572_v46 = vrot.slane %v4591_v29, %v11726_v13  ;;  %v12575_v16 = vrot.slane %v2824_v25, %v11726_v13 }
 0x13a   :  { %21361 = vst [vmem:[#allocation139_spill] sm:$0xff] %v12542_v54  ;;  %1974 = vbcast.lane.b32.xlu1 %v1122_v20, 264  ;;  %v1775_v61 = vpop.permute.xlu0 %1774  ;;  %v533_v20 = vrot.slane %v511_v62, %v11630_v5  ;;  %v4262_v47 = vrot.slane %v4248_v12, %v11711_v56  ;;  %v541_v38 = vcombine.high %v519_v14, %v519_v14 }
 0x13b   :  { %21363 = vst [vmem:[#allocation141_spill] sm:$0xff] %v12572_v46  ;;  %21364 = vst [vmem:[#allocation142_spill] sm:$0xff] %v12575_v16  ;;  %v12587_v29 = vrot.slane %v2856_v36, %v11726_v13  ;;  %v510_v48 = vrot.slane %v496_v43, %v11630_v5  ;;  %v4280_v59 = vcombine.high %v4255_v0, %v4255_v0  ;;  %v13652_v16 = vld [vmem:[#allocation2 + $0x70] sm:$0xff] }
 0x13c   :  { %v12562_v23 = vpop.permute.xlu1 %1778  ;;  %1977 = vbcast.lane.b32.xlu0 %v1126_v34, 256  ;;  %v1134_v37 = vrot.slane %v533_v20, %v11634_v8  ;;  %v4663_v18 = vcombine.low %v12505_v51, %v12542_v54  ;;  %v4295_v26 = vcombine.low %v4262_v47, %v4262_v47 }
 0x13d   :  { %21362 = vst [vmem:[#allocation140_spill] sm:$0xff] %v12562_v23  ;;  %21367 = vst [vmem:[#allocation145_spill] sm:$0xff] %v12587_v29 }
 0x13e   :  { %1981 = vbcast.lane.b32.xlu1 %v1126_v34, 264  ;;  %v1782_v4 = vpop.permute.xlu0 %1781  ;;  %v12584_v34 = vrot.slane %v4623_v40, %v11726_v13 }
 0x13f   :  { %v4263_v57 = vcombine.low %v1775_v61, %v1782_v4  ;;  %v4264_v62 = vcombine.high %v1775_v61, %v1782_v4  ;;  %v543_v61 = vcombine.high %v533_v20, %v533_v20  ;;  %v4279_v4 = vcombine.low %v4255_v0, %v4255_v0 }
 0x140   :  { %v12580_v24 = vpop.permute.xlu1 %1785  ;;  %1984 = vbcast.lane.b32.xlu0 %v1130_v28, 256  ;;  %21366 = vst [vmem:[#allocation144_spill] sm:$0xff] %v12584_v34  ;;  %v1138_v0 = vrot.slane %v541_v38, %v11634_v8  ;;  %v12619_v38 = vrot.slane %v4280_v59, %v11726_v13 }
 0x141   :  { %21365 = vst [vmem:[#allocation143_spill] sm:$0xff] %v12580_v24  ;;  %v4271_v25 = vrot.slane %v4263_v57, %v11711_v56  ;;  %v4278_v12 = vrot.slane %v4264_v62, %v11711_v56  ;;  %v2808_v57 = vcombine.high %v11701_v45, %v11715_v60  ;;  %v4679_v43 = vcombine.low %v12562_v23, %v12580_v24 }
 0x142   :  { %1988 = vbcast.lane.b32.xlu1 %v1130_v28, 264  ;;  %v1789_v14 = vpop.permute.xlu0 %1788  ;;  %v1142_v40 = vrot.slane %v543_v61, %v11634_v8  ;;  %v12613_v45 = vrot.slane %v4663_v18, %v11711_v56  ;;  %v12616_v34 = vrot.slane %v4279_v4, %v11726_v13  ;;  %21372 = vst [vmem:[#allocation150_spill] sm:$0xff] %v12619_v38 }
 0x143   :  { %v4311_v36 = vcombine.low %v4271_v25, %v4271_v25  ;;  %v4312_v11 = vcombine.high %v4271_v25, %v4271_v25  ;;  %v4327_v6 = vcombine.low %v4278_v12, %v4278_v12  ;;  %v4328_v62 = vcombine.high %v4278_v12, %v4278_v12 }
 0x144   :  { %v12600_v20 = vpop.permute.xlu1 %1792  ;;  %1991 = vbcast.lane.b32.xlu0 %v1134_v37, 256  ;;  %21371 = vst [vmem:[#allocation149_spill] sm:$0xff] %v12616_v34  ;;  %v4296_v61 = vcombine.high %v4262_v47, %v4262_v47  ;;  %v12628_v28 = vrot.slane %v4295_v26, %v11726_v13  ;;  %v12631_v18 = vrot.slane %v4679_v43, %v11711_v56 }
 0x145   :  { %21368 = vst [vmem:[#allocation146_spill] sm:$0xff] %v12600_v20  ;;  %v12607_v25 = vrot.slane %v4311_v36, %v11726_v13  ;;  %v12610_v46 = vrot.slane %v4312_v11, %v11726_v13  ;;  %v12622_v12 = vrot.slane %v4327_v6, %v11726_v13  ;;  %v12625_v36 = vrot.slane %v510_v48, %v11630_v5 }
 0x146   :  { %1995 = vbcast.lane.b32.xlu1 %v1134_v37, 264  ;;  %v1796_v60 = vpop.permute.xlu0 %1795  ;;  %v512_v11 = vcombine.high %v510_v48, %v510_v48  ;;  %21374 = vst [vmem:[#allocation152_spill] sm:$0xff] %v12628_v28  ;;  %v12642_v48 = vrot.slane %v2792_v1, %v11711_v56  ;;  %v12645_v4 = vrot.slane %v4328_v62, %v11726_v13 }
 0x147   :  { %21369 = vst [vmem:[#allocation147_spill] sm:$0xff] %v12607_v25  ;;  %21370 = vst [vmem:[#allocation148_spill] sm:$0xff] %v12610_v46  ;;  %v4351_v26 = vcombine.low %v1789_v14, %v1796_v60  ;;  %v12648_v43 = vrot.slane %v2808_v57, %v11711_v56  ;;  %v4695_v23 = vcombine.low %v12613_v45, %v12613_v45 }
 0x148   :  { %21373 = vst [vmem:[#allocation151_spill] sm:$0xff] %v12622_v12  ;;  %v12633_v37 = vpop.permute.xlu1 %1799  ;;  %1998 = vbcast.lane.b32.xlu0 %v1138_v0, 256  ;;  %21376 = vst [vmem:[#allocation154_spill] sm:$0xff] %v12642_v48  ;;  %v4352_v59 = vcombine.high %v1789_v14, %v1796_v60  ;;  %v540_v47 = vrot.slane %v512_v11, %v11630_v5  ;;  %v12656_v1 = vrot.slane %v4296_v61, %v11726_v13  ;;  %v12669_v11 = vld [vmem:[#allocation2 + $0x50] sm:$0xff] }
 0x149   :  { %21375 = vst [vmem:[#allocation153_spill] sm:$0xff] %v12633_v37  ;;  %21377 = vst [vmem:[#allocation155_spill] sm:$0xff] %v12645_v4  ;;  %v4727_v62 = vcombine.low %v12631_v18, %v12631_v18  ;;  %v1146_v57 = vrot.slane %v12625_v36, %v11634_v8  ;;  %v4359_v60 = vrot.slane %v4351_v26, %v11711_v56 }
 0x14a   :  { %21378 = vst [vmem:[#allocation156_spill] sm:$0xff] %v12648_v43  ;;  %2002 = vbcast.lane.b32.xlu1 %v1138_v0, 264  ;;  %v1803_v24 = vpop.permute.xlu0 %1802  ;;  %21379 = vst [vmem:[#allocation157_spill] sm:$0xff] %v12656_v1  ;;  %v2896_v28 = vcombine.high %v11707_v50, %v11721_v10  ;;  %v4366_v12 = vrot.slane %v4352_v59, %v11711_v56  ;;  %v12679_v38 = vrot.slane %v4695_v23, %v11726_v13 }
 0x14b   :  { %v1150_v34 = vrot.slane %v540_v47, %v11634_v8  ;;  %v542_v61 = vcombine.high %v12625_v36, %v12625_v36  ;;  %v544_v6 = vcombine.high %v540_v47, %v540_v47  ;;  %v552_v50 = vrot.slane %v12669_v11, %v11630_v5 }
 0x14c   :  { %v12660_v46 = vpop.permute.xlu1 %1806  ;;  %2005 = vbcast.lane.b32.xlu0 %v1142_v40, 256  ;;  %21381 = vst [vmem:[#allocation159_spill] sm:$0xff] %v12679_v38  ;;  %v12691_v23 = vrot.slane %v4727_v62, %v11726_v13  ;;  %v4399_v51 = vcombine.low %v4366_v12, %v4366_v12  ;;  %v4400_v47 = vcombine.high %v4366_v12, %v4366_v12 }
 0x14d   :  { %21380 = vst [vmem:[#allocation158_spill] sm:$0xff] %v12660_v46 }
 0x14e   :  { %2009 = vbcast.lane.b32.xlu1 %v1142_v40, 264  ;;  %v1810_v14 = vpop.permute.xlu0 %1809  ;;  %21383 = vst [vmem:[#allocation161_spill] sm:$0xff] %v12691_v23  ;;  %v4383_v40 = vcombine.low %v4359_v60, %v4359_v60  ;;  %v12734_v23 = vrot.slane %v552_v50, %v11630_v5 }
 0x14f   :  { %v4367_v0 = vcombine.low %v1803_v24, %v1810_v14  ;;  %v4368_v26 = vcombine.high %v1803_v24, %v1810_v14  ;;  %v4767_v24 = vcombine.low %v12600_v20, %v12633_v37  ;;  %v4384_v14 = vcombine.high %v4359_v60, %v4359_v60 }
 0x150   :  { %v12684_v25 = vpop.permute.xlu1 %1813  ;;  %2012 = vbcast.lane.b32.xlu0 %v1146_v57, 256  ;;  %v12721_v20 = vrot.slane %v4383_v40, %v11726_v13  ;;  %v12740_v40 = vrot.slane %v4400_v47, %v11726_v13 }
 0x151   :  { %21382 = vst [vmem:[#allocation160_spill] sm:$0xff] %v12684_v25  ;;  %v4375_v59 = vrot.slane %v4367_v0, %v11711_v56  ;;  %v4382_v36 = vrot.slane %v4368_v26, %v11711_v56  ;;  %v12704_v0 = vrot.slane %v2896_v28, %v11711_v56  ;;  %v4783_v60 = vcombine.low %v12660_v46, %v12684_v25 }
 0x152   :  { %2016 = vbcast.lane.b32.xlu1 %v1146_v57, 264  ;;  %v12697_v54 = vpop.permute.xlu0 %1816  ;;  %v1154_v57 = vrot.slane %v542_v61, %v11634_v8  ;;  %v12712_v26 = vrot.slane %v4767_v24, %v11711_v56  ;;  %21388 = vst [vmem:[#allocation166_spill] sm:$0xff] %v12721_v20  ;;  %v12724_v38 = vrot.slane %v4384_v14, %v11726_v13  ;;  %21393 = vst [vmem:[#allocation171_spill] sm:$0xff] %v12740_v40 }
 0x153   :  { %v4415_v4 = vcombine.low %v4375_v59, %v4375_v59  ;;  %v4416_v62 = vcombine.high %v4375_v59, %v4375_v59  ;;  %v4431_v1 = vcombine.low %v4382_v36, %v4382_v36  ;;  %v4432_v31 = vcombine.high %v4382_v36, %v4382_v36  ;;  %21384 = vst [vmem:[#allocation162_spill] sm:$0xff] %v12704_v0 }
 0x154   :  { %v12708_v12 = vpop.permute.xlu1 %1820  ;;  %2019 = vbcast.lane.b32.xlu0 %v1150_v34, 256  ;;  %v560_v59 = vcombine.high %v552_v50, %v552_v50  ;;  %21389 = vst [vmem:[#allocation167_spill] sm:$0xff] %v12724_v38  ;;  %v12743_v14 = vrot.slane %v4783_v60, %v11711_v56  ;;  %v3000_v50 = vcombine.high %v11776_v55, %v11799_v9 }
 0x155   :  { %21385 = vst [vmem:[#allocation163_spill] sm:$0xff] %v12708_v12  ;;  %v12715_v36 = vrot.slane %v4415_v4, %v11726_v13  ;;  %v12718_v10 = vrot.slane %v4416_v62, %v11726_v13  ;;  %v12727_v61 = vrot.slane %v4431_v1, %v11726_v13  ;;  %v12730_v24 = vrot.slane %v4432_v31, %v11726_v13 }
 0x156   :  { %2023 = vbcast.lane.b32.xlu1 %v1150_v34, 264  ;;  %v1824_v28 = vpop.permute.xlu0 %1823  ;;  %v1158_v4 = vrot.slane %v544_v6, %v11634_v8  ;;  %v12737_v34 = vrot.slane %v4399_v51, %v11726_v13  ;;  %v2912_v51 = vcombine.high %v11732_v21, %v11755_v33  ;;  %v582_v47 = vrot.slane %v560_v59, %v11630_v5 }
 0x157   :  { %21386 = vst [vmem:[#allocation164_spill] sm:$0xff] %v12715_v36  ;;  %21387 = vst [vmem:[#allocation165_spill] sm:$0xff] %v12718_v10  ;;  %v4799_v31 = vcombine.low %v12712_v26, %v12712_v26  ;;  %v4871_v20 = vcombine.low %v12697_v54, %v1824_v28  ;;  %v4872_v59 = vcombine.high %v12697_v54, %v1824_v28 }
 0x158   :  { %21390 = vst [vmem:[#allocation168_spill] sm:$0xff] %v12727_v61  ;;  %21391 = vst [vmem:[#allocation169_spill] sm:$0xff] %v12730_v24  ;;  %v12745_v62 = vpop.permute.xlu1 %1827  ;;  %2026 = vbcast.lane.b32.xlu0 %v1154_v57, 256  ;;  %v3064_v1 = vcombine.high %v12077_v52, %v12077_v52  ;;  %v4831_v21 = vcombine.low %v12743_v14, %v12743_v14  ;;  %v1162_v55 = vrot.slane %v12734_v23, %v11634_v8 }
 0x159   :  { %21392 = vst [vmem:[#allocation170_spill] sm:$0xff] %v12737_v34  ;;  %21394 = vst [vmem:[#allocation172_spill] sm:$0xff] %v12745_v62  ;;  %v12785_v33 = vrot.slane %v2912_v51, %v11711_v56  ;;  %v545_v52 = vcombine.high %v12669_v11, %v12669_v11  ;;  %v3016_v28 = vcombine.high %v11820_v30, %v11835_v53 }
 0x15a   :  { %2030 = vbcast.lane.b32.xlu1 %v1154_v57, 264  ;;  %v1831_v6 = vpop.permute.xlu0 %1830  ;;  %v3032_v57 = vcombine.high %v12074_v19, %v12074_v19  ;;  %v12790_v19 = vrot.slane %v3000_v50, %v11711_v56  ;;  %v4879_v9 = vrot.slane %v4871_v20, %v11711_v56  ;;  %v1166_v61 = vrot.slane %v582_v47, %v11634_v8 }
 0x15b   :  { %21396 = vst [vmem:[#allocation174_spill] sm:$0xff] %v12785_v33  ;;  %v12799_v51 = vrot.slane %v4799_v31, %v11726_v13  ;;  %v12802_v54 = vrot.slane %v4872_v59, %v11711_v56  ;;  %v590_v30 = vcombine.high %v12734_v23, %v12734_v23  ;;  %v12811_v53 = vrot.slane %v4831_v21, %v11726_v13 }
 0x15c   :  { %v12780_v60 = vpop.permute.xlu1 %1834  ;;  %2033 = vbcast.lane.b32.xlu0 %v1158_v4, 256  ;;  %21397 = vst [vmem:[#allocation175_spill] sm:$0xff] %v12790_v19  ;;  %v12814_v20 = vrot.slane %v3032_v57, %v11726_v13  ;;  %v559_v59 = vrot.slane %v545_v52, %v11630_v5  ;;  %v4903_v11 = vcombine.low %v4879_v9, %v4879_v9 }
 0x15d   :  { %21395 = vst [vmem:[#allocation173_spill] sm:$0xff] %v12780_v60  ;;  %21398 = vst [vmem:[#allocation176_spill] sm:$0xff] %v12799_v51  ;;  %v4904_v24 = vcombine.high %v4879_v9, %v4879_v9  ;;  %v5287_v23 = vcombine.low %v12708_v12, %v12745_v62  ;;  %v3104_v12 = vcombine.high %v11854_v32, %v11876_v39 }
 0x15e   :  { %2037 = vbcast.lane.b32.xlu1 %v1158_v4, 264  ;;  %v1838_v34 = vpop.permute.xlu0 %1837  ;;  %21400 = vst [vmem:[#allocation178_spill] sm:$0xff] %v12811_v53  ;;  %21401 = vst [vmem:[#allocation179_spill] sm:$0xff] %v12814_v20  ;;  %v12817_v4 = vrot.slane %v3064_v1, %v11726_v13  ;;  %v4919_v1 = vcombine.low %v12802_v54, %v12802_v54 }
 0x15f   :  { %v4887_v50 = vcombine.low %v1831_v6, %v1838_v34  ;;  %v4888_v10 = vcombine.high %v1831_v6, %v1838_v34  ;;  %v592_v6 = vcombine.high %v582_v47, %v582_v47  ;;  %v12846_v53 = vrot.slane %v5287_v23, %v11711_v56 }
 0x160   :  { %v12806_v38 = vpop.permute.xlu1 %1841  ;;  %2040 = vbcast.lane.b32.xlu0 %v1162_v55, 256  ;;  %21402 = vst [vmem:[#allocation180_spill] sm:$0xff] %v12817_v4  ;;  %v12863_v23 = vrot.slane %v4919_v1, %v11726_v13 }
 0x161   :  { %21399 = vst [vmem:[#allocation177_spill] sm:$0xff] %v12806_v38  ;;  %v4895_v34 = vrot.slane %v4887_v50, %v11711_v56  ;;  %v4902_v31 = vrot.slane %v4888_v10, %v11711_v56  ;;  %v12829_v10 = vrot.slane %v3016_v28, %v11711_v56  ;;  %v5303_v47 = vcombine.low %v12780_v60, %v12806_v38 }
 0x162   :  { %2044 = vbcast.lane.b32.xlu1 %v1162_v55, 264  ;;  %v1845_v21 = vpop.permute.xlu0 %1844  ;;  %v1170_v55 = vrot.slane %v590_v30, %v11634_v8  ;;  %v1174_v51 = vrot.slane %v592_v6, %v11634_v8  ;;  %v12849_v38 = vrot.slane %v4903_v11, %v11726_v13  ;;  %v12852_v30 = vrot.slane %v4904_v24, %v11726_v13 }
 0x163   :  { %v4935_v40 = vcombine.low %v4895_v34, %v4895_v34  ;;  %v4936_v50 = vcombine.high %v4895_v34, %v4895_v34  ;;  %v4951_v36 = vcombine.low %v4902_v31, %v4902_v31  ;;  %21403 = vst [vmem:[#allocation181_spill] sm:$0xff] %v12829_v10  ;;  %v4952_v57 = vcombine.high %v4902_v31, %v4902_v31 }
 0x164   :  { %v12833_v9 = vpop.permute.xlu1 %1848  ;;  %2047 = vbcast.lane.b32.xlu0 %v1166_v61, 256  ;;  %21407 = vst [vmem:[#allocation185_spill] sm:$0xff] %v12849_v38  ;;  %21408 = vst [vmem:[#allocation186_spill] sm:$0xff] %v12852_v30  ;;  %v12860_v6 = vrot.slane %v559_v59, %v11630_v5 }
 0x165   :  { %21404 = vst [vmem:[#allocation182_spill] sm:$0xff] %v12833_v9  ;;  %v12840_v34 = vrot.slane %v4935_v40, %v11726_v13  ;;  %v12843_v28 = vrot.slane %v4936_v50, %v11726_v13  ;;  %v12855_v31 = vrot.slane %v4951_v36, %v11726_v13  ;;  %v4920_v40 = vcombine.high %v12802_v54, %v12802_v54  ;;  %v12910_v54 = vld [vmem:[#allocation2 + $0x58] sm:$0xff] }
 0x166   :  { %2051 = vbcast.lane.b32.xlu1 %v1166_v61, 264  ;;  %v1852_v60 = vpop.permute.xlu0 %1851  ;;  %v561_v50 = vcombine.high %v559_v59, %v559_v59  ;;  %21410 = vst [vmem:[#allocation188_spill] sm:$0xff] %v12863_v23  ;;  %v12866_v61 = vrot.slane %v5303_v47, %v11711_v56  ;;  %v12881_v52 = vrot.slane %v4952_v57, %v11726_v13 }
 0x167   :  { %21405 = vst [vmem:[#allocation183_spill] sm:$0xff] %v12840_v34  ;;  %21406 = vst [vmem:[#allocation184_spill] sm:$0xff] %v12843_v28  ;;  %v4975_v47 = vcombine.low %v1845_v21, %v1852_v60  ;;  %v5319_v36 = vcombine.low %v12846_v53, %v12846_v53  ;;  %v4976_v24 = vcombine.high %v1845_v21, %v1852_v60  ;;  %v21421_v34 = vld [vmem:[#allocation32_spill] sm:$0xff] }
 0x168   :  { %21409 = vst [vmem:[#allocation187_spill] sm:$0xff] %v12855_v31  ;;  %v12868_v11 = vpop.permute.xlu1 %1855  ;;  %2054 = vbcast.lane.b32.xlu0 %v1170_v55, 256  ;;  %21412 = vst [vmem:[#allocation190_spill] sm:$0xff] %v12881_v52  ;;  %v589_v1 = vrot.slane %v561_v50, %v11630_v5  ;;  %v12895_v38 = vrot.slane %v4920_v40, %v11726_v13  ;;  %v5351_v60 = vcombine.low %v12866_v61, %v12866_v61  ;;  %v21420_v31 = vld [vmem:[#allocation33_spill] sm:$0xff] }
 0x169   :  { %21411 = vst [vmem:[#allocation189_spill] sm:$0xff] %v12868_v11  ;;  %v4983_v40 = vrot.slane %v4975_v47, %v11711_v56  ;;  %v12917_v23 = vrot.slane %v3104_v12, %v11711_v56  ;;  %v3120_v46 = vcombine.high %v21421_v34, %v21420_v31  ;;  %v4990_v25 = vrot.slane %v4976_v24, %v11711_v56 }
 0x16a   :  { %2058 = vbcast.lane.b32.xlu1 %v1170_v55, 264  ;;  %v1859_v62 = vpop.permute.xlu0 %1858  ;;  %21415 = vst [vmem:[#allocation191_spill] sm:$0xff] %v12895_v38  ;;  %v1178_v55 = vrot.slane %v12860_v6, %v11634_v8  ;;  %v12923_v47 = vrot.slane %v5319_v36, %v11726_v13  ;;  %v1182_v59 = vrot.slane %v589_v1, %v11634_v8 }
 0x16b   :  { %21419 = vst [vmem:[#allocation193_spill] sm:$0xff] %v12917_v23  ;;  %v591_v32 = vcombine.high %v12860_v6, %v12860_v6  ;;  %v593_v12 = vcombine.high %v589_v1, %v589_v1  ;;  %v601_v34 = vrot.slane %v12910_v54, %v11630_v5  ;;  %v12935_v31 = vrot.slane %v5351_v60, %v11726_v13 }
 0x16c   :  { %v12903_v21 = vpop.permute.xlu1 %1862  ;;  %2061 = vbcast.lane.b32.xlu0 %v1174_v51, 256  ;;  %21422 = vst [vmem:[#allocation33_spill] sm:$0xff] %v12923_v47  ;;  %v5007_v36 = vcombine.low %v4983_v40, %v4983_v40  ;;  %v5023_v30 = vcombine.low %v4990_v25, %v4990_v25  ;;  %v5024_v1 = vcombine.high %v4990_v25, %v4990_v25 }
 0x16d   :  { %21416 = vst [vmem:[#allocation192_spill] sm:$0xff] %v12903_v21  ;;  %21424 = vst [vmem:[#allocation194_spill] sm:$0xff] %v12935_v31  ;;  %v12946_v27 = vrot.slane %v3120_v46, %v11711_v56  ;;  %v12978_v47 = vrot.slane %v601_v34, %v11630_v5 }
 0x16e   :  { %2065 = vbcast.lane.b32.xlu1 %v1174_v51, 264  ;;  %v1866_v50 = vpop.permute.xlu0 %1865 }
 0x16f   :  { %v4991_v37 = vcombine.low %v1859_v62, %v1866_v50  ;;  %v4992_v28 = vcombine.high %v1859_v62, %v1866_v50  ;;  %v5391_v62 = vcombine.low %v12833_v9, %v12868_v11  ;;  %v5008_v50 = vcombine.high %v4983_v40, %v4983_v40  ;;  %21425 = vst [vmem:[#allocation195_spill] sm:$0xff] %v12946_v27  ;;  %v21426_v9 = vld [vmem:[#allocation42_spill] sm:$0xff] }
 0x170   :  { %v12928_v39 = vpop.permute.xlu1 %1869  ;;  %2068 = vbcast.lane.b32.xlu0 %v1178_v55, 256 }
 0x171   :  { %21423 = vst [vmem:[#allocation32_spill] sm:$0xff] %v12928_v39  ;;  %v4999_v24 = vrot.slane %v4991_v37, %v11711_v56  ;;  %v5006_v6 = vrot.slane %v4992_v28, %v11711_v56  ;;  %v21427_v37 = vld [vmem:[#allocation34_spill] sm:$0xff]  ;;  %v5407_v28 = vcombine.low %v12903_v21, %v12928_v39  ;;  %v12956_v40 = vrot.slane %v5391_v62, %v11711_v56 }
 0x172   :  { %2072 = vbcast.lane.b32.xlu1 %v1178_v55, 264  ;;  %v12941_v57 = vpop.permute.xlu0 %1872  ;;  %v3624_v11 = vcombine.high %v21427_v37, %v21426_v9  ;;  %v1186_v55 = vrot.slane %v591_v32, %v11634_v8  ;;  %v12965_v37 = vrot.slane %v5007_v36, %v11726_v13  ;;  %v12968_v51 = vrot.slane %v5008_v50, %v11726_v13 }
 0x173   :  { %v5039_v52 = vcombine.low %v4999_v24, %v4999_v24  ;;  %v5040_v60 = vcombine.high %v4999_v24, %v4999_v24  ;;  %v5055_v38 = vcombine.low %v5006_v6, %v5006_v6  ;;  %v5056_v3 = vcombine.high %v5006_v6, %v5006_v6 }
 0x174   :  { %v12952_v25 = vpop.permute.xlu1 %1876  ;;  %2075 = vbcast.lane.b32.xlu0 %v1182_v59, 256  ;;  %v609_v24 = vcombine.high %v601_v34, %v601_v34  ;;  %21431 = vst [vmem:[#allocation197_spill] sm:$0xff] %v12965_v37  ;;  %21432 = vst [vmem:[#allocation198_spill] sm:$0xff] %v12968_v51  ;;  %v12984_v36 = vrot.slane %v5024_v1, %v11726_v13  ;;  %v12987_v50 = vrot.slane %v5407_v28, %v11711_v56  ;;  %v21439_v1 = vld [vmem:[#allocation45_spill] sm:$0xff]  ;;  %v21440_v28 = vld [vmem:[#allocation44_spill] sm:$0xff] }
 0x175   :  { %21428 = vst [vmem:[#allocation42_spill] sm:$0xff] %v12952_v25  ;;  %v12959_v6 = vrot.slane %v5039_v52, %v11726_v13  ;;  %v12962_v46 = vrot.slane %v5040_v60, %v11726_v13  ;;  %v12971_v32 = vrot.slane %v5055_v38, %v11726_v13  ;;  %v12974_v62 = vrot.slane %v5056_v3, %v11726_v13  ;;  %v21442_v51 = vld [vmem:[#allocation77_spill] sm:$0xff] }
 0x176   :  { %2079 = vbcast.lane.b32.xlu1 %v1182_v59, 264  ;;  %v1880_v9 = vpop.permute.xlu0 %1879  ;;  %v1190_v52 = vrot.slane %v593_v12, %v11634_v8  ;;  %v12981_v59 = vrot.slane %v5023_v30, %v11726_v13  ;;  %21436 = vst [vmem:[#allocation202_spill] sm:$0xff] %v12984_v36  ;;  %v13000_v34 = vrot.slane %v3624_v11, %v11711_v56 }
 0x177   :  { %21429 = vst [vmem:[#allocation34_spill] sm:$0xff] %v12959_v6  ;;  %21430 = vst [vmem:[#allocation196_spill] sm:$0xff] %v12962_v46  ;;  %v3640_v31 = vcombine.high %v21440_v28, %v21439_v1  ;;  %v13005_v21 = vrot.slane %v609_v24, %v11630_v5  ;;  %v5423_v3 = vcombine.low %v12956_v40, %v12956_v40  ;;  %v21441_v46 = vld [vmem:[#allocation74_spill] sm:$0xff] }
 0x178   :  { %21433 = vst [vmem:[#allocation199_spill] sm:$0xff] %v12971_v32  ;;  %21434 = vst [vmem:[#allocation200_spill] sm:$0xff] %v12974_v62  ;;  %v12989_v60 = vpop.permute.xlu1 %1883  ;;  %2082 = vbcast.lane.b32.xlu0 %v1186_v55, 256  ;;  %v5079_v38 = vcombine.low %v12941_v57, %v1880_v9  ;;  %v5080_v28 = vcombine.high %v12941_v57, %v1880_v9  ;;  %v3688_v12 = vcombine.high %v21442_v51, %v21442_v51 }
 0x179   :  { %21435 = vst [vmem:[#allocation201_spill] sm:$0xff] %v12981_v59  ;;  %21437 = vst [vmem:[#allocation203_spill] sm:$0xff] %v12989_v60  ;;  %v5455_v11 = vcombine.low %v12987_v50, %v12987_v50  ;;  %v1194_v30 = vrot.slane %v12978_v47, %v11634_v8  ;;  %v13040_v32 = vrot.slane %v3640_v31, %v11711_v56 }
 0x17a   :  { %21438 = vst [vmem:[#allocation204_spill] sm:$0xff] %v13000_v34  ;;  %2086 = vbcast.lane.b32.xlu1 %v1186_v55, 264  ;;  %v1887_v39 = vpop.permute.xlu0 %1886  ;;  %v3656_v55 = vcombine.high %v21441_v46, %v21441_v46  ;;  %v594_v46 = vcombine.high %v12910_v54, %v12910_v54  ;;  %v5087_v37 = vrot.slane %v5079_v38, %v11711_v56 }
 0x17b   :  { %21446 = vst [vmem:[#allocation44_spill] sm:$0xff] %v13040_v32  ;;  %v1198_v58 = vrot.slane %v13005_v21, %v11634_v8  ;;  %v13046_v1 = vrot.slane %v5423_v3, %v11726_v13  ;;  %v13049_v57 = vrot.slane %v5080_v28, %v11711_v56  ;;  %v13058_v38 = vrot.slane %v5455_v11, %v11726_v13 }
 0x17c   :  { %v13027_v59 = vpop.permute.xlu1 %1890  ;;  %2089 = vbcast.lane.b32.xlu0 %v1190_v52, 256  ;;  %v13061_v3 = vrot.slane %v3656_v55, %v11726_v13  ;;  %v13064_v28 = vrot.slane %v3688_v12, %v11726_v13  ;;  %v641_v24 = vcombine.high %v13005_v21, %v13005_v21  ;;  %v608_v62 = vrot.slane %v594_v46, %v11630_v5  ;;  %v21452_v21 = vld [vmem:[#allocation46_spill] sm:$0xff] }
 0x17d   :  { %21443 = vst [vmem:[#allocation45_spill] sm:$0xff] %v13027_v59  ;;  %21447 = vst [vmem:[#allocation74_spill] sm:$0xff] %v13046_v1  ;;  %v5111_v36 = vcombine.low %v5087_v37, %v5087_v37  ;;  %v5495_v11 = vcombine.low %v12952_v25, %v12989_v60  ;;  %v3728_v27 = vcombine.high %v21452_v21, %v11995_v2 }
 0x17e   :  { %2093 = vbcast.lane.b32.xlu1 %v1190_v52, 264  ;;  %v1894_v6 = vpop.permute.xlu0 %1893  ;;  %v639_v52 = vcombine.high %v12978_v47, %v12978_v47  ;;  %21449 = vst [vmem:[#allocation205_spill] sm:$0xff] %v13058_v38  ;;  %21450 = vst [vmem:[#allocation206_spill] sm:$0xff] %v13061_v3  ;;  %v5112_v47 = vcombine.high %v5087_v37, %v5087_v37  ;;  %v610_v38 = vcombine.high %v608_v62, %v608_v62 }
 0x17f   :  { %v5095_v54 = vcombine.low %v1887_v39, %v1894_v6  ;;  %v5096_v44 = vcombine.high %v1887_v39, %v1894_v6  ;;  %21451 = vst [vmem:[#allocation207_spill] sm:$0xff] %v13064_v28  ;;  %v13093_v2 = vrot.slane %v5495_v11, %v11711_v56  ;;  %v13108_v12 = vrot.slane %v608_v62, %v11630_v5 }
 0x180   :  { %v13053_v31 = vpop.permute.xlu1 %1897  ;;  %2096 = vbcast.lane.b32.xlu0 %v1194_v30, 256  ;;  %v13137_v62 = vrot.slane %v3728_v27, %v11711_v56 }
 0x181   :  { %21448 = vst [vmem:[#allocation77_spill] sm:$0xff] %v13053_v31  ;;  %v5103_v39 = vrot.slane %v5095_v54, %v11711_v56  ;;  %v5110_v6 = vrot.slane %v5096_v44, %v11711_v56  ;;  %v5127_v54 = vcombine.low %v13049_v57, %v13049_v57  ;;  %v5511_v37 = vcombine.low %v13027_v59, %v13053_v31 }
 0x182   :  { %2100 = vbcast.lane.b32.xlu1 %v1194_v30, 264  ;;  %v1901_v55 = vpop.permute.xlu0 %1900  ;;  %v1202_v30 = vrot.slane %v639_v52, %v11634_v8  ;;  %v13096_v59 = vrot.slane %v5111_v36, %v11726_v13  ;;  %v13099_v52 = vrot.slane %v5112_v47, %v11726_v13  ;;  %v5527_v31 = vcombine.low %v13093_v2, %v13093_v2 }
 0x183   :  { %v5143_v9 = vcombine.low %v5103_v39, %v5103_v39  ;;  %v5144_v44 = vcombine.high %v5103_v39, %v5103_v39  ;;  %v5159_v51 = vcombine.low %v5110_v6, %v5110_v6  ;;  %v5160_v1 = vcombine.high %v5110_v6, %v5110_v6 }
 0x184   :  { %v13081_v46 = vpop.permute.xlu1 %1904  ;;  %2103 = vbcast.lane.b32.xlu0 %v1198_v58, 256  ;;  %21456 = vst [vmem:[#allocation210_spill] sm:$0xff] %v13096_v59  ;;  %21457 = vst [vmem:[#allocation211_spill] sm:$0xff] %v13099_v52  ;;  %v13114_v36 = vrot.slane %v5511_v37, %v11711_v56  ;;  %v1210_v47 = vrot.slane %v13108_v12, %v11634_v8  ;;  %v13170_v32 = vrot.slane %v5527_v31, %v11726_v13 }
 0x185   :  { %21453 = vst [vmem:[#allocation46_spill] sm:$0xff] %v13081_v46  ;;  %v13087_v25 = vrot.slane %v5143_v9, %v11726_v13  ;;  %v13090_v39 = vrot.slane %v5144_v44, %v11726_v13  ;;  %v13102_v6 = vrot.slane %v5159_v51, %v11726_v13  ;;  %v5128_v9 = vcombine.high %v13049_v57, %v13049_v57 }
 0x186   :  { %2107 = vbcast.lane.b32.xlu1 %v1198_v58, 264  ;;  %v1908_v21 = vpop.permute.xlu0 %1907  ;;  %v1206_v44 = vrot.slane %v641_v24, %v11634_v8  ;;  %v13111_v58 = vrot.slane %v5127_v54, %v11726_v13  ;;  %21460 = vst [vmem:[#allocation214_spill] sm:$0xff] %v13114_v36  ;;  %v13129_v37 = vrot.slane %v5160_v1, %v11726_v13 }
 0x187   :  { %21454 = vst [vmem:[#allocation208_spill] sm:$0xff] %v13087_v25  ;;  %21455 = vst [vmem:[#allocation209_spill] sm:$0xff] %v13090_v39  ;;  %v5183_v54 = vcombine.low %v1901_v55, %v1908_v21  ;;  %v5184_v51 = vcombine.high %v1901_v55, %v1908_v21  ;;  %v638_v57 = vrot.slane %v610_v38, %v11630_v5  ;;  %v13141_v39 = vld [vmem:[#allocation2 + $0x60] sm:$0xff]  ;;  %v21467_v21 = vld [vmem:[#allocation55_spill] sm:$0xff] }
 0x188   :  { %21458 = vst [vmem:[#allocation212_spill] sm:$0xff] %v13102_v6  ;;  %21459 = vst [vmem:[#allocation213_spill] sm:$0xff] %v13111_v58  ;;  %v13116_v11 = vpop.permute.xlu1 %1911  ;;  %2110 = vbcast.lane.b32.xlu0 %v1202_v30, 256  ;;  %v13146_v55 = vrot.slane %v5128_v9, %v11726_v13  ;;  %v21468_v25 = vld [vmem:[#allocation100_spill] sm:$0xff]  ;;  %v5559_v27 = vcombine.low %v13114_v36, %v13114_v36  ;;  %v21470_v6 = vld [vmem:[#allocation81_spill] sm:$0xff]  ;;  %v650_v0 = vrot.slane %v13141_v39, %v11630_v5 }
 0x189   :  { %21461 = vst [vmem:[#allocation215_spill] sm:$0xff] %v13116_v11  ;;  %21462 = vst [vmem:[#allocation216_spill] sm:$0xff] %v13129_v37  ;;  %v21471_v9 = vld [vmem:[#allocation83_spill] sm:$0xff]  ;;  %v5191_v38 = vrot.slane %v5183_v54, %v11711_v56  ;;  %v5198_v52 = vrot.slane %v5184_v51, %v11711_v56  ;;  %v1214_v33 = vrot.slane %v638_v57, %v11634_v8 }
 0x18a   :  { %2114 = vbcast.lane.b32.xlu1 %v1202_v30, 264  ;;  %v1915_v60 = vpop.permute.xlu0 %1914  ;;  %21465 = vst [vmem:[#allocation217_spill] sm:$0xff] %v13146_v55  ;;  %v21466_v30 = vld [vmem:[#allocation56_spill] sm:$0xff]  ;;  %21472 = vst [vmem:[#allocation55_spill] sm:$0xff] %v13170_v32  ;;  %v640_v54 = vcombine.high %v13108_v12, %v13108_v12  ;;  %v642_v1 = vcombine.high %v638_v57, %v638_v57  ;;  %v5599_v24 = vcombine.low %v13081_v46, %v13116_v11 }
 0x18b   :  { %v13181_v10 = vrot.slane %v5559_v27, %v11726_v13  ;;  %v5215_v31 = vcombine.low %v5191_v38, %v5191_v38  ;;  %v5216_v19 = vcombine.high %v5191_v38, %v5191_v38  ;;  %v5231_v12 = vcombine.low %v5198_v52, %v5198_v52 }
 0x18c   :  { %v13154_v58 = vpop.permute.xlu1 %1918  ;;  %2117 = vbcast.lane.b32.xlu0 %v1206_v44, 256  ;;  %v5232_v57 = vcombine.high %v5198_v52, %v5198_v52  ;;  %v666_v52 = vrot.slane %v650_v0, %v11630_v5  ;;  %v643_v43 = vcombine.high %v13141_v39, %v13141_v39 }
 0x18d   :  { %21469 = vst [vmem:[#allocation56_spill] sm:$0xff] %v13154_v58  ;;  %21474 = vst [vmem:[#allocation81_spill] sm:$0xff] %v13181_v10 }
 0x18e   :  { %2121 = vbcast.lane.b32.xlu1 %v1206_v44, 264  ;;  %v1922_v23 = vpop.permute.xlu0 %1921  ;;  %v658_v44 = vcombine.high %v650_v0, %v650_v0  ;;  %v13210_v0 = vrot.slane %v5216_v19, %v11726_v13 }
 0x18f   :  { %v5199_v59 = vcombine.low %v1915_v60, %v1922_v23  ;;  %v5200_v34 = vcombine.high %v1915_v60, %v1922_v23 }
 0x190   :  { %v13176_v51 = vpop.permute.xlu1 %1925  ;;  %2124 = vbcast.lane.b32.xlu0 %v1210_v47, 256  ;;  %v680_v38 = vrot.slane %v658_v44, %v11630_v5  ;;  %21479 = vst [vmem:[#allocation221_spill] sm:$0xff] %v13210_v0 }
 0x191   :  { %21473 = vst [vmem:[#allocation100_spill] sm:$0xff] %v13176_v51  ;;  %v5207_v23 = vrot.slane %v5199_v59, %v11711_v56  ;;  %v5214_v60 = vrot.slane %v5200_v34, %v11711_v56  ;;  %v5615_v46 = vcombine.low %v13154_v58, %v13176_v51  ;;  %v1218_v59 = vrot.slane %v640_v54, %v11634_v8 }
 0x192   :  { %2128 = vbcast.lane.b32.xlu1 %v1210_v47, 264  ;;  %v1929_v11 = vpop.permute.xlu0 %1928  ;;  %v1222_v34 = vrot.slane %v642_v1, %v11634_v8  ;;  %v13196_v47 = vrot.slane %v5599_v24, %v11711_v56  ;;  %v13207_v1 = vrot.slane %v5215_v31, %v11726_v13  ;;  %v690_v10 = vcombine.high %v680_v38, %v680_v38 }
 0x193   :  { %v5247_v48 = vcombine.low %v5207_v23, %v5207_v23  ;;  %v5248_v37 = vcombine.high %v5207_v23, %v5207_v23  ;;  %v5263_v27 = vcombine.low %v5214_v60, %v5214_v60  ;;  %v5264_v55 = vcombine.high %v5214_v60, %v5214_v60 }
 0x194   :  { %v13189_v36 = vpop.permute.xlu1 %1932  ;;  %2131 = vbcast.lane.b32.xlu0 %v1214_v33, 256  ;;  %21478 = vst [vmem:[#allocation220_spill] sm:$0xff] %v13207_v1  ;;  %v1226_v58 = vrot.slane %v666_v52, %v11634_v8 }
 0x195   :  { %21475 = vst [vmem:[#allocation83_spill] sm:$0xff] %v13189_v36  ;;  %v13201_v23 = vrot.slane %v5247_v48, %v11726_v13  ;;  %v13204_v60 = vrot.slane %v5248_v37, %v11726_v13  ;;  %v13213_v24 = vrot.slane %v5263_v27, %v11726_v13  ;;  %v13216_v44 = vrot.slane %v5264_v55, %v11726_v13 }
 0x196   :  { %2135 = vbcast.lane.b32.xlu1 %v1214_v33, 264  ;;  %v1936_v54 = vpop.permute.xlu0 %1935  ;;  %v13219_v48 = vrot.slane %v5615_v46, %v11711_v56  ;;  %v13222_v37 = vrot.slane %v5231_v12, %v11726_v13  ;;  %v13225_v33 = vrot.slane %v5232_v57, %v11726_v13  ;;  %v688_v27 = vcombine.high %v666_v52, %v666_v52 }
 0x197   :  { %21476 = vst [vmem:[#allocation218_spill] sm:$0xff] %v13201_v23  ;;  %21477 = vst [vmem:[#allocation219_spill] sm:$0xff] %v13204_v60  ;;  %v5703_v39 = vcombine.low %v1929_v11, %v1936_v54  ;;  %v5704_v31 = vcombine.high %v1929_v11, %v1936_v54  ;;  %v657_v57 = vrot.slane %v643_v43, %v11630_v5  ;;  %v21486_v60 = vld [vmem:[#allocation115_spill] sm:$0xff] }
 0x198   :  { %21480 = vst [vmem:[#allocation222_spill] sm:$0xff] %v13213_v24  ;;  %21481 = vst [vmem:[#allocation223_spill] sm:$0xff] %v13216_v44  ;;  %v13227_v32 = vpop.permute.xlu1 %1939  ;;  %2138 = vbcast.lane.b32.xlu0 %v1218_v59, 256  ;;  %v5631_v11 = vcombine.low %v13196_v47, %v13196_v47  ;;  %v4488_v0 = vcombine.high %v21486_v60, %v21486_v60  ;;  %v5663_v43 = vcombine.low %v13219_v48, %v13219_v48 }
 0x199   :  { %21482 = vst [vmem:[#allocation224_spill] sm:$0xff] %v13219_v48  ;;  %21483 = vst [vmem:[#allocation225_spill] sm:$0xff] %v13222_v37  ;;  %v5711_v54 = vrot.slane %v5703_v39, %v11711_v56  ;;  %v21487_v39 = vld [vmem:[#allocation120_spill] sm:$0xff]  ;;  %v5718_v51 = vrot.slane %v5704_v31, %v11711_v56  ;;  %v1230_v46 = vrot.slane %v680_v38, %v11634_v8 }
 0x19a   :  { %21484 = vst [vmem:[#allocation226_spill] sm:$0xff] %v13225_v33  ;;  %21485 = vst [vmem:[#allocation227_spill] sm:$0xff] %v13227_v32  ;;  %2142 = vbcast.lane.b32.xlu1 %v1218_v59, 264  ;;  %v1943_v19 = vpop.permute.xlu0 %1942  ;;  %v4520_v59 = vcombine.high %v21487_v39, %v21487_v39  ;;  %v13261_v60 = vrot.slane %v688_v27, %v11634_v8  ;;  %v13264_v37 = vrot.slane %v690_v10, %v11634_v8 }
 0x19b   :  { %v13267_v52 = vrot.slane %v657_v57, %v11630_v5  ;;  %v659_v39 = vcombine.high %v657_v57, %v657_v57  ;;  %v5735_v24 = vcombine.low %v5711_v54, %v5711_v54  ;;  %v6119_v31 = vcombine.low %v13189_v36, %v13227_v32 }
 0x19c   :  { %v13255_v55 = vpop.permute.xlu1 %1946  ;;  %2145 = vbcast.lane.b32.xlu0 %v1222_v34, 256  ;;  %v13272_v38 = vrot.slane %v5631_v11, %v11726_v13  ;;  %v21490_v27 = vcombine.high %v21470_v6, %v21470_v6  ;;  %v13281_v33 = vrot.slane %v5663_v43, %v11726_v13  ;;  %v21493_v57 = vcombine.high %v21471_v9, %v21471_v9 }
 0x19d   :  { %21488 = vst [vmem:[#allocation115_spill] sm:$0xff] %v13255_v55  ;;  %v5736_v36 = vcombine.high %v5711_v54, %v5711_v54  ;;  %v5751_v11 = vcombine.low %v5718_v51, %v5718_v51  ;;  %v21496_v6 = vcombine.high %v12238_v17, %v12238_v17  ;;  %v5752_v9 = vcombine.high %v5718_v51, %v5718_v51 }
 0x19e   :  { %2149 = vbcast.lane.b32.xlu1 %v1222_v34, 264  ;;  %v1950_v1 = vpop.permute.xlu0 %1949  ;;  %21489 = vst [vmem:[#allocation120_spill] sm:$0xff] %v13272_v38  ;;  %v13278_v12 = vrot.slane %v21490_v27, %v11726_v13  ;;  %21492 = vst [vmem:[#allocation229_spill] sm:$0xff] %v13281_v33  ;;  %v13287_v34 = vrot.slane %v21493_v57, %v11726_v13  ;;  %v13308_v23 = vrot.slane %v6119_v31, %v11711_v56  ;;  %v13340_v38 = vld [vmem:[#allocation2 + $0x68] sm:$0xff] }
 0x19f   :  { %v5719_v10 = vcombine.low %v1943_v19, %v1950_v1  ;;  %v5720_v44 = vcombine.high %v1943_v19, %v1950_v1  ;;  %v13295_v27 = vrot.slane %v21496_v6, %v11726_v13  ;;  %v21498_v1 = vcombine.high %v12259_v35, %v12259_v35 }
 0x1a0   :  { %21491 = vst [vmem:[#allocation228_spill] sm:$0xff] %v13278_v12  ;;  %21494 = vst [vmem:[#allocation230_spill] sm:$0xff] %v13287_v34  ;;  %v13289_v32 = vpop.permute.xlu1 %1953  ;;  %2152 = vbcast.lane.b32.xlu0 %v1226_v58, 256  ;;  %v13323_v6 = vrot.slane %v5735_v24, %v11726_v13  ;;  %v13326_v35 = vrot.slane %v5736_v36, %v11726_v13  ;;  %v13343_v24 = vrot.slane %v5752_v9, %v11726_v13 }
 0x1a1   :  { %21495 = vst [vmem:[#allocation231_spill] sm:$0xff] %v13289_v32  ;;  %21497 = vst [vmem:[#allocation232_spill] sm:$0xff] %v13295_v27  ;;  %v13301_v19 = vrot.slane %v21498_v1, %v11726_v13  ;;  %v5727_v43 = vrot.slane %v5719_v10, %v11711_v56  ;;  %v5734_v54 = vrot.slane %v5720_v44, %v11711_v56 }
 0x1a2   :  { %v6135_v57 = vcombine.low %v13255_v55, %v13289_v32  ;;  %21500 = vst [vmem:[#allocation234_spill] sm:$0xff] %v13308_v23  ;;  %2156 = vbcast.lane.b32.xlu1 %v1226_v58, 264  ;;  %v1957_v17 = vpop.permute.xlu0 %1956  ;;  %v687_v58 = vrot.slane %v659_v39, %v11630_v5  ;;  %21503 = vst [vmem:[#allocation237_spill] sm:$0xff] %v13323_v6  ;;  %v689_v9 = vcombine.high %v13267_v52, %v13267_v52 }
 0x1a3   :  { %21499 = vst [vmem:[#allocation233_spill] sm:$0xff] %v13301_v19  ;;  %v5767_v10 = vcombine.low %v5727_v43, %v5727_v43  ;;  %v5768_v1 = vcombine.high %v5727_v43, %v5727_v43  ;;  %v5783_v44 = vcombine.low %v5734_v54, %v5734_v54  ;;  %v5784_v48 = vcombine.high %v5734_v54, %v5734_v54  ;;  %v21568_v19 = vld [vmem:[#allocation84_spill] sm:$0xff] }
 0x1a4   :  { %v13317_v55 = vrot.slane %v6135_v57, %v11711_v56  ;;  %v13319_v31 = vpop.permute.xlu1 %1960  ;;  %2159 = vbcast.lane.b32.xlu0 %v1230_v46, 256  ;;  %21504 = vst [vmem:[#allocation238_spill] sm:$0xff] %v13326_v35  ;;  %v13335_v54 = vrot.slane %v5751_v11, %v11726_v13  ;;  %21509 = vst [vmem:[#allocation243_spill] sm:$0xff] %v13343_v24  ;;  %v6151_v11 = vcombine.low %v13308_v23, %v13308_v23 }
 0x1a5   :  { %21502 = vst [vmem:[#allocation236_spill] sm:$0xff] %v13319_v31  ;;  %v13329_v51 = vrot.slane %v5767_v10, %v11726_v13  ;;  %v13332_v43 = vrot.slane %v5768_v1, %v11726_v13  ;;  %v13338_v57 = vrot.slane %v5783_v44, %v11726_v13  ;;  %v13346_v36 = vrot.slane %v5784_v48, %v11726_v13 }
 0x1a6   :  { %21501 = vst [vmem:[#allocation235_spill] sm:$0xff] %v13317_v55  ;;  %21507 = vst [vmem:[#allocation241_spill] sm:$0xff] %v13335_v54  ;;  %2163 = vbcast.lane.b32.xlu1 %v1230_v46, 264  ;;  %v1964_v39 = vpop.permute.xlu0 %1963  ;;  %v13349_v10 = vrot.slane %v4488_v0, %v11726_v13  ;;  %v13352_v1 = vrot.slane %v4520_v59, %v11726_v13  ;;  %v6183_v46 = vcombine.low %v13317_v55, %v13317_v55 }
 0x1a7   :  { %21505 = vst [vmem:[#allocation239_spill] sm:$0xff] %v13329_v51  ;;  %21506 = vst [vmem:[#allocation240_spill] sm:$0xff] %v13332_v43  ;;  %v5807_v44 = vcombine.low %v1957_v17, %v1964_v39  ;;  %v5808_v33 = vcombine.high %v1957_v17, %v1964_v39  ;;  %v691_v17 = vcombine.high %v687_v58, %v687_v58 }
 0x1a8   :  { %21508 = vst [vmem:[#allocation242_spill] sm:$0xff] %v13338_v57  ;;  %21510 = vst [vmem:[#allocation244_spill] sm:$0xff] %v13346_v36  ;;  %v13360_v32 = vpop.permute.xlu1 %1967  ;;  %2166 = vbcast.lane.b32.xlu0 %v13261_v60, 256  ;;  %v699_v39 = vrot.slane %v13340_v38, %v11630_v5  ;;  %v1242_v54 = vrot.slane %v13267_v52, %v11634_v8  ;;  %v13386_v57 = vrot.slane %v6151_v11, %v11726_v13 }
 0x1a9   :  { %21511 = vst [vmem:[#allocation245_spill] sm:$0xff] %v13349_v10  ;;  %21512 = vst [vmem:[#allocation246_spill] sm:$0xff] %v13352_v1  ;;  %v5815_v23 = vrot.slane %v5807_v44, %v11711_v56  ;;  %v13389_v44 = vrot.slane %v6183_v46, %v11726_v13  ;;  %v5822_v55 = vrot.slane %v5808_v33, %v11711_v56 }
 0x1aa   :  { %21513 = vst [vmem:[#allocation247_spill] sm:$0xff] %v13360_v32  ;;  %2170 = vbcast.lane.b32.xlu1 %v13261_v60, 264  ;;  %v1971_v0 = vpop.permute.xlu0 %1970  ;;  %21514 = vst [vmem:[#allocation248_spill] sm:$0xff] %v13386_v57  ;;  %v21516_v60 = vcombine.high %v12292_v15, %v12292_v15  ;;  %v1246_v52 = vrot.slane %v687_v58, %v11634_v8  ;;  %v21519_v11 = vcombine.high %v12295_v22, %v12295_v22 }
 0x1ab   :  { %21515 = vst [vmem:[#allocation249_spill] sm:$0xff] %v13389_v44  ;;  %v4696_v15 = vcombine.high %v12613_v45, %v12613_v45  ;;  %v13415_v33 = vrot.slane %v689_v9, %v11634_v8  ;;  %v13418_v59 = vrot.slane %v691_v17, %v11634_v8  ;;  %v5839_v24 = vcombine.low %v5815_v23, %v5815_v23 }
 0x1ac   :  { %v13395_v48 = vrot.slane %v21516_v60, %v11726_v13  ;;  %v13400_v36 = vpop.permute.xlu1 %1974  ;;  %2173 = vbcast.lane.b32.xlu0 %v13264_v37, 256  ;;  %v13408_v46 = vrot.slane %v21519_v11, %v11726_v13  ;;  %v6223_v60 = vcombine.low %v13319_v31, %v13360_v32  ;;  %v5840_v58 = vcombine.high %v5815_v23, %v5815_v23 }
 0x1ad   :  { %21518 = vst [vmem:[#allocation251_spill] sm:$0xff] %v13400_v36  ;;  %v13422_v22 = vrot.slane %v699_v39, %v11630_v5  ;;  %v707_v11 = vcombine.high %v699_v39, %v699_v39  ;;  %v5855_v32 = vcombine.low %v5822_v55, %v5822_v55  ;;  %v5856_v17 = vcombine.high %v5822_v55, %v5822_v55 }
 0x1ae   :  { %21517 = vst [vmem:[#allocation250_spill] sm:$0xff] %v13395_v48  ;;  %21520 = vst [vmem:[#allocation252_spill] sm:$0xff] %v13408_v46  ;;  %2177 = vbcast.lane.b32.xlu1 %v13264_v37, 264  ;;  %v1978_v43 = vpop.permute.xlu0 %1977  ;;  %v21522_v23 = vcombine.high %v12318_v41, %v12318_v41  ;;  %v13443_v39 = vrot.slane %v6223_v60, %v11711_v56  ;;  %v4728_v41 = vcombine.high %v12631_v18, %v12631_v18  ;;  %v21566_v46 = vld [vmem:[#allocation69_spill] sm:$0xff]  ;;  %v21567_v48 = vld [vmem:[#allocation67_spill] sm:$0xff] }
 0x1af   :  { %v5823_v35 = vcombine.low %v1971_v0, %v1978_v43  ;;  %v5824_v45 = vcombine.high %v1971_v0, %v1978_v43  ;;  %v21524_v43 = vcombine.high %v21468_v25, %v21468_v25  ;;  %v729_v57 = vrot.slane %v707_v11, %v11630_v5 }
 0x1b0   :  { %v13428_v6 = vpop.permute.xlu1 %1981  ;;  %2180 = vbcast.lane.b32.xlu0 %v1242_v54, 256  ;;  %v13434_v37 = vrot.slane %v21522_v23, %v11726_v13  ;;  %21526 = vst [vmem:[#allocation256_spill] sm:$0xff] %v13443_v39  ;;  %v13453_v25 = vrot.slane %v5839_v24, %v11726_v13  ;;  %v13463_v18 = vrot.slane %v5840_v58, %v11726_v13 }
 0x1b1   :  { %21521 = vst [vmem:[#allocation253_spill] sm:$0xff] %v13428_v6  ;;  %v13440_v0 = vrot.slane %v21524_v43, %v11726_v13  ;;  %v5831_v55 = vrot.slane %v5823_v35, %v11711_v56  ;;  %v5838_v9 = vrot.slane %v5824_v45, %v11711_v56  ;;  %v6239_v31 = vcombine.low %v13400_v36, %v13428_v6 }
 0x1b2   :  { %21523 = vst [vmem:[#allocation254_spill] sm:$0xff] %v13434_v37  ;;  %2184 = vbcast.lane.b32.xlu1 %v1242_v54, 264  ;;  %v1985_v23 = vpop.permute.xlu0 %1984  ;;  %21527 = vst [vmem:[#allocation257_spill] sm:$0xff] %v13453_v25  ;;  %v13466_v54 = vrot.slane %v5855_v32, %v11726_v13  ;;  %v13469_v24 = vrot.slane %v5856_v17, %v11726_v13  ;;  %v6255_v11 = vcombine.low %v13443_v39, %v13443_v39  ;;  %v21544_v25 = vld [vmem:[#allocation65_spill] sm:$0xff] }
 0x1b3   :  { %21525 = vst [vmem:[#allocation255_spill] sm:$0xff] %v13440_v0  ;;  %v5871_v43 = vcombine.low %v5831_v55, %v5831_v55  ;;  %v5872_v35 = vcombine.high %v5831_v55, %v5831_v55  ;;  %v5887_v44 = vcombine.low %v5838_v9, %v5838_v9  ;;  %v5888_v45 = vcombine.high %v5838_v9, %v5838_v9 }
 0x1b4   :  { %v13458_v51 = vrot.slane %v6239_v31, %v11711_v56  ;;  %v13460_v36 = vpop.permute.xlu1 %1988  ;;  %2187 = vbcast.lane.b32.xlu0 %v1246_v52, 256  ;;  %21530 = vst [vmem:[#allocation260_spill] sm:$0xff] %v13463_v18  ;;  %21531 = vst [vmem:[#allocation261_spill] sm:$0xff] %v13466_v54  ;;  %v13486_v17 = vrot.slane %v4696_v15, %v11726_v13  ;;  %v13489_v60 = vrot.slane %v4728_v41, %v11726_v13 }
 0x1b5   :  { %21529 = vst [vmem:[#allocation259_spill] sm:$0xff] %v13460_v36  ;;  %21532 = vst [vmem:[#allocation262_spill] sm:$0xff] %v13469_v24  ;;  %v13474_v9 = vrot.slane %v5871_v43, %v11726_v13  ;;  %v13477_v31 = vrot.slane %v5872_v35, %v11726_v13  ;;  %v13480_v55 = vrot.slane %v5887_v44, %v11726_v13 }
 0x1b6   :  { %21528 = vst [vmem:[#allocation258_spill] sm:$0xff] %v13458_v51  ;;  %2191 = vbcast.lane.b32.xlu1 %v1246_v52, 264  ;;  %v1992_v58 = vpop.permute.xlu0 %1991  ;;  %v13483_v32 = vrot.slane %v5888_v45, %v11726_v13  ;;  %21537 = vst [vmem:[#allocation267_spill] sm:$0xff] %v13486_v17  ;;  %v21539_v43 = vcombine.high %v12430_v63, %v12430_v63  ;;  %v6287_v44 = vcombine.low %v13458_v51, %v13458_v51  ;;  %v21703_v17 = vld [vmem:[#allocation58_spill] sm:$0xff] }
 0x1b7   :  { %21533 = vst [vmem:[#allocation263_spill] sm:$0xff] %v13474_v9  ;;  %21534 = vst [vmem:[#allocation264_spill] sm:$0xff] %v13477_v31  ;;  %v5911_v52 = vcombine.low %v1985_v23, %v1992_v58  ;;  %v21541_v15 = vcombine.high %v12433_v49, %v12433_v49  ;;  %v5912_v41 = vcombine.high %v1985_v23, %v1992_v58  ;;  %v21545_v9 = vld [vmem:[#allocation57_spill] sm:$0xff] }
 0x1b8   :  { %21535 = vst [vmem:[#allocation265_spill] sm:$0xff] %v13480_v55  ;;  %21536 = vst [vmem:[#allocation266_spill] sm:$0xff] %v13483_v32  ;;  %v13495_v35 = vrot.slane %v21539_v43, %v11726_v13  ;;  %v13507_v39 = vpop.permute.xlu1 %1995  ;;  %2194 = vbcast.lane.b32.xlu0 %v13415_v33, 256  ;;  %v737_v49 = vcombine.high %v13422_v22, %v13422_v22  ;;  %v739_v23 = vcombine.high %v729_v57, %v729_v57 }
 0x1b9   :  { %21538 = vst [vmem:[#allocation268_spill] sm:$0xff] %v13489_v60  ;;  %v13505_v6 = vrot.slane %v21541_v15, %v11726_v13  ;;  %21543 = vst [vmem:[#allocation271_spill] sm:$0xff] %v13507_v39  ;;  %v692_v58 = vcombine.high %v13340_v38, %v13340_v38  ;;  %v5919_v15 = vrot.slane %v5911_v52, %v11711_v56 }
 0x1ba   :  { %21540 = vst [vmem:[#allocation269_spill] sm:$0xff] %v13495_v35  ;;  %2198 = vbcast.lane.b32.xlu1 %v13415_v33, 264  ;;  %v1999_v63 = vpop.permute.xlu0 %1998  ;;  %v13531_v54 = vrot.slane %v6255_v11, %v11726_v13  ;;  %v13534_v55 = vrot.slane %v6287_v44, %v11726_v13  ;;  %v21548_v38 = vcombine.high %v12511_v42, %v12511_v42 }
 0x1bb   :  { %21542 = vst [vmem:[#allocation270_spill] sm:$0xff] %v13505_v6  ;;  %v21550_v52 = vcombine.high %v12540_v7, %v12540_v7  ;;  %v5926_v51 = vrot.slane %v5912_v41, %v11711_v56  ;;  %v1258_v11 = vrot.slane %v13422_v22, %v11634_v8  ;;  %v1262_v44 = vrot.slane %v729_v57, %v11634_v8 }
 0x1bc   :  { %21546 = vst [vmem:[#allocation65_spill] sm:$0xff] %v13531_v54  ;;  %21547 = vst [vmem:[#allocation57_spill] sm:$0xff] %v13534_v55  ;;  %v13540_v33 = vrot.slane %v21548_v38, %v11726_v13  ;;  %v13549_v43 = vpop.permute.xlu1 %2002  ;;  %2201 = vbcast.lane.b32.xlu0 %v13418_v59, 256  ;;  %v4800_v38 = vcombine.high %v12712_v26, %v12712_v26  ;;  %v13560_v7 = vrot.slane %v737_v49, %v11634_v8 }
 0x1bd   :  { %v13546_v45 = vrot.slane %v21550_v52, %v11726_v13  ;;  %21552 = vst [vmem:[#allocation274_spill] sm:$0xff] %v13549_v43  ;;  %v13563_v41 = vrot.slane %v739_v23, %v11634_v8  ;;  %v706_v52 = vrot.slane %v692_v58, %v11630_v5  ;;  %v4832_v32 = vcombine.high %v12743_v14, %v12743_v14 }
 0x1be   :  { %21549 = vst [vmem:[#allocation272_spill] sm:$0xff] %v13540_v33  ;;  %v5943_v22 = vcombine.low %v5919_v15, %v5919_v15  ;;  %v5944_v24 = vcombine.high %v5919_v15, %v5919_v15  ;;  %v6327_v57 = vcombine.low %v13460_v36, %v13507_v39  ;;  %2205 = vbcast.lane.b32.xlu1 %v13418_v59, 264  ;;  %v2006_v42 = vpop.permute.xlu0 %2005  ;;  %v21613_v39 = vld [vmem:[#allocation93_spill] sm:$0xff] }
 0x1bf   :  { %21551 = vst [vmem:[#allocation273_spill] sm:$0xff] %v13546_v45  ;;  %v5927_v26 = vcombine.low %v1999_v63, %v2006_v42  ;;  %v5928_v31 = vcombine.high %v1999_v63, %v2006_v42  ;;  %v5959_v58 = vcombine.low %v5926_v51, %v5926_v51  ;;  %v5960_v63 = vcombine.high %v5926_v51, %v5926_v51  ;;  %v21660_v45 = vld [vmem:[#allocation162_spill] sm:$0xff] }
 0x1c0   :  { %v13575_v18 = vpop.permute.xlu1 %2009  ;;  %2208 = vbcast.lane.b32.xlu0 %v1258_v11, 256  ;;  %v13588_v54 = vrot.slane %v6327_v57, %v11711_v56  ;;  %v708_v4 = vcombine.high %v706_v52, %v706_v52  ;;  %v13603_v14 = vrot.slane %v5943_v22, %v11726_v13  ;;  %v13609_v51 = vrot.slane %v5944_v24, %v11726_v13 }
 0x1c1   :  { %21553 = vst [vmem:[#allocation275_spill] sm:$0xff] %v13575_v18  ;;  %v5935_v42 = vrot.slane %v5927_v26, %v11711_v56  ;;  %v5942_v49 = vrot.slane %v5928_v31, %v11711_v56  ;;  %v6343_v23 = vcombine.low %v13549_v43, %v13575_v18  ;;  %v13618_v0 = vrot.slane %v5959_v58, %v11726_v13 }
 0x1c2   :  { %2212 = vbcast.lane.b32.xlu1 %v1258_v11, 264  ;;  %v2013_v55 = vpop.permute.xlu0 %2012  ;;  %v722_v11 = vrot.slane %v706_v52, %v11630_v5  ;;  %21555 = vst [vmem:[#allocation277_spill] sm:$0xff] %v13603_v14  ;;  %21557 = vst [vmem:[#allocation279_spill] sm:$0xff] %v13609_v51  ;;  %v13624_v22 = vrot.slane %v4800_v38, %v11726_v13  ;;  %v13627_v24 = vrot.slane %v4832_v32, %v11726_v13 }
 0x1c3   :  { %v5975_v26 = vcombine.low %v5935_v42, %v5935_v42  ;;  %v5976_v59 = vcombine.high %v5935_v42, %v5935_v42  ;;  %v5991_v31 = vcombine.low %v5942_v49, %v5942_v49  ;;  %v5992_v28 = vcombine.high %v5942_v49, %v5942_v49  ;;  %21560 = vst [vmem:[#allocation282_spill] sm:$0xff] %v13618_v0 }
 0x1c4   :  { %v13597_v3 = vrot.slane %v6343_v23, %v11711_v56  ;;  %v13599_v57 = vpop.permute.xlu1 %2016  ;;  %2215 = vbcast.lane.b32.xlu0 %v1262_v44, 256  ;;  %21562 = vst [vmem:[#allocation284_spill] sm:$0xff] %v13624_v22  ;;  %21563 = vst [vmem:[#allocation285_spill] sm:$0xff] %v13627_v24  ;;  %v13636_v58 = vrot.slane %v5960_v63, %v11726_v13  ;;  %v21569_v63 = vld [vmem:[#allocation73_spill] sm:$0xff]  ;;  %v736_v20 = vrot.slane %v708_v4, %v11630_v5 }
 0x1c5   :  { %21554 = vst [vmem:[#allocation276_spill] sm:$0xff] %v13599_v57  ;;  %v13606_v15 = vrot.slane %v5975_v26, %v11726_v13  ;;  %v13612_v49 = vrot.slane %v5976_v59, %v11726_v13  ;;  %v13615_v23 = vrot.slane %v5991_v31, %v11726_v13  ;;  %v13621_v52 = vrot.slane %v5992_v28, %v11726_v13 }
 0x1c6   :  { %2219 = vbcast.lane.b32.xlu1 %v1262_v44, 264  ;;  %v2020_v42 = vpop.permute.xlu0 %2019  ;;  %v6359_v59 = vcombine.low %v13588_v54, %v13588_v54  ;;  %v6391_v26 = vcombine.low %v13597_v3, %v13597_v3  ;;  %21564 = vst [vmem:[#allocation286_spill] sm:$0xff] %v13636_v58  ;;  %v3848_v44 = vcombine.high %v21567_v48, %v21566_v46 }
 0x1c7   :  { %21556 = vst [vmem:[#allocation278_spill] sm:$0xff] %v13606_v15  ;;  %21558 = vst [vmem:[#allocation280_spill] sm:$0xff] %v13612_v49  ;;  %v6015_v28 = vcombine.low %v2013_v55, %v2020_v42  ;;  %v3936_v27 = vcombine.high %v21569_v63, %v21568_v19  ;;  %v738_v29 = vcombine.high %v722_v11, %v722_v11 }
 0x1c8   :  { %21559 = vst [vmem:[#allocation281_spill] sm:$0xff] %v13615_v23  ;;  %21561 = vst [vmem:[#allocation283_spill] sm:$0xff] %v13621_v52  ;;  %v13638_v31 = vpop.permute.xlu1 %2023  ;;  %2222 = vbcast.lane.b32.xlu0 %v13560_v7, 256  ;;  %v6016_v43 = vcombine.high %v2013_v55, %v2020_v42  ;;  %v740_v4 = vcombine.high %v736_v20, %v736_v20  ;;  %v13664_v46 = vrot.slane %v6359_v59, %v11726_v13 }
 0x1c9   :  { %21565 = vst [vmem:[#allocation287_spill] sm:$0xff] %v13638_v31  ;;  %v13667_v55 = vrot.slane %v6391_v26, %v11726_v13  ;;  %v1274_v63 = vrot.slane %v722_v11, %v11634_v8  ;;  %v748_v48 = vrot.slane %v13652_v16, %v11630_v5  ;;  %v21573_v59 = vcombine.high %v21467_v21, %v21466_v30 }
 0x1ca   :  { %2226 = vbcast.lane.b32.xlu1 %v13560_v7, 264  ;;  %v2027_v32 = vpop.permute.xlu0 %2026  ;;  %21570 = vst [vmem:[#allocation69_spill] sm:$0xff] %v13664_v46  ;;  %v6023_v7 = vrot.slane %v6015_v28, %v11711_v56  ;;  %v21574_v28 = vcombine.high %v21545_v9, %v21544_v25  ;;  %v13691_v11 = vrot.slane %v3848_v44, %v11711_v56 }
 0x1cb   :  { %21571 = vst [vmem:[#allocation67_spill] sm:$0xff] %v13667_v55  ;;  %v13682_v26 = vrot.slane %v21573_v59, %v11711_v56  ;;  %v13694_v19 = vrot.slane %v3936_v27, %v11711_v56  ;;  %v6030_v37 = vrot.slane %v6016_v43, %v11711_v56  ;;  %v6431_v34 = vcombine.low %v13599_v57, %v13638_v31  ;;  %v21592_v57 = vld [vmem:[#allocation87_spill] sm:$0xff] }
 0x1cc   :  { %v13670_v42 = vpop.permute.xlu1 %2030  ;;  %2229 = vbcast.lane.b32.xlu0 %v13563_v41, 256  ;;  %v13688_v38 = vrot.slane %v21574_v28, %v11711_v56  ;;  %v1278_v21 = vrot.slane %v736_v20, %v11634_v8  ;;  %v1282_v25 = vrot.slane %v738_v29, %v11634_v8  ;;  %v13703_v44 = vrot.slane %v740_v4, %v11634_v8 }
 0x1cd   :  { %21572 = vst [vmem:[#allocation84_spill] sm:$0xff] %v13670_v42  ;;  %21575 = vst [vmem:[#allocation73_spill] sm:$0xff] %v13694_v19  ;;  %v5320_v43 = vcombine.high %v12846_v53, %v12846_v53  ;;  %v6047_v28 = vcombine.low %v6023_v7, %v6023_v7  ;;  %v756_v20 = vcombine.high %v748_v48, %v748_v48 }
 0x1ce   :  { %2233 = vbcast.lane.b32.xlu1 %v13563_v41, 264  ;;  %v2034_v30 = vpop.permute.xlu0 %2033  ;;  %v13712_v41 = vrot.slane %v748_v48, %v11630_v5  ;;  %v6048_v29 = vcombine.high %v6023_v7, %v6023_v7  ;;  %v5352_v27 = vcombine.high %v12866_v61, %v12866_v61  ;;  %v6063_v53 = vcombine.low %v6030_v37, %v6030_v37 }
 0x1cf   :  { %v6031_v9 = vcombine.low %v2027_v32, %v2034_v30  ;;  %v6032_v59 = vcombine.high %v2027_v32, %v2034_v30  ;;  %v6064_v46 = vcombine.high %v6030_v37, %v6030_v37  ;;  %v13721_v55 = vrot.slane %v6431_v34, %v11711_v56 }
 0x1d0   :  { %v13709_v12 = vpop.permute.xlu1 %2037  ;;  %2236 = vbcast.lane.b32.xlu0 %v1274_v63, 256  ;;  %v778_v23 = vrot.slane %v756_v20, %v11630_v5  ;;  %v741_v61 = vcombine.high %v13652_v16, %v13652_v16  ;;  %v13732_v34 = vrot.slane %v6047_v28, %v11726_v13  ;;  %v13756_v28 = vrot.slane %v5352_v27, %v11726_v13 }
 0x1d1   :  { %21576 = vst [vmem:[#allocation288_spill] sm:$0xff] %v13709_v12  ;;  %v6039_v32 = vrot.slane %v6031_v9, %v11711_v56  ;;  %v6046_v4 = vrot.slane %v6032_v59, %v11711_v56  ;;  %v6447_v30 = vcombine.low %v13670_v42, %v13709_v12  ;;  %21577 = vst [vmem:[#allocation289_spill] sm:$0xff] %v13721_v55  ;;  %v21591_v12 = vld [vmem:[#allocation90_spill] sm:$0xff] }
 0x1d2   :  { %2240 = vbcast.lane.b32.xlu1 %v1274_v63, 264  ;;  %v2041_v52 = vpop.permute.xlu0 %2040  ;;  %21580 = vst [vmem:[#allocation292_spill] sm:$0xff] %v13732_v34  ;;  %v13738_v63 = vrot.slane %v6048_v29, %v11726_v13  ;;  %21588 = vst [vmem:[#allocation300_spill] sm:$0xff] %v13756_v28  ;;  %v6463_v29 = vcombine.low %v13721_v55, %v13721_v55  ;;  %v3952_v31 = vcombine.high %v21592_v57, %v21591_v12  ;;  %v21797_v28 = vld [vmem:[#allocation149_spill] sm:$0xff] }
 0x1d3   :  { %v6079_v58 = vcombine.low %v6039_v32, %v6039_v32  ;;  %v6080_v48 = vcombine.high %v6039_v32, %v6039_v32  ;;  %v6095_v7 = vcombine.low %v6046_v4, %v6046_v4  ;;  %v6096_v0 = vcombine.high %v6046_v4, %v6046_v4 }
 0x1d4   :  { %v13724_v9 = vrot.slane %v6447_v30, %v11711_v56  ;;  %v13726_v59 = vpop.permute.xlu1 %2044  ;;  %2243 = vbcast.lane.b32.xlu0 %v1278_v21, 256  ;;  %21582 = vst [vmem:[#allocation294_spill] sm:$0xff] %v13738_v63  ;;  %v13747_v30 = vrot.slane %v6063_v53, %v11726_v13  ;;  %v13765_v53 = vrot.slane %v6064_v46, %v11726_v13 }
 0x1d5   :  { %21579 = vst [vmem:[#allocation291_spill] sm:$0xff] %v13726_v59  ;;  %v13735_v37 = vrot.slane %v6079_v58, %v11726_v13  ;;  %v13741_v32 = vrot.slane %v6080_v48, %v11726_v13  ;;  %v13744_v4 = vrot.slane %v6095_v7, %v11726_v13  ;;  %v13750_v16 = vrot.slane %v6096_v0, %v11726_v13 }
 0x1d6   :  { %21578 = vst [vmem:[#allocation290_spill] sm:$0xff] %v13724_v9  ;;  %2247 = vbcast.lane.b32.xlu1 %v1278_v21, 264  ;;  %v2048_v20 = vpop.permute.xlu0 %2047  ;;  %21585 = vst [vmem:[#allocation297_spill] sm:$0xff] %v13747_v30  ;;  %v13753_v58 = vrot.slane %v5320_v43, %v11726_v13  ;;  %v6495_v48 = vcombine.low %v13724_v9, %v13724_v9  ;;  %v786_v46 = vcombine.high %v13712_v41, %v13712_v41 }
 0x1d7   :  { %21581 = vst [vmem:[#allocation293_spill] sm:$0xff] %v13735_v37  ;;  %21583 = vst [vmem:[#allocation295_spill] sm:$0xff] %v13741_v32  ;;  %v6535_v0 = vcombine.low %v2041_v52, %v2048_v20  ;;  %v788_v21 = vcombine.high %v778_v23, %v778_v23  ;;  %v755_v49 = vrot.slane %v741_v61, %v11630_v5 }
 0x1d8   :  { %21584 = vst [vmem:[#allocation296_spill] sm:$0xff] %v13744_v4  ;;  %21586 = vst [vmem:[#allocation298_spill] sm:$0xff] %v13750_v16  ;;  %v13767_v7 = vpop.permute.xlu1 %2051  ;;  %2250 = vbcast.lane.b32.xlu0 %v1282_v25, 256  ;;  %v6536_v51 = vcombine.high %v2041_v52, %v2048_v20  ;;  %v13791_v61 = vrot.slane %v6463_v29, %v11726_v13  ;;  %v13794_v52 = vrot.slane %v6495_v48, %v11726_v13 }
 0x1d9   :  { %21587 = vst [vmem:[#allocation299_spill] sm:$0xff] %v13753_v58  ;;  %21589 = vst [vmem:[#allocation301_spill] sm:$0xff] %v13765_v53  ;;  %v1290_v42 = vrot.slane %v13712_v41, %v11634_v8  ;;  %v757_v43 = vcombine.high %v755_v49, %v755_v49  ;;  %v13809_v12 = vrot.slane %v3952_v31, %v11711_v56 }
 0x1da   :  { %21590 = vst [vmem:[#allocation302_spill] sm:$0xff] %v13767_v7  ;;  %2254 = vbcast.lane.b32.xlu1 %v1282_v25, 264  ;;  %v2055_v18 = vpop.permute.xlu0 %2054  ;;  %21593 = vst [vmem:[#allocation90_spill] sm:$0xff] %v13791_v61  ;;  %v6543_v25 = vrot.slane %v6535_v0, %v11711_v56  ;;  %v1294_v0 = vrot.slane %v778_v23, %v11634_v8  ;;  %v6550_v57 = vrot.slane %v6536_v51, %v11711_v56 }
 0x1db   :  { %21594 = vst [vmem:[#allocation87_spill] sm:$0xff] %v13794_v52  ;;  %21596 = vst [vmem:[#allocation304_spill] sm:$0xff] %v13809_v12  ;;  %v6951_v41 = vcombine.low %v13726_v59, %v13767_v7  ;;  %v1298_v27 = vrot.slane %v786_v46, %v11634_v8  ;;  %v13818_v29 = vrot.slane %v788_v21, %v11634_v8 }
 0x1dc   :  { %v13797_v20 = vpop.permute.xlu1 %2058  ;;  %2257 = vbcast.lane.b32.xlu0 %v13703_v44, 256  ;;  %v5424_v48 = vcombine.high %v12956_v40, %v12956_v40  ;;  %v5456_v51 = vcombine.high %v12987_v50, %v12987_v50  ;;  %v6567_v35 = vcombine.low %v6543_v25, %v6543_v25  ;;  %v785_v21 = vrot.slane %v757_v43, %v11630_v5 }
 0x1dd   :  { %21595 = vst [vmem:[#allocation303_spill] sm:$0xff] %v13797_v20  ;;  %v6568_v46 = vcombine.high %v6543_v25, %v6543_v25  ;;  %v6583_v23 = vcombine.low %v6550_v57, %v6550_v57  ;;  %v6584_v50 = vcombine.high %v6550_v57, %v6550_v57  ;;  %v13837_v61 = vrot.slane %v6951_v41, %v11711_v56 }
 0x1de   :  { %2261 = vbcast.lane.b32.xlu1 %v13703_v44, 264  ;;  %v2062_v16 = vpop.permute.xlu0 %2061  ;;  %v771_v44 = vrot.slane %v755_v49, %v11630_v5  ;;  %v13847_v41 = vrot.slane %v6567_v35, %v11726_v13  ;;  %v1310_v36 = vrot.slane %v785_v21, %v11634_v8 }
 0x1df   :  { %v6551_v31 = vcombine.low %v2055_v18, %v2062_v16  ;;  %v6552_v6 = vcombine.high %v2055_v18, %v2062_v16  ;;  %v13834_v16 = vld [vmem:[#allocation2 + $0x78] sm:$0xff]  ;;  %21598 = vst [vmem:[#allocation306_spill] sm:$0xff] %v13837_v61  ;;  %v13862_v7 = vrot.slane %v6583_v23, %v11726_v13  ;;  %v13880_v23 = vrot.slane %v6584_v50, %v11726_v13  ;;  %v21618_v50 = vld [vmem:[#allocation156_spill] sm:$0xff] }
 0x1e0   :  { %v13826_v53 = vpop.permute.xlu1 %2065  ;;  %2264 = vbcast.lane.b32.xlu0 %v1290_v42, 256  ;;  %v787_v49 = vcombine.high %v771_v44, %v771_v44  ;;  %v797_v57 = vrot.slane %v13834_v16, %v11630_v5  ;;  %21601 = vst [vmem:[#allocation309_spill] sm:$0xff] %v13847_v41  ;;  %v1306_v37 = vrot.slane %v771_v44, %v11634_v8 }
 0x1e1   :  { %21597 = vst [vmem:[#allocation305_spill] sm:$0xff] %v13826_v53  ;;  %v6559_v30 = vrot.slane %v6551_v31, %v11711_v56  ;;  %v6566_v40 = vrot.slane %v6552_v6, %v11711_v56  ;;  %v6967_v18 = vcombine.low %v13797_v20, %v13826_v53  ;;  %v789_v20 = vcombine.high %v785_v21, %v785_v21 }
 0x1e2   :  { %2268 = vbcast.lane.b32.xlu1 %v1290_v42, 264  ;;  %v2069_v52 = vpop.permute.xlu0 %2068  ;;  %21606 = vst [vmem:[#allocation314_spill] sm:$0xff] %v13862_v7  ;;  %21610 = vst [vmem:[#allocation318_spill] sm:$0xff] %v13880_v23  ;;  %v13903_v7 = vrot.slane %v787_v49, %v11634_v8  ;;  %v21619_v49 = vcombine.low %v21618_v50, %v21618_v50 }
 0x1e3   :  { %v6599_v4 = vcombine.low %v6559_v30, %v6559_v30  ;;  %v6600_v43 = vcombine.high %v6559_v30, %v6559_v30  ;;  %v6615_v25 = vcombine.low %v6566_v40, %v6566_v40  ;;  %v6616_v59 = vcombine.high %v6566_v40, %v6566_v40 }
 0x1e4   :  { %v13840_v31 = vrot.slane %v6967_v18, %v11711_v56  ;;  %v13842_v6 = vpop.permute.xlu1 %2072  ;;  %2271 = vbcast.lane.b32.xlu0 %v1294_v0, 256  ;;  %v13853_v30 = vrot.slane %v6568_v46, %v11726_v13  ;;  %v13871_v46 = vrot.slane %v5456_v51, %v11726_v13  ;;  %v13918_v21 = vrot.slane %v789_v20, %v11634_v8 }
 0x1e5   :  { %21600 = vst [vmem:[#allocation308_spill] sm:$0xff] %v13842_v6  ;;  %v13850_v42 = vrot.slane %v6599_v4, %v11726_v13  ;;  %v13856_v40 = vrot.slane %v6600_v43, %v11726_v13  ;;  %v13859_v18 = vrot.slane %v6615_v25, %v11726_v13  ;;  %v13865_v35 = vrot.slane %v6616_v59, %v11726_v13 }
 0x1e6   :  { %21599 = vst [vmem:[#allocation307_spill] sm:$0xff] %v13840_v31  ;;  %21603 = vst [vmem:[#allocation311_spill] sm:$0xff] %v13853_v30  ;;  %2275 = vbcast.lane.b32.xlu1 %v1294_v0, 264  ;;  %v2076_v53 = vpop.permute.xlu0 %2075  ;;  %v13868_v4 = vrot.slane %v5424_v48, %v11726_v13  ;;  %v6983_v43 = vcombine.low %v13837_v61, %v13837_v61  ;;  %v7015_v25 = vcombine.low %v13840_v31, %v13840_v31  ;;  %v21612_v0 = vld [vmem:[#allocation102_spill] sm:$0xff] }
 0x1e7   :  { %21602 = vst [vmem:[#allocation310_spill] sm:$0xff] %v13850_v42  ;;  %21604 = vst [vmem:[#allocation312_spill] sm:$0xff] %v13856_v40  ;;  %v6639_v59 = vcombine.low %v2069_v52, %v2076_v53  ;;  %v6640_v31 = vcombine.high %v2069_v52, %v2076_v53  ;;  %v805_v61 = vcombine.high %v797_v57, %v797_v57  ;;  %v21628_v30 = vld [vmem:[#allocation154_spill] sm:$0xff] }
 0x1e8   :  { %21605 = vst [vmem:[#allocation313_spill] sm:$0xff] %v13859_v18  ;;  %21607 = vst [vmem:[#allocation315_spill] sm:$0xff] %v13865_v35  ;;  %v13882_v32 = vpop.permute.xlu1 %2079  ;;  %2278 = vbcast.lane.b32.xlu0 %v1298_v27, 256  ;;  %v13906_v53 = vrot.slane %v6983_v43, %v11726_v13  ;;  %v5528_v52 = vcombine.high %v13093_v2, %v13093_v2  ;;  %v21617_v43 = vld [vmem:[#allocation214_spill] sm:$0xff]  ;;  %v813_v48 = vrot.slane %v797_v57, %v11630_v5 }
 0x1e9   :  { %21608 = vst [vmem:[#allocation316_spill] sm:$0xff] %v13868_v4  ;;  %21609 = vst [vmem:[#allocation317_spill] sm:$0xff] %v13871_v46  ;;  %v6647_v44 = vrot.slane %v6639_v59, %v11711_v56  ;;  %v5560_v63 = vcombine.high %v21617_v43, %v21617_v43  ;;  %v13927_v2 = vrot.slane %v805_v61, %v11630_v5  ;;  %v21621_v43 = vld [vmem:[#allocation175_spill] sm:$0xff]  ;;  %v21624_v61 = vld [vmem:[#allocation181_spill] sm:$0xff] }
 0x1ea   :  { %21611 = vst [vmem:[#allocation319_spill] sm:$0xff] %v13882_v32  ;;  %2282 = vbcast.lane.b32.xlu1 %v1298_v27, 264  ;;  %v2083_v34 = vpop.permute.xlu0 %2082  ;;  %21614 = vst [vmem:[#allocation102_spill] sm:$0xff] %v13906_v53  ;;  %v13909_v27 = vrot.slane %v7015_v25, %v11726_v13  ;;  %v6654_v25 = vrot.slane %v6640_v31, %v11711_v56  ;;  %v7055_v59 = vcombine.low %v13842_v6, %v13882_v32  ;;  %v21840_v46 = vld [vmem:[#allocation278_spill] sm:$0xff]  ;;  %v21841_v4 = vld [vmem:[#allocation277_spill] sm:$0xff] }
 0x1eb   :  { %v13936_v1 = vrot.slane %v21619_v49, %v11726_v13  ;;  %v21622_v31 = vcombine.low %v21621_v43, %v21621_v43  ;;  %v21625_v10 = vcombine.low %v21624_v61, %v21624_v61  ;;  %v835_v18 = vcombine.high %v813_v48, %v813_v48 }
 0x1ec   :  { %21615 = vst [vmem:[#allocation93_spill] sm:$0xff] %v13909_v27  ;;  %v13914_v51 = vpop.permute.xlu1 %2086  ;;  %2285 = vbcast.lane.b32.xlu0 %v13818_v29, 256  ;;  %v6671_v49 = vcombine.low %v6647_v44, %v6647_v44  ;;  %v6672_v32 = vcombine.high %v6647_v44, %v6647_v44  ;;  %v21629_v41 = vcombine.low %v21628_v30, %v21628_v30 }
 0x1ed   :  { %21616 = vst [vmem:[#allocation320_spill] sm:$0xff] %v13914_v51  ;;  %21620 = vst [vmem:[#allocation214_spill] sm:$0xff] %v13936_v1  ;;  %v13942_v57 = vrot.slane %v21622_v31, %v11726_v13  ;;  %v13948_v35 = vrot.slane %v21625_v10, %v11726_v13  ;;  %v837_v31 = vcombine.high %v13927_v2, %v13927_v2 }
 0x1ee   :  { %2289 = vbcast.lane.b32.xlu1 %v13818_v29, 264  ;;  %v2090_v20 = vpop.permute.xlu0 %2089  ;;  %v13960_v10 = vrot.slane %v21629_v41, %v11726_v13  ;;  %v6687_v42 = vcombine.low %v6654_v25, %v6654_v25  ;;  %v6688_v6 = vcombine.high %v6654_v25, %v6654_v25  ;;  %v13967_v53 = vrot.slane %v7055_v59, %v11711_v56 }
 0x1ef   :  { %21623 = vst [vmem:[#allocation156_spill] sm:$0xff] %v13942_v57  ;;  %21626 = vst [vmem:[#allocation175_spill] sm:$0xff] %v13948_v35  ;;  %v6655_v29 = vcombine.low %v2083_v34, %v2090_v20  ;;  %v6656_v23 = vcombine.high %v2083_v34, %v2090_v20  ;;  %v13981_v25 = vrot.slane %v6671_v49, %v11726_v13  ;;  %v21645_v35 = vld [vmem:[#allocation109_spill] sm:$0xff] }
 0x1f0   :  { %v13952_v40 = vpop.permute.xlu1 %2093  ;;  %2292 = vbcast.lane.b32.xlu0 %v1306_v37, 256  ;;  %21630 = vst [vmem:[#allocation154_spill] sm:$0xff] %v13960_v10  ;;  %21631 = vst [vmem:[#allocation321_spill] sm:$0xff] %v13967_v53  ;;  %v13984_v59 = vrot.slane %v6672_v32, %v11726_v13  ;;  %v13999_v49 = vrot.slane %v6688_v6, %v11726_v13  ;;  %v21646_v10 = vld [vmem:[#allocation104_spill] sm:$0xff] }
 0x1f1   :  { %21627 = vst [vmem:[#allocation181_spill] sm:$0xff] %v13952_v40  ;;  %v6663_v34 = vrot.slane %v6655_v29, %v11711_v56  ;;  %v6670_v20 = vrot.slane %v6656_v23, %v11711_v56  ;;  %v7071_v44 = vcombine.low %v13914_v51, %v13952_v40  ;;  %21634 = vst [vmem:[#allocation324_spill] sm:$0xff] %v13981_v25 }
 0x1f2   :  { %2296 = vbcast.lane.b32.xlu1 %v1306_v37, 264  ;;  %v2097_v27 = vpop.permute.xlu0 %2096  ;;  %v790_v37 = vcombine.high %v13834_v16, %v13834_v16  ;;  %21635 = vst [vmem:[#allocation325_spill] sm:$0xff] %v13984_v59  ;;  %21640 = vst [vmem:[#allocation330_spill] sm:$0xff] %v13999_v49  ;;  %v1322_v40 = vrot.slane %v813_v48, %v11634_v8 }
 0x1f3   :  { %v6703_v14 = vcombine.low %v6663_v34, %v6663_v34  ;;  %v6704_v15 = vcombine.high %v6663_v34, %v6663_v34  ;;  %v6719_v29 = vcombine.low %v6670_v20, %v6670_v20  ;;  %v6720_v55 = vcombine.high %v6670_v20, %v6670_v20 }
 0x1f4   :  { %v13974_v23 = vrot.slane %v7071_v44, %v11711_v56  ;;  %v13976_v51 = vpop.permute.xlu1 %2100  ;;  %2299 = vbcast.lane.b32.xlu0 %v1310_v36, 256  ;;  %v13993_v20 = vrot.slane %v6687_v42, %v11726_v13  ;;  %v7087_v42 = vcombine.low %v13967_v53, %v13967_v53 }
 0x1f5   :  { %21633 = vst [vmem:[#allocation323_spill] sm:$0xff] %v13976_v51  ;;  %v13987_v41 = vrot.slane %v6703_v14, %v11726_v13  ;;  %v13990_v34 = vrot.slane %v6704_v15, %v11726_v13  ;;  %v13996_v44 = vrot.slane %v6719_v29, %v11726_v13  ;;  %v14002_v32 = vrot.slane %v6720_v55, %v11726_v13 }
 0x1f6   :  { %21632 = vst [vmem:[#allocation322_spill] sm:$0xff] %v13974_v23  ;;  %21638 = vst [vmem:[#allocation328_spill] sm:$0xff] %v13993_v20  ;;  %2303 = vbcast.lane.b32.xlu1 %v1310_v36, 264  ;;  %v2104_v16 = vpop.permute.xlu0 %2103  ;;  %v14005_v14 = vrot.slane %v5528_v52, %v11726_v13  ;;  %v14008_v15 = vrot.slane %v5560_v63, %v11726_v13  ;;  %v7119_v29 = vcombine.low %v13974_v23, %v13974_v23 }
 0x1f7   :  { %21636 = vst [vmem:[#allocation326_spill] sm:$0xff] %v13987_v41  ;;  %21637 = vst [vmem:[#allocation327_spill] sm:$0xff] %v13990_v34  ;;  %v6743_v36 = vcombine.low %v2097_v27, %v2104_v16  ;;  %v6744_v9 = vcombine.high %v2097_v27, %v2104_v16  ;;  %v1326_v27 = vrot.slane %v13927_v2, %v11634_v8 }
 0x1f8   :  { %21639 = vst [vmem:[#allocation329_spill] sm:$0xff] %v13996_v44  ;;  %21641 = vst [vmem:[#allocation331_spill] sm:$0xff] %v14002_v32  ;;  %v14016_v57 = vpop.permute.xlu1 %2107  ;;  %2306 = vbcast.lane.b32.xlu0 %v13903_v7, 256  ;;  %v14031_v16 = vrot.slane %v835_v18, %v11634_v8  ;;  %v14035_v55 = vrot.slane %v837_v31, %v11634_v8  ;;  %v14044_v2 = vrot.slane %v790_v37, %v11630_v5  ;;  %v21649_v31 = vld [vmem:[#allocation204_spill] sm:$0xff] }
 0x1f9   :  { %21642 = vst [vmem:[#allocation332_spill] sm:$0xff] %v14005_v14  ;;  %21643 = vst [vmem:[#allocation333_spill] sm:$0xff] %v14008_v15  ;;  %v14047_v18 = vrot.slane %v7087_v42, %v11726_v13  ;;  %v21650_v1 = vcombine.low %v21649_v31, %v21649_v31  ;;  %v6751_v63 = vrot.slane %v6743_v36, %v11711_v56  ;;  %v21653_v42 = vld [vmem:[#allocation44_spill] sm:$0xff] }
 0x1fa   :  { %21644 = vst [vmem:[#allocation334_spill] sm:$0xff] %v14016_v57  ;;  %2310 = vbcast.lane.b32.xlu1 %v13903_v7, 264  ;;  %v2111_v6 = vpop.permute.xlu0 %2110  ;;  %v14050_v7 = vrot.slane %v7119_v29, %v11726_v13  ;;  %v6758_v32 = vrot.slane %v6744_v9, %v11711_v56  ;;  %v21654_v29 = vcombine.low %v21653_v42, %v21653_v42 }
 0x1fb   :  { %21647 = vst [vmem:[#allocation109_spill] sm:$0xff] %v14047_v18  ;;  %v14056_v52 = vrot.slane %v21650_v1, %v11726_v13  ;;  %v5632_v1 = vcombine.high %v13196_v47, %v13196_v47  ;;  %v21656_v9 = vcombine.low %v13688_v38, %v13688_v38  ;;  %v21658_v20 = vcombine.low %v13691_v11, %v13691_v11  ;;  %v21704_v18 = vld [vmem:[#allocation60_spill] sm:$0xff] }
 0x1fc   :  { %21648 = vst [vmem:[#allocation104_spill] sm:$0xff] %v14050_v7  ;;  %v14060_v48 = vpop.permute.xlu1 %2114  ;;  %2313 = vbcast.lane.b32.xlu0 %v13918_v21, 256  ;;  %v14069_v49 = vrot.slane %v21654_v29, %v11726_v13  ;;  %v21661_v29 = vcombine.low %v21660_v45, %v21660_v45  ;;  %v7159_v47 = vcombine.low %v13976_v51, %v14016_v57 }
 0x1fd   :  { %21651 = vst [vmem:[#allocation204_spill] sm:$0xff] %v14056_v52  ;;  %21652 = vst [vmem:[#allocation335_spill] sm:$0xff] %v14060_v48  ;;  %v14077_v36 = vrot.slane %v21656_v9, %v11726_v13  ;;  %v14083_v37 = vrot.slane %v21658_v20, %v11726_v13  ;;  %v21663_v9 = vld [vmem:[#allocation174_spill] sm:$0xff]  ;;  %v21666_v20 = vld [vmem:[#allocation193_spill] sm:$0xff]  ;;  %v6776_v25 = vcombine.high %v6751_v63, %v6751_v63 }
 0x1fe   :  { %21655 = vst [vmem:[#allocation336_spill] sm:$0xff] %v14069_v49  ;;  %v14089_v33 = vrot.slane %v21661_v29, %v11726_v13  ;;  %2317 = vbcast.lane.b32.xlu1 %v13918_v21, 264  ;;  %v2118_v44 = vpop.permute.xlu0 %2117  ;;  %v21664_v34 = vcombine.low %v21663_v9, %v21663_v9  ;;  %v21667_v23 = vcombine.low %v21666_v20, %v21666_v20  ;;  %v21669_v29 = vld [vmem:[#allocation195_spill] sm:$0xff]  ;;  %v21672_v21 = vld [vmem:[#allocation224_spill] sm:$0xff] }
 0x1ff   :  { %21657 = vst [vmem:[#allocation337_spill] sm:$0xff] %v14077_v36  ;;  %21659 = vst [vmem:[#allocation338_spill] sm:$0xff] %v14083_v37  ;;  %v21670_v45 = vcombine.low %v21669_v29, %v21669_v29  ;;  %v5664_v57 = vcombine.high %v21672_v21, %v21672_v21  ;;  %v6759_v14 = vcombine.low %v2111_v6, %v2118_v44 }
 0x200   :  { %21662 = vst [vmem:[#allocation339_spill] sm:$0xff] %v14089_v33  ;;  %v14098_v59 = vrot.slane %v21664_v34, %v11726_v13  ;;  %v14104_v53 = vrot.slane %v21667_v23, %v11726_v13  ;;  %v6760_v15 = vcombine.high %v2111_v6, %v2118_v44  ;;  %v6775_v9 = vcombine.low %v6751_v63, %v6751_v63  ;;  %v14116_v20 = vpop.permute.xlu1 %2121 }
 0x201   :  { %v14110_v51 = vrot.slane %v21670_v45, %v11726_v13  ;;  %v6791_v41 = vcombine.low %v6758_v32, %v6758_v32  ;;  %21673 = vst [vmem:[#allocation224_spill] sm:$0xff] %v14116_v20  ;;  %2320 = vbcast.lane.b32.xlu0 %v1322_v40, 256  ;;  %v6792_v29 = vcombine.high %v6758_v32, %v6758_v32 }
 0x202   :  { %21665 = vst [vmem:[#allocation340_spill] sm:$0xff] %v14098_v59  ;;  %21668 = vst [vmem:[#allocation341_spill] sm:$0xff] %v14104_v53  ;;  %v6767_v45 = vrot.slane %v6759_v14, %v11711_v56  ;;  %v6774_v42 = vrot.slane %v6760_v15, %v11711_v56  ;;  %v7175_v44 = vcombine.low %v14060_v48, %v14116_v20  ;;  %2324 = vbcast.lane.b32.xlu1 %v1322_v40, 264  ;;  %v2125_v63 = vpop.permute.xlu0 %2124 }
 0x203   :  { %21671 = vst [vmem:[#allocation342_spill] sm:$0xff] %v14110_v51  ;;  %v14125_v6 = vrot.slane %v7159_v47, %v11711_v56  ;;  %v14140_v40 = vrot.slane %v14044_v2, %v11630_v5  ;;  %v806_v34 = vcombine.high %v14044_v2, %v14044_v2  ;;  %v14145_v21 = vrot.slane %v6775_v9, %v11726_v13 }
 0x204   :  { %v6807_v14 = vcombine.low %v6767_v45, %v6767_v45  ;;  %v6808_v23 = vcombine.high %v6767_v45, %v6767_v45  ;;  %v6823_v15 = vcombine.low %v6774_v42, %v6774_v42  ;;  %v6824_v52 = vcombine.high %v6774_v42, %v6774_v42  ;;  %v14136_v47 = vpop.permute.xlu1 %2128 }
 0x205   :  { %21674 = vst [vmem:[#allocation343_spill] sm:$0xff] %v14125_v6  ;;  %v14134_v49 = vrot.slane %v7175_v44, %v11711_v56  ;;  %21676 = vst [vmem:[#allocation345_spill] sm:$0xff] %v14136_v47  ;;  %2327 = vbcast.lane.b32.xlu0 %v1326_v27, 256  ;;  %v14151_v42 = vrot.slane %v6776_v25, %v11726_v13  ;;  %v14160_v51 = vrot.slane %v6791_v41, %v11726_v13 }
 0x206   :  { %21677 = vst [vmem:[#allocation346_spill] sm:$0xff] %v14145_v21  ;;  %v14148_v45 = vrot.slane %v6807_v14, %v11726_v13  ;;  %v14154_v44 = vrot.slane %v6808_v23, %v11726_v13  ;;  %v14157_v32 = vrot.slane %v6823_v15, %v11726_v13  ;;  %2331 = vbcast.lane.b32.xlu1 %v1326_v27, 264  ;;  %v2132_v53 = vpop.permute.xlu0 %2131 }
 0x207   :  { %21675 = vst [vmem:[#allocation344_spill] sm:$0xff] %v14134_v49  ;;  %21679 = vst [vmem:[#allocation348_spill] sm:$0xff] %v14151_v42  ;;  %v14163_v2 = vrot.slane %v6824_v52, %v11726_v13  ;;  %v14166_v9 = vrot.slane %v5632_v1, %v11726_v13  ;;  %v14169_v25 = vrot.slane %v5664_v57, %v11726_v13 }
 0x208   :  { %21678 = vst [vmem:[#allocation347_spill] sm:$0xff] %v14148_v45  ;;  %21680 = vst [vmem:[#allocation349_spill] sm:$0xff] %v14154_v44  ;;  %v7191_v23 = vcombine.low %v14125_v6, %v14125_v6  ;;  %v7223_v14 = vcombine.low %v14134_v49, %v14134_v49  ;;  %v14178_v41 = vrot.slane %v6792_v29, %v11726_v13  ;;  %v14180_v15 = vpop.permute.xlu1 %2135  ;;  %v21727_v44 = vld [vmem:[#allocation96_spill] sm:$0xff]  ;;  %v21756_v6 = vld [vmem:[#allocation146_spill] sm:$0xff] }
 0x209   :  { %21681 = vst [vmem:[#allocation350_spill] sm:$0xff] %v14157_v32  ;;  %21682 = vst [vmem:[#allocation351_spill] sm:$0xff] %v14160_v51  ;;  %v6847_v52 = vcombine.low %v2125_v63, %v2132_v53  ;;  %2334 = vbcast.lane.b32.xlu0 %v14031_v16, 256  ;;  %v21688_v27 = vcombine.high %v21613_v39, %v21612_v0  ;;  %v21689_v59 = vcombine.high %v21646_v10, %v21645_v35  ;;  %v21701_v39 = vld [vmem:[#allocation121_spill] sm:$0xff] }
 0x20a   :  { %21683 = vst [vmem:[#allocation352_spill] sm:$0xff] %v14163_v2  ;;  %21684 = vst [vmem:[#allocation353_spill] sm:$0xff] %v14166_v9  ;;  %v1338_v57 = vrot.slane %v14140_v40, %v11634_v8  ;;  %v834_v1 = vrot.slane %v806_v34, %v11630_v5  ;;  %v6848_v37 = vcombine.high %v2125_v63, %v2132_v53  ;;  %2338 = vbcast.lane.b32.xlu1 %v14031_v16, 264  ;;  %v2139_v33 = vpop.permute.xlu0 %2138 }
 0x20b   :  { %21685 = vst [vmem:[#allocation354_spill] sm:$0xff] %v14169_v25  ;;  %21686 = vst [vmem:[#allocation355_spill] sm:$0xff] %v14178_v41  ;;  %v14193_v29 = vrot.slane %v21688_v27, %v11711_v56  ;;  %v14199_v36 = vrot.slane %v21689_v59, %v11711_v56  ;;  %v14212_v10 = vrot.slane %v7191_v23, %v11726_v13  ;;  %v21702_v23 = vld [vmem:[#allocation112_spill] sm:$0xff] }
 0x20c   :  { %21687 = vst [vmem:[#allocation356_spill] sm:$0xff] %v14180_v15  ;;  %v14215_v59 = vrot.slane %v7223_v14, %v11726_v13  ;;  %v21692_v5 = vcombine.low %v13137_v62, %v13137_v62  ;;  %v21694_v16 = vcombine.low %v13682_v26, %v13682_v26  ;;  %v6855_v63 = vrot.slane %v6847_v52, %v11711_v56  ;;  %v14230_v27 = vpop.permute.xlu1 %2142 }
 0x20d   :  { %21690 = vst [vmem:[#allocation357_spill] sm:$0xff] %v14212_v10  ;;  %21696 = vst [vmem:[#allocation361_spill] sm:$0xff] %v14230_v27  ;;  %2341 = vbcast.lane.b32.xlu0 %v14035_v55, 256  ;;  %v21697_v14 = vcombine.low %v13694_v19, %v13694_v19  ;;  %v4560_v60 = vcombine.high %v21702_v23, %v21701_v39  ;;  %v7263_v2 = vcombine.low %v14136_v47, %v14180_v15  ;;  %v21705_v23 = vld [vmem:[#allocation234_spill] sm:$0xff]  ;;  %v21707_v39 = vld [vmem:[#allocation235_spill] sm:$0xff] }
 0x20e   :  { %21691 = vst [vmem:[#allocation358_spill] sm:$0xff] %v14215_v59  ;;  %v14221_v53 = vrot.slane %v21692_v5, %v11726_v13  ;;  %v14227_v34 = vrot.slane %v21694_v16, %v11726_v13  ;;  %v21699_v16 = vcombine.low %v13809_v12, %v13809_v12  ;;  %2345 = vbcast.lane.b32.xlu1 %v14035_v55, 264 }
 0x20f   :  { %v14239_v5 = vrot.slane %v21697_v14, %v11726_v13  ;;  %v6862_v14 = vrot.slane %v6848_v37, %v11711_v56  ;;  %v1342_v41 = vrot.slane %v834_v1, %v11634_v8  ;;  %v836_v52 = vcombine.high %v14140_v40, %v14140_v40 }
 0x210   :  { %21693 = vst [vmem:[#allocation359_spill] sm:$0xff] %v14221_v53  ;;  %21695 = vst [vmem:[#allocation360_spill] sm:$0xff] %v14227_v34  ;;  %v14245_v35 = vrot.slane %v21699_v16, %v11726_v13  ;;  %v2146_v16 = vpop.permute.xlu0 %2145  ;;  %v838_v32 = vcombine.high %v834_v1, %v834_v1  ;;  %v6152_v37 = vcombine.high %v21705_v23, %v21705_v23  ;;  %v14266_v48 = vpop.permute.xlu1 %2149 }
 0x211   :  { %21698 = vst [vmem:[#allocation362_spill] sm:$0xff] %v14239_v5  ;;  %v6863_v0 = vcombine.low %v2139_v33, %v2146_v16  ;;  %v6864_v51 = vcombine.high %v2139_v33, %v2146_v16  ;;  %v6879_v7 = vcombine.low %v6855_v63, %v6855_v63  ;;  %21706 = vst [vmem:[#allocation121_spill] sm:$0xff] %v14266_v48  ;;  %2348 = vbcast.lane.b32.xlu0 %v1338_v57, 256 }
 0x212   :  { %21700 = vst [vmem:[#allocation363_spill] sm:$0xff] %v14245_v35  ;;  %v6880_v40 = vcombine.high %v6855_v63, %v6855_v63  ;;  %v7279_v16 = vcombine.low %v14230_v27, %v14266_v48  ;;  %v6184_v23 = vcombine.high %v21707_v39, %v21707_v39  ;;  %v6895_v10 = vcombine.low %v6862_v14, %v6862_v14  ;;  %v21710_v35 = vld [vmem:[#allocation124_spill] sm:$0xff] }
 0x213   :  { %v6871_v33 = vrot.slane %v6863_v0, %v11711_v56  ;;  %v6878_v1 = vrot.slane %v6864_v51, %v11711_v56  ;;  %v6896_v59 = vcombine.high %v6862_v14, %v6862_v14  ;;  %v14279_v15 = vrot.slane %v7263_v2, %v11711_v56  ;;  %2352 = vbcast.lane.b32.xlu1 %v1338_v57, 264  ;;  %v21709_v0 = vld [vmem:[#allocation126_spill] sm:$0xff] }
 0x214   :  { %v2153_v55 = vpop.permute.xlu0 %2152  ;;  %v4576_v51 = vcombine.high %v21710_v35, %v21709_v0  ;;  %v14284_v34 = vrot.slane %v7279_v16, %v11711_v56  ;;  %v14286_v27 = vpop.permute.xlu1 %2156  ;;  %v1346_v14 = vrot.slane %v836_v52, %v11634_v8  ;;  %v1350_v2 = vrot.slane %v838_v32, %v11634_v8 }
 0x215   :  { %21708 = vst [vmem:[#allocation112_spill] sm:$0xff] %v14279_v15  ;;  %v6911_v53 = vcombine.low %v6871_v33, %v6871_v33  ;;  %v6912_v47 = vcombine.high %v6871_v33, %v6871_v33  ;;  %v6927_v63 = vcombine.low %v6878_v1, %v6878_v1  ;;  %v6928_v5 = vcombine.high %v6878_v1, %v6878_v1 }
 0x216   :  { %21711 = vst [vmem:[#allocation234_spill] sm:$0xff] %v14284_v34  ;;  %21712 = vst [vmem:[#allocation235_spill] sm:$0xff] %v14286_v27  ;;  %2355 = vbcast.lane.b32.xlu0 %v1342_v41, 256  ;;  %v14291_v57 = vrot.slane %v6879_v7, %v11726_v13  ;;  %v14297_v33 = vrot.slane %v6880_v40, %v11726_v13  ;;  %v14303_v16 = vrot.slane %v6895_v10, %v11726_v13 }
 0x217   :  { %v14294_v39 = vrot.slane %v6911_v53, %v11726_v13  ;;  %v14300_v35 = vrot.slane %v6912_v47, %v11726_v13  ;;  %2359 = vbcast.lane.b32.xlu1 %v1342_v41, 264  ;;  %v14306_v52 = vrot.slane %v6927_v63, %v11726_v13  ;;  %v14309_v8 = vrot.slane %v6896_v59, %v11726_v13 }
 0x218   :  { %21713 = vst [vmem:[#allocation126_spill] sm:$0xff] %v14291_v57  ;;  %21715 = vst [vmem:[#allocation364_spill] sm:$0xff] %v14297_v33  ;;  %v2160_v1 = vpop.permute.xlu0 %2159  ;;  %v14312_v7 = vrot.slane %v6928_v5, %v11726_v13  ;;  %v7295_v32 = vcombine.low %v14279_v15, %v14279_v15  ;;  %v7327_v47 = vcombine.low %v14284_v34, %v14284_v34  ;;  %v14324_v40 = vpop.permute.xlu1 %2163  ;;  %v21735_v33 = vld [vmem:[#allocation139_spill] sm:$0xff] }
 0x219   :  { %21714 = vst [vmem:[#allocation124_spill] sm:$0xff] %v14294_v39  ;;  %21716 = vst [vmem:[#allocation365_spill] sm:$0xff] %v14300_v35  ;;  %v14319_v41 = vrot.slane %v6152_v37, %v11726_v13  ;;  %v14322_v10 = vrot.slane %v6184_v23, %v11726_v13  ;;  %v7367_v53 = vcombine.low %v2153_v55, %v2160_v1  ;;  %v21724_v35 = vld [vmem:[#allocation75_spill] sm:$0xff]  ;;  %v21725_v23 = vld [vmem:[#allocation78_spill] sm:$0xff] }
 0x21a   :  { %21717 = vst [vmem:[#allocation366_spill] sm:$0xff] %v14303_v16  ;;  %21718 = vst [vmem:[#allocation367_spill] sm:$0xff] %v14306_v52  ;;  %2362 = vbcast.lane.b32.xlu0 %v1346_v14, 256  ;;  %v14337_v0 = vrot.slane %v4560_v60, %v11711_v56  ;;  %v14340_v48 = vrot.slane %v4576_v51, %v11711_v56  ;;  %v7368_v20 = vcombine.high %v2153_v55, %v2160_v1  ;;  %v21726_v60 = vld [vmem:[#allocation94_spill] sm:$0xff]  ;;  %v21738_v16 = vld [vmem:[#allocation116_spill] sm:$0xff] }
 0x21b   :  { %21719 = vst [vmem:[#allocation368_spill] sm:$0xff] %v14309_v8  ;;  %21720 = vst [vmem:[#allocation369_spill] sm:$0xff] %v14312_v7  ;;  %2366 = vbcast.lane.b32.xlu1 %v1346_v14, 264  ;;  %v14353_v51 = vrot.slane %v7295_v32, %v11726_v13  ;;  %v14356_v55 = vrot.slane %v7327_v47, %v11726_v13  ;;  %v7375_v14 = vrot.slane %v7367_v53, %v11711_v56  ;;  %v21736_v37 = vld [vmem:[#allocation130_spill] sm:$0xff]  ;;  %v21737_v8 = vld [vmem:[#allocation113_spill] sm:$0xff] }
 0x21c   :  { %21721 = vst [vmem:[#allocation370_spill] sm:$0xff] %v14319_v41  ;;  %21722 = vst [vmem:[#allocation371_spill] sm:$0xff] %v14322_v10  ;;  %v2167_v59 = vpop.permute.xlu0 %2166  ;;  %v14359_v1 = vpop.permute.xlu1 %2170  ;;  %v21731_v63 = vcombine.low %v14193_v29, %v14193_v29  ;;  %v21733_v32 = vcombine.low %v14199_v36, %v14199_v36  ;;  %v4664_v7 = vcombine.high %v21736_v37, %v21735_v33 }
 0x21d   :  { %21723 = vst [vmem:[#allocation372_spill] sm:$0xff] %v14324_v40  ;;  %21728 = vst [vmem:[#allocation373_spill] sm:$0xff] %v14353_v51  ;;  %v7382_v15 = vrot.slane %v7368_v20, %v11711_v56  ;;  %v21740_v42 = vcombine.high %v21618_v50, %v21618_v50  ;;  %v21742_v20 = vld [vmem:[#allocation258_spill] sm:$0xff]  ;;  %v21745_v50 = vld [vmem:[#allocation8_spill] sm:$0xff]  ;;  %v7400_v52 = vcombine.high %v7375_v14, %v7375_v14 }
 0x21e   :  { %21729 = vst [vmem:[#allocation374_spill] sm:$0xff] %v14356_v55  ;;  %21730 = vst [vmem:[#allocation375_spill] sm:$0xff] %v14359_v1  ;;  %2369 = vbcast.lane.b32.xlu0 %v1350_v2, 256  ;;  %v14367_v5 = vrot.slane %v21731_v63, %v11726_v13  ;;  %v14373_v47 = vrot.slane %v21733_v32, %v11726_v13  ;;  %v21739_v63 = vld [vmem:[#allocation256_spill] sm:$0xff]  ;;  %v7783_v32 = vcombine.low %v14286_v27, %v14324_v40  ;;  %v21744_v40 = vld [vmem:[#allocation10_spill] sm:$0xff] }
 0x21f   :  { %v6256_v34 = vcombine.high %v21739_v63, %v21739_v63  ;;  %2373 = vbcast.lane.b32.xlu1 %v1350_v2, 264  ;;  %v14392_v53 = vrot.slane %v21740_v42, %v11726_v13  ;;  %v6288_v49 = vcombine.high %v21742_v20, %v21742_v20  ;;  %v7399_v27 = vcombine.low %v7375_v14, %v7375_v14  ;;  %v21753_v55 = vld [vmem:[#allocation143_spill] sm:$0xff] }
 0x220   :  { %21732 = vst [vmem:[#allocation376_spill] sm:$0xff] %v14367_v5  ;;  %21734 = vst [vmem:[#allocation377_spill] sm:$0xff] %v14373_v47  ;;  %v2174_v12 = vpop.permute.xlu0 %2173  ;;  %v14400_v2 = vpop.permute.xlu1 %2177  ;;  %v21746_v42 = vcombine.high %v21744_v40, %v21745_v50  ;;  %v7415_v51 = vcombine.low %v7382_v15, %v7382_v15  ;;  %v7416_v50 = vcombine.high %v7382_v15, %v7382_v15  ;;  %v21751_v40 = vld [vmem:[#allocation12_spill] sm:$0xff]  ;;  %v21755_v15 = vld [vmem:[#allocation153_spill] sm:$0xff] }
 0x221   :  { %21741 = vst [vmem:[#allocation139_spill] sm:$0xff] %v14392_v53  ;;  %v7383_v33 = vcombine.low %v2167_v59, %v2174_v12  ;;  %v7384_v37 = vcombine.high %v2167_v59, %v2174_v12  ;;  %21743 = vst [vmem:[#allocation130_spill] sm:$0xff] %v14400_v2  ;;  %v21747_v59 = vcombine.high %v21628_v30, %v21628_v30  ;;  %v21750_v12 = vld [vmem:[#allocation14_spill] sm:$0xff] }
 0x222   :  { %9063 = vrot.lane.b32.xlu0 %v21746_v42, %s11587_s0  ;;  %v7799_v22 = vcombine.low %v14359_v1, %v14400_v2  ;;  %v14419_v42 = vrot.slane %v7783_v32, %v11711_v56  ;;  %v21752_v5 = vcombine.high %v21750_v12, %v21751_v40  ;;  %v21754_v1 = vld [vmem:[#allocation140_spill] sm:$0xff]  ;;  %v4768_v32 = vcombine.high %v21756_v6, %v21755_v15  ;;  %v21768_v15 = vld [vmem:[#allocation35_spill] sm:$0xff] }
 0x223   :  { %v14412_v63 = vrot.slane %v21747_v59, %v11726_v13  ;;  %v7391_v20 = vrot.slane %v7383_v33, %v11711_v56  ;;  %v7398_v24 = vrot.slane %v7384_v37, %v11711_v56  ;;  %v4680_v2 = vcombine.high %v21754_v1, %v21753_v55  ;;  %v21760_v40 = vld [vmem:[#allocation24_spill] sm:$0xff]  ;;  %v21767_v1 = vld [vmem:[#allocation37_spill] sm:$0xff] }
 0x224   :  { %21749 = vst [vmem:[#allocation258_spill] sm:$0xff] %v14419_v42  ;;  %9065 = vrot.lane.b32.xlu1 %v21752_v5, %s11587_s0  ;;  %v2181_v30 = vpop.permute.xlu0 %2180  ;;  %v14432_v19 = vrot.slane %v7799_v22, %v11711_v56  ;;  %v14434_v41 = vpop.permute.xlu1 %2184  ;;  %v21759_v5 = vld [vmem:[#allocation26_spill] sm:$0xff]  ;;  %v14447_v55 = vrot.slane %v7400_v52, %v11726_v13  ;;  %v21769_v14 = vcombine.high %v21767_v1, %v21768_v15 }
 0x225   :  { %21748 = vst [vmem:[#allocation256_spill] sm:$0xff] %v14412_v63  ;;  %v7431_v33 = vcombine.low %v7391_v20, %v7391_v20  ;;  %v7432_v59 = vcombine.high %v7391_v20, %v7391_v20  ;;  %v7447_v37 = vcombine.low %v7398_v24, %v7398_v24  ;;  %v7448_v47 = vcombine.high %v7398_v24, %v7398_v24 }
 0x226   :  { %21757 = vst [vmem:[#allocation143_spill] sm:$0xff] %v14432_v19  ;;  %21758 = vst [vmem:[#allocation140_spill] sm:$0xff] %v14434_v41  ;;  %v21761_v12 = vcombine.high %v21759_v5, %v21760_v40  ;;  %v14441_v20 = vrot.slane %v7399_v27, %v11726_v13  ;;  %v14460_v27 = vrot.slane %v7415_v51, %v11726_v13  ;;  %v21777_v40 = vld [vmem:[#allocation47_spill] sm:$0xff] }
 0x227   :  { %v14444_v24 = vrot.slane %v7431_v33, %v11726_v13  ;;  %21764 = vst [vmem:[#allocation378_spill] sm:$0xff] %v14447_v55  ;;  %v14450_v6 = vrot.slane %v7432_v59, %v11726_v13  ;;  %v14453_v22 = vrot.slane %v7447_v37, %v11726_v13  ;;  %v14463_v33 = vrot.slane %v7448_v47, %v11726_v13 }
 0x228   :  { %9067 = vrot.lane.b32.xlu0 %v21761_v12, %s11587_s0  ;;  %21762 = vst [vmem:[#allocation153_spill] sm:$0xff] %v14441_v20  ;;  %9069 = vrot.lane.b32.xlu1 %v21769_v14, %s11587_s0  ;;  %v2188_v12 = vpop.permute.xlu0 %2187  ;;  %21770 = vst [vmem:[#allocation381_spill] sm:$0xff] %v14460_v27  ;;  %v14466_v52 = vrot.slane %v6256_v34, %v11726_v13  ;;  %v14469_v59 = vrot.slane %v6288_v49, %v11726_v13  ;;  %v14480_v1 = vpop.permute.xlu1 %2191  ;;  %v21776_v34 = vld [vmem:[#allocation49_spill] sm:$0xff] }
 0x229   :  { %21763 = vst [vmem:[#allocation146_spill] sm:$0xff] %v14444_v24  ;;  %21765 = vst [vmem:[#allocation379_spill] sm:$0xff] %v14450_v6  ;;  %v7815_v37 = vcombine.low %v14419_v42, %v14419_v42  ;;  %v7847_v15 = vcombine.low %v14432_v19, %v14432_v19  ;;  %v14478_v51 = vrot.slane %v7416_v50, %v11726_v13  ;;  %v21824_v6 = vld [vmem:[#allocation237_spill] sm:$0xff] }
 0x22a   :  { %21766 = vst [vmem:[#allocation380_spill] sm:$0xff] %v14453_v22  ;;  %21771 = vst [vmem:[#allocation382_spill] sm:$0xff] %v14463_v33  ;;  %v7471_v47 = vcombine.low %v2181_v30, %v2188_v12  ;;  %v21778_v49 = vcombine.high %v21776_v34, %v21777_v40  ;;  %v14493_v50 = vrot.slane %v4664_v7, %v11711_v56  ;;  %v21779_v40 = vld [vmem:[#allocation160_spill] sm:$0xff]  ;;  %v21820_v22 = vld [vmem:[#allocation210_spill] sm:$0xff] }
 0x22b   :  { %21772 = vst [vmem:[#allocation383_spill] sm:$0xff] %v14466_v52  ;;  %21773 = vst [vmem:[#allocation384_spill] sm:$0xff] %v14469_v59  ;;  %v14496_v53 = vrot.slane %v4680_v2, %v11711_v56  ;;  %v14499_v19 = vrot.slane %v4768_v32, %v11711_v56  ;;  %v7472_v42 = vcombine.high %v2181_v30, %v2188_v12 }
 0x22c   :  { %21774 = vst [vmem:[#allocation385_spill] sm:$0xff] %v14478_v51  ;;  %21775 = vst [vmem:[#allocation386_spill] sm:$0xff] %v14480_v1  ;;  %9071 = vrot.lane.b32.xlu0 %v21778_v49, %s11587_s0  ;;  %v21780_v49 = vld [vmem:[#allocation158_spill] sm:$0xff]  ;;  %v21781_v5 = vcombine.high %v21704_v18, %v21703_v17  ;;  %v2195_v63 = vpop.permute.xlu0 %2194  ;;  %v14514_v14 = vrot.slane %v7815_v37, %v11726_v13  ;;  %v21784_v30 = vcombine.low %v14337_v0, %v14337_v0  ;;  %v14532_v2 = vpop.permute.xlu1 %2198  ;;  %v21795_v37 = vld [vmem:[#allocation133_spill] sm:$0xff] }
 0x22d   :  { %v4784_v34 = vcombine.high %v21780_v49, %v21779_v40  ;;  %v14517_v40 = vrot.slane %v7847_v15, %v11726_v13  ;;  %v21786_v12 = vcombine.low %v14340_v48, %v14340_v48  ;;  %v7479_v32 = vrot.slane %v7471_v47, %v11711_v56  ;;  %21788 = vst [vmem:[#allocation389_spill] sm:$0xff] %v14532_v2  ;;  %v21796_v18 = vld [vmem:[#allocation147_spill] sm:$0xff] }
 0x22e   :  { %9073 = vrot.lane.b32.xlu1 %v21781_v5, %s11587_s0  ;;  %21782 = vst [vmem:[#allocation160_spill] sm:$0xff] %v14514_v14  ;;  %v14523_v5 = vrot.slane %v21784_v30, %v11726_v13  ;;  %v21789_v15 = vcombine.high %v21725_v23, %v21724_v35  ;;  %v21790_v30 = vcombine.high %v21621_v43, %v21621_v43  ;;  %v21794_v35 = vld [vmem:[#allocation131_spill] sm:$0xff]  ;;  %v21806_v14 = vld [vmem:[#allocation34_spill] sm:$0xff] }
 0x22f   :  { %21783 = vst [vmem:[#allocation158_spill] sm:$0xff] %v14517_v40  ;;  %v14529_v49 = vrot.slane %v21786_v12, %v11726_v13  ;;  %v21792_v47 = vcombine.high %v21624_v61, %v21624_v61  ;;  %v4240_v23 = vcombine.high %v21795_v37, %v21794_v35  ;;  %v4344_v43 = vcombine.high %v21797_v28, %v21796_v18  ;;  %v21799_v18 = vld [vmem:[#allocation164_spill] sm:$0xff]  ;;  %v21800_v28 = vld [vmem:[#allocation166_spill] sm:$0xff] }
 0x230   :  { %21785 = vst [vmem:[#allocation387_spill] sm:$0xff] %v14523_v5  ;;  %9075 = vrot.lane.b32.xlu0 %v21789_v15, %s11587_s0  ;;  %v14544_v7 = vrot.slane %v21790_v30, %v11726_v13  ;;  %v14563_v58 = vrot.slane %v4784_v34, %v11711_v56  ;;  %v7486_v61 = vrot.slane %v7472_v42, %v11711_v56  ;;  %v2202_v17 = vpop.permute.xlu0 %2201  ;;  %v14578_v51 = vpop.permute.xlu1 %2205 }
 0x231   :  { %21787 = vst [vmem:[#allocation388_spill] sm:$0xff] %v14529_v49  ;;  %v14550_v12 = vrot.slane %v21792_v47, %v11726_v13  ;;  %v7887_v47 = vcombine.low %v14434_v41, %v14480_v1  ;;  %v21798_v15 = vcombine.high %v21727_v44, %v21726_v60  ;;  %v7487_v35 = vcombine.low %v2195_v63, %v2202_v17  ;;  %v21805_v49 = vld [vmem:[#allocation185_spill] sm:$0xff]  ;;  %v21822_v41 = vld [vmem:[#allocation220_spill] sm:$0xff] }
 0x232   :  { %21791 = vst [vmem:[#allocation390_spill] sm:$0xff] %v14544_v7  ;;  %v7488_v37 = vcombine.high %v2195_v63, %v2202_v17  ;;  %v4448_v33 = vcombine.high %v21800_v28, %v21799_v18  ;;  %v6360_v42 = vcombine.high %v13588_v54, %v13588_v54  ;;  %v7503_v30 = vcombine.low %v7479_v32, %v7479_v32 }
 0x233   :  { %21793 = vst [vmem:[#allocation391_spill] sm:$0xff] %v14550_v12  ;;  %9077 = vrot.lane.b32.xlu1 %v21798_v15, %s11587_s0  ;;  %21801 = vst [vmem:[#allocation392_spill] sm:$0xff] %v14578_v51  ;;  %v21802_v60 = vcombine.high %v21738_v16, %v21737_v8  ;;  %v7504_v15 = vcombine.high %v7479_v32, %v7479_v32  ;;  %v7495_v34 = vrot.slane %v7487_v35, %v11711_v56 }
 0x234   :  { %v7502_v18 = vrot.slane %v7488_v37, %v11711_v56  ;;  %v7903_v54 = vcombine.low %v14532_v2, %v14578_v51  ;;  %v6392_v28 = vcombine.high %v13597_v3, %v13597_v3  ;;  %v7519_v44 = vcombine.low %v7486_v61, %v7486_v61  ;;  %v2209_v17 = vpop.permute.xlu0 %2208  ;;  %v14601_v5 = vpop.permute.xlu1 %2212  ;;  %v21804_v3 = vld [vmem:[#allocation183_spill] sm:$0xff]  ;;  %v21821_v51 = vld [vmem:[#allocation218_spill] sm:$0xff] }
 0x235   :  { %9079 = vrot.lane.b32.xlu0 %v21802_v60, %s11587_s0  ;;  %v7520_v8 = vcombine.high %v7486_v61, %v7486_v61  ;;  %v14595_v60 = vrot.slane %v7887_v47, %v11711_v56  ;;  %v7535_v63 = vcombine.low %v7495_v34, %v7495_v34  ;;  %v7536_v32 = vcombine.high %v7495_v34, %v7495_v34  ;;  %v21807_v47 = vld [vmem:[#allocation197_spill] sm:$0xff] }
 0x236   :  { %v7551_v16 = vcombine.low %v7502_v18, %v7502_v18  ;;  %v7552_v35 = vcombine.high %v7502_v18, %v7502_v18  ;;  %v14599_v37 = vrot.slane %v7903_v54, %v11711_v56  ;;  %21803 = vst [vmem:[#allocation393_spill] sm:$0xff] %v14601_v5  ;;  %v4968_v61 = vcombine.high %v21805_v49, %v21804_v3 }
 0x237   :  { %9081 = vrot.lane.b32.xlu1 %v4240_v23, %s11587_s0  ;;  %v5072_v40 = vcombine.high %v21807_v47, %v21806_v14  ;;  %v14609_v23 = vrot.slane %v7503_v30, %v11726_v13  ;;  %v14612_v34 = vrot.slane %v7535_v63, %v11726_v13  ;;  %v14615_v18 = vrot.slane %v7504_v15, %v11726_v13 }
 0x238   :  { %v14618_v54 = vrot.slane %v7536_v32, %v11726_v13  ;;  %v2216_v3 = vpop.permute.xlu0 %2215  ;;  %v14625_v14 = vrot.slane %v7519_v44, %v11726_v13  ;;  %v14628_v30 = vrot.slane %v7552_v35, %v11726_v13  ;;  %v14631_v63 = vrot.slane %v6360_v42, %v11726_v13  ;;  %v14645_v47 = vpop.permute.xlu1 %2219 }
 0x239   :  { %9083 = vrot.lane.b32.xlu0 %v4344_v43, %s11587_s0  ;;  %21808 = vst [vmem:[#allocation394_spill] sm:$0xff] %v14609_v23  ;;  %21809 = vst [vmem:[#allocation395_spill] sm:$0xff] %v14612_v34  ;;  %v14621_v43 = vrot.slane %v7551_v16, %v11726_v13  ;;  %v14634_v15 = vrot.slane %v6392_v28, %v11726_v13  ;;  %v7919_v32 = vcombine.low %v14595_v60, %v14595_v60  ;;  %v21823_v28 = vld [vmem:[#allocation239_spill] sm:$0xff] }
 0x23a   :  { %21810 = vst [vmem:[#allocation396_spill] sm:$0xff] %v14615_v18  ;;  %21811 = vst [vmem:[#allocation397_spill] sm:$0xff] %v14618_v54  ;;  %v7951_v16 = vcombine.low %v14599_v37, %v14599_v37  ;;  %v14643_v44 = vrot.slane %v7520_v8, %v11726_v13  ;;  %v7575_v35 = vcombine.low %v2209_v17, %v2216_v3  ;;  %v21819_v8 = vld [vmem:[#allocation208_spill] sm:$0xff] }
 0x23b   :  { %21812 = vst [vmem:[#allocation398_spill] sm:$0xff] %v14621_v43  ;;  %9085 = vrot.lane.b32.xlu1 %v4448_v33, %s11587_s0  ;;  %21813 = vst [vmem:[#allocation399_spill] sm:$0xff] %v14625_v14  ;;  %v7576_v27 = vcombine.high %v2209_v17, %v2216_v3  ;;  %v5176_v2 = vcombine.high %v21820_v22, %v21819_v8  ;;  %v5280_v1 = vcombine.high %v21822_v41, %v21821_v51  ;;  %v21834_v51 = vld [vmem:[#allocation44_spill] sm:$0xff]  ;;  %v21838_v22 = vld [vmem:[#allocation263_spill] sm:$0xff] }
 0x23c   :  { %21814 = vst [vmem:[#allocation400_spill] sm:$0xff] %v14628_v30  ;;  %21815 = vst [vmem:[#allocation401_spill] sm:$0xff] %v14631_v63  ;;  %v5800_v55 = vcombine.high %v21824_v6, %v21823_v28  ;;  %v14670_v3 = vrot.slane %v7919_v32, %v11726_v13  ;;  %v14673_v33 = vrot.slane %v7951_v16, %v11726_v13  ;;  %v14688_v6 = vpop.permute.xlu1 %2226  ;;  %v21839_v30 = vld [vmem:[#allocation257_spill] sm:$0xff] }
 0x23d   :  { %21816 = vst [vmem:[#allocation402_spill] sm:$0xff] %v14634_v15  ;;  %21817 = vst [vmem:[#allocation403_spill] sm:$0xff] %v14643_v44  ;;  %9087 = vrot.lane.b32.xlu0 %v4968_v61, %s11587_s0  ;;  %v2223_v61 = vpop.permute.xlu0 %2222  ;;  %v21829_v42 = vcombine.low %v14496_v53, %v14496_v53  ;;  %v7583_v17 = vrot.slane %v7575_v35, %v11711_v56  ;;  %v21832_v16 = vcombine.high %v21649_v31, %v21649_v31  ;;  %v21837_v35 = vld [vmem:[#allocation289_spill] sm:$0xff]  ;;  %v21842_v31 = vld [vmem:[#allocation290_spill] sm:$0xff] }
 0x23e   :  { %21818 = vst [vmem:[#allocation404_spill] sm:$0xff] %v14645_v47  ;;  %21825 = vst [vmem:[#allocation405_spill] sm:$0xff] %v14670_v3  ;;  %v6464_v8 = vcombine.high %v21837_v35, %v21837_v35  ;;  %v5904_v32 = vcombine.high %v21839_v30, %v21838_v22  ;;  %v6008_v44 = vcombine.high %v21841_v4, %v21840_v46  ;;  %v21847_v22 = vld [vmem:[#allocation293_spill] sm:$0xff]  ;;  %v21848_v30 = vld [vmem:[#allocation292_spill] sm:$0xff] }
 0x23f   :  { %9089 = vrot.lane.b32.xlu1 %v5072_v40, %s11587_s0  ;;  %21826 = vst [vmem:[#allocation406_spill] sm:$0xff] %v14673_v33  ;;  %v21827_v40 = vcombine.low %v14493_v50, %v14493_v50  ;;  %v14685_v49 = vrot.slane %v21829_v42, %v11726_v13  ;;  %21831 = vst [vmem:[#allocation409_spill] sm:$0xff] %v14688_v6  ;;  %v21835_v42 = vcombine.high %v21834_v51, %v21834_v51 }
 0x240   :  { %v7991_v14 = vcombine.low %v14601_v5, %v14645_v47  ;;  %v21845_v35 = vcombine.high %v13691_v11, %v13691_v11  ;;  %v6112_v43 = vcombine.high %v21848_v30, %v21847_v22  ;;  %v7607_v5 = vcombine.low %v7583_v17, %v7583_v17  ;;  %v14733_v54 = vpop.permute.xlu1 %2233  ;;  %v21851_v22 = vld [vmem:[#allocation310_spill] sm:$0xff] }
 0x241   :  { %v14679_v28 = vrot.slane %v21827_v40, %v11726_v13  ;;  %21830 = vst [vmem:[#allocation408_spill] sm:$0xff] %v14685_v49  ;;  %9091 = vrot.lane.b32.xlu0 %v5176_v2, %s11587_s0  ;;  %v14697_v40 = vrot.slane %v21832_v16, %v11726_v13  ;;  %v14703_v41 = vrot.slane %v21835_v42, %v11726_v13  ;;  %v2230_v51 = vpop.permute.xlu0 %2229  ;;  %21849 = vst [vmem:[#allocation411_spill] sm:$0xff] %v14733_v54 }
 0x242   :  { %v7590_v2 = vrot.slane %v7576_v27, %v11711_v56  ;;  %v6496_v16 = vcombine.high %v21842_v31, %v21842_v31  ;;  %v21843_v42 = vcombine.high %v13688_v38, %v13688_v38  ;;  %v14727_v46 = vrot.slane %v21845_v35, %v11726_v13  ;;  %v21852_v38 = vld [vmem:[#allocation309_spill] sm:$0xff] }
 0x243   :  { %21828 = vst [vmem:[#allocation407_spill] sm:$0xff] %v14679_v28  ;;  %21833 = vst [vmem:[#allocation410_spill] sm:$0xff] %v14697_v40  ;;  %9093 = vrot.lane.b32.xlu1 %v5280_v1, %s11587_s0  ;;  %v7591_v4 = vcombine.low %v2223_v61, %v2230_v51  ;;  %v7592_v31 = vcombine.high %v2223_v61, %v2230_v51  ;;  %v7608_v47 = vcombine.high %v7583_v17, %v7583_v17 }
 0x244   :  { %21836 = vst [vmem:[#allocation44_spill] sm:$0xff] %v14703_v41  ;;  %v14721_v27 = vrot.slane %v21843_v42, %v11726_v13  ;;  %21846 = vst [vmem:[#allocation290_spill] sm:$0xff] %v14727_v46  ;;  %v7623_v42 = vcombine.low %v7590_v2, %v7590_v2  ;;  %v8007_v35 = vcombine.low %v14688_v6, %v14733_v54  ;;  %v21869_v54 = vld [vmem:[#allocation163_spill] sm:$0xff] }
 0x245   :  { %9095 = vrot.lane.b32.xlu0 %v5800_v55, %s11587_s0  ;;  %v7599_v61 = vrot.slane %v7591_v4, %v11711_v56  ;;  %v7606_v51 = vrot.slane %v7592_v31, %v11711_v56  ;;  %v7624_v1 = vcombine.high %v7590_v2, %v7590_v2  ;;  %v14745_v17 = vrot.slane %v7991_v14, %v11711_v56  ;;  %v2237_v55 = vpop.permute.xlu0 %2236  ;;  %v14755_v2 = vpop.permute.xlu1 %2240  ;;  %v21855_v14 = vld [vmem:[#allocation326_spill] sm:$0xff] }
 0x246   :  { %21844 = vst [vmem:[#allocation289_spill] sm:$0xff] %v14721_v27  ;;  %v6632_v30 = vcombine.high %v21852_v38, %v21851_v22  ;;  %v14753_v3 = vrot.slane %v8007_v35, %v11711_v56  ;;  %21854 = vst [vmem:[#allocation414_spill] sm:$0xff] %v14755_v2  ;;  %v14761_v6 = vrot.slane %v7607_v5, %v11726_v13  ;;  %v21868_v38 = vld [vmem:[#allocation172_spill] sm:$0xff] }
 0x247   :  { %21850 = vst [vmem:[#allocation412_spill] sm:$0xff] %v14745_v17  ;;  %9097 = vrot.lane.b32.xlu1 %v5904_v32, %s11587_s0  ;;  %v7639_v28 = vcombine.low %v7599_v61, %v7599_v61  ;;  %v7640_v4 = vcombine.high %v7599_v61, %v7599_v61  ;;  %v7655_v49 = vcombine.low %v7606_v51, %v7606_v51  ;;  %v21856_v32 = vld [vmem:[#allocation324_spill] sm:$0xff] }
 0x248   :  { %v7656_v31 = vcombine.high %v7606_v51, %v7606_v51  ;;  %21853 = vst [vmem:[#allocation413_spill] sm:$0xff] %v14753_v3  ;;  %v6736_v33 = vcombine.high %v21856_v32, %v21855_v14  ;;  %21857 = vst [vmem:[#allocation415_spill] sm:$0xff] %v14761_v6  ;;  %v14764_v22 = vrot.slane %v7608_v47, %v11726_v13 }
 0x249   :  { %9099 = vrot.lane.b32.xlu0 %v6008_v44, %s11587_s0  ;;  %v14767_v61 = vrot.slane %v7639_v28, %v11726_v13  ;;  %v14770_v51 = vrot.slane %v7640_v4, %v11726_v13  ;;  %v14773_v35 = vrot.slane %v7623_v42, %v11726_v13  ;;  %v14776_v44 = vrot.slane %v7655_v49, %v11726_v13  ;;  %v2244_v11 = vpop.permute.xlu0 %2243  ;;  %v14797_v32 = vpop.permute.xlu1 %2247 }
 0x24a   :  { %21858 = vst [vmem:[#allocation416_spill] sm:$0xff] %v14764_v22  ;;  %v14780_v5 = vrot.slane %v7624_v1, %v11726_v13  ;;  %v14783_v47 = vrot.slane %v7656_v31, %v11726_v13  ;;  %v14786_v28 = vrot.slane %v6464_v8, %v11726_v13  ;;  %v14789_v4 = vrot.slane %v6496_v16, %v11726_v13 }
 0x24b   :  { %21859 = vst [vmem:[#allocation417_spill] sm:$0xff] %v14767_v61  ;;  %21860 = vst [vmem:[#allocation418_spill] sm:$0xff] %v14770_v51  ;;  %9101 = vrot.lane.b32.xlu1 %v6112_v43, %s11587_s0  ;;  %v8023_v42 = vcombine.low %v14745_v17, %v14745_v17  ;;  %v8055_v49 = vcombine.low %v14753_v3, %v14753_v3  ;;  %v7679_v43 = vcombine.low %v2237_v55, %v2244_v11  ;;  %v21907_v17 = vld [vmem:[#allocation195_spill] sm:$0xff] }
 0x24c   :  { %21861 = vst [vmem:[#allocation419_spill] sm:$0xff] %v14773_v35  ;;  %21862 = vst [vmem:[#allocation420_spill] sm:$0xff] %v14776_v44  ;;  %v7680_v14 = vcombine.high %v2237_v55, %v2244_v11  ;;  %v5288_v18 = vcombine.high %v21869_v54, %v21868_v38  ;;  %v6840_v1 = vcombine.high %v14145_v21, %v14148_v45  ;;  %v21885_v35 = vld [vmem:[#allocation177_spill] sm:$0xff] }
 0x24d   :  { %21863 = vst [vmem:[#allocation421_spill] sm:$0xff] %v14780_v5  ;;  %21864 = vst [vmem:[#allocation422_spill] sm:$0xff] %v14783_v47  ;;  %9103 = vrot.lane.b32.xlu0 %v6632_v30, %s11587_s0  ;;  %v6944_v11 = vcombine.high %v14291_v57, %v14294_v39  ;;  %v2251_v30 = vpop.permute.xlu0 %2250  ;;  %v21870_v54 = vcombine.low %v14499_v19, %v14499_v19  ;;  %v7687_v16 = vrot.slane %v7679_v43, %v11711_v56  ;;  %v14839_v57 = vpop.permute.xlu1 %2254  ;;  %v21882_v47 = vld [vmem:[#allocation174_spill] sm:$0xff] }
 0x24e   :  { %21865 = vst [vmem:[#allocation423_spill] sm:$0xff] %v14786_v28  ;;  %21866 = vst [vmem:[#allocation424_spill] sm:$0xff] %v14789_v4  ;;  %v14830_v39 = vrot.slane %v8055_v49, %v11726_v13  ;;  %v21874_v8 = vcombine.low %v14563_v58, %v14563_v58  ;;  %v7694_v31 = vrot.slane %v7680_v14, %v11711_v56  ;;  %v22072_v4 = vld [vmem:[#allocation97_spill] sm:$0xff] }
 0x24f   :  { %21867 = vst [vmem:[#allocation425_spill] sm:$0xff] %v14797_v32  ;;  %9105 = vrot.lane.b32.xlu1 %v6736_v33, %s11587_s0  ;;  %v14823_v38 = vrot.slane %v21870_v54, %v11726_v13  ;;  %v14827_v33 = vrot.slane %v8023_v42, %v11726_v13  ;;  %21876 = vst [vmem:[#allocation428_spill] sm:$0xff] %v14839_v57  ;;  %v21879_v42 = vld [vmem:[#allocation162_spill] sm:$0xff]  ;;  %v14857_v14 = vrot.slane %v5288_v18, %v11711_v56 }
 0x250   :  { %21873 = vst [vmem:[#allocation426_spill] sm:$0xff] %v14830_v39  ;;  %v14836_v55 = vrot.slane %v21874_v8, %v11726_v13  ;;  %v21880_v49 = vcombine.high %v21879_v42, %v21879_v42  ;;  %v21883_v8 = vcombine.high %v21882_v47, %v21882_v47  ;;  %v4504_v45 = vcombine.high %v14193_v29, %v14193_v29  ;;  %v21891_v39 = vld [vmem:[#allocation182_spill] sm:$0xff] }
 0x251   :  { %21871 = vst [vmem:[#allocation172_spill] sm:$0xff] %v14823_v38  ;;  %21872 = vst [vmem:[#allocation163_spill] sm:$0xff] %v14827_v33  ;;  %9107 = vrot.lane.b32.xlu0 %v6840_v1, %s11587_s0  ;;  %v21886_v1 = vld [vmem:[#allocation173_spill] sm:$0xff]  ;;  %v4536_v42 = vcombine.high %v14199_v36, %v14199_v36  ;;  %v7464_v47 = vcombine.high %v14441_v20, %v14444_v24  ;;  %v7711_v18 = vcombine.low %v7687_v16, %v7687_v16  ;;  %v14872_v51 = vpop.permute.xlu1 %2261 }
 0x252   :  { %21875 = vst [vmem:[#allocation427_spill] sm:$0xff] %v14836_v55  ;;  %v14848_v21 = vrot.slane %v21880_v49, %v11726_v13  ;;  %v14854_v5 = vrot.slane %v21883_v8, %v11726_v13  ;;  %v5304_v44 = vcombine.high %v21886_v1, %v21885_v35  ;;  %v2258_v49 = vpop.permute.xlu0 %2257  ;;  %v7568_v8 = vcombine.high %v14609_v23, %v14612_v34  ;;  %v21888_v35 = vld [vmem:[#allocation306_spill] sm:$0xff] }
 0x253   :  { %9109 = vrot.lane.b32.xlu1 %v6944_v11, %s11587_s0  ;;  %v7695_v54 = vcombine.low %v2251_v30, %v2258_v49  ;;  %v7696_v43 = vcombine.high %v2251_v30, %v2258_v49  ;;  %v7712_v1 = vcombine.high %v7687_v16, %v7687_v16  ;;  %v7727_v29 = vcombine.low %v7694_v31, %v7694_v31 }
 0x254   :  { %21881 = vst [vmem:[#allocation162_spill] sm:$0xff] %v14848_v21  ;;  %21884 = vst [vmem:[#allocation174_spill] sm:$0xff] %v14854_v5  ;;  %v5335_v34 = vcombine.low %v14857_v14, %v14857_v14  ;;  %v14882_v30 = vrot.slane %v5304_v44, %v11711_v56  ;;  %v6984_v23 = vcombine.high %v21888_v35, %v21888_v35  ;;  %v22054_v5 = vld [vmem:[#allocation148_spill] sm:$0xff] }
 0x255   :  { %21887 = vst [vmem:[#allocation177_spill] sm:$0xff] %v14872_v51  ;;  %9111 = vrot.lane.b32.xlu0 %v7464_v47, %s11587_s0  ;;  %v7703_v49 = vrot.slane %v7695_v54, %v11711_v56  ;;  %v7710_v16 = vrot.slane %v7696_v43, %v11711_v56  ;;  %v21889_v47 = vld [vmem:[#allocation307_spill] sm:$0xff]  ;;  %v7728_v36 = vcombine.high %v7694_v31, %v7694_v31  ;;  %v21890_v54 = vld [vmem:[#allocation189_spill] sm:$0xff]  ;;  %v14895_v22 = vpop.permute.xlu1 %2268 }
 0x256   :  { %v7016_v24 = vcombine.high %v21889_v47, %v21889_v47  ;;  %v2265_v11 = vpop.permute.xlu0 %2264  ;;  %v7672_v20 = vcombine.high %v14761_v6, %v14767_v61  ;;  %v5392_v43 = vcombine.high %v21891_v39, %v21890_v54  ;;  %21892 = vst [vmem:[#allocation173_spill] sm:$0xff] %v14895_v22  ;;  %v14899_v35 = vrot.slane %v7711_v18, %v11726_v13  ;;  %v21906_v6 = vld [vmem:[#allocation193_spill] sm:$0xff] }
 0x257   :  { %9113 = vrot.lane.b32.xlu1 %v7568_v8, %s11587_s0  ;;  %v7743_v38 = vcombine.low %v7703_v49, %v7703_v49  ;;  %v7744_v44 = vcombine.high %v7703_v49, %v7703_v49  ;;  %v7759_v55 = vcombine.low %v7710_v16, %v7710_v16  ;;  %v7760_v33 = vcombine.high %v7710_v16, %v7710_v16 }
 0x258   :  { %21893 = vst [vmem:[#allocation306_spill] sm:$0xff] %v14899_v35  ;;  %v14902_v31 = vrot.slane %v7712_v1, %v11726_v13  ;;  %v14905_v8 = vrot.slane %v7727_v29, %v11726_v13  ;;  %v14923_v1 = vrot.slane %v6984_v23, %v11726_v13  ;;  %v14926_v29 = vrot.slane %v7016_v24, %v11726_v13 }
 0x259   :  { %9115 = vrot.lane.b32.xlu0 %v7672_v20, %s11587_s0  ;;  %v14908_v49 = vrot.slane %v7743_v38, %v11726_v13  ;;  %v14911_v16 = vrot.slane %v7744_v44, %v11726_v13  ;;  %v14914_v39 = vrot.slane %v7759_v55, %v11726_v13  ;;  %v14917_v20 = vrot.slane %v4504_v45, %v11726_v13  ;;  %v14940_v54 = vpop.permute.xlu1 %2275 }
 0x25a   :  { %21894 = vst [vmem:[#allocation307_spill] sm:$0xff] %v14902_v31  ;;  %21895 = vst [vmem:[#allocation189_spill] sm:$0xff] %v14905_v8  ;;  %v2272_v18 = vpop.permute.xlu0 %2271  ;;  %v14920_v47 = vrot.slane %v7760_v33, %v11726_v13  ;;  %v14929_v38 = vrot.slane %v4536_v42, %v11726_v13  ;;  %v5367_v55 = vcombine.low %v14882_v30, %v14882_v30  ;;  %v21909_v8 = vld [vmem:[#allocation192_spill] sm:$0xff] }
 0x25b   :  { %21896 = vst [vmem:[#allocation182_spill] sm:$0xff] %v14908_v49  ;;  %21897 = vst [vmem:[#allocation429_spill] sm:$0xff] %v14911_v16  ;;  %v7776_v45 = vcombine.high %v14899_v35, %v14908_v49  ;;  %v14938_v33 = vrot.slane %v7728_v36, %v11726_v13  ;;  %v8199_v23 = vcombine.low %v2265_v11, %v2272_v18 }
 0x25c   :  { %21898 = vst [vmem:[#allocation430_spill] sm:$0xff] %v14914_v39  ;;  %21899 = vst [vmem:[#allocation431_spill] sm:$0xff] %v14917_v20  ;;  %v3152_v3 = vcombine.high %v21906_v6, %v21906_v6  ;;  %v3184_v44 = vcombine.high %v21907_v17, %v21907_v17  ;;  %v14953_v36 = vrot.slane %v5392_v43, %v11711_v56  ;;  %v21908_v17 = vld [vmem:[#allocation32_spill] sm:$0xff] }
 0x25d   :  { %21900 = vst [vmem:[#allocation432_spill] sm:$0xff] %v14920_v47  ;;  %21901 = vst [vmem:[#allocation433_spill] sm:$0xff] %v14923_v1  ;;  %v8200_v49 = vcombine.high %v2265_v11, %v2272_v18  ;;  %9117 = vrot.lane.b32.xlu1 %v7776_v45, %s11587_s0  ;;  %v5408_v43 = vcombine.high %v21909_v8, %v21908_v17  ;;  %v8207_v11 = vrot.slane %v8199_v23, %v11711_v56  ;;  %v14967_v18 = vpop.permute.xlu1 %2282 }
 0x25e   :  { %21902 = vst [vmem:[#allocation434_spill] sm:$0xff] %v14926_v29  ;;  %21903 = vst [vmem:[#allocation435_spill] sm:$0xff] %v14929_v38  ;;  %v2279_v35 = vpop.permute.xlu0 %2278  ;;  %v14970_v45 = vrot.slane %v5335_v34, %v11726_v13  ;;  %v14973_v24 = vrot.slane %v5367_v55, %v11726_v13  ;;  %v8615_v6 = vcombine.low %v14895_v22, %v14940_v54 }
 0x25f   :  { %21904 = vst [vmem:[#allocation436_spill] sm:$0xff] %v14938_v33  ;;  %21905 = vst [vmem:[#allocation437_spill] sm:$0xff] %v14940_v54  ;;  %v8214_v42 = vrot.slane %v8200_v49, %v11711_v56  ;;  %v14981_v8 = vrot.slane %v3152_v3, %v11726_v13  ;;  %v14984_v23 = vrot.slane %v3184_v44, %v11726_v13  ;;  %v21915_v33 = vld [vmem:[#allocation321_spill] sm:$0xff] }
 0x260   :  { %21910 = vst [vmem:[#allocation193_spill] sm:$0xff] %v14967_v18  ;;  %21911 = vst [vmem:[#allocation195_spill] sm:$0xff] %v14970_v45  ;;  %v14987_v34 = vrot.slane %v5408_v43, %v11711_v56  ;;  %v7088_v61 = vcombine.high %v21915_v33, %v21915_v33  ;;  %v8231_v39 = vcombine.low %v8207_v11, %v8207_v11 }
 0x261   :  { %21912 = vst [vmem:[#allocation32_spill] sm:$0xff] %v14973_v24  ;;  %21913 = vst [vmem:[#allocation192_spill] sm:$0xff] %v14981_v8  ;;  %v8232_v22 = vcombine.high %v8207_v11, %v8207_v11  ;;  %v14993_v54 = vpop.permute.xlu1 %2289  ;;  %v8247_v44 = vcombine.low %v8214_v42, %v8214_v42  ;;  %v8248_v25 = vcombine.high %v8214_v42, %v8214_v42  ;;  %v22067_v8 = vld [vmem:[#allocation59_spill] sm:$0xff] }
 0x262   :  { %v2286_v47 = vpop.permute.xlu0 %2285  ;;  %21914 = vst [vmem:[#allocation438_spill] sm:$0xff] %v14984_v23  ;;  %21916 = vst [vmem:[#allocation321_spill] sm:$0xff] %v14993_v54  ;;  %v15004_v33 = vrot.slane %v8615_v6, %v11711_v56  ;;  %v15016_v42 = vrot.slane %v8231_v39, %v11726_v13  ;;  %v3808_v38 = vcombine.high %v13682_v26, %v13682_v26  ;;  %v22064_v23 = vld [vmem:[#allocation184_spill] sm:$0xff] }
 0x263   :  { %v8215_v55 = vcombine.low %v2279_v35, %v2286_v47  ;;  %v8216_v17 = vcombine.high %v2279_v35, %v2286_v47  ;;  %v8631_v35 = vcombine.low %v14967_v18, %v14993_v54  ;;  %v21917_v47 = vld [vmem:[#allocation322_spill] sm:$0xff]  ;;  %v15019_v6 = vrot.slane %v8232_v22, %v11726_v13 }
 0x264   :  { %v7120_v49 = vcombine.high %v21917_v47, %v21917_v47  ;;  %21918 = vst [vmem:[#allocation322_spill] sm:$0xff] %v15004_v33  ;;  %21921 = vst [vmem:[#allocation441_spill] sm:$0xff] %v15016_v42  ;;  %v15034_v31 = vrot.slane %v8248_v25, %v11726_v13  ;;  %v15040_v22 = vrot.slane %v7088_v61, %v11726_v13  ;;  %v21933_v25 = vld [vmem:[#allocation42_spill] sm:$0xff] }
 0x265   :  { %v8223_v16 = vrot.slane %v8215_v55, %v11711_v56  ;;  %v8230_v43 = vrot.slane %v8216_v17, %v11711_v56  ;;  %v5471_v17 = vcombine.low %v14987_v34, %v14987_v34  ;;  %v15011_v18 = vrot.slane %v8631_v35, %v11711_v56  ;;  %v15013_v54 = vpop.permute.xlu1 %2296  ;;  %21922 = vst [vmem:[#allocation442_spill] sm:$0xff] %v15019_v6 }
 0x266   :  { %v2293_v11 = vpop.permute.xlu0 %2292  ;;  %21920 = vst [vmem:[#allocation440_spill] sm:$0xff] %v15013_v54  ;;  %21927 = vst [vmem:[#allocation447_spill] sm:$0xff] %v15034_v31  ;;  %v21932_v54 = vld [vmem:[#allocation203_spill] sm:$0xff]  ;;  %v4744_v26 = vcombine.high %v14496_v53, %v14496_v53 }
 0x267   :  { %v8263_v3 = vcombine.low %v8223_v16, %v8223_v16  ;;  %v8264_v45 = vcombine.high %v8223_v16, %v8223_v16  ;;  %v8279_v24 = vcombine.low %v8230_v43, %v8230_v43  ;;  %v8280_v55 = vcombine.high %v8230_v43, %v8230_v43  ;;  %21919 = vst [vmem:[#allocation439_spill] sm:$0xff] %v15011_v18 }
 0x268   :  { %v15028_v43 = vrot.slane %v8247_v44, %v11726_v13  ;;  %21929 = vst [vmem:[#allocation449_spill] sm:$0xff] %v15040_v22  ;;  %v5496_v1 = vcombine.high %v21933_v25, %v21932_v54  ;;  %v15096_v53 = vrot.slane %v5471_v17, %v11726_v13  ;;  %v21946_v17 = vld [vmem:[#allocation343_spill] sm:$0xff]  ;;  %v21954_v22 = vld [vmem:[#allocation56_spill] sm:$0xff] }
 0x269   :  { %v15022_v47 = vrot.slane %v8263_v3, %v11726_v13  ;;  %v15025_v16 = vrot.slane %v8264_v45, %v11726_v13  ;;  %v15031_v35 = vrot.slane %v8279_v24, %v11726_v13  ;;  %v15037_v39 = vrot.slane %v8280_v55, %v11726_v13  ;;  %v15053_v20 = vpop.permute.xlu1 %2303 }
 0x26a   :  { %21925 = vst [vmem:[#allocation445_spill] sm:$0xff] %v15028_v43  ;;  %v2300_v9 = vpop.permute.xlu0 %2299  ;;  %v15043_v3 = vrot.slane %v7120_v49, %v11726_v13  ;;  %v8647_v45 = vcombine.low %v15004_v33, %v15004_v33  ;;  %v8679_v24 = vcombine.low %v15011_v18, %v15011_v18  ;;  %21931 = vst [vmem:[#allocation451_spill] sm:$0xff] %v15053_v20 }
 0x26b   :  { %21923 = vst [vmem:[#allocation443_spill] sm:$0xff] %v15022_v47  ;;  %21924 = vst [vmem:[#allocation444_spill] sm:$0xff] %v15025_v16  ;;  %v8296_v44 = vcombine.high %v15016_v42, %v15022_v47  ;;  %v8303_v55 = vcombine.low %v2293_v11, %v2300_v9  ;;  %v3776_v18 = vcombine.high %v13137_v62, %v13137_v62  ;;  %v21943_v47 = vld [vmem:[#allocation45_spill] sm:$0xff] }
 0x26c   :  { %21926 = vst [vmem:[#allocation446_spill] sm:$0xff] %v15031_v35  ;;  %21928 = vst [vmem:[#allocation448_spill] sm:$0xff] %v15037_v39  ;;  %v8304_v20 = vcombine.high %v2293_v11, %v2300_v9  ;;  %v4712_v62 = vcombine.high %v14493_v50, %v14493_v50  ;;  %v15079_v54 = vrot.slane %v8647_v45, %v11726_v13  ;;  %v21941_v45 = vld [vmem:[#allocation73_spill] sm:$0xff] }
 0x26d   :  { %21930 = vst [vmem:[#allocation450_spill] sm:$0xff] %v15043_v3  ;;  %9119 = vrot.lane.b32.xlu0 %v8296_v44, %s11587_s0  ;;  %v15082_v9 = vrot.slane %v8679_v24, %v11726_v13  ;;  %v8311_v11 = vrot.slane %v8303_v55, %v11711_v56  ;;  %v15085_v44 = vpop.permute.xlu1 %2310  ;;  %v21938_v50 = vcombine.low %v14953_v36, %v14953_v36  ;;  %21940 = vst [vmem:[#allocation454_spill] sm:$0xff] %v15096_v53  ;;  %v21942_v55 = vld [vmem:[#allocation77_spill] sm:$0xff] }
 0x26e   :  { %v2307_v29 = vpop.permute.xlu0 %2306  ;;  %21934 = vst [vmem:[#allocation203_spill] sm:$0xff] %v15079_v54  ;;  %21936 = vst [vmem:[#allocation452_spill] sm:$0xff] %v15085_v44  ;;  %v15101_v61 = vrot.slane %v5496_v1, %v11711_v56  ;;  %v5512_v42 = vcombine.high %v21943_v47, %v21942_v55  ;;  %v8318_v49 = vrot.slane %v8304_v20, %v11711_v56  ;;  %v21950_v47 = vld [vmem:[#allocation344_spill] sm:$0xff] }
 0x26f   :  { %21935 = vst [vmem:[#allocation42_spill] sm:$0xff] %v15082_v9  ;;  %v15093_v33 = vrot.slane %v21938_v50, %v11726_v13  ;;  %v15107_v25 = vrot.slane %v3776_v18, %v11726_v13  ;;  %v15110_v50 = vrot.slane %v3808_v38, %v11726_v13  ;;  %v7192_v39 = vcombine.high %v21946_v17, %v21946_v17 }
 0x270   :  { %v8335_v43 = vcombine.low %v8311_v11, %v8311_v11  ;;  %v15121_v18 = vrot.slane %v4712_v62, %v11726_v13  ;;  %v15124_v38 = vrot.slane %v4744_v26, %v11726_v13  ;;  %v7224_v55 = vcombine.high %v21950_v47, %v21950_v47 }
 0x271   :  { %21939 = vst [vmem:[#allocation453_spill] sm:$0xff] %v15093_v33  ;;  %21944 = vst [vmem:[#allocation73_spill] sm:$0xff] %v15107_v25  ;;  %v15116_v35 = vpop.permute.xlu1 %2317  ;;  %v8336_v17 = vcombine.high %v8311_v11, %v8311_v11  ;;  %v8351_v1 = vcombine.low %v8318_v49, %v8318_v49  ;;  %v8352_v54 = vcombine.high %v8318_v49, %v8318_v49  ;;  %v21951_v11 = vld [vmem:[#allocation215_spill] sm:$0xff]  ;;  %v22063_v25 = vld [vmem:[#allocation186_spill] sm:$0xff] }
 0x272   :  { %v2314_v10 = vpop.permute.xlu0 %2313  ;;  %21945 = vst [vmem:[#allocation77_spill] sm:$0xff] %v15110_v50  ;;  %21947 = vst [vmem:[#allocation45_spill] sm:$0xff] %v15116_v35  ;;  %v15135_v47 = vrot.slane %v5512_v42, %v11711_v56  ;;  %v15144_v20 = vrot.slane %v8335_v43, %v11726_v13  ;;  %v15165_v43 = vrot.slane %v7192_v39, %v11726_v13 }
 0x273   :  { %v8319_v31 = vcombine.low %v2307_v29, %v2314_v10  ;;  %v8320_v24 = vcombine.high %v2307_v29, %v2314_v10  ;;  %21948 = vst [vmem:[#allocation343_spill] sm:$0xff] %v15121_v18  ;;  %21949 = vst [vmem:[#allocation455_spill] sm:$0xff] %v15124_v38  ;;  %v5543_v38 = vcombine.low %v15101_v61, %v15101_v61 }
 0x274   :  { %21956 = vst [vmem:[#allocation215_spill] sm:$0xff] %v15144_v20  ;;  %21963 = vst [vmem:[#allocation459_spill] sm:$0xff] %v15165_v43  ;;  %v5575_v39 = vcombine.low %v15135_v47, %v15135_v47  ;;  %v5544_v7 = vcombine.high %v15101_v61, %v15101_v61 }
 0x275   :  { %v8327_v10 = vrot.slane %v8319_v31, %v11711_v56  ;;  %v8334_v29 = vrot.slane %v8320_v24, %v11711_v56  ;;  %v21952_v31 = vld [vmem:[#allocation46_spill] sm:$0xff]  ;;  %v21953_v24 = vld [vmem:[#allocation100_spill] sm:$0xff]  ;;  %v15141_v3 = vpop.permute.xlu1 %2324 }
 0x276   :  { %v2321_v9 = vpop.permute.xlu0 %2320  ;;  %v5600_v6 = vcombine.high %v21952_v31, %v21951_v11  ;;  %v5616_v49 = vcombine.high %v21954_v22, %v21953_v24  ;;  %21955 = vst [vmem:[#allocation344_spill] sm:$0xff] %v15141_v3  ;;  %v15159_v22 = vrot.slane %v8351_v1, %v11726_v13  ;;  %v15177_v1 = vrot.slane %v8352_v54, %v11726_v13 }
 0x277   :  { %v8367_v33 = vcombine.low %v8327_v10, %v8327_v10  ;;  %v8368_v26 = vcombine.high %v8327_v10, %v8327_v10  ;;  %v8383_v53 = vcombine.low %v8334_v29, %v8334_v29  ;;  %v8384_v16 = vcombine.high %v8334_v29, %v8334_v29 }
 0x278   :  { %v15150_v10 = vrot.slane %v8336_v17, %v11726_v13  ;;  %21961 = vst [vmem:[#allocation457_spill] sm:$0xff] %v15159_v22  ;;  %v21965_v17 = vld [vmem:[#allocation304_spill] sm:$0xff]  ;;  %v15190_v24 = vrot.slane %v5600_v6, %v11711_v56  ;;  %v15193_v54 = vrot.slane %v5616_v49, %v11711_v56  ;;  %v15217_v6 = vrot.slane %v5543_v38, %v11726_v13  ;;  %v21976_v22 = vld [vmem:[#allocation231_spill] sm:$0xff] }
 0x279   :  { %v15147_v62 = vrot.slane %v8367_v33, %v11726_v13  ;;  %v15153_v42 = vrot.slane %v8368_v26, %v11726_v13  ;;  %v15156_v29 = vrot.slane %v8383_v53, %v11726_v13  ;;  %v15162_v31 = vrot.slane %v8384_v16, %v11726_v13  ;;  %21966 = vst [vmem:[#allocation304_spill] sm:$0xff] %v15177_v1  ;;  %v15179_v18 = vpop.permute.xlu1 %2331  ;;  %v21975_v1 = vld [vmem:[#allocation83_spill] sm:$0xff] }
 0x27a   :  { %21958 = vst [vmem:[#allocation100_spill] sm:$0xff] %v15150_v10  ;;  %v2328_v11 = vpop.permute.xlu0 %2327  ;;  %v15168_v33 = vrot.slane %v7224_v55, %v11726_v13  ;;  %v4016_v26 = vcombine.high %v21965_v17, %v21965_v17  ;;  %21967 = vst [vmem:[#allocation461_spill] sm:$0xff] %v15179_v18  ;;  %v8823_v49 = vcombine.low %v15141_v3, %v15179_v18  ;;  %v21978_v10 = vld [vmem:[#allocation112_spill] sm:$0xff] }
 0x27b   :  { %21957 = vst [vmem:[#allocation46_spill] sm:$0xff] %v15147_v62  ;;  %21959 = vst [vmem:[#allocation56_spill] sm:$0xff] %v15153_v42  ;;  %v8400_v53 = vcombine.high %v15144_v20, %v15147_v62  ;;  %v8407_v16 = vcombine.low %v2321_v9, %v2328_v11  ;;  %v8408_v44 = vcombine.high %v2321_v9, %v2328_v11 }
 0x27c   :  { %21960 = vst [vmem:[#allocation456_spill] sm:$0xff] %v15156_v29  ;;  %21962 = vst [vmem:[#allocation458_spill] sm:$0xff] %v15162_v31  ;;  %v15222_v9 = vrot.slane %v5575_v39, %v11726_v13  ;;  %v15231_v55 = vrot.slane %v4016_v26, %v11726_v13  ;;  %v21977_v29 = vld [vmem:[#allocation115_spill] sm:$0xff]  ;;  %v7296_v39 = vcombine.high %v21978_v10, %v21978_v10 }
 0x27d   :  { %21964 = vst [vmem:[#allocation460_spill] sm:$0xff] %v15168_v33  ;;  %9121 = vrot.lane.b32.xlu1 %v8400_v53, %s11587_s0  ;;  %v8415_v11 = vrot.slane %v8407_v16, %v11711_v56  ;;  %v15209_v53 = vpop.permute.xlu1 %2338  ;;  %v8422_v17 = vrot.slane %v8408_v44, %v11711_v56  ;;  %21969 = vst [vmem:[#allocation463_spill] sm:$0xff] %v15217_v6  ;;  %v21971_v16 = vcombine.high %v21941_v45, %v21941_v45  ;;  %v21974_v44 = vld [vmem:[#allocation227_spill] sm:$0xff] }
 0x27e   :  { %v2335_v62 = vpop.permute.xlu0 %2334  ;;  %21968 = vst [vmem:[#allocation462_spill] sm:$0xff] %v15209_v53  ;;  %21970 = vst [vmem:[#allocation464_spill] sm:$0xff] %v15222_v9  ;;  %v6120_v38 = vcombine.high %v21975_v1, %v21974_v44  ;;  %v6136_v42 = vcombine.high %v21977_v29, %v21976_v22  ;;  %v21980_v22 = vld [vmem:[#allocation234_spill] sm:$0xff]  ;;  %v15250_v10 = vrot.slane %v8823_v49, %v11711_v56 }
 0x27f   :  { %v15228_v20 = vrot.slane %v21971_v16, %v11726_v13  ;;  %21973 = vst [vmem:[#allocation466_spill] sm:$0xff] %v15231_v55  ;;  %v8439_v43 = vcombine.low %v8415_v11, %v8415_v11  ;;  %v8440_v33 = vcombine.high %v8415_v11, %v8415_v11  ;;  %v8455_v26 = vcombine.low %v8422_v17, %v8422_v17  ;;  %v22120_v55 = vld [vmem:[#allocation349_spill] sm:$0xff] }
 0x280   :  { %21981 = vst [vmem:[#allocation83_spill] sm:$0xff] %v15250_v10  ;;  %v8456_v52 = vcombine.high %v8422_v17, %v8422_v17  ;;  %v15309_v44 = vrot.slane %v6136_v42, %v11711_v56  ;;  %v5336_v42 = vcombine.high %v14857_v14, %v14857_v14  ;;  %v21997_v14 = vcombine.low %v15193_v54, %v15193_v54 }
 0x281   :  { %21972 = vst [vmem:[#allocation465_spill] sm:$0xff] %v15228_v20  ;;  %v15239_v35 = vpop.permute.xlu1 %2345  ;;  %v15263_v49 = vrot.slane %v8440_v33, %v11726_v13  ;;  %v15283_v33 = vrot.slane %v7296_v39, %v11726_v13  ;;  %v22122_v20 = vld [vmem:[#allocation221_spill] sm:$0xff] }
 0x282   :  { %v2342_v31 = vpop.permute.xlu0 %2341  ;;  %21979 = vst [vmem:[#allocation227_spill] sm:$0xff] %v15239_v35  ;;  %v8839_v29 = vcombine.low %v15209_v53, %v15239_v35  ;;  %v15301_v6 = vrot.slane %v8456_v52, %v11726_v13  ;;  %v22000_v52 = vld [vmem:[#allocation9_spill] sm:$0xff] }
 0x283   :  { %v8423_v3 = vcombine.low %v2335_v62, %v2342_v31  ;;  %v8424_v18 = vcombine.high %v2335_v62, %v2342_v31  ;;  %v7328_v62 = vcombine.high %v21980_v22, %v21980_v22  ;;  %v15260_v22 = vrot.slane %v8439_v43, %v11726_v13  ;;  %21984 = vst [vmem:[#allocation112_spill] sm:$0xff] %v15263_v49 }
 0x284   :  { %v15257_v53 = vrot.slane %v8839_v29, %v11711_v56  ;;  %21990 = vst [vmem:[#allocation471_spill] sm:$0xff] %v15283_v33  ;;  %21992 = vst [vmem:[#allocation473_spill] sm:$0xff] %v15301_v6  ;;  %v22045_v33 = vld [vmem:[#allocation15_spill] sm:$0xff] }
 0x285   :  { %v8431_v16 = vrot.slane %v8423_v3, %v11711_v56  ;;  %v8438_v1 = vrot.slane %v8424_v18, %v11711_v56  ;;  %21983 = vst [vmem:[#allocation115_spill] sm:$0xff] %v15260_v22 }
 0x286   :  { %v2349_v31 = vpop.permute.xlu0 %2348  ;;  %21982 = vst [vmem:[#allocation231_spill] sm:$0xff] %v15257_v53 }
 0x287   :  { %v8471_v45 = vcombine.low %v8431_v16, %v8431_v16  ;;  %v8472_v3 = vcombine.high %v8431_v16, %v8431_v16  ;;  %v8487_v59 = vcombine.low %v8438_v1, %v8438_v1  ;;  %v8488_v18 = vcombine.high %v8438_v1, %v8438_v1 }
 0x288   :  { %v15272_v16 = vrot.slane %v8455_v26, %v11726_v13  ;;  %v8855_v1 = vcombine.low %v15250_v10, %v15250_v10  ;;  %v8887_v26 = vcombine.low %v15257_v53, %v15257_v53  ;;  %v15306_v53 = vrot.slane %v6120_v38, %v11711_v56 }
 0x289   :  { %v15266_v35 = vrot.slane %v8471_v45, %v11726_v13  ;;  %v15269_v11 = vrot.slane %v8472_v3, %v11726_v13  ;;  %v15275_v17 = vrot.slane %v8487_v59, %v11726_v13  ;;  %v15280_v29 = vrot.slane %v8488_v18, %v11726_v13 }
 0x28a   :  { %21987 = vst [vmem:[#allocation468_spill] sm:$0xff] %v15272_v16  ;;  %v2356_v43 = vpop.permute.xlu0 %2355  ;;  %v15286_v45 = vrot.slane %v7328_v62, %v11726_v13  ;;  %v8095_v18 = vcombine.low %v14755_v2, %v14797_v32  ;;  %v21995_v38 = vcombine.low %v15190_v24, %v15190_v24  ;;  %v22008_v32 = vld [vmem:[#allocation25_spill] sm:$0xff] }
 0x28b   :  { %21985 = vst [vmem:[#allocation234_spill] sm:$0xff] %v15266_v35  ;;  %21986 = vst [vmem:[#allocation467_spill] sm:$0xff] %v15269_v11  ;;  %v8511_v3 = vcombine.low %v2349_v31, %v2356_v43  ;;  %v8504_v59 = vcombine.high %v15260_v22, %v15266_v35  ;;  %v8512_v39 = vcombine.high %v2349_v31, %v2356_v43 }
 0x28c   :  { %21988 = vst [vmem:[#allocation469_spill] sm:$0xff] %v15275_v17  ;;  %21989 = vst [vmem:[#allocation470_spill] sm:$0xff] %v15280_v29  ;;  %v15324_v22 = vrot.slane %v8855_v1, %v11726_v13  ;;  %v15327_v31 = vrot.slane %v8887_v26, %v11726_v13  ;;  %v5368_v43 = vcombine.high %v14882_v30, %v14882_v30 }
 0x28d   :  { %21991 = vst [vmem:[#allocation472_spill] sm:$0xff] %v15286_v45  ;;  %9123 = vrot.lane.b32.xlu0 %v8504_v59, %s11587_s0  ;;  %v8519_v9 = vrot.slane %v8511_v3, %v11711_v56  ;;  %v15337_v62 = vrot.slane %v21995_v38, %v11726_v13  ;;  %v15343_v1 = vrot.slane %v21997_v14, %v11726_v13  ;;  %v21999_v38 = vld [vmem:[#allocation11_spill] sm:$0xff]  ;;  %v22362_v45 = vld [vmem:[#allocation41_spill] sm:$0xff] }
 0x28e   :  { %v2363_v35 = vpop.permute.xlu0 %2362  ;;  %21993 = vst [vmem:[#allocation474_spill] sm:$0xff] %v15324_v22  ;;  %21994 = vst [vmem:[#allocation475_spill] sm:$0xff] %v15327_v31  ;;  %v4848_v26 = vcombine.high %v14563_v58, %v14563_v58  ;;  %v6167_v59 = vcombine.low %v15306_v53, %v15306_v53  ;;  %v22001_v15 = vcombine.low %v21999_v38, %v22000_v52 }
 0x28f   :  { %21996 = vst [vmem:[#allocation476_spill] sm:$0xff] %v15337_v62  ;;  %21998 = vst [vmem:[#allocation477_spill] sm:$0xff] %v15343_v1  ;;  %v6199_v14 = vcombine.low %v15309_v44, %v15309_v44  ;;  %v15360_v58 = vrot.slane %v8095_v18, %v11711_v56  ;;  %v8111_v30 = vcombine.low %v14839_v57, %v14872_v51  ;;  %v22005_v57 = vld [vmem:[#allocation258_spill] sm:$0xff]  ;;  %v22006_v51 = vld [vmem:[#allocation143_spill] sm:$0xff] }
 0x290   :  { %v8526_v3 = vrot.slane %v8512_v39, %v11711_v56  ;;  %v8543_v29 = vcombine.low %v8519_v9, %v8519_v9  ;;  %v8544_v16 = vcombine.high %v8519_v9, %v8519_v9  ;;  %v15370_v17 = vrot.slane %v5336_v42, %v11726_v13  ;;  %v22007_v9 = vld [vmem:[#allocation27_spill] sm:$0xff] }
 0x291   :  { %9191 = vrot.lane.b32.xlu0 %v22001_v15, %s11588_s20  ;;  %22002 = vst [vmem:[#allocation11_spill] sm:$0xff] %v15360_v58  ;;  %v15373_v18 = vrot.slane %v5368_v43, %v11726_v13  ;;  %v7816_v39 = vcombine.high %v22005_v57, %v22005_v57  ;;  %v7848_v10 = vcombine.high %v22006_v51, %v22006_v51  ;;  %v22014_v57 = vld [vmem:[#allocation50_spill] sm:$0xff] }
 0x292   :  { %v2370_v63 = vpop.permute.xlu0 %2369  ;;  %22003 = vst [vmem:[#allocation9_spill] sm:$0xff] %v15370_v17  ;;  %v22009_v15 = vcombine.low %v22007_v9, %v22008_v32  ;;  %v15386_v42 = vrot.slane %v8111_v30, %v11711_v56  ;;  %v8559_v43 = vcombine.low %v8526_v3, %v8526_v3  ;;  %v8560_v62 = vcombine.high %v8526_v3, %v8526_v3  ;;  %v22015_v17 = vld [vmem:[#allocation48_spill] sm:$0xff] }
 0x293   :  { %v8527_v6 = vcombine.low %v2363_v35, %v2370_v63  ;;  %v8528_v2 = vcombine.high %v2363_v35, %v2370_v63  ;;  %22004 = vst [vmem:[#allocation478_spill] sm:$0xff] %v15373_v18  ;;  %v8127_v51 = vcombine.low %v15360_v58, %v15360_v58  ;;  %v15393_v31 = vrot.slane %v8543_v29, %v11726_v13 }
 0x294   :  { %22010 = vst [vmem:[#allocation258_spill] sm:$0xff] %v15386_v42  ;;  %v22012_v30 = vcombine.high %v14337_v0, %v14337_v0  ;;  %v22016_v58 = vcombine.low %v22014_v57, %v22015_v17  ;;  %v22019_v0 = vcombine.high %v14340_v48, %v14340_v48  ;;  %v22026_v18 = vcombine.high %v14499_v19, %v14499_v19 }
 0x295   :  { %v8535_v63 = vrot.slane %v8527_v6, %v11711_v56  ;;  %v8542_v35 = vrot.slane %v8528_v2, %v11711_v56  ;;  %9195 = vrot.lane.b32.xlu0 %v22009_v15, %s11588_s20  ;;  %22011 = vst [vmem:[#allocation143_spill] sm:$0xff] %v15393_v31  ;;  %v15396_v15 = vrot.slane %v8544_v16, %v11726_v13 }
 0x296   :  { %v15402_v3 = vrot.slane %v22012_v30, %v11726_v13  ;;  %v8159_v30 = vcombine.low %v15386_v42, %v15386_v42  ;;  %v15441_v42 = vrot.slane %v7816_v39, %v11726_v13  ;;  %v15454_v48 = vrot.slane %v22026_v18, %v11726_v13  ;;  %v15520_v18 = vpop.permute.xlu1 %2352 }
 0x297   :  { %v8575_v1 = vcombine.low %v8535_v63, %v8535_v63  ;;  %v8576_v6 = vcombine.high %v8535_v63, %v8535_v63  ;;  %v8591_v22 = vcombine.low %v8542_v35, %v8542_v35  ;;  %v8592_v2 = vcombine.high %v8542_v35, %v8542_v35 }
 0x298   :  { %22013 = vst [vmem:[#allocation27_spill] sm:$0xff] %v15402_v3  ;;  %v15421_v35 = vrot.slane %v22019_v0, %v11726_v13  ;;  %22024 = vst [vmem:[#allocation482_spill] sm:$0xff] %v15441_v42  ;;  %v22028_v0 = vld [vmem:[#allocation79_spill] sm:$0xff]  ;;  %v22209_v3 = vld [vmem:[#allocation308_spill] sm:$0xff] }
 0x299   :  { %9199 = vrot.lane.b32.xlu0 %v22016_v58, %s11588_s20  ;;  %v15409_v63 = vrot.slane %v8575_v1, %v11726_v13  ;;  %v15412_v29 = vrot.slane %v8576_v6, %v11726_v13  ;;  %v15415_v16 = vrot.slane %v8591_v22, %v11726_v13  ;;  %v15426_v58 = vrot.slane %v8559_v43, %v11726_v13 }
 0x29a   :  { %22020 = vst [vmem:[#allocation48_spill] sm:$0xff] %v15421_v35  ;;  %v15429_v1 = vrot.slane %v8560_v62, %v11726_v13  ;;  %v15432_v6 = vrot.slane %v6167_v59, %v11726_v13  ;;  %v15448_v59 = vrot.slane %v8592_v2, %v11726_v13  ;;  %22027 = vst [vmem:[#allocation484_spill] sm:$0xff] %v15454_v48  ;;  %v22046_v2 = vld [vmem:[#allocation13_spill] sm:$0xff]  ;;  %v15560_v50 = vpop.permute.xlu1 %2359  ;;  %v22088_v48 = vld [vmem:[#allocation240_spill] sm:$0xff] }
 0x29b   :  { %22017 = vst [vmem:[#allocation25_spill] sm:$0xff] %v15409_v63  ;;  %22018 = vst [vmem:[#allocation50_spill] sm:$0xff] %v15415_v16  ;;  %v8608_v22 = vcombine.high %v15393_v31, %v15409_v63  ;;  %v22029_v63 = vld [vmem:[#allocation76_spill] sm:$0xff]  ;;  %v15462_v43 = vrot.slane %v7848_v10, %v11726_v13  ;;  %v15465_v62 = vrot.slane %v6199_v14, %v11726_v13  ;;  %v22040_v16 = vld [vmem:[#allocation253_spill] sm:$0xff] }
 0x29c   :  { %22021 = vst [vmem:[#allocation479_spill] sm:$0xff] %v15426_v58  ;;  %22022 = vst [vmem:[#allocation480_spill] sm:$0xff] %v15429_v1  ;;  %v22030_v39 = vcombine.low %v22028_v0, %v22029_v63  ;;  %v15474_v31 = vrot.slane %v4848_v26, %v11726_v13  ;;  %v15479_v10 = vrot.slane %v8127_v51, %v11726_v13  ;;  %v22038_v26 = vld [vmem:[#allocation247_spill] sm:$0xff]  ;;  %v22042_v51 = vld [vmem:[#allocation117_spill] sm:$0xff] }
 0x29d   :  { %22023 = vst [vmem:[#allocation481_spill] sm:$0xff] %v15432_v6  ;;  %22025 = vst [vmem:[#allocation483_spill] sm:$0xff] %v15448_v59  ;;  %9125 = vrot.lane.b32.xlu1 %v8608_v22, %s11587_s0  ;;  %v15482_v14 = vrot.slane %v8159_v30, %v11726_v13  ;;  %v22039_v59 = vld [vmem:[#allocation236_spill] sm:$0xff]  ;;  %v22041_v58 = vld [vmem:[#allocation251_spill] sm:$0xff]  ;;  %v22047_v42 = vcombine.low %v22045_v33, %v22046_v2 }
 0x29e   :  { %9203 = vrot.lane.b32.xlu0 %v22030_v39, %s11588_s20  ;;  %22031 = vst [vmem:[#allocation79_spill] sm:$0xff] %v15462_v43  ;;  %22032 = vst [vmem:[#allocation76_spill] sm:$0xff] %v15465_v62  ;;  %v6224_v1 = vcombine.high %v22039_v59, %v22038_v26  ;;  %v6240_v39 = vcombine.high %v22041_v58, %v22040_v16  ;;  %v22043_v22 = vld [vmem:[#allocation114_spill] sm:$0xff]  ;;  %v22048_v59 = vcombine.high %v14953_v36, %v14953_v36  ;;  %v22069_v6 = vld [vmem:[#allocation211_spill] sm:$0xff]  ;;  %v15594_v61 = vpop.permute.xlu1 %2366 }
 0x29f   :  { %22033 = vst [vmem:[#allocation485_spill] sm:$0xff] %v15474_v31  ;;  %22036 = vst [vmem:[#allocation486_spill] sm:$0xff] %v15479_v10  ;;  %v22044_v30 = vcombine.low %v22042_v51, %v22043_v22  ;;  %v22050_v16 = vcombine.high %v14987_v34, %v14987_v34  ;;  %v7952_v34 = vcombine.high %v14599_v37, %v14599_v37  ;;  %v22056_v37 = vld [vmem:[#allocation38_spill] sm:$0xff]  ;;  %v22091_v10 = vld [vmem:[#allocation132_spill] sm:$0xff] }
 0x2a0   :  { %22037 = vst [vmem:[#allocation487_spill] sm:$0xff] %v15482_v14  ;;  %v15508_v26 = vrot.slane %v22048_v59, %v11726_v13  ;;  %22052 = vst [vmem:[#allocation253_spill] sm:$0xff] %v15520_v18  ;;  %v15537_v19 = vrot.slane %v6224_v1, %v11711_v56  ;;  %v15540_v36 = vrot.slane %v6240_v39, %v11711_v56  ;;  %v22053_v59 = vld [vmem:[#allocation150_spill] sm:$0xff] }
 0x2a1   :  { %9193 = vrot.lane.b32.xlu1 %v22047_v42, %s11588_s20  ;;  %v15514_v58 = vrot.slane %v22050_v16, %v11726_v13  ;;  %v7920_v42 = vcombine.high %v14595_v60, %v14595_v60  ;;  %v22055_v21 = vcombine.low %v22053_v59, %v22054_v5  ;;  %v22057_v16 = vld [vmem:[#allocation36_spill] sm:$0xff]  ;;  %22061 = vst [vmem:[#allocation114_spill] sm:$0xff] %v15560_v50  ;;  %22077 = vst [vmem:[#allocation148_spill] sm:$0xff] %v15594_v61 }
 0x2a2   :  { %9207 = vrot.lane.b32.xlu0 %v22044_v30, %s11588_s20  ;;  %22049 = vst [vmem:[#allocation247_spill] sm:$0xff] %v15508_v26  ;;  %v22058_v41 = vcombine.low %v22056_v37, %v22057_v16  ;;  %v15554_v30 = vrot.slane %v7952_v34, %v11726_v13  ;;  %v6271_v1 = vcombine.low %v15537_v19, %v15537_v19  ;;  %v22084_v26 = vld [vmem:[#allocation259_spill] sm:$0xff] }
 0x2a3   :  { %22051 = vst [vmem:[#allocation236_spill] sm:$0xff] %v15514_v58  ;;  %v15551_v60 = vrot.slane %v7920_v42, %v11726_v13  ;;  %v6303_v39 = vcombine.low %v15540_v36, %v15540_v36  ;;  %v22066_v42 = vld [vmem:[#allocation61_spill] sm:$0xff]  ;;  %v22085_v58 = vld [vmem:[#allocation275_spill] sm:$0xff] }
 0x2a4   :  { %22060 = vst [vmem:[#allocation117_spill] sm:$0xff] %v15554_v30  ;;  %v22068_v34 = vcombine.low %v22066_v42, %v22067_v8  ;;  %v15589_v40 = vrot.slane %v6271_v1, %v11726_v13  ;;  %v22087_v30 = vld [vmem:[#allocation238_spill] sm:$0xff] }
 0x2a5   :  { %9197 = vrot.lane.b32.xlu1 %v22058_v41, %s11588_s20  ;;  %22059 = vst [vmem:[#allocation251_spill] sm:$0xff] %v15551_v60  ;;  %v22065_v41 = vcombine.low %v22063_v25, %v22064_v23  ;;  %v15592_v12 = vrot.slane %v6303_v39, %v11726_v13  ;;  %v22086_v60 = vld [vmem:[#allocation274_spill] sm:$0xff]  ;;  %v22089_v31 = vcombine.low %v22087_v30, %v22088_v48  ;;  %v22098_v48 = vld [vmem:[#allocation413_spill] sm:$0xff] }
 0x2a6   :  { %9211 = vrot.lane.b32.xlu0 %v22055_v21, %s11588_s20  ;;  %v15562_v21 = vpop.permute.xlu0 %9063  ;;  %22075 = vst [vmem:[#allocation13_spill] sm:$0xff] %v15589_v40  ;;  %v6344_v39 = vcombine.high %v22086_v60, %v22085_v58  ;;  %v22095_v58 = vld [vmem:[#allocation45_spill] sm:$0xff]  ;;  %v22096_v60 = vld [vmem:[#allocation452_spill] sm:$0xff]  ;;  %v8056_v30 = vcombine.high %v22098_v48, %v22098_v48  ;;  %v15636_v40 = vpop.permute.xlu1 %2373 }
 0x2a7   :  { %22062 = vst [vmem:[#allocation15_spill] sm:$0xff] %v15562_v21  ;;  %v5576_v21 = vcombine.high %v15135_v47, %v15135_v47  ;;  %22076 = vst [vmem:[#allocation150_spill] sm:$0xff] %v15592_v12  ;;  %v8735_v43 = vcombine.low %v22096_v60, %v22095_v58  ;;  %v22101_v12 = vld [vmem:[#allocation279_spill] sm:$0xff]  ;;  %v22105_v58 = vld [vmem:[#allocation165_spill] sm:$0xff] }
 0x2a8   :  { %22099 = vst [vmem:[#allocation184_spill] sm:$0xff] %v15636_v40 }
 0x2a9   :  { %9201 = vrot.lane.b32.xlu1 %v22068_v34, %s11588_s20  ;;  %v22073_v34 = vld [vmem:[#allocation95_spill] sm:$0xff]  ;;  %v15604_v14 = vrot.slane %v5576_v21, %v11726_v13 }
 0x2aa   :  { %9215 = vrot.lane.b32.xlu0 %v22065_v41, %s11588_s20  ;;  %v22070_v41 = vld [vmem:[#allocation209_spill] sm:$0xff]  ;;  %v22074_v28 = vcombine.low %v22072_v4, %v22073_v34  ;;  %v15596_v46 = vpop.permute.xlu0 %9067  ;;  %v22097_v34 = vld [vmem:[#allocation412_spill] sm:$0xff] }
 0x2ab   :  { %v22071_v62 = vcombine.low %v22069_v6, %v22070_v41  ;;  %22078 = vst [vmem:[#allocation38_spill] sm:$0xff] %v15596_v46  ;;  %22082 = vst [vmem:[#allocation186_spill] sm:$0xff] %v15604_v14  ;;  %v22090_v46 = vld [vmem:[#allocation134_spill] sm:$0xff]  ;;  %v22112_v14 = vld [vmem:[#allocation312_spill] sm:$0xff] }
 0x2ac   :  { %v22092_v47 = vcombine.low %v22090_v46, %v22091_v10  ;;  %v15680_v10 = vpop.permute.xlu1 %9065 }
 0x2ad   :  { %9205 = vrot.lane.b32.xlu1 %v22074_v28, %s11588_s20  ;;  %v22083_v28 = vld [vmem:[#allocation271_spill] sm:$0xff] }
 0x2ae   :  { %9219 = vrot.lane.b32.xlu0 %v22071_v62, %s11588_s20  ;;  %v15601_v62 = vrot.slane %v5544_v7, %v11726_v13  ;;  %v6328_v1 = vcombine.high %v22084_v26, %v22083_v28  ;;  %v22093_v26 = vld [vmem:[#allocation451_spill] sm:$0xff]  ;;  %v22094_v28 = vld [vmem:[#allocation440_spill] sm:$0xff]  ;;  %v15634_v7 = vrot.slane %v6344_v39, %v11711_v56  ;;  %v15638_v21 = vpop.permute.xlu0 %9071  ;;  %22117 = vst [vmem:[#allocation271_spill] sm:$0xff] %v15680_v10 }
 0x2af   :  { %v8719_v27 = vcombine.low %v22094_v28, %v22093_v26  ;;  %22100 = vst [vmem:[#allocation61_spill] sm:$0xff] %v15638_v21  ;;  %v22102_v28 = vld [vmem:[#allocation280_spill] sm:$0xff]  ;;  %v15658_v21 = vrot.slane %v8056_v30, %v11726_v13 }
 0x2b0   :  { %22081 = vst [vmem:[#allocation36_spill] sm:$0xff] %v15601_v62  ;;  %v22103_v60 = vcombine.low %v22101_v12, %v22102_v28  ;;  %v6407_v62 = vcombine.low %v15634_v7, %v15634_v7  ;;  %v22119_v30 = vld [vmem:[#allocation348_spill] sm:$0xff] }
 0x2b1   :  { %9209 = vrot.lane.b32.xlu1 %v22092_v47, %s11588_s20  ;;  %v15631_v47 = vrot.slane %v6328_v1, %v11711_v56  ;;  %v15649_v48 = vrot.slane %v8719_v27, %v11711_v56  ;;  %v15652_v1 = vrot.slane %v8735_v43, %v11711_v56  ;;  %22110 = vst [vmem:[#allocation97_spill] sm:$0xff] %v15658_v21  ;;  %v22114_v43 = vld [vmem:[#allocation198_spill] sm:$0xff] }
 0x2b2   :  { %9223 = vrot.lane.b32.xlu0 %v22089_v31, %s11588_s20  ;;  %v8024_v31 = vcombine.high %v22097_v34, %v22097_v34  ;;  %v22104_v34 = vld [vmem:[#allocation167_spill] sm:$0xff] }
 0x2b3   :  { %v22106_v26 = vcombine.low %v22104_v34, %v22105_v58  ;;  %22107 = vst [vmem:[#allocation59_spill] sm:$0xff] %v15649_v48  ;;  %22108 = vst [vmem:[#allocation211_spill] sm:$0xff] %v15652_v1  ;;  %v22115_v58 = vld [vmem:[#allocation196_spill] sm:$0xff]  ;;  %v8751_v28 = vcombine.low %v15649_v48, %v15649_v48  ;;  %v8783_v12 = vcombine.low %v15652_v1, %v15652_v1  ;;  %v22123_v48 = vld [vmem:[#allocation219_spill] sm:$0xff] }
 0x2b4   :  { %v15655_v39 = vrot.slane %v8024_v31, %v11726_v13  ;;  %v22116_v34 = vcombine.low %v22114_v43, %v22115_v58  ;;  %v5648_v58 = vcombine.high %v15190_v24, %v15190_v24  ;;  %v22121_v31 = vcombine.low %v22119_v30, %v22120_v55  ;;  %v22136_v30 = vld [vmem:[#allocation84_spill] sm:$0xff] }
 0x2b5   :  { %9213 = vrot.lane.b32.xlu1 %v22106_v26, %s11588_s20  ;;  %v22111_v26 = vld [vmem:[#allocation311_spill] sm:$0xff]  ;;  %v15703_v24 = vrot.slane %v8751_v28, %v11726_v13  ;;  %v15720_v28 = vpop.permute.xlu1 %9069  ;;  %v22143_v1 = vld [vmem:[#allocation264_spill] sm:$0xff] }
 0x2b6   :  { %9227 = vrot.lane.b32.xlu0 %v22103_v60, %s11588_s20  ;;  %22109 = vst [vmem:[#allocation209_spill] sm:$0xff] %v15655_v39  ;;  %v6375_v60 = vcombine.low %v15631_v47, %v15631_v47  ;;  %v22113_v27 = vcombine.low %v22111_v26, %v22112_v14  ;;  %v22124_v39 = vcombine.low %v22122_v20, %v22123_v48  ;;  %v22134_v48 = vld [vmem:[#allocation276_spill] sm:$0xff]  ;;  %v22140_v26 = vld [vmem:[#allocation379_spill] sm:$0xff] }
 0x2b7   :  { %22127 = vst [vmem:[#allocation134_spill] sm:$0xff] %v15703_v24  ;;  %v15711_v55 = vrot.slane %v5648_v58, %v11726_v13  ;;  %v22142_v58 = vld [vmem:[#allocation260_spill] sm:$0xff] }
 0x2b8   :  { %v15697_v10 = vrot.slane %v6375_v60, %v11726_v13  ;;  %v22133_v60 = vld [vmem:[#allocation287_spill] sm:$0xff]  ;;  %v22154_v24 = vld [vmem:[#allocation444_spill] sm:$0xff] }
 0x2b9   :  { %9217 = vrot.lane.b32.xlu1 %v22116_v34, %s11588_s20  ;;  %v5680_v34 = vcombine.high %v15193_v54, %v15193_v54  ;;  %v15706_v54 = vrot.slane %v8783_v12, %v11726_v13  ;;  %22131 = vst [vmem:[#allocation413_spill] sm:$0xff] %v15711_v55  ;;  %v6432_v20 = vcombine.high %v22134_v48, %v22133_v60  ;;  %22137 = vst [vmem:[#allocation287_spill] sm:$0xff] %v15720_v28  ;;  %v22139_v12 = vld [vmem:[#allocation378_spill] sm:$0xff]  ;;  %v22149_v48 = vld [vmem:[#allocation295_spill] sm:$0xff] }
 0x2ba   :  { %9231 = vrot.lane.b32.xlu0 %v22113_v27, %s11588_s20  ;;  %v15682_v27 = vpop.permute.xlu0 %9075  ;;  %22125 = vst [vmem:[#allocation275_spill] sm:$0xff] %v15697_v10  ;;  %v22146_v28 = vld [vmem:[#allocation418_spill] sm:$0xff]  ;;  %v22157_v55 = vld [vmem:[#allocation327_spill] sm:$0xff] }
 0x2bb   :  { %22118 = vst [vmem:[#allocation259_spill] sm:$0xff] %v15682_v27  ;;  %v15700_v27 = vrot.slane %v6407_v62, %v11726_v13  ;;  %22128 = vst [vmem:[#allocation412_spill] sm:$0xff] %v15706_v54  ;;  %v22135_v62 = vld [vmem:[#allocation288_spill] sm:$0xff]  ;;  %v22153_v60 = vld [vmem:[#allocation442_spill] sm:$0xff] }
 0x2bc   :  { %v6448_v43 = vcombine.high %v22136_v30, %v22135_v62  ;;  %v15739_v62 = vrot.slane %v6432_v20, %v11711_v56  ;;  %v15752_v30 = vpop.permute.xlu1 %9073  ;;  %v22155_v54 = vcombine.low %v22153_v60, %v22154_v24 }
 0x2bd   :  { %9221 = vrot.lane.b32.xlu1 %v22124_v39, %s11588_s20  ;;  %22126 = vst [vmem:[#allocation274_spill] sm:$0xff] %v15700_v27  ;;  %v15714_v39 = vrot.slane %v5680_v34, %v11726_v13  ;;  %v22144_v34 = vcombine.low %v22142_v58, %v22143_v1  ;;  %22151 = vst [vmem:[#allocation288_spill] sm:$0xff] %v15752_v30  ;;  %v22179_v30 = vld [vmem:[#allocation397_spill] sm:$0xff] }
 0x2be   :  { %9235 = vrot.lane.b32.xlu0 %v22121_v31, %s11588_s20  ;;  %v15722_v14 = vpop.permute.xlu0 %9079  ;;  %v22141_v31 = vcombine.low %v22139_v12, %v22140_v26  ;;  %v6479_v20 = vcombine.low %v15739_v62, %v15739_v62 }
 0x2bf   :  { %22132 = vst [vmem:[#allocation488_spill] sm:$0xff] %v15714_v39  ;;  %22138 = vst [vmem:[#allocation276_spill] sm:$0xff] %v15722_v14  ;;  %v15742_v14 = vrot.slane %v6448_v43, %v11711_v56 }
 0x2c1   :  { %9225 = vrot.lane.b32.xlu1 %v22144_v34, %s11588_s20  ;;  %v22148_v34 = vld [vmem:[#allocation294_spill] sm:$0xff]  ;;  %v6511_v43 = vcombine.low %v15742_v14, %v15742_v14 }
 0x2c2   :  { %9239 = vrot.lane.b32.xlu0 %v22141_v31, %s11588_s20  ;;  %v22145_v31 = vld [vmem:[#allocation416_spill] sm:$0xff]  ;;  %v22150_v10 = vcombine.low %v22148_v34, %v22149_v48  ;;  %v15754_v27 = vpop.permute.xlu0 %9083  ;;  %v6200_v34 = vcombine.high %v15309_v44, %v15309_v44  ;;  %v15787_v48 = vrot.slane %v6479_v20, %v11726_v13  ;;  %v22177_v20 = vcombine.high %v21999_v38, %v22000_v52  ;;  %v22183_v38 = vld [vmem:[#allocation322_spill] sm:$0xff] }
 0x2c3   :  { %v22147_v21 = vcombine.low %v22145_v31, %v22146_v28  ;;  %22152 = vst [vmem:[#allocation84_spill] sm:$0xff] %v15754_v27  ;;  %v6168_v27 = vcombine.high %v15306_v53, %v15306_v53  ;;  %v15774_v28 = vpop.permute.xlu1 %9077  ;;  %v15790_v53 = vrot.slane %v6511_v43, %v11726_v13  ;;  %v22178_v43 = vld [vmem:[#allocation396_spill] sm:$0xff] }
 0x2c4   :  { %22161 = vst [vmem:[#allocation378_spill] sm:$0xff] %v15774_v28  ;;  %22167 = vst [vmem:[#allocation260_spill] sm:$0xff] %v15787_v48  ;;  %v15798_v28 = vrot.slane %v6200_v34, %v11726_v13  ;;  %v22185_v48 = vcombine.high %v22007_v9, %v22008_v32 }
 0x2c5   :  { %9229 = vrot.lane.b32.xlu1 %v22150_v10, %s11588_s20  ;;  %22168 = vst [vmem:[#allocation264_spill] sm:$0xff] %v15790_v53 }
 0x2c6   :  { %9243 = vrot.lane.b32.xlu0 %v22147_v21, %s11588_s20  ;;  %v22156_v21 = vld [vmem:[#allocation325_spill] sm:$0xff]  ;;  %v15776_v31 = vpop.permute.xlu0 %9087  ;;  %22172 = vst [vmem:[#allocation444_spill] sm:$0xff] %v15798_v28 }
 0x2c7   :  { %v22158_v39 = vcombine.low %v22156_v21, %v22157_v55  ;;  %22162 = vst [vmem:[#allocation379_spill] sm:$0xff] %v15776_v31  ;;  %v22165_v55 = vld [vmem:[#allocation365_spill] sm:$0xff]  ;;  %v15795_v31 = vrot.slane %v6168_v27, %v11726_v13  ;;  %v22180_v27 = vcombine.low %v22178_v43, %v22179_v30 }
 0x2c9   :  { %9233 = vrot.lane.b32.xlu1 %v22158_v39, %s11588_s20  ;;  %v22164_v39 = vld [vmem:[#allocation364_spill] sm:$0xff]  ;;  %22171 = vst [vmem:[#allocation442_spill] sm:$0xff] %v15795_v31 }
 0x2ca   :  { %9247 = vrot.lane.b32.xlu0 %v22155_v54, %s11588_s20  ;;  %v22163_v54 = vcombine.low %v15263_v49, %v15269_v11  ;;  %v22166_v21 = vcombine.low %v22164_v39, %v22165_v55  ;;  %v22174_v11 = vld [vmem:[#allocation291_spill] sm:$0xff]  ;;  %v22175_v55 = vld [vmem:[#allocation305_spill] sm:$0xff]  ;;  %v15822_v52 = vpop.permute.xlu0 %9091 }
 0x2cb   :  { %22182 = vst [vmem:[#allocation291_spill] sm:$0xff] %v15822_v52  ;;  %v22187_v52 = vld [vmem:[#allocation429_spill] sm:$0xff] }
 0x2cd   :  { %9237 = vrot.lane.b32.xlu1 %v22166_v21, %s11588_s20  ;;  %v22176_v21 = vld [vmem:[#allocation303_spill] sm:$0xff] }
 0x2ce   :  { %9251 = vrot.lane.b32.xlu0 %v22163_v54, %s11588_s20  ;;  %v22173_v54 = vld [vmem:[#allocation302_spill] sm:$0xff]  ;;  %v6968_v39 = vcombine.high %v22176_v21, %v22175_v55  ;;  %v8927_v55 = vcombine.low %v15520_v18, %v15560_v50  ;;  %v15820_v21 = vpop.permute.xlu1 %9081 }
 0x2cf   :  { %v6952_v49 = vcombine.high %v22174_v11, %v22173_v54  ;;  %v8943_v54 = vcombine.low %v15594_v61, %v15636_v40  ;;  %22181 = vst [vmem:[#allocation302_spill] sm:$0xff] %v15820_v21  ;;  %v22186_v21 = vld [vmem:[#allocation307_spill] sm:$0xff]  ;;  %v22210_v40 = vld [vmem:[#allocation181_spill] sm:$0xff] }
 0x2d0   :  { %v15832_v11 = vrot.slane %v6968_v39, %v11711_v56  ;;  %v22188_v53 = vcombine.low %v22186_v21, %v22187_v52 }
 0x2d1   :  { %9241 = vrot.lane.b32.xlu1 %v22180_v27, %s11588_s20  ;;  %v22184_v27 = vld [vmem:[#allocation439_spill] sm:$0xff]  ;;  %v15829_v34 = vrot.slane %v6952_v49, %v11711_v56 }
 0x2d2   :  { %9319 = vrot.lane.b32.xlu0 %v22177_v20, %s11589_s21  ;;  %v8648_v20 = vcombine.high %v22183_v38, %v22183_v38  ;;  %v8680_v44 = vcombine.high %v22184_v27, %v22184_v27  ;;  %v15843_v38 = vrot.slane %v8927_v55, %v11711_v56  ;;  %v15846_v27 = vrot.slane %v8943_v54, %v11711_v56  ;;  %v22194_v54 = vld [vmem:[#allocation100_spill] sm:$0xff] }
 0x2d3   :  { %v6999_v32 = vcombine.low %v15829_v34, %v15829_v34  ;;  %v7031_v9 = vcombine.low %v15832_v11, %v15832_v11  ;;  %v22193_v55 = vcombine.high %v22014_v57, %v22015_v17  ;;  %v6304_v57 = vcombine.high %v15540_v36, %v15540_v36 }
 0x2d4   :  { %v15849_v49 = vrot.slane %v8648_v20, %v11726_v13  ;;  %v15852_v39 = vrot.slane %v8680_v44, %v11726_v13  ;;  %v22195_v20 = vld [vmem:[#allocation56_spill] sm:$0xff]  ;;  %v8991_v17 = vcombine.low %v15846_v27, %v15846_v27 }
 0x2d5   :  { %9245 = vrot.lane.b32.xlu1 %v22188_v53, %s11588_s20  ;;  %v15860_v53 = vpop.permute.xlu0 %9095  ;;  %v22196_v44 = vcombine.low %v22194_v54, %v22195_v20  ;;  %v15894_v10 = vrot.slane %v7031_v9, %v11726_v13  ;;  %v22208_v9 = vld [vmem:[#allocation319_spill] sm:$0xff] }
 0x2d6   :  { %9323 = vrot.lane.b32.xlu0 %v22185_v48, %s11589_s21  ;;  %22189 = vst [vmem:[#allocation305_spill] sm:$0xff] %v15849_v49  ;;  %22190 = vst [vmem:[#allocation303_spill] sm:$0xff] %v15852_v39  ;;  %v15858_v48 = vpop.permute.xlu1 %9085 }
 0x2d7   :  { %22191 = vst [vmem:[#allocation396_spill] sm:$0xff] %v15858_v48  ;;  %22192 = vst [vmem:[#allocation397_spill] sm:$0xff] %v15860_v53  ;;  %v6272_v48 = vcombine.high %v15537_v19, %v15537_v19  ;;  %v8959_v53 = vcombine.low %v15843_v38, %v15843_v38  ;;  %v15891_v19 = vrot.slane %v6999_v32, %v11726_v13 }
 0x2d8   :  { %22200 = vst [vmem:[#allocation439_spill] sm:$0xff] %v15894_v10  ;;  %v15912_v32 = vrot.slane %v6304_v57, %v11726_v13 }
 0x2d9   :  { %9249 = vrot.lane.b32.xlu1 %v22196_v44, %s11588_s20  ;;  %v22198_v44 = vcombine.low %v15396_v15, %v15412_v29  ;;  %22199 = vst [vmem:[#allocation322_spill] sm:$0xff] %v15891_v19  ;;  %v15898_v35 = vpop.permute.xlu0 %9099  ;;  %v15901_v36 = vrot.slane %v8959_v53, %v11726_v13  ;;  %v22212_v53 = vcombine.high %v22042_v51, %v22043_v22 }
 0x2da   :  { %9327 = vrot.lane.b32.xlu0 %v22193_v55, %s11589_s21  ;;  %v22197_v55 = vcombine.high %v22028_v0, %v22029_v63  ;;  %v15896_v61 = vpop.permute.xlu1 %9089  ;;  %22202 = vst [vmem:[#allocation429_spill] sm:$0xff] %v15898_v35  ;;  %v15904_v63 = vrot.slane %v8991_v17, %v11726_v13  ;;  %22207 = vst [vmem:[#allocation490_spill] sm:$0xff] %v15912_v32  ;;  %v22211_v35 = vld [vmem:[#allocation320_spill] sm:$0xff]  ;;  %v22213_v17 = vcombine.high %v22045_v33, %v22046_v2 }
 0x2db   :  { %22201 = vst [vmem:[#allocation307_spill] sm:$0xff] %v15896_v61  ;;  %22203 = vst [vmem:[#allocation100_spill] sm:$0xff] %v15901_v36  ;;  %v7056_v61 = vcombine.high %v22209_v3, %v22208_v9  ;;  %v7072_v18 = vcombine.high %v22211_v35, %v22210_v40  ;;  %v22216_v33 = vcombine.high %v22053_v59, %v22054_v5  ;;  %v22245_v3 = vld [vmem:[#allocation231_spill] sm:$0xff]  ;;  %v22364_v0 = vld [vmem:[#allocation152_spill] sm:$0xff] }
 0x2dc   :  { %22204 = vst [vmem:[#allocation56_spill] sm:$0xff] %v15904_v63  ;;  %v22217_v2 = vcombine.high %v22056_v37, %v22057_v16  ;;  %v22218_v9 = vcombine.high %v22063_v25, %v22064_v23  ;;  %v22219_v5 = vcombine.high %v22066_v42, %v22067_v8  ;;  %v6376_v37 = vcombine.high %v15631_v47, %v15631_v47  ;;  %v22225_v8 = vld [vmem:[#allocation95_spill] sm:$0xff]  ;;  %v22375_v36 = vld [vmem:[#allocation98_spill] sm:$0xff]  ;;  %v22376_v63 = vld [vmem:[#allocation101_spill] sm:$0xff] }
 0x2dd   :  { %9253 = vrot.lane.b32.xlu1 %v22198_v44, %s11588_s20  ;;  %v15909_v44 = vrot.slane %v6272_v48, %v11726_v13  ;;  %v15933_v40 = vrot.slane %v7056_v61, %v11711_v56  ;;  %v15936_v35 = vrot.slane %v7072_v18, %v11711_v56  ;;  %v15940_v51 = vpop.permute.xlu0 %9103  ;;  %v22224_v23 = vcombine.high %v22069_v6, %v22070_v41  ;;  %v22233_v41 = vld [vmem:[#allocation334_spill] sm:$0xff] }
 0x2de   :  { %9331 = vrot.lane.b32.xlu0 %v22197_v55, %s11589_s21  ;;  %v15938_v22 = vpop.permute.xlu1 %9093  ;;  %22215 = vst [vmem:[#allocation308_spill] sm:$0xff] %v15940_v51  ;;  %v22226_v25 = vcombine.high %v22072_v4, %v22225_v8  ;;  %v22235_v4 = vld [vmem:[#allocation224_spill] sm:$0xff]  ;;  %v22236_v8 = vld [vmem:[#allocation335_spill] sm:$0xff]  ;;  %v8888_v59 = vcombine.high %v22245_v3, %v22245_v3  ;;  %v3619_v50 = vcombine.low %v22376_v63, %v22375_v36 }
 0x2df   :  { %22206 = vst [vmem:[#allocation489_spill] sm:$0xff] %v15909_v44  ;;  %22214 = vst [vmem:[#allocation319_spill] sm:$0xff] %v15938_v22  ;;  %v7103_v61 = vcombine.low %v15933_v40, %v15933_v40  ;;  %v7135_v18 = vcombine.low %v15936_v35, %v15936_v35  ;;  %v22240_v55 = vld [vmem:[#allocation240_spill] sm:$0xff]  ;;  %v22321_v22 = vld [vmem:[#allocation375_spill] sm:$0xff]  ;;  %v7136_v19 = vcombine.high %v15936_v35, %v15936_v35 }
 0x2e0   :  { %v16040_v3 = vrot.slane %v8888_v59, %v11726_v13  ;;  %v22270_v59 = vld [vmem:[#allocation219_spill] sm:$0xff] }
 0x2e1   :  { %9321 = vrot.lane.b32.xlu1 %v22213_v17, %s11589_s21  ;;  %v15981_v42 = vrot.slane %v7103_v61, %v11726_v13  ;;  %v15984_v47 = vrot.slane %v7135_v18, %v11726_v13  ;;  %v22239_v18 = vld [vmem:[#allocation238_spill] sm:$0xff] }
 0x2e2   :  { %9335 = vrot.lane.b32.xlu0 %v22212_v53, %s11589_s21  ;;  %v15966_v17 = vpop.permute.xlu1 %9097  ;;  %v22241_v16 = vcombine.high %v22239_v18, %v22240_v55  ;;  %v22247_v18 = vld [vmem:[#allocation280_spill] sm:$0xff]  ;;  %22255 = vst [vmem:[#allocation240_spill] sm:$0xff] %v16040_v3  ;;  %v22673_v3 = vld [vmem:[#allocation226_spill] sm:$0xff] }
 0x2e3   :  { %22222 = vst [vmem:[#allocation181_spill] sm:$0xff] %v15966_v17  ;;  %22227 = vst [vmem:[#allocation95_spill] sm:$0xff] %v15981_v42 }
 0x2e4   :  { %22228 = vst [vmem:[#allocation491_spill] sm:$0xff] %v15984_v47 }
 0x2e5   :  { %9325 = vrot.lane.b32.xlu1 %v22217_v2, %s11589_s21  ;;  %v6408_v2 = vcombine.high %v15634_v7, %v15634_v7  ;;  %v15989_v7 = vrot.slane %v6376_v37, %v11726_v13  ;;  %v22242_v37 = vld [vmem:[#allocation132_spill] sm:$0xff] }
 0x2e6   :  { %9339 = vrot.lane.b32.xlu0 %v22216_v33, %s11589_s21  ;;  %v15968_v33 = vpop.permute.xlu0 %9107  ;;  %v15998_v61 = vpop.permute.xlu1 %9101 }
 0x2e7   :  { %22223 = vst [vmem:[#allocation320_spill] sm:$0xff] %v15968_v33  ;;  %22231 = vst [vmem:[#allocation492_spill] sm:$0xff] %v15989_v7  ;;  %v15992_v6 = vrot.slane %v6408_v2, %v11726_v13  ;;  %v22243_v2 = vcombine.high %v22090_v46, %v22242_v37  ;;  %v22246_v46 = vld [vmem:[#allocation279_spill] sm:$0xff] }
 0x2e8   :  { %22237 = vst [vmem:[#allocation334_spill] sm:$0xff] %v15998_v61  ;;  %v22248_v37 = vcombine.high %v22246_v46, %v22247_v18  ;;  %v22256_v18 = vld [vmem:[#allocation311_spill] sm:$0xff] }
 0x2e9   :  { %9329 = vrot.lane.b32.xlu1 %v22219_v5, %s11589_s21  ;;  %22232 = vst [vmem:[#allocation493_spill] sm:$0xff] %v15992_v6 }
 0x2ea   :  { %9343 = vrot.lane.b32.xlu0 %v22218_v9, %s11589_s21  ;;  %v16000_v48 = vpop.permute.xlu0 %9111 }
 0x2ed   :  { %9333 = vrot.lane.b32.xlu1 %v22226_v25, %s11589_s21  ;;  %v7176_v25 = vcombine.high %v22236_v8, %v22235_v4  ;;  %v22244_v4 = vld [vmem:[#allocation83_spill] sm:$0xff] }
 0x2ee   :  { %9347 = vrot.lane.b32.xlu0 %v22224_v23, %s11589_s21  ;;  %v22234_v23 = vld [vmem:[#allocation323_spill] sm:$0xff]  ;;  %v8856_v8 = vcombine.high %v22244_v4, %v22244_v4  ;;  %v16032_v4 = vpop.permute.xlu1 %9105  ;;  %v16034_v53 = vpop.permute.xlu0 %9115 }
 0x2ef   :  { %v7160_v57 = vcombine.high %v22234_v23, %v22233_v41  ;;  %22238 = vst [vmem:[#allocation323_spill] sm:$0xff] %v16000_v48  ;;  %v22250_v23 = vld [vmem:[#allocation165_spill] sm:$0xff]  ;;  %22252 = vst [vmem:[#allocation224_spill] sm:$0xff] %v16032_v4  ;;  %v6480_v4 = vcombine.high %v15739_v62, %v15739_v62 }
 0x2f0   :  { %22253 = vst [vmem:[#allocation335_spill] sm:$0xff] %v16034_v53 }
 0x2f1   :  { %9337 = vrot.lane.b32.xlu1 %v22243_v2, %s11589_s21  ;;  %v16019_v55 = vrot.slane %v7160_v57, %v11711_v56  ;;  %v22249_v2 = vld [vmem:[#allocation167_spill] sm:$0xff]  ;;  %v16037_v57 = vrot.slane %v8856_v8, %v11726_v13  ;;  %v16085_v61 = vrot.slane %v6480_v4, %v11726_v13 }
 0x2f2   :  { %9351 = vrot.lane.b32.xlu0 %v22241_v16, %s11589_s21  ;;  %v16022_v16 = vrot.slane %v7176_v25, %v11711_v56  ;;  %v22251_v41 = vcombine.high %v22249_v2, %v22250_v23  ;;  %v22257_v23 = vld [vmem:[#allocation312_spill] sm:$0xff]  ;;  %v16060_v51 = vpop.permute.xlu0 %9119 }
 0x2f3   :  { %22254 = vst [vmem:[#allocation238_spill] sm:$0xff] %v16037_v57  ;;  %v7207_v25 = vcombine.low %v16019_v55, %v16019_v55  ;;  %v22260_v2 = vld [vmem:[#allocation196_spill] sm:$0xff]  ;;  %22264 = vst [vmem:[#allocation132_spill] sm:$0xff] %v16060_v51  ;;  %v22361_v51 = vld [vmem:[#allocation39_spill] sm:$0xff] }
 0x2f4   :  { %v7239_v46 = vcombine.low %v16022_v16, %v16022_v16  ;;  %22277 = vst [vmem:[#allocation167_spill] sm:$0xff] %v16085_v61  ;;  %v22390_v61 = vld [vmem:[#allocation393_spill] sm:$0xff]  ;;  %v22674_v57 = vld [vmem:[#allocation223_spill] sm:$0xff] }
 0x2f5   :  { %9341 = vrot.lane.b32.xlu1 %v22251_v41, %s11589_s21  ;;  %v22258_v41 = vcombine.high %v22256_v18, %v22257_v23  ;;  %v6512_v18 = vcombine.high %v15742_v14, %v15742_v14  ;;  %v16064_v23 = vpop.permute.xlu1 %9109  ;;  %v16075_v33 = vrot.slane %v7207_v25, %v11726_v13  ;;  %v22282_v25 = vld [vmem:[#allocation361_spill] sm:$0xff]  ;;  %v22367_v14 = vld [vmem:[#allocation62_spill] sm:$0xff] }
 0x2f6   :  { %9355 = vrot.lane.b32.xlu0 %v22248_v37, %s11589_s21  ;;  %v22259_v37 = vld [vmem:[#allocation198_spill] sm:$0xff]  ;;  %22265 = vst [vmem:[#allocation83_spill] sm:$0xff] %v16064_v23  ;;  %v16078_v62 = vrot.slane %v7239_v46, %v11726_v13  ;;  %v22283_v46 = vcombine.high %v22139_v12, %v22140_v26  ;;  %v22284_v23 = vcombine.high %v22142_v58, %v22143_v1  ;;  %v22287_v12 = vld [vmem:[#allocation416_spill] sm:$0xff] }
 0x2f7   :  { %v22261_v53 = vcombine.high %v22259_v37, %v22260_v2  ;;  %v22267_v37 = vld [vmem:[#allocation349_spill] sm:$0xff]  ;;  %22272 = vst [vmem:[#allocation231_spill] sm:$0xff] %v16075_v33  ;;  %v22288_v1 = vld [vmem:[#allocation418_spill] sm:$0xff] }
 0x2f8   :  { %v22269_v2 = vld [vmem:[#allocation221_spill] sm:$0xff]  ;;  %22273 = vst [vmem:[#allocation279_spill] sm:$0xff] %v16078_v62  ;;  %v22289_v58 = vcombine.high %v22287_v12, %v22288_v1  ;;  %v22295_v12 = vcombine.high %v22153_v60, %v22154_v24  ;;  %v22303_v24 = vld [vmem:[#allocation112_spill] sm:$0xff]  ;;  %v22304_v60 = vld [vmem:[#allocation467_spill] sm:$0xff] }
 0x2f9   :  { %9345 = vrot.lane.b32.xlu1 %v22261_v53, %s11589_s21  ;;  %v22271_v8 = vcombine.high %v22269_v2, %v22270_v59  ;;  %v22280_v59 = vld [vmem:[#allocation345_spill] sm:$0xff]  ;;  %v22341_v62 = vld [vmem:[#allocation82_spill] sm:$0xff] }
 0x2fa   :  { %9359 = vrot.lane.b32.xlu0 %v22258_v41, %s11589_s21  ;;  %v22266_v41 = vld [vmem:[#allocation348_spill] sm:$0xff]  ;;  %v22296_v1 = vld [vmem:[#allocation325_spill] sm:$0xff] }
 0x2fb   :  { %v22268_v53 = vcombine.high %v22266_v41, %v22267_v37  ;;  %v16088_v41 = vrot.slane %v6512_v18, %v11726_v13  ;;  %v22279_v37 = vld [vmem:[#allocation356_spill] sm:$0xff] }
 0x2fd   :  { %9349 = vrot.lane.b32.xlu1 %v22271_v8, %s11589_s21  ;;  %22278 = vst [vmem:[#allocation165_spill] sm:$0xff] %v16088_v41  ;;  %v7264_v8 = vcombine.high %v22280_v59, %v22279_v37  ;;  %v16106_v37 = vpop.permute.xlu1 %9113 }
 0x2fe   :  { %9363 = vrot.lane.b32.xlu0 %v22268_v53, %s11589_s21  ;;  %v22281_v53 = vld [vmem:[#allocation121_spill] sm:$0xff]  ;;  %22285 = vst [vmem:[#allocation311_spill] sm:$0xff] %v16106_v37  ;;  %v7032_v37 = vcombine.high %v15832_v11, %v15832_v11  ;;  %v22313_v11 = vld [vmem:[#allocation16_spill] sm:$0xff] }
 0x2ff   :  { %v16080_v48 = vpop.permute.xlu0 %9123  ;;  %v7280_v2 = vcombine.high %v22282_v25, %v22281_v53  ;;  %v16111_v53 = vrot.slane %v7264_v8, %v11711_v56  ;;  %v22291_v25 = vld [vmem:[#allocation295_spill] sm:$0xff] }
 0x300   :  { %22274 = vst [vmem:[#allocation280_spill] sm:$0xff] %v16080_v48  ;;  %v16180_v42 = vrot.slane %v7032_v37, %v11726_v13  ;;  %v22327_v37 = vld [vmem:[#allocation29_spill] sm:$0xff] }
 0x301   :  { %9353 = vrot.lane.b32.xlu1 %v22284_v23, %s11589_s21  ;;  %v16114_v26 = vrot.slane %v7280_v2, %v11711_v56  ;;  %v22290_v23 = vld [vmem:[#allocation294_spill] sm:$0xff]  ;;  %v16124_v18 = vpop.permute.xlu1 %9117  ;;  %v7311_v8 = vcombine.low %v16111_v53, %v16111_v53 }
 0x302   :  { %9367 = vrot.lane.b32.xlu0 %v22283_v46, %s11589_s21  ;;  %v22292_v46 = vcombine.high %v22290_v23, %v22291_v25  ;;  %22293 = vst [vmem:[#allocation198_spill] sm:$0xff] %v16124_v18  ;;  %22322 = vst [vmem:[#allocation361_spill] sm:$0xff] %v16180_v42 }
 0x303   :  { %v16108_v59 = vpop.permute.xlu0 %9191  ;;  %v7343_v2 = vcombine.low %v16114_v26, %v16114_v26 }
 0x304   :  { %22286 = vst [vmem:[#allocation312_spill] sm:$0xff] %v16108_v59  ;;  %v16159_v59 = vrot.slane %v7311_v8, %v11726_v13 }
 0x305   :  { %9357 = vrot.lane.b32.xlu1 %v22292_v46, %s11589_s21  ;;  %v16144_v48 = vpop.permute.xlu1 %9121  ;;  %v22314_v46 = vld [vmem:[#allocation17_spill] sm:$0xff] }
 0x306   :  { %9371 = vrot.lane.b32.xlu0 %v22289_v58, %s11589_s21  ;;  %v22297_v58 = vld [vmem:[#allocation327_spill] sm:$0xff]  ;;  %22301 = vst [vmem:[#allocation348_spill] sm:$0xff] %v16144_v48  ;;  %22309 = vst [vmem:[#allocation221_spill] sm:$0xff] %v16159_v59 }
 0x307   :  { %v16126_v4 = vpop.permute.xlu0 %9195  ;;  %v22298_v23 = vcombine.high %v22296_v1, %v22297_v58  ;;  %v22306_v1 = vld [vmem:[#allocation364_spill] sm:$0xff]  ;;  %v22307_v58 = vld [vmem:[#allocation365_spill] sm:$0xff] }
 0x308   :  { %22294 = vst [vmem:[#allocation196_spill] sm:$0xff] %v16126_v4  ;;  %v7000_v4 = vcombine.high %v15829_v34, %v15829_v34  ;;  %v16162_v34 = vrot.slane %v7343_v2, %v11726_v13 }
 0x309   :  { %9361 = vrot.lane.b32.xlu1 %v22298_v23, %s11589_s21  ;;  %v22308_v23 = vcombine.high %v22306_v1, %v22307_v58  ;;  %v22318_v1 = vld [vmem:[#allocation372_spill] sm:$0xff]  ;;  %v22319_v58 = vld [vmem:[#allocation235_spill] sm:$0xff] }
 0x30a   :  { %9375 = vrot.lane.b32.xlu0 %v22295_v12, %s11589_s21  ;;  %v22305_v12 = vcombine.high %v22303_v24, %v22304_v60  ;;  %22310 = vst [vmem:[#allocation219_spill] sm:$0xff] %v16162_v34  ;;  %v16173_v17 = vrot.slane %v7000_v4, %v11726_v13  ;;  %v7784_v8 = vcombine.high %v22319_v58, %v22318_v1  ;;  %v22332_v4 = vld [vmem:[#allocation52_spill] sm:$0xff] }
 0x30b   :  { %v16146_v18 = vpop.permute.xlu0 %9199  ;;  %v7104_v34 = vcombine.high %v15933_v40, %v15933_v40  ;;  %v7240_v60 = vcombine.high %v16022_v16, %v16022_v16  ;;  %v22381_v16 = vld [vmem:[#allocation135_spill] sm:$0xff] }
 0x30c   :  { %22302 = vst [vmem:[#allocation349_spill] sm:$0xff] %v16146_v18  ;;  %v2475_v18 = vcombine.low %v22314_v46, %v22313_v11  ;;  %22317 = vst [vmem:[#allocation121_spill] sm:$0xff] %v16173_v17  ;;  %v22386_v17 = vld [vmem:[#allocation241_spill] sm:$0xff] }
 0x30d   :  { %9365 = vrot.lane.b32.xlu1 %v22308_v23, %s11589_s21  ;;  %v22320_v23 = vld [vmem:[#allocation130_spill] sm:$0xff] }
 0x30e   :  { %9379 = vrot.lane.b32.xlu0 %v22305_v12, %s11589_s21  ;;  %v7800_v2 = vcombine.high %v22321_v22, %v22320_v23  ;;  %v22326_v22 = vld [vmem:[#allocation28_spill] sm:$0xff]  ;;  %v22331_v12 = vld [vmem:[#allocation51_spill] sm:$0xff] }
 0x30f   :  { %v16164_v48 = vpop.permute.xlu1 %9125  ;;  %v2683_v23 = vcombine.low %v22327_v37, %v22326_v22 }
 0x310   :  { %22311 = vst [vmem:[#allocation356_spill] sm:$0xff] %v16164_v48  ;;  %v16166_v25 = vpop.permute.xlu0 %9203  ;;  %v16198_v48 = vrot.slane %v7784_v8, %v11711_v56 }
 0x311   :  { %22312 = vst [vmem:[#allocation345_spill] sm:$0xff] %v16166_v25  ;;  %v22323_v25 = vcombine.high %v22178_v43, %v22179_v30  ;;  %v16201_v30 = vrot.slane %v7800_v2, %v11711_v56  ;;  %v22328_v43 = vcombine.high %v22186_v21, %v22187_v52  ;;  %v22334_v21 = vld [vmem:[#allocation258_spill] sm:$0xff] }
 0x312   :  { %9447 = vrot.lane.b32.xlu0 %v2475_v18, %s11583_s17  ;;  %v7831_v8 = vcombine.low %v16198_v48, %v16198_v48  ;;  %v8160_v52 = vcombine.high %v22334_v21, %v22334_v21 }
 0x313   :  { %9369 = vrot.lane.b32.xlu1 %v22323_v25, %s11589_s21  ;;  %v16191_v1 = vpop.permute.xlu1 %9193  ;;  %v7863_v2 = vcombine.low %v16201_v30, %v16201_v30 }
 0x314   :  { %22324 = vst [vmem:[#allocation416_spill] sm:$0xff] %v16191_v1  ;;  %v16193_v58 = vpop.permute.xlu0 %9207  ;;  %v22333_v1 = vld [vmem:[#allocation11_spill] sm:$0xff] }
 0x315   :  { %22325 = vst [vmem:[#allocation418_spill] sm:$0xff] %v16193_v58  ;;  %v3307_v58 = vcombine.low %v22332_v4, %v22331_v12  ;;  %v8128_v59 = vcombine.high %v22333_v1, %v22333_v1  ;;  %v22340_v1 = vld [vmem:[#allocation80_spill] sm:$0xff] }
 0x316   :  { %9451 = vrot.lane.b32.xlu0 %v2683_v23, %s11583_s17  ;;  %v22335_v23 = vcombine.high %v22194_v54, %v22195_v20  ;;  %v3515_v21 = vcombine.low %v22341_v62, %v22340_v1  ;;  %v16240_v54 = vrot.slane %v7831_v8, %v11726_v13  ;;  %v22343_v20 = vcombine.high %v15396_v15, %v15412_v29  ;;  %v22351_v15 = vld [vmem:[#allocation118_spill] sm:$0xff]  ;;  %v22352_v29 = vld [vmem:[#allocation119_spill] sm:$0xff] }
 0x317   :  { %9373 = vrot.lane.b32.xlu1 %v22328_v43, %s11589_s21  ;;  %v16208_v18 = vpop.permute.xlu1 %9197  ;;  %v16248_v40 = vrot.slane %v8128_v59, %v11726_v13  ;;  %v22350_v43 = vld [vmem:[#allocation19_spill] sm:$0xff] }
 0x318   :  { %22329 = vst [vmem:[#allocation294_spill] sm:$0xff] %v16208_v18  ;;  %v16210_v25 = vpop.permute.xlu0 %9211  ;;  %22342 = vst [vmem:[#allocation112_spill] sm:$0xff] %v16240_v54  ;;  %v22349_v18 = vld [vmem:[#allocation18_spill] sm:$0xff]  ;;  %v22369_v54 = vld [vmem:[#allocation187_spill] sm:$0xff] }
 0x319   :  { %22330 = vst [vmem:[#allocation295_spill] sm:$0xff] %v16210_v25  ;;  %22344 = vst [vmem:[#allocation467_spill] sm:$0xff] %v16248_v40  ;;  %v2579_v25 = vcombine.low %v22350_v43, %v22349_v18 }
 0x31a   :  { %9455 = vrot.lane.b32.xlu0 %v3307_v58, %s11583_s17  ;;  %v16251_v58 = vrot.slane %v8160_v52, %v11726_v13  ;;  %v16270_v52 = vrot.slane %v7136_v19, %v11726_v13 }
 0x31b   :  { %9377 = vrot.lane.b32.xlu1 %v22335_v23, %s11589_s21  ;;  %v16231_v47 = vpop.permute.xlu1 %9201  ;;  %v16254_v23 = vrot.slane %v7863_v2, %v11726_v13  ;;  %v22355_v2 = vld [vmem:[#allocation386_spill] sm:$0xff] }
 0x31c   :  { %22338 = vst [vmem:[#allocation325_spill] sm:$0xff] %v16231_v47  ;;  %v16233_v33 = vpop.permute.xlu0 %9215  ;;  %22345 = vst [vmem:[#allocation364_spill] sm:$0xff] %v16251_v58  ;;  %v22357_v47 = vld [vmem:[#allocation392_spill] sm:$0xff]  ;;  %v22404_v58 = vld [vmem:[#allocation314_spill] sm:$0xff] }
 0x31d   :  { %22339 = vst [vmem:[#allocation327_spill] sm:$0xff] %v16233_v33  ;;  %22346 = vst [vmem:[#allocation365_spill] sm:$0xff] %v16254_v23  ;;  %v22356_v33 = vld [vmem:[#allocation140_spill] sm:$0xff] }
 0x31e   :  { %9459 = vrot.lane.b32.xlu0 %v3515_v21, %s11583_s17  ;;  %v16267_v21 = vrot.slane %v7104_v34, %v11726_v13  ;;  %22354 = vst [vmem:[#allocation235_spill] sm:$0xff] %v16270_v52  ;;  %v22370_v23 = vld [vmem:[#allocation188_spill] sm:$0xff] }
 0x31f   :  { %9381 = vrot.lane.b32.xlu1 %v22343_v20, %s11589_s21  ;;  %v16256_v35 = vpop.permute.xlu1 %9205  ;;  %v4139_v20 = vcombine.low %v22352_v29, %v22351_v15  ;;  %v4971_v24 = vcombine.low %v22370_v23, %v22369_v54 }
 0x320   :  { %22347 = vst [vmem:[#allocation16_spill] sm:$0xff] %v16256_v35  ;;  %v16258_v8 = vpop.permute.xlu0 %9219  ;;  %22353 = vst [vmem:[#allocation372_spill] sm:$0xff] %v16267_v21  ;;  %v7888_v35 = vcombine.high %v22356_v33, %v22355_v2  ;;  %v2787_v33 = vcombine.low %v22362_v45, %v22361_v51  ;;  %v22363_v2 = vld [vmem:[#allocation151_spill] sm:$0xff]  ;;  %v22377_v21 = vld [vmem:[#allocation212_spill] sm:$0xff] }
 0x321   :  { %22348 = vst [vmem:[#allocation17_spill] sm:$0xff] %v16258_v8  ;;  %v22358_v8 = vld [vmem:[#allocation389_spill] sm:$0xff] }
 0x322   :  { %v7904_v10 = vcombine.high %v22358_v8, %v22357_v47  ;;  %9463 = vrot.lane.b32.xlu0 %v4139_v20, %s11583_s17  ;;  %v4347_v47 = vcombine.low %v22364_v0, %v22363_v2 }
 0x323   :  { %9449 = vrot.lane.b32.xlu1 %v2579_v25, %s11583_s17  ;;  %v16282_v59 = vpop.permute.xlu1 %9209  ;;  %v16291_v25 = vrot.slane %v7888_v35, %v11711_v56 }
 0x324   :  { %22359 = vst [vmem:[#allocation130_spill] sm:$0xff] %v16282_v59  ;;  %v16284_v19 = vpop.permute.xlu0 %9223  ;;  %v16294_v8 = vrot.slane %v7904_v10, %v11711_v56 }
 0x325   :  { %22360 = vst [vmem:[#allocation375_spill] sm:$0xff] %v16284_v19  ;;  %v22368_v19 = vld [vmem:[#allocation64_spill] sm:$0xff]  ;;  %v7935_v35 = vcombine.low %v16291_v25, %v16291_v25 }
 0x326   :  { %9467 = vrot.lane.b32.xlu0 %v4347_v47, %s11583_s17  ;;  %v3411_v59 = vcombine.low %v22368_v19, %v22367_v14  ;;  %v7967_v10 = vcombine.low %v16294_v8, %v16294_v8 }
 0x327   :  { %9453 = vrot.lane.b32.xlu1 %v2787_v33, %s11583_s17  ;;  %v16298_v20 = vpop.permute.xlu1 %9213 }
 0x328   :  { %22365 = vst [vmem:[#allocation28_spill] sm:$0xff] %v16298_v20  ;;  %v16300_v34 = vpop.permute.xlu0 %9227  ;;  %v22382_v20 = vld [vmem:[#allocation137_spill] sm:$0xff] }
 0x329   :  { %22366 = vst [vmem:[#allocation29_spill] sm:$0xff] %v16300_v34  ;;  %v7208_v34 = vcombine.high %v16019_v55, %v16019_v55  ;;  %v16332_v55 = vrot.slane %v7967_v10, %v11726_v13  ;;  %v4243_v33 = vcombine.low %v22382_v20, %v22381_v16  ;;  %v22389_v10 = vld [vmem:[#allocation404_spill] sm:$0xff]  ;;  %v22391_v16 = vld [vmem:[#allocation411_spill] sm:$0xff]  ;;  %v22392_v20 = vld [vmem:[#allocation409_spill] sm:$0xff] }
 0x32a   :  { %9471 = vrot.lane.b32.xlu0 %v4971_v24, %s11583_s17  ;;  %v16329_v24 = vrot.slane %v7935_v35, %v11726_v13  ;;  %v16348_v35 = vrot.slane %v7240_v60, %v11726_v13  ;;  %v7992_v41 = vcombine.high %v22390_v61, %v22389_v10  ;;  %v22395_v61 = vld [vmem:[#allocation168_spill] sm:$0xff]  ;;  %v22396_v10 = vld [vmem:[#allocation170_spill] sm:$0xff] }
 0x32b   :  { %9457 = vrot.lane.b32.xlu1 %v3411_v59, %s11583_s17  ;;  %v16318_v9 = vpop.permute.xlu1 %9217  ;;  %v22378_v59 = vld [vmem:[#allocation213_spill] sm:$0xff]  ;;  %22380 = vst [vmem:[#allocation258_spill] sm:$0xff] %v16332_v55 }
 0x32c   :  { %22373 = vst [vmem:[#allocation51_spill] sm:$0xff] %v16318_v9  ;;  %v16320_v5 = vpop.permute.xlu0 %9231  ;;  %v5179_v52 = vcombine.low %v22378_v59, %v22377_v21  ;;  %22379 = vst [vmem:[#allocation11_spill] sm:$0xff] %v16329_v24  ;;  %v22385_v9 = vld [vmem:[#allocation242_spill] sm:$0xff]  ;;  %v22403_v55 = vld [vmem:[#allocation313_spill] sm:$0xff] }
 0x32d   :  { %22374 = vst [vmem:[#allocation52_spill] sm:$0xff] %v16320_v5  ;;  %v5803_v42 = vcombine.low %v22386_v17, %v22385_v9  ;;  %22388 = vst [vmem:[#allocation19_spill] sm:$0xff] %v16348_v35  ;;  %v6635_v40 = vcombine.low %v22404_v58, %v22403_v55  ;;  %v7312_v55 = vcombine.high %v16111_v53, %v16111_v53 }
 0x32e   :  { %9475 = vrot.lane.b32.xlu0 %v5179_v52, %s11583_s17  ;;  %v16345_v52 = vrot.slane %v7208_v34, %v11726_v13 }
 0x32f   :  { %9461 = vrot.lane.b32.xlu1 %v3619_v50, %s11583_s17  ;;  %v16336_v47 = vpop.permute.xlu1 %9221 }
 0x330   :  { %22383 = vst [vmem:[#allocation80_spill] sm:$0xff] %v16336_v47  ;;  %v16338_v5 = vpop.permute.xlu0 %9235  ;;  %22387 = vst [vmem:[#allocation18_spill] sm:$0xff] %v16345_v52  ;;  %v8008_v47 = vcombine.high %v22392_v20, %v22391_v16  ;;  %v4451_v20 = vcombine.low %v22396_v10, %v22395_v61  ;;  %v22397_v16 = vld [vmem:[#allocation281_spill] sm:$0xff]  ;;  %v22405_v52 = vld [vmem:[#allocation59_spill] sm:$0xff] }
 0x331   :  { %22384 = vst [vmem:[#allocation82_spill] sm:$0xff] %v16338_v5  ;;  %v22413_v61 = vld [vmem:[#allocation350_spill] sm:$0xff]  ;;  %v22414_v10 = vld [vmem:[#allocation351_spill] sm:$0xff] }
 0x332   :  { %9479 = vrot.lane.b32.xlu0 %v5803_v42, %s11583_s17  ;;  %v16371_v42 = vrot.slane %v7992_v41, %v11711_v56  ;;  %v16374_v5 = vrot.slane %v8008_v47, %v11711_v56 }
 0x333   :  { %9465 = vrot.lane.b32.xlu1 %v4243_v33, %s11583_s17  ;;  %v16362_v50 = vpop.permute.xlu1 %9225  ;;  %v22398_v33 = vld [vmem:[#allocation282_spill] sm:$0xff] }
 0x334   :  { %22393 = vst [vmem:[#allocation118_spill] sm:$0xff] %v16362_v50  ;;  %v16364_v39 = vpop.permute.xlu0 %9239  ;;  %v6011_v49 = vcombine.low %v22398_v33, %v22397_v16  ;;  %v22402_v50 = vld [vmem:[#allocation201_spill] sm:$0xff]  ;;  %v8039_v41 = vcombine.low %v16371_v42, %v16371_v42  ;;  %v8071_v47 = vcombine.low %v16374_v5, %v16374_v5  ;;  %v22411_v16 = vld [vmem:[#allocation222_spill] sm:$0xff] }
 0x335   :  { %22394 = vst [vmem:[#allocation119_spill] sm:$0xff] %v16364_v39  ;;  %v22401_v39 = vld [vmem:[#allocation199_spill] sm:$0xff]  ;;  %v22412_v33 = vld [vmem:[#allocation225_spill] sm:$0xff] }
 0x336   :  { %9483 = vrot.lane.b32.xlu0 %v6011_v49, %s11583_s17  ;;  %v5075_v24 = vcombine.low %v22402_v50, %v22401_v39  ;;  %v22406_v49 = vld [vmem:[#allocation211_spill] sm:$0xff] }
 0x337   :  { %9469 = vrot.lane.b32.xlu1 %v4451_v20, %s11583_s17  ;;  %v16378_v60 = vpop.permute.xlu1 %9229  ;;  %v8752_v20 = vcombine.high %v22405_v52, %v22405_v52  ;;  %v5283_v52 = vcombine.low %v22412_v33, %v22411_v16 }
 0x338   :  { %22399 = vst [vmem:[#allocation386_spill] sm:$0xff] %v16378_v60  ;;  %v16380_v34 = vpop.permute.xlu0 %9243  ;;  %v8784_v60 = vcombine.high %v22406_v49, %v22406_v49  ;;  %v6843_v49 = vcombine.low %v22414_v10, %v22413_v61  ;;  %v22423_v61 = vld [vmem:[#allocation380_spill] sm:$0xff] }
 0x339   :  { %22400 = vst [vmem:[#allocation140_spill] sm:$0xff] %v16380_v34  ;;  %v16416_v53 = vrot.slane %v8752_v20, %v11726_v13  ;;  %v16422_v34 = vrot.slane %v8071_v47, %v11726_v13  ;;  %v22429_v20 = vld [vmem:[#allocation296_spill] sm:$0xff]  ;;  %v22435_v47 = vld [vmem:[#allocation329_spill] sm:$0xff] }
 0x33a   :  { %9487 = vrot.lane.b32.xlu0 %v6635_v40, %s11583_s17  ;;  %v16411_v40 = vrot.slane %v8039_v41, %v11726_v13  ;;  %v16419_v39 = vrot.slane %v8784_v60, %v11726_v13  ;;  %v22422_v41 = vld [vmem:[#allocation261_spill] sm:$0xff] }
 0x33b   :  { %9473 = vrot.lane.b32.xlu1 %v5075_v24, %s11583_s17  ;;  %v16400_v58 = vpop.permute.xlu1 %9233  ;;  %v7344_v24 = vcombine.high %v16114_v26, %v16114_v26  ;;  %22416 = vst [vmem:[#allocation41_spill] sm:$0xff] %v16416_v53  ;;  %22418 = vst [vmem:[#allocation152_spill] sm:$0xff] %v16422_v34  ;;  %v22421_v26 = vld [vmem:[#allocation265_spill] sm:$0xff] }
 0x33c   :  { %22409 = vst [vmem:[#allocation392_spill] sm:$0xff] %v16400_v58  ;;  %v16402_v50 = vpop.permute.xlu0 %9247  ;;  %22415 = vst [vmem:[#allocation39_spill] sm:$0xff] %v16411_v40  ;;  %v5907_v58 = vcombine.low %v22422_v41, %v22421_v26  ;;  %v22431_v26 = vld [vmem:[#allocation420_spill] sm:$0xff]  ;;  %v22438_v34 = vld [vmem:[#allocation445_spill] sm:$0xff] }
 0x33d   :  { %22410 = vst [vmem:[#allocation389_spill] sm:$0xff] %v16402_v50  ;;  %22417 = vst [vmem:[#allocation151_spill] sm:$0xff] %v16419_v39  ;;  %v16438_v60 = vrot.slane %v7344_v24, %v11726_v13  ;;  %v22432_v24 = vld [vmem:[#allocation419_spill] sm:$0xff] }
 0x33e   :  { %9491 = vrot.lane.b32.xlu0 %v6843_v49, %s11583_s17  ;;  %v16435_v49 = vrot.slane %v7312_v55, %v11726_v13  ;;  %v22430_v55 = vld [vmem:[#allocation297_spill] sm:$0xff]  ;;  %v7675_v41 = vcombine.low %v22432_v24, %v22431_v26  ;;  %v22444_v26 = vld [vmem:[#allocation468_spill] sm:$0xff]  ;;  %v22469_v39 = vld [vmem:[#allocation479_spill] sm:$0xff] }
 0x33f   :  { %9477 = vrot.lane.b32.xlu1 %v5283_v52, %s11583_s17  ;;  %v16424_v35 = vpop.permute.xlu1 %9237  ;;  %v22424_v52 = vld [vmem:[#allocation381_spill] sm:$0xff]  ;;  %22426 = vst [vmem:[#allocation188_spill] sm:$0xff] %v16438_v60  ;;  %v22442_v60 = vld [vmem:[#allocation366_spill] sm:$0xff] }
 0x340   :  { %22419 = vst [vmem:[#allocation62_spill] sm:$0xff] %v16424_v35  ;;  %v16426_v50 = vpop.permute.xlu0 %9251  ;;  %v7467_v10 = vcombine.low %v22424_v52, %v22423_v61  ;;  %22425 = vst [vmem:[#allocation187_spill] sm:$0xff] %v16435_v49  ;;  %v6115_v52 = vcombine.low %v22430_v55, %v22429_v20  ;;  %v22447_v49 = vld [vmem:[#allocation398_spill] sm:$0xff] }
 0x341   :  { %22420 = vst [vmem:[#allocation64_spill] sm:$0xff] %v16426_v50  ;;  %v22436_v50 = vld [vmem:[#allocation328_spill] sm:$0xff] }
 0x342   :  { %9495 = vrot.lane.b32.xlu0 %v7467_v10, %s11583_s17  ;;  %v6739_v40 = vcombine.low %v22436_v50, %v22435_v47  ;;  %v22443_v50 = vld [vmem:[#allocation469_spill] sm:$0xff] }
 0x343   :  { %9481 = vrot.lane.b32.xlu1 %v5907_v58, %s11583_s17  ;;  %v16446_v35 = vpop.permute.xlu1 %9241 }
 0x344   :  { %22427 = vst [vmem:[#allocation98_spill] sm:$0xff] %v16446_v35  ;;  %v16448_v61 = vpop.permute.xlu0 %9319  ;;  %v22437_v35 = vld [vmem:[#allocation446_spill] sm:$0xff] }
 0x345   :  { %22428 = vst [vmem:[#allocation101_spill] sm:$0xff] %v16448_v61  ;;  %v8299_v61 = vcombine.low %v22438_v34, %v22437_v35  ;;  %v8507_v35 = vcombine.low %v22444_v26, %v22443_v50  ;;  %v22450_v50 = vld [vmem:[#allocation437_spill] sm:$0xff] }
 0x346   :  { %9499 = vrot.lane.b32.xlu0 %v7675_v41, %s11583_s17  ;;  %v7832_v41 = vcombine.high %v16198_v48, %v16198_v48  ;;  %v22451_v26 = vld [vmem:[#allocation173_spill] sm:$0xff] }
 0x347   :  { %9485 = vrot.lane.b32.xlu1 %v6115_v52, %s11583_s17  ;;  %v16456_v58 = vpop.permute.xlu1 %9245 }
 0x348   :  { %22433 = vst [vmem:[#allocation212_spill] sm:$0xff] %v16456_v58  ;;  %v16458_v10 = vpop.permute.xlu0 %9323 }
 0x349   :  { %22434 = vst [vmem:[#allocation213_spill] sm:$0xff] %v16458_v10  ;;  %v22441_v10 = vld [vmem:[#allocation367_spill] sm:$0xff] }
 0x34a   :  { %9503 = vrot.lane.b32.xlu0 %v8299_v61, %s11583_s17  ;;  %v6947_v47 = vcombine.low %v22442_v60, %v22441_v10  ;;  %v22452_v10 = vld [vmem:[#allocation321_spill] sm:$0xff] }
 0x34b   :  { %9489 = vrot.lane.b32.xlu1 %v6739_v40, %s11583_s17  ;;  %v16470_v52 = vpop.permute.xlu1 %9249  ;;  %v7864_v40 = vcombine.high %v16201_v30, %v16201_v30  ;;  %v8616_v30 = vcombine.high %v22451_v26, %v22450_v50  ;;  %v22463_v50 = vld [vmem:[#allocation456_spill] sm:$0xff] }
 0x34c   :  { %22439 = vst [vmem:[#allocation242_spill] sm:$0xff] %v16470_v52  ;;  %v16472_v58 = vpop.permute.xlu0 %9327  ;;  %v22448_v52 = vld [vmem:[#allocation399_spill] sm:$0xff] }
 0x34d   :  { %22440 = vst [vmem:[#allocation241_spill] sm:$0xff] %v16472_v58  ;;  %v7571_v28 = vcombine.low %v22448_v52, %v22447_v49  ;;  %v16491_v58 = vrot.slane %v7832_v41, %v11726_v13  ;;  %v22464_v41 = vld [vmem:[#allocation457_spill] sm:$0xff] }
 0x34e   :  { %9507 = vrot.lane.b32.xlu0 %v8507_v35, %s11583_s17  ;;  %v16498_v35 = vrot.slane %v7864_v40, %v11726_v13  ;;  %v22458_v40 = vld [vmem:[#allocation430_spill] sm:$0xff] }
 0x34f   :  { %9493 = vrot.lane.b32.xlu1 %v6947_v47, %s11583_s17  ;;  %v16482_v61 = vpop.permute.xlu1 %9253  ;;  %22449 = vst [vmem:[#allocation411_spill] sm:$0xff] %v16491_v58  ;;  %v22453_v47 = vld [vmem:[#allocation193_spill] sm:$0xff] }
 0x350   :  { %22445 = vst [vmem:[#allocation404_spill] sm:$0xff] %v16482_v61  ;;  %v16484_v48 = vpop.permute.xlu0 %9331  ;;  %v8632_v60 = vcombine.high %v22453_v47, %v22452_v10  ;;  %22454 = vst [vmem:[#allocation409_spill] sm:$0xff] %v16498_v35  ;;  %v22459_v47 = vld [vmem:[#allocation189_spill] sm:$0xff]  ;;  %v22716_v35 = vld [vmem:[#allocation400_spill] sm:$0xff] }
 0x351   :  { %22446 = vst [vmem:[#allocation393_spill] sm:$0xff] %v16484_v48  ;;  %v22455_v48 = vcombine.high %v22314_v46, %v22313_v11  ;;  %v7779_v31 = vcombine.low %v22459_v47, %v22458_v40  ;;  %v22460_v46 = vcombine.high %v22327_v37, %v22326_v22  ;;  %v8992_v22 = vcombine.high %v15846_v27, %v15846_v27 }
 0x352   :  { %v16519_v61 = vrot.slane %v8632_v60, %v11711_v56  ;;  %v22465_v37 = vcombine.high %v22332_v4, %v22331_v12  ;;  %v22471_v12 = vcombine.high %v22341_v62, %v22340_v1  ;;  %v22479_v1 = vcombine.high %v22350_v43, %v22349_v18 }
 0x353   :  { %9497 = vrot.lane.b32.xlu1 %v7571_v28, %s11583_s17  ;;  %9575 = vrot.lane.b32.xlu0 %v22455_v48, %s11590_s22  ;;  %v16509_v26 = vpop.permute.xlu1 %9321  ;;  %v16516_v28 = vrot.slane %v8616_v30, %v11711_v56  ;;  %v22483_v18 = vcombine.high %v22362_v45, %v22361_v51  ;;  %v22484_v43 = vcombine.high %v22364_v0, %v22363_v2  ;;  %v22502_v45 = vld [vmem:[#allocation344_spill] sm:$0xff] }
 0x354   :  { %22456 = vst [vmem:[#allocation59_spill] sm:$0xff] %v16509_v26  ;;  %v16511_v10 = vpop.permute.xlu0 %9335  ;;  %v8695_v60 = vcombine.low %v16519_v61, %v16519_v61  ;;  %v8040_v0 = vcombine.high %v16371_v42, %v16371_v42  ;;  %v8072_v51 = vcombine.high %v16374_v5, %v16374_v5 }
 0x355   :  { %22457 = vst [vmem:[#allocation211_spill] sm:$0xff] %v16511_v10  ;;  %v8403_v10 = vcombine.low %v22464_v41, %v22463_v50  ;;  %v8663_v30 = vcombine.low %v16516_v28, %v16516_v28 }
 0x356   :  { %v16645_v5 = vrot.slane %v8040_v0, %v11726_v13  ;;  %v16648_v42 = vrot.slane %v8072_v51, %v11726_v13  ;;  %v22508_v51 = vcombine.high %v22386_v17, %v22385_v9  ;;  %v22511_v9 = vld [vmem:[#allocation170_spill] sm:$0xff] }
 0x357   :  { %9501 = vrot.lane.b32.xlu1 %v7779_v31, %s11583_s17  ;;  %9579 = vrot.lane.b32.xlu0 %v22460_v46, %s11590_s22  ;;  %v16526_v11 = vpop.permute.xlu1 %9325  ;;  %v8960_v31 = vcombine.high %v15843_v38, %v15843_v38  ;;  %v22468_v38 = vld [vmem:[#allocation50_spill] sm:$0xff]  ;;  %v16558_v53 = vrot.slane %v8663_v30, %v11726_v13 }
 0x358   :  { %22461 = vst [vmem:[#allocation222_spill] sm:$0xff] %v16526_v11  ;;  %v16528_v48 = vpop.permute.xlu0 %9339  ;;  %v8611_v27 = vcombine.low %v22469_v39, %v22468_v38  ;;  %22495 = vst [vmem:[#allocation496_spill] sm:$0xff] %v16645_v5  ;;  %v22860_v5 = vld [vmem:[#allocation176_spill] sm:$0xff] }
 0x359   :  { %22462 = vst [vmem:[#allocation225_spill] sm:$0xff] %v16528_v48  ;;  %v7936_v48 = vcombine.high %v16291_v25, %v16291_v25  ;;  %22470 = vst [vmem:[#allocation419_spill] sm:$0xff] %v16558_v53  ;;  %v16566_v4 = vrot.slane %v8960_v31, %v11726_v13  ;;  %v16569_v25 = vrot.slane %v8992_v22, %v11726_v13  ;;  %v22505_v31 = vld [vmem:[#allocation137_spill] sm:$0xff]  ;;  %v22667_v53 = vld [vmem:[#allocation315_spill] sm:$0xff] }
 0x35a   :  { %22496 = vst [vmem:[#allocation497_spill] sm:$0xff] %v16648_v42 }
 0x35b   :  { %9505 = vrot.lane.b32.xlu1 %v8403_v10, %s11583_s17  ;;  %9583 = vrot.lane.b32.xlu0 %v22465_v37, %s11590_s22  ;;  %v16549_v11 = vpop.permute.xlu1 %9329  ;;  %v7968_v10 = vcombine.high %v16294_v8, %v16294_v8  ;;  %22472 = vst [vmem:[#allocation445_spill] sm:$0xff] %v16566_v4  ;;  %22473 = vst [vmem:[#allocation398_spill] sm:$0xff] %v16569_v25  ;;  %v16572_v37 = vrot.slane %v8695_v60, %v11726_v13 }
 0x35c   :  { %22466 = vst [vmem:[#allocation296_spill] sm:$0xff] %v16549_v11  ;;  %v16551_v26 = vpop.permute.xlu0 %9343  ;;  %v16581_v46 = vrot.slane %v7936_v48, %v11726_v13  ;;  %v22480_v60 = vcombine.high %v22352_v29, %v22351_v15  ;;  %v22645_v11 = vld [vmem:[#allocation138_spill] sm:$0xff] }
 0x35d   :  { %22467 = vst [vmem:[#allocation297_spill] sm:$0xff] %v16551_v26  ;;  %22474 = vst [vmem:[#allocation399_spill] sm:$0xff] %v16572_v37  ;;  %v16584_v62 = vrot.slane %v7968_v10, %v11726_v13 }
 0x35e   :  { %22477 = vst [vmem:[#allocation321_spill] sm:$0xff] %v16581_v46  ;;  %v22839_v46 = vld [vmem:[#allocation194_spill] sm:$0xff] }
 0x35f   :  { %9509 = vrot.lane.b32.xlu1 %v8611_v27, %s11583_s17  ;;  %9587 = vrot.lane.b32.xlu0 %v22471_v12, %s11590_s22  ;;  %v16574_v8 = vpop.permute.xlu1 %9333  ;;  %22478 = vst [vmem:[#allocation193_spill] sm:$0xff] %v16584_v62  ;;  %v22487_v12 = vcombine.high %v22368_v19, %v22367_v14  ;;  %v22491_v14 = vcombine.high %v22376_v63, %v22375_v36  ;;  %v22499_v36 = vld [vmem:[#allocation177_spill] sm:$0xff]  ;;  %v22500_v63 = vld [vmem:[#allocation428_spill] sm:$0xff]  ;;  %v22506_v27 = vld [vmem:[#allocation135_spill] sm:$0xff] }
 0x360   :  { %22475 = vst [vmem:[#allocation437_spill] sm:$0xff] %v16574_v8  ;;  %v16576_v30 = vpop.permute.xlu0 %9347  ;;  %v22507_v0 = vcombine.high %v22505_v31, %v22506_v27  ;;  %v22643_v8 = vld [vmem:[#allocation184_spill] sm:$0xff] }
 0x361   :  { %22476 = vst [vmem:[#allocation173_spill] sm:$0xff] %v16576_v30 }
 0x363   :  { %9577 = vrot.lane.b32.xlu1 %v22479_v1, %s11590_s22  ;;  %9591 = vrot.lane.b32.xlu0 %v22480_v60, %s11590_s22  ;;  %v16598_v22 = vpop.permute.xlu1 %9337  ;;  %v22488_v1 = vcombine.high %v22370_v23, %v22369_v54  ;;  %v22492_v54 = vcombine.high %v22378_v59, %v22377_v21  ;;  %v22503_v59 = vld [vmem:[#allocation227_spill] sm:$0xff] }
 0x364   :  { %22481 = vst [vmem:[#allocation430_spill] sm:$0xff] %v16598_v22  ;;  %v16600_v10 = vpop.permute.xlu0 %9351  ;;  %v22635_v22 = vld [vmem:[#allocation216_spill] sm:$0xff] }
 0x365   :  { %22482 = vst [vmem:[#allocation189_spill] sm:$0xff] %v16600_v10 }
 0x367   :  { %9581 = vrot.lane.b32.xlu1 %v22483_v18, %s11590_s22  ;;  %9595 = vrot.lane.b32.xlu0 %v22484_v43, %s11590_s22  ;;  %v16610_v15 = vpop.permute.xlu1 %9341  ;;  %v22497_v18 = vld [vmem:[#allocation425_spill] sm:$0xff]  ;;  %v22498_v43 = vld [vmem:[#allocation414_spill] sm:$0xff] }
 0x368   :  { %22485 = vst [vmem:[#allocation456_spill] sm:$0xff] %v16610_v15  ;;  %v16612_v29 = vpop.permute.xlu0 %9355  ;;  %v22632_v15 = vld [vmem:[#allocation99_spill] sm:$0xff] }
 0x369   :  { %22486 = vst [vmem:[#allocation457_spill] sm:$0xff] %v16612_v29 }
 0x36b   :  { %9585 = vrot.lane.b32.xlu1 %v22487_v12, %s11590_s22  ;;  %9599 = vrot.lane.b32.xlu0 %v22488_v1, %s11590_s22  ;;  %v16628_v2 = vpop.permute.xlu1 %9345  ;;  %v8096_v12 = vcombine.high %v22498_v43, %v22497_v18  ;;  %v8112_v1 = vcombine.high %v22500_v63, %v22499_v36 }
 0x36c   :  { %22489 = vst [vmem:[#allocation50_spill] sm:$0xff] %v16628_v2  ;;  %v16630_v60 = vpop.permute.xlu0 %9359 }
 0x36d   :  { %22490 = vst [vmem:[#allocation479_spill] sm:$0xff] %v16630_v60  ;;  %v16675_v63 = vrot.slane %v8096_v12, %v11711_v56  ;;  %v16678_v27 = vrot.slane %v8112_v1, %v11711_v56  ;;  %v22641_v60 = vld [vmem:[#allocation114_spill] sm:$0xff] }
 0x36f   :  { %9589 = vrot.lane.b32.xlu1 %v22491_v14, %s11590_s22  ;;  %9603 = vrot.lane.b32.xlu0 %v22492_v54, %s11590_s22  ;;  %v16640_v23 = vpop.permute.xlu1 %9349  ;;  %v22501_v14 = vld [vmem:[#allocation461_spill] sm:$0xff]  ;;  %v22504_v54 = vld [vmem:[#allocation462_spill] sm:$0xff] }
 0x370   :  { %22493 = vst [vmem:[#allocation494_spill] sm:$0xff] %v16640_v23  ;;  %v16642_v19 = vpop.permute.xlu0 %9363  ;;  %v8824_v21 = vcombine.high %v22502_v45, %v22501_v14  ;;  %v8840_v48 = vcombine.high %v22504_v54, %v22503_v59  ;;  %v22512_v14 = vld [vmem:[#allocation168_spill] sm:$0xff]  ;;  %v22514_v54 = vld [vmem:[#allocation282_spill] sm:$0xff] }
 0x371   :  { %22494 = vst [vmem:[#allocation495_spill] sm:$0xff] %v16642_v19  ;;  %v22513_v59 = vcombine.high %v22511_v9, %v22512_v14  ;;  %v22519_v14 = vld [vmem:[#allocation201_spill] sm:$0xff]  ;;  %v22625_v19 = vld [vmem:[#allocation190_spill] sm:$0xff] }
 0x372   :  { %v16681_v31 = vrot.slane %v8824_v21, %v11711_v56  ;;  %v16684_v17 = vrot.slane %v8840_v48, %v11711_v56  ;;  %v8143_v21 = vcombine.low %v16675_v63, %v16675_v63  ;;  %v8175_v48 = vcombine.low %v16678_v27, %v16678_v27 }
 0x373   :  { %9593 = vrot.lane.b32.xlu1 %v22507_v0, %s11590_s22  ;;  %9607 = vrot.lane.b32.xlu0 %v22508_v51, %s11590_s22  ;;  %v16670_v45 = vpop.permute.xlu1 %9353  ;;  %v22515_v0 = vld [vmem:[#allocation281_spill] sm:$0xff] }
 0x374   :  { %22509 = vst [vmem:[#allocation425_spill] sm:$0xff] %v16670_v45  ;;  %v16672_v36 = vpop.permute.xlu0 %9367  ;;  %v22516_v51 = vcombine.high %v22514_v54, %v22515_v0  ;;  %v8871_v43 = vcombine.low %v16681_v31, %v16681_v31  ;;  %v8903_v9 = vcombine.low %v16684_v17, %v16684_v17  ;;  %v22522_v0 = vld [vmem:[#allocation314_spill] sm:$0xff]  ;;  %v16738_v6 = vrot.slane %v8175_v48, %v11726_v13  ;;  %v22553_v48 = vld [vmem:[#allocation329_spill] sm:$0xff]  ;;  %v22622_v45 = vld [vmem:[#allocation63_spill] sm:$0xff] }
 0x375   :  { %22510 = vst [vmem:[#allocation414_spill] sm:$0xff] %v16672_v36 }
 0x376   :  { %22536 = vst [vmem:[#allocation135_spill] sm:$0xff] %v16738_v6  ;;  %v22659_v6 = vld [vmem:[#allocation283_spill] sm:$0xff] }
 0x377   :  { %9597 = vrot.lane.b32.xlu1 %v22513_v59, %s11590_s22  ;;  %9611 = vrot.lane.b32.xlu0 %v22516_v51, %s11590_s22  ;;  %v16694_v12 = vpop.permute.xlu1 %9357  ;;  %v22520_v59 = vld [vmem:[#allocation199_spill] sm:$0xff]  ;;  %v22523_v51 = vld [vmem:[#allocation313_spill] sm:$0xff] }
 0x378   :  { %22517 = vst [vmem:[#allocation177_spill] sm:$0xff] %v16694_v12  ;;  %v16696_v1 = vpop.permute.xlu0 %9371  ;;  %v22521_v54 = vcombine.high %v22519_v14, %v22520_v59  ;;  %v22524_v18 = vcombine.high %v22522_v0, %v22523_v51  ;;  %v16721_v12 = vrot.slane %v8143_v21, %v11726_v13  ;;  %v22530_v14 = vcombine.high %v22412_v33, %v22411_v16  ;;  %v22531_v59 = vld [vmem:[#allocation351_spill] sm:$0xff]  ;;  %v22539_v16 = vld [vmem:[#allocation261_spill] sm:$0xff] }
 0x379   :  { %22518 = vst [vmem:[#allocation428_spill] sm:$0xff] %v16696_v1  ;;  %v16735_v51 = vrot.slane %v8903_v9, %v11726_v13  ;;  %v22540_v33 = vld [vmem:[#allocation265_spill] sm:$0xff] }
 0x37a   :  { %22529 = vst [vmem:[#allocation227_spill] sm:$0xff] %v16721_v12 }
 0x37b   :  { %9601 = vrot.lane.b32.xlu1 %v22521_v54, %s11590_s22  ;;  %9615 = vrot.lane.b32.xlu0 %v22524_v18, %s11590_s22  ;;  %v16716_v7 = vpop.permute.xlu1 %9361  ;;  %v22532_v54 = vld [vmem:[#allocation350_spill] sm:$0xff]  ;;  %v16732_v18 = vrot.slane %v8871_v43, %v11726_v13  ;;  %22535 = vst [vmem:[#allocation137_spill] sm:$0xff] %v16735_v51 }
 0x37c   :  { %22527 = vst [vmem:[#allocation461_spill] sm:$0xff] %v16716_v7  ;;  %v16718_v1 = vpop.permute.xlu0 %9375  ;;  %v22533_v0 = vcombine.high %v22531_v59, %v22532_v54  ;;  %v22542_v59 = vld [vmem:[#allocation381_spill] sm:$0xff]  ;;  %v22543_v54 = vld [vmem:[#allocation380_spill] sm:$0xff] }
 0x37d   :  { %22528 = vst [vmem:[#allocation344_spill] sm:$0xff] %v16718_v1  ;;  %22534 = vst [vmem:[#allocation462_spill] sm:$0xff] %v16732_v18  ;;  %v22544_v43 = vcombine.high %v22542_v59, %v22543_v54  ;;  %v22616_v1 = vld [vmem:[#allocation157_spill] sm:$0xff] }
 0x37f   :  { %9605 = vrot.lane.b32.xlu1 %v22530_v14, %s11590_s22  ;;  %9619 = vrot.lane.b32.xlu0 %v22533_v0, %s11590_s22  ;;  %v16740_v21 = vpop.permute.xlu1 %9365  ;;  %v22541_v14 = vcombine.high %v22539_v16, %v22540_v33  ;;  %v22547_v16 = vcombine.high %v22430_v55, %v22429_v20  ;;  %v22548_v33 = vld [vmem:[#allocation420_spill] sm:$0xff]  ;;  %v22571_v20 = vld [vmem:[#allocation451_spill] sm:$0xff] }
 0x380   :  { %22537 = vst [vmem:[#allocation170_spill] sm:$0xff] %v16740_v21  ;;  %v16742_v32 = vpop.permute.xlu0 %9379  ;;  %v22572_v55 = vld [vmem:[#allocation440_spill] sm:$0xff] }
 0x381   :  { %22538 = vst [vmem:[#allocation168_spill] sm:$0xff] %v16742_v32 }
 0x383   :  { %9609 = vrot.lane.b32.xlu1 %v22541_v14, %s11590_s22  ;;  %9623 = vrot.lane.b32.xlu0 %v22544_v43, %s11590_s22  ;;  %v22549_v14 = vcombine.high %v22432_v24, %v22548_v33  ;;  %v22552_v43 = vld [vmem:[#allocation328_spill] sm:$0xff]  ;;  %v8664_v24 = vcombine.high %v16516_v28, %v16516_v28  ;;  %v8696_v33 = vcombine.high %v16519_v61, %v16519_v61 }
 0x384   :  { %v16758_v44 = vpop.permute.xlu0 %9447  ;;  %v22554_v9 = vcombine.high %v22552_v43, %v22553_v48  ;;  %v22562_v48 = vld [vmem:[#allocation367_spill] sm:$0xff] }
 0x385   :  { %v16756_v0 = vpop.permute.xlu1 %9369  ;;  %22546 = vst [vmem:[#allocation281_spill] sm:$0xff] %v16758_v44  ;;  %v16803_v61 = vrot.slane %v8664_v24, %v11726_v13 }
 0x386   :  { %22545 = vst [vmem:[#allocation282_spill] sm:$0xff] %v16756_v0  ;;  %v22555_v0 = vld [vmem:[#allocation446_spill] sm:$0xff] }
 0x387   :  { %9613 = vrot.lane.b32.xlu1 %v22547_v16, %s11590_s22  ;;  %9627 = vrot.lane.b32.xlu0 %v22549_v14, %s11590_s22  ;;  %v22556_v44 = vcombine.high %v22438_v34, %v22555_v0  ;;  %v22565_v34 = vld [vmem:[#allocation469_spill] sm:$0xff]  ;;  %22569 = vst [vmem:[#allocation261_spill] sm:$0xff] %v16803_v61 }
 0x388   :  { %v16770_v54 = vpop.permute.xlu0 %9451 }
 0x389   :  { %v16768_v59 = vpop.permute.xlu1 %9373  ;;  %22551 = vst [vmem:[#allocation199_spill] sm:$0xff] %v16770_v54  ;;  %v22597_v54 = vcombine.high %v22469_v39, %v22468_v38  ;;  %v22608_v38 = vld [vmem:[#allocation123_spill] sm:$0xff] }
 0x38a   :  { %22550 = vst [vmem:[#allocation201_spill] sm:$0xff] %v16768_v59 }
 0x38b   :  { %9617 = vrot.lane.b32.xlu1 %v22554_v9, %s11590_s22  ;;  %9631 = vrot.lane.b32.xlu0 %v22556_v44, %s11590_s22  ;;  %v22561_v9 = vld [vmem:[#allocation366_spill] sm:$0xff]  ;;  %v22564_v44 = vld [vmem:[#allocation468_spill] sm:$0xff] }
 0x38c   :  { %v16788_v59 = vpop.permute.xlu0 %9455  ;;  %v22563_v43 = vcombine.high %v22561_v9, %v22562_v48  ;;  %v22566_v0 = vcombine.high %v22564_v44, %v22565_v34  ;;  %v22573_v9 = vld [vmem:[#allocation45_spill] sm:$0xff]  ;;  %v22574_v48 = vld [vmem:[#allocation452_spill] sm:$0xff]  ;;  %v22575_v44 = vcombine.high %v22448_v52, %v22447_v49  ;;  %v22583_v49 = vcombine.high %v22459_v47, %v22458_v40  ;;  %v22584_v52 = vld [vmem:[#allocation31_spill] sm:$0xff] }
 0x38d   :  { %v16786_v14 = vpop.permute.xlu1 %9377  ;;  %22560 = vst [vmem:[#allocation313_spill] sm:$0xff] %v16788_v59  ;;  %v8720_v59 = vcombine.high %v22572_v55, %v22571_v20  ;;  %v22576_v34 = vld [vmem:[#allocation20_spill] sm:$0xff]  ;;  %v22589_v40 = vcombine.high %v22464_v41, %v22463_v50  ;;  %v22590_v47 = vld [vmem:[#allocation54_spill] sm:$0xff]  ;;  %v22599_v50 = vld [vmem:[#allocation85_spill] sm:$0xff] }
 0x38e   :  { %22559 = vst [vmem:[#allocation314_spill] sm:$0xff] %v16786_v14  ;;  %v16806_v14 = vrot.slane %v8696_v33, %v11726_v13  ;;  %v22598_v41 = vld [vmem:[#allocation86_spill] sm:$0xff] }
 0x38f   :  { %9621 = vrot.lane.b32.xlu1 %v22563_v43, %s11590_s22  ;;  %9635 = vrot.lane.b32.xlu0 %v22566_v0, %s11590_s22  ;;  %v8736_v43 = vcombine.high %v22574_v48, %v22573_v9  ;;  %v22577_v0 = vld [vmem:[#allocation21_spill] sm:$0xff]  ;;  %v16827_v55 = vrot.slane %v8720_v59, %v11711_v56  ;;  %v22585_v48 = vld [vmem:[#allocation30_spill] sm:$0xff] }
 0x390   :  { %v16800_v28 = vpop.permute.xlu0 %9459  ;;  %22570 = vst [vmem:[#allocation265_spill] sm:$0xff] %v16806_v14  ;;  %v22578_v24 = vcombine.low %v22576_v34, %v22577_v0  ;;  %v22694_v14 = vld [vmem:[#allocation421_spill] sm:$0xff]  ;;  %v22718_v58 = vcombine.high %v22576_v34, %v22577_v0  ;;  %v22728_v34 = vld [vmem:[#allocation458_spill] sm:$0xff] }
 0x391   :  { %v16798_v16 = vpop.permute.xlu1 %9381  ;;  %22568 = vst [vmem:[#allocation350_spill] sm:$0xff] %v16800_v28  ;;  %22581 = vst [vmem:[#allocation420_spill] sm:$0xff] %v16827_v55  ;;  %v16830_v9 = vrot.slane %v8736_v43, %v11711_v56  ;;  %v8767_v59 = vcombine.low %v16827_v55, %v16827_v55 }
 0x392   :  { %22567 = vst [vmem:[#allocation351_spill] sm:$0xff] %v16798_v16 }
 0x393   :  { %9625 = vrot.lane.b32.xlu1 %v22575_v44, %s11590_s22  ;;  %9703 = vrot.lane.b32.xlu0 %v22578_v24, %s11591_s23  ;;  %22582 = vst [vmem:[#allocation328_spill] sm:$0xff] %v16830_v9  ;;  %v22586_v44 = vcombine.low %v22584_v52, %v22585_v48  ;;  %v8799_v43 = vcombine.low %v16830_v9, %v16830_v9  ;;  %v22687_v9 = vld [vmem:[#allocation382_spill] sm:$0xff] }
 0x394   :  { %v16824_v20 = vpop.permute.xlu0 %9463  ;;  %v16871_v32 = vrot.slane %v8767_v59, %v11726_v13  ;;  %v22621_v59 = vld [vmem:[#allocation66_spill] sm:$0xff] }
 0x395   :  { %v16822_v28 = vpop.permute.xlu1 %9449  ;;  %22580 = vst [vmem:[#allocation380_spill] sm:$0xff] %v16824_v20 }
 0x396   :  { %22579 = vst [vmem:[#allocation381_spill] sm:$0xff] %v16822_v28  ;;  %22601 = vst [vmem:[#allocation468_spill] sm:$0xff] %v16871_v32  ;;  %v22646_v32 = vld [vmem:[#allocation136_spill] sm:$0xff] }
 0x397   :  { %9629 = vrot.lane.b32.xlu1 %v22583_v49, %s11590_s22  ;;  %9707 = vrot.lane.b32.xlu0 %v22586_v44, %s11591_s23  ;;  %v22591_v49 = vld [vmem:[#allocation53_spill] sm:$0xff] }
 0x398   :  { %v16842_v33 = vpop.permute.xlu0 %9467  ;;  %v22592_v20 = vcombine.low %v22590_v47, %v22591_v49 }
 0x399   :  { %v16840_v24 = vpop.permute.xlu1 %9453  ;;  %22588 = vst [vmem:[#allocation446_spill] sm:$0xff] %v16842_v33 }
 0x39a   :  { %22587 = vst [vmem:[#allocation329_spill] sm:$0xff] %v16840_v24  ;;  %v22605_v24 = vld [vmem:[#allocation22_spill] sm:$0xff] }
 0x39b   :  { %9633 = vrot.lane.b32.xlu1 %v22589_v40, %s11590_s22  ;;  %9711 = vrot.lane.b32.xlu0 %v22592_v20, %s11591_s23  ;;  %v22600_v40 = vcombine.low %v22598_v41, %v22599_v50  ;;  %v16874_v20 = vrot.slane %v8799_v43, %v11726_v13 }
 0x39c   :  { %v16860_v16 = vpop.permute.xlu0 %9471 }
 0x39d   :  { %v16858_v33 = vpop.permute.xlu1 %9457  ;;  %22596 = vst [vmem:[#allocation367_spill] sm:$0xff] %v16860_v16  ;;  %22602 = vst [vmem:[#allocation469_spill] sm:$0xff] %v16874_v20  ;;  %v22606_v16 = vld [vmem:[#allocation23_spill] sm:$0xff] }
 0x39e   :  { %22595 = vst [vmem:[#allocation366_spill] sm:$0xff] %v16858_v33  ;;  %v22607_v39 = vcombine.low %v22605_v24, %v22606_v16 }
 0x39f   :  { %9637 = vrot.lane.b32.xlu1 %v22597_v54, %s11590_s22  ;;  %9715 = vrot.lane.b32.xlu0 %v22600_v40, %s11591_s23  ;;  %v22609_v54 = vld [vmem:[#allocation122_spill] sm:$0xff] }
 0x3a0   :  { %v16878_v44 = vpop.permute.xlu0 %9475  ;;  %v22610_v33 = vcombine.low %v22608_v38, %v22609_v54 }
 0x3a1   :  { %v16876_v28 = vpop.permute.xlu1 %9461  ;;  %22604 = vst [vmem:[#allocation440_spill] sm:$0xff] %v16878_v44  ;;  %v22614_v44 = vld [vmem:[#allocation40_spill] sm:$0xff] }
 0x3a2   :  { %22603 = vst [vmem:[#allocation451_spill] sm:$0xff] %v16876_v28  ;;  %v22613_v28 = vld [vmem:[#allocation43_spill] sm:$0xff] }
 0x3a3   :  { %9705 = vrot.lane.b32.xlu1 %v22607_v39, %s11591_s23  ;;  %9719 = vrot.lane.b32.xlu0 %v22610_v33, %s11591_s23  ;;  %v22615_v21 = vcombine.low %v22613_v28, %v22614_v44  ;;  %v22617_v39 = vld [vmem:[#allocation155_spill] sm:$0xff] }
 0x3a4   :  { %v16892_v43 = vpop.permute.xlu0 %9479  ;;  %v22618_v7 = vcombine.low %v22616_v1, %v22617_v39 }
 0x3a5   :  { %v16890_v40 = vpop.permute.xlu1 %9465  ;;  %22612 = vst [vmem:[#allocation452_spill] sm:$0xff] %v16892_v43  ;;  %v22624_v43 = vld [vmem:[#allocation191_spill] sm:$0xff] }
 0x3a6   :  { %22611 = vst [vmem:[#allocation45_spill] sm:$0xff] %v16890_v40  ;;  %v22623_v40 = vcombine.low %v22621_v59, %v22622_v45  ;;  %v22626_v23 = vcombine.low %v22624_v43, %v22625_v19 }
 0x3a7   :  { %9709 = vrot.lane.b32.xlu1 %v22615_v21, %s11591_s23  ;;  %9723 = vrot.lane.b32.xlu0 %v22618_v7, %s11591_s23  ;;  %v8872_v7 = vcombine.high %v16681_v31, %v16681_v31 }
 0x3a8   :  { %v16904_v33 = vpop.permute.xlu0 %9483 }
 0x3a9   :  { %v16902_v36 = vpop.permute.xlu1 %9469  ;;  %22620 = vst [vmem:[#allocation21_spill] sm:$0xff] %v16904_v33 }
 0x3aa   :  { %22619 = vst [vmem:[#allocation20_spill] sm:$0xff] %v16902_v36  ;;  %v8904_v36 = vcombine.high %v16684_v17, %v16684_v17  ;;  %v16937_v17 = vrot.slane %v8872_v7, %v11726_v13 }
 0x3ab   :  { %9713 = vrot.lane.b32.xlu1 %v22623_v40, %s11591_s23  ;;  %9727 = vrot.lane.b32.xlu0 %v22626_v23, %s11591_s23  ;;  %v22631_v40 = vld [vmem:[#allocation103_spill] sm:$0xff]  ;;  %v22634_v23 = vld [vmem:[#allocation217_spill] sm:$0xff] }
 0x3ac   :  { %v16922_v29 = vpop.permute.xlu0 %9487  ;;  %v22633_v10 = vcombine.low %v22631_v40, %v22632_v15  ;;  %v22636_v30 = vcombine.low %v22634_v23, %v22635_v22  ;;  %22639 = vst [vmem:[#allocation86_spill] sm:$0xff] %v16937_v17  ;;  %v16940_v21 = vrot.slane %v8904_v36, %v11726_v13 }
 0x3ad   :  { %v16920_v33 = vpop.permute.xlu1 %9473  ;;  %22630 = vst [vmem:[#allocation30_spill] sm:$0xff] %v16922_v29  ;;  %v22642_v29 = vld [vmem:[#allocation253_spill] sm:$0xff] }
 0x3ae   :  { %22629 = vst [vmem:[#allocation31_spill] sm:$0xff] %v16920_v33  ;;  %22640 = vst [vmem:[#allocation85_spill] sm:$0xff] %v16940_v21  ;;  %v8928_v33 = vcombine.high %v22642_v29, %v22641_v60  ;;  %v22655_v60 = vld [vmem:[#allocation171_spill] sm:$0xff] }
 0x3af   :  { %9717 = vrot.lane.b32.xlu1 %v22633_v10, %s11591_s23  ;;  %9731 = vrot.lane.b32.xlu0 %v22636_v30, %s11591_s23  ;;  %v22644_v10 = vld [vmem:[#allocation148_spill] sm:$0xff]  ;;  %v22647_v30 = vcombine.low %v22645_v11, %v22646_v32 }
 0x3b0   :  { %v16934_v31 = vpop.permute.xlu0 %9491  ;;  %v8944_v26 = vcombine.high %v22644_v10, %v22643_v8  ;;  %v16961_v29 = vrot.slane %v8928_v33, %v11711_v56  ;;  %v22656_v10 = vld [vmem:[#allocation169_spill] sm:$0xff] }
 0x3b1   :  { %v16932_v2 = vpop.permute.xlu1 %9477  ;;  %22638 = vst [vmem:[#allocation53_spill] sm:$0xff] %v16934_v31  ;;  %v22649_v31 = vld [vmem:[#allocation244_spill] sm:$0xff] }
 0x3b2   :  { %22637 = vst [vmem:[#allocation54_spill] sm:$0xff] %v16932_v2  ;;  %v22648_v2 = vld [vmem:[#allocation243_spill] sm:$0xff]  ;;  %22653 = vst [vmem:[#allocation123_spill] sm:$0xff] %v16961_v29  ;;  %v16964_v8 = vrot.slane %v8944_v26, %v11711_v56  ;;  %v8975_v33 = vcombine.low %v16961_v29, %v16961_v29  ;;  %v22663_v26 = vld [vmem:[#allocation202_spill] sm:$0xff] }
 0x3b3   :  { %9721 = vrot.lane.b32.xlu1 %v22647_v30, %s11591_s23  ;;  %v22650_v20 = vcombine.low %v22648_v2, %v22649_v31  ;;  %v22657_v30 = vcombine.low %v22655_v60, %v22656_v10  ;;  %v22676_v29 = vld [vmem:[#allocation355_spill] sm:$0xff] }
 0x3b4   :  { %v16958_v12 = vpop.permute.xlu0 %9495  ;;  %22654 = vst [vmem:[#allocation122_spill] sm:$0xff] %v16964_v8  ;;  %v9007_v56 = vcombine.low %v16964_v8, %v16964_v8  ;;  %v22675_v8 = vcombine.low %v22673_v3, %v22674_v57  ;;  %v17005_v21 = vrot.slane %v8975_v33, %v11726_v13 }
 0x3b5   :  { %9735 = vrot.lane.b32.xlu0 %v22650_v20, %s11591_s23  ;;  %v16956_v7 = vpop.permute.xlu1 %9481  ;;  %22652 = vst [vmem:[#allocation23_spill] sm:$0xff] %v16958_v12  ;;  %v22658_v20 = vld [vmem:[#allocation286_spill] sm:$0xff]  ;;  %v22664_v12 = vld [vmem:[#allocation200_spill] sm:$0xff] }
 0x3b6   :  { %22651 = vst [vmem:[#allocation22_spill] sm:$0xff] %v16956_v7  ;;  %v22660_v18 = vcombine.low %v22658_v20, %v22659_v6  ;;  %v22665_v51 = vcombine.low %v22663_v26, %v22664_v12  ;;  %22679 = vst [vmem:[#allocation66_spill] sm:$0xff] %v17005_v21  ;;  %v22700_v21 = vld [vmem:[#allocation331_spill] sm:$0xff] }
 0x3b7   :  { %9725 = vrot.lane.b32.xlu1 %v22657_v30, %s11591_s23  ;;  %v22666_v30 = vld [vmem:[#allocation318_spill] sm:$0xff] }
 0x3b8   :  { %v16976_v7 = vpop.permute.xlu0 %9499  ;;  %v22668_v37 = vcombine.low %v22666_v30, %v22667_v53 }
 0x3b9   :  { %9739 = vrot.lane.b32.xlu0 %v22660_v18, %s11591_s23  ;;  %v16974_v36 = vpop.permute.xlu1 %9485  ;;  %22662 = vst [vmem:[#allocation40_spill] sm:$0xff] %v16976_v7 }
 0x3ba   :  { %22661 = vst [vmem:[#allocation43_spill] sm:$0xff] %v16974_v36  ;;  %v22683_v36 = vld [vmem:[#allocation262_spill] sm:$0xff] }
 0x3bb   :  { %9729 = vrot.lane.b32.xlu1 %v22665_v51, %s11591_s23  ;;  %v22677_v51 = vld [vmem:[#allocation352_spill] sm:$0xff] }
 0x3bc   :  { %v16994_v4 = vpop.permute.xlu0 %9503  ;;  %v22678_v17 = vcombine.low %v22676_v29, %v22677_v51 }
 0x3bd   :  { %9743 = vrot.lane.b32.xlu0 %v22668_v37, %s11591_s23  ;;  %v16992_v7 = vpop.permute.xlu1 %9489  ;;  %22672 = vst [vmem:[#allocation155_spill] sm:$0xff] %v16994_v4  ;;  %v17008_v37 = vrot.slane %v9007_v56, %v11726_v13  ;;  %v22684_v4 = vld [vmem:[#allocation266_spill] sm:$0xff] }
 0x3be   :  { %22671 = vst [vmem:[#allocation157_spill] sm:$0xff] %v16992_v7  ;;  %v22685_v7 = vcombine.low %v22683_v36, %v22684_v4 }
 0x3bf   :  { %9733 = vrot.lane.b32.xlu1 %v22675_v8, %s11591_s23  ;;  %22680 = vst [vmem:[#allocation63_spill] sm:$0xff] %v17008_v37  ;;  %v22686_v8 = vld [vmem:[#allocation385_spill] sm:$0xff]  ;;  %v22703_v37 = vld [vmem:[#allocation448_spill] sm:$0xff] }
 0x3c0   :  { %v17012_v18 = vpop.permute.xlu0 %9507  ;;  %v22688_v55 = vcombine.low %v22686_v8, %v22687_v9 }
 0x3c1   :  { %9747 = vrot.lane.b32.xlu0 %v22678_v17, %s11591_s23  ;;  %v17010_v25 = vpop.permute.xlu1 %9493  ;;  %22682 = vst [vmem:[#allocation190_spill] sm:$0xff] %v17012_v18  ;;  %v22692_v18 = vld [vmem:[#allocation298_spill] sm:$0xff] }
 0x3c2   :  { %22681 = vst [vmem:[#allocation191_spill] sm:$0xff] %v17010_v25  ;;  %v22691_v25 = vld [vmem:[#allocation301_spill] sm:$0xff]  ;;  %v22699_v17 = vld [vmem:[#allocation330_spill] sm:$0xff] }
 0x3c3   :  { %9737 = vrot.lane.b32.xlu1 %v22685_v7, %s11591_s23  ;;  %v22693_v61 = vcombine.low %v22691_v25, %v22692_v18  ;;  %v22695_v7 = vld [vmem:[#allocation422_spill] sm:$0xff] }
 0x3c4   :  { %v22696_v4 = vcombine.low %v22694_v14, %v22695_v7 }
 0x3c5   :  { %9751 = vrot.lane.b32.xlu0 %v22688_v55, %s11591_s23  ;;  %v17024_v33 = vpop.permute.xlu1 %9497  ;;  %v17026_v56 = vpop.permute.xlu0 %9575 }
 0x3c6   :  { %22689 = vst [vmem:[#allocation103_spill] sm:$0xff] %v17024_v33  ;;  %22690 = vst [vmem:[#allocation99_spill] sm:$0xff] %v17026_v56  ;;  %v22701_v33 = vcombine.low %v22699_v17, %v22700_v21  ;;  %v22702_v56 = vld [vmem:[#allocation447_spill] sm:$0xff]  ;;  %v22710_v21 = vld [vmem:[#allocation473_spill] sm:$0xff] }
 0x3c7   :  { %9741 = vrot.lane.b32.xlu1 %v22693_v61, %s11591_s23  ;;  %v22704_v9 = vcombine.low %v22702_v56, %v22703_v37  ;;  %v22715_v61 = vld [vmem:[#allocation403_spill] sm:$0xff] }
 0x3c9   :  { %9755 = vrot.lane.b32.xlu0 %v22696_v4, %s11591_s23  ;;  %v17036_v36 = vpop.permute.xlu1 %9501  ;;  %v17038_v55 = vpop.permute.xlu0 %9579 }
 0x3ca   :  { %22697 = vst [vmem:[#allocation217_spill] sm:$0xff] %v17036_v36  ;;  %22698 = vst [vmem:[#allocation216_spill] sm:$0xff] %v17038_v55  ;;  %v22707_v36 = vld [vmem:[#allocation368_spill] sm:$0xff]  ;;  %v22708_v55 = vld [vmem:[#allocation369_spill] sm:$0xff] }
 0x3cb   :  { %9745 = vrot.lane.b32.xlu1 %v22701_v33, %s11591_s23  ;;  %v22709_v7 = vcombine.low %v22707_v36, %v22708_v55  ;;  %v22711_v33 = vld [vmem:[#allocation470_spill] sm:$0xff] }
 0x3cc   :  { %v22712_v17 = vcombine.low %v22710_v21, %v22711_v33 }
 0x3cd   :  { %9759 = vrot.lane.b32.xlu0 %v22704_v9, %s11591_s23  ;;  %v17050_v18 = vpop.permute.xlu1 %9505  ;;  %v17052_v4 = vpop.permute.xlu0 %9583 }
 0x3ce   :  { %22705 = vst [vmem:[#allocation114_spill] sm:$0xff] %v17050_v18  ;;  %22706 = vst [vmem:[#allocation253_spill] sm:$0xff] %v17052_v4  ;;  %v22717_v18 = vcombine.low %v22715_v61, %v22716_v35 }
 0x3cf   :  { %9749 = vrot.lane.b32.xlu1 %v22709_v7, %s11591_s23 }
 0x3d1   :  { %9763 = vrot.lane.b32.xlu0 %v22712_v17, %s11591_s23  ;;  %v17062_v14 = vpop.permute.xlu1 %9509  ;;  %v17064_v9 = vpop.permute.xlu0 %9587  ;;  %v22721_v17 = vld [vmem:[#allocation436_spill] sm:$0xff] }
 0x3d2   :  { %22713 = vst [vmem:[#allocation184_spill] sm:$0xff] %v17062_v14  ;;  %22714 = vst [vmem:[#allocation148_spill] sm:$0xff] %v17064_v9  ;;  %v22722_v14 = vld [vmem:[#allocation432_spill] sm:$0xff]  ;;  %v22724_v9 = vcombine.high %v22584_v52, %v22585_v48 }
 0x3d3   :  { %9753 = vrot.lane.b32.xlu1 %v22717_v18, %s11591_s23  ;;  %v22723_v33 = vcombine.low %v22721_v17, %v22722_v14  ;;  %v22733_v48 = vld [vmem:[#allocation480_spill] sm:$0xff] }
 0x3d5   :  { %9831 = vrot.lane.b32.xlu0 %v22718_v58, %s11592_s24  ;;  %v17074_v7 = vpop.permute.xlu1 %9577  ;;  %v17076_v4 = vpop.permute.xlu0 %9591  ;;  %v22727_v58 = vld [vmem:[#allocation304_spill] sm:$0xff] }
 0x3d6   :  { %22719 = vst [vmem:[#allocation138_spill] sm:$0xff] %v17074_v7  ;;  %22720 = vst [vmem:[#allocation136_spill] sm:$0xff] %v17076_v4  ;;  %v22729_v0 = vcombine.low %v22727_v58, %v22728_v34  ;;  %v22730_v4 = vcombine.high %v22590_v47, %v22591_v49  ;;  %v22739_v49 = vcombine.high %v22605_v24, %v22606_v16 }
 0x3d7   :  { %9757 = vrot.lane.b32.xlu1 %v22723_v33, %s11591_s23 }
 0x3d9   :  { %9835 = vrot.lane.b32.xlu0 %v22724_v9, %s11592_s24  ;;  %v17086_v18 = vpop.permute.xlu1 %9581  ;;  %v17088_v35 = vpop.permute.xlu0 %9595  ;;  %v22734_v9 = vld [vmem:[#allocation483_spill] sm:$0xff] }
 0x3da   :  { %22725 = vst [vmem:[#allocation243_spill] sm:$0xff] %v17086_v18  ;;  %22726 = vst [vmem:[#allocation244_spill] sm:$0xff] %v17088_v35  ;;  %v22735_v35 = vcombine.low %v22733_v48, %v22734_v9 }
 0x3db   :  { %9761 = vrot.lane.b32.xlu1 %v22729_v0, %s11591_s23  ;;  %v22736_v0 = vcombine.high %v22598_v41, %v22599_v50  ;;  %v22743_v41 = vcombine.high %v22613_v28, %v22614_v44  ;;  %v22744_v50 = vcombine.high %v22616_v1, %v22617_v39  ;;  %v22751_v39 = vcombine.high %v22631_v40, %v22632_v15 }
 0x3dc   :  { %v8144_v15 = vcombine.high %v16675_v63, %v16675_v63 }
 0x3dd   :  { %9839 = vrot.lane.b32.xlu0 %v22730_v4, %s11592_s24  ;;  %v17100_v7 = vpop.permute.xlu1 %9585  ;;  %v17102_v52 = vpop.permute.xlu0 %9599  ;;  %v22740_v4 = vcombine.high %v22608_v38, %v22609_v54  ;;  %v22747_v38 = vcombine.high %v22621_v59, %v22622_v45  ;;  %v22748_v54 = vcombine.high %v22624_v43, %v22625_v19  ;;  %v22752_v45 = vcombine.high %v22634_v23, %v22635_v22 }
 0x3de   :  { %22731 = vst [vmem:[#allocation171_spill] sm:$0xff] %v17100_v7  ;;  %22732 = vst [vmem:[#allocation169_spill] sm:$0xff] %v17102_v52  ;;  %v22755_v43 = vcombine.high %v22645_v11, %v22646_v32  ;;  %v8176_v22 = vcombine.high %v16678_v27, %v16678_v27  ;;  %v22759_v32 = vcombine.high %v22655_v60, %v22656_v10  ;;  %v22828_v10 = vld [vmem:[#allocation125_spill] sm:$0xff]  ;;  %v22900_v52 = vld [vmem:[#allocation474_spill] sm:$0xff] }
 0x3df   :  { %9765 = vrot.lane.b32.xlu1 %v22735_v35, %s11591_s23  ;;  %v22760_v11 = vcombine.high %v22658_v20, %v22659_v6  ;;  %v17195_v27 = vrot.slane %v8144_v15, %v11726_v13  ;;  %v22765_v60 = vcombine.high %v22663_v26, %v22664_v12  ;;  %v22766_v6 = vcombine.high %v22666_v30, %v22667_v53  ;;  %v22820_v20 = vld [vmem:[#allocation92_spill] sm:$0xff] }
 0x3e0   :  { %v22769_v12 = vcombine.high %v22673_v3, %v22674_v57  ;;  %v22770_v53 = vcombine.high %v22676_v29, %v22677_v51  ;;  %v22780_v29 = vld [vmem:[#allocation298_spill] sm:$0xff] }
 0x3e1   :  { %9843 = vrot.lane.b32.xlu0 %v22736_v0, %s11592_s24  ;;  %v17112_v18 = vpop.permute.xlu1 %9589  ;;  %v17114_v47 = vpop.permute.xlu0 %9603  ;;  %v22756_v0 = vcombine.high %v22648_v2, %v22649_v31  ;;  %22763 = vst [vmem:[#allocation368_spill] sm:$0xff] %v17195_v27  ;;  %v17198_v31 = vrot.slane %v8176_v22, %v11726_v13  ;;  %v22781_v51 = vcombine.high %v22691_v25, %v22780_v29  ;;  %v22801_v29 = vld [vmem:[#allocation70_spill] sm:$0xff] }
 0x3e2   :  { %22737 = vst [vmem:[#allocation286_spill] sm:$0xff] %v17112_v18  ;;  %22738 = vst [vmem:[#allocation283_spill] sm:$0xff] %v17114_v47 }
 0x3e3   :  { %9833 = vrot.lane.b32.xlu1 %v22739_v49, %s11592_s24  ;;  %22764 = vst [vmem:[#allocation369_spill] sm:$0xff] %v17198_v31 }
 0x3e5   :  { %9847 = vrot.lane.b32.xlu0 %v22740_v4, %s11592_s24  ;;  %v17124_v35 = vpop.permute.xlu1 %9593  ;;  %v17126_v33 = vpop.permute.xlu0 %9607 }
 0x3e6   :  { %22741 = vst [vmem:[#allocation202_spill] sm:$0xff] %v17124_v35  ;;  %22742 = vst [vmem:[#allocation200_spill] sm:$0xff] %v17126_v33  ;;  %v22894_v35 = vld [vmem:[#allocation203_spill] sm:$0xff] }
 0x3e7   :  { %9837 = vrot.lane.b32.xlu1 %v22743_v41, %s11592_s24  ;;  %v22773_v41 = vld [vmem:[#allocation262_spill] sm:$0xff] }
 0x3e9   :  { %9851 = vrot.lane.b32.xlu0 %v22744_v50, %s11592_s24  ;;  %v17136_v16 = vpop.permute.xlu1 %9597  ;;  %v17138_v24 = vpop.permute.xlu0 %9611  ;;  %v22774_v50 = vld [vmem:[#allocation266_spill] sm:$0xff] }
 0x3ea   :  { %22745 = vst [vmem:[#allocation318_spill] sm:$0xff] %v17136_v16  ;;  %22746 = vst [vmem:[#allocation315_spill] sm:$0xff] %v17138_v24 }
 0x3eb   :  { %9841 = vrot.lane.b32.xlu1 %v22747_v38, %s11592_s24  ;;  %v22775_v38 = vcombine.high %v22773_v41, %v22774_v50  ;;  %v22795_v50 = vcombine.high %v22707_v36, %v22708_v55  ;;  %v22804_v36 = vld [vmem:[#allocation420_spill] sm:$0xff] }
 0x3ec   :  { %v8768_v55 = vcombine.high %v22804_v36, %v22804_v36 }
 0x3ed   :  { %9855 = vrot.lane.b32.xlu0 %v22748_v54, %s11592_s24  ;;  %v17150_v44 = vpop.permute.xlu1 %9601  ;;  %v17152_v1 = vpop.permute.xlu0 %9615  ;;  %v22776_v54 = vld [vmem:[#allocation382_spill] sm:$0xff] }
 0x3ee   :  { %22749 = vst [vmem:[#allocation226_spill] sm:$0xff] %v17150_v44  ;;  %22750 = vst [vmem:[#allocation223_spill] sm:$0xff] %v17152_v1  ;;  %v17307_v36 = vrot.slane %v8768_v55, %v11726_v13 }
 0x3ef   :  { %9845 = vrot.lane.b32.xlu1 %v22751_v39, %s11592_s24  ;;  %v22777_v39 = vcombine.high %v22686_v8, %v22776_v54  ;;  %v22787_v8 = vld [vmem:[#allocation330_spill] sm:$0xff] }
 0x3f1   :  { %9859 = vrot.lane.b32.xlu0 %v22752_v45, %s11592_s24  ;;  %v17162_v59 = vpop.permute.xlu1 %9605  ;;  %v17164_v19 = vpop.permute.xlu0 %9619  ;;  %v22782_v45 = vld [vmem:[#allocation421_spill] sm:$0xff] }
 0x3f2   :  { %22753 = vst [vmem:[#allocation355_spill] sm:$0xff] %v17162_v59  ;;  %22754 = vst [vmem:[#allocation352_spill] sm:$0xff] %v17164_v19 }
 0x3f3   :  { %9849 = vrot.lane.b32.xlu1 %v22755_v43, %s11592_s24  ;;  %v22783_v43 = vld [vmem:[#allocation422_spill] sm:$0xff] }
 0x3f5   :  { %9863 = vrot.lane.b32.xlu0 %v22756_v0, %s11592_s24  ;;  %v17178_v40 = vpop.permute.xlu1 %9609  ;;  %v17180_v23 = vpop.permute.xlu0 %9623  ;;  %v22784_v0 = vcombine.high %v22782_v45, %v22783_v43  ;;  %v22802_v45 = vld [vmem:[#allocation400_spill] sm:$0xff] }
 0x3f6   :  { %22757 = vst [vmem:[#allocation385_spill] sm:$0xff] %v17178_v40  ;;  %22758 = vst [vmem:[#allocation301_spill] sm:$0xff] %v17180_v23  ;;  %v22803_v43 = vcombine.high %v22715_v61, %v22802_v45  ;;  %v22810_v61 = vcombine.high %v22721_v17, %v22722_v14  ;;  %v22814_v45 = vld [vmem:[#allocation88_spill] sm:$0xff]  ;;  %v22817_v14 = vcombine.high %v22727_v58, %v22728_v34  ;;  %v22827_v17 = vld [vmem:[#allocation127_spill] sm:$0xff] }
 0x3f7   :  { %9853 = vrot.lane.b32.xlu1 %v22759_v32, %s11592_s24  ;;  %v22788_v32 = vld [vmem:[#allocation331_spill] sm:$0xff]  ;;  %v22822_v58 = vcombine.high %v22733_v48, %v22734_v9  ;;  %v22831_v9 = vld [vmem:[#allocation108_spill] sm:$0xff]  ;;  %v22875_v40 = vld [vmem:[#allocation358_spill] sm:$0xff] }
 0x3f9   :  { %9867 = vrot.lane.b32.xlu0 %v22760_v11, %s11592_s24  ;;  %v17190_v2 = vpop.permute.xlu1 %9613  ;;  %v17192_v63 = vpop.permute.xlu0 %9627  ;;  %v22789_v11 = vcombine.high %v22787_v8, %v22788_v32 }
 0x3fa   :  { %22761 = vst [vmem:[#allocation447_spill] sm:$0xff] %v17190_v2  ;;  %22762 = vst [vmem:[#allocation448_spill] sm:$0xff] %v17192_v63 }
 0x3fb   :  { %9857 = vrot.lane.b32.xlu1 %v22765_v60, %s11592_s24  ;;  %v22790_v60 = vcombine.high %v22702_v56, %v22703_v37  ;;  %v22800_v56 = vld [vmem:[#allocation68_spill] sm:$0xff] }
 0x3fd   :  { %9871 = vrot.lane.b32.xlu0 %v22766_v6, %s11592_s24  ;;  %v17212_v49 = vpop.permute.xlu1 %9617  ;;  %v17214_v4 = vpop.permute.xlu0 %9631  ;;  %v22854_v6 = vld [vmem:[#allocation248_spill] sm:$0xff] }
 0x3fe   :  { %22767 = vst [vmem:[#allocation473_spill] sm:$0xff] %v17212_v49  ;;  %22768 = vst [vmem:[#allocation403_spill] sm:$0xff] %v17214_v4  ;;  %v22868_v49 = vld [vmem:[#allocation102_spill] sm:$0xff] }
 0x3ff   :  { %9861 = vrot.lane.b32.xlu1 %v22769_v12, %s11592_s24 }
 0x401   :  { %9875 = vrot.lane.b32.xlu0 %v22770_v53, %s11592_s24  ;;  %v17224_v26 = vpop.permute.xlu1 %9621  ;;  %v17226_v30 = vpop.permute.xlu0 %9635 }
 0x402   :  { %22771 = vst [vmem:[#allocation436_spill] sm:$0xff] %v17224_v26  ;;  %22772 = vst [vmem:[#allocation432_spill] sm:$0xff] %v17226_v30 }
 0x403   :  { %9865 = vrot.lane.b32.xlu1 %v22775_v38, %s11592_s24  ;;  %v22796_v38 = vld [vmem:[#allocation470_spill] sm:$0xff] }
 0x404   :  { %v22797_v54 = vcombine.high %v22710_v21, %v22796_v38  ;;  %v22805_v21 = vld [vmem:[#allocation328_spill] sm:$0xff]  ;;  %22815 = vst [vmem:[#allocation470_spill] sm:$0xff] %v17307_v36 }
 0x405   :  { %9879 = vrot.lane.b32.xlu0 %v22777_v39, %s11592_s24  ;;  %v17236_v57 = vpop.permute.xlu1 %9625  ;;  %v17238_v3 = vpop.permute.xlu0 %9703 }
 0x406   :  { %22778 = vst [vmem:[#allocation304_spill] sm:$0xff] %v17236_v57  ;;  %22779 = vst [vmem:[#allocation458_spill] sm:$0xff] %v17238_v3  ;;  %v22833_v57 = vld [vmem:[#allocation161_spill] sm:$0xff]  ;;  %v22888_v3 = vld [vmem:[#allocation163_spill] sm:$0xff] }
 0x407   :  { %9869 = vrot.lane.b32.xlu1 %v22781_v51, %s11592_s24  ;;  %v2887_v51 = vcombine.low %v22801_v29, %v22800_v56 }
 0x409   :  { %9883 = vrot.lane.b32.xlu0 %v22784_v0, %s11592_s24  ;;  %v17248_v15 = vpop.permute.xlu1 %9629  ;;  %v17250_v22 = vpop.permute.xlu0 %9707  ;;  %v8800_v0 = vcombine.high %v22805_v21, %v22805_v21 }
 0x40a   :  { %22785 = vst [vmem:[#allocation480_spill] sm:$0xff] %v17248_v15  ;;  %22786 = vst [vmem:[#allocation483_spill] sm:$0xff] %v17250_v22  ;;  %v22873_v22 = vld [vmem:[#allocation229_spill] sm:$0xff] }
 0x40b   :  { %9873 = vrot.lane.b32.xlu1 %v22789_v11, %s11592_s24  ;;  %v22808_v11 = vld [vmem:[#allocation72_spill] sm:$0xff]  ;;  %v17310_v21 = vrot.slane %v8800_v0, %v11726_v13  ;;  %v22821_v0 = vld [vmem:[#allocation91_spill] sm:$0xff] }
 0x40c   :  { %v3927_v12 = vcombine.low %v22821_v0, %v22820_v20 }
 0x40d   :  { %9887 = vrot.lane.b32.xlu0 %v22790_v60, %s11592_s24  ;;  %v17262_v53 = vpop.permute.xlu1 %9633  ;;  %v17264_v41 = vpop.permute.xlu0 %9711  ;;  %v22809_v60 = vld [vmem:[#allocation71_spill] sm:$0xff]  ;;  %22816 = vst [vmem:[#allocation68_spill] sm:$0xff] %v17310_v21 }
 0x40e   :  { %22793 = vst [vmem:[#allocation262_spill] sm:$0xff] %v17262_v53  ;;  %22794 = vst [vmem:[#allocation266_spill] sm:$0xff] %v17264_v41  ;;  %v4551_v53 = vcombine.low %v22828_v10, %v22827_v17  ;;  %v22834_v21 = vld [vmem:[#allocation159_spill] sm:$0xff]  ;;  %v22862_v41 = vld [vmem:[#allocation69_spill] sm:$0xff] }
 0x40f   :  { %9877 = vrot.lane.b32.xlu1 %v22795_v50, %s11592_s24  ;;  %v3095_v50 = vcombine.low %v22809_v60, %v22808_v11  ;;  %v4759_v36 = vcombine.low %v22834_v21, %v22833_v57 }
 0x411   :  { %9891 = vrot.lane.b32.xlu0 %v22797_v54, %s11592_s24  ;;  %v17274_v39 = vpop.permute.xlu1 %9637  ;;  %v17276_v37 = vpop.permute.xlu0 %9715 }
 0x412   :  { %22798 = vst [vmem:[#allocation382_spill] sm:$0xff] %v17274_v39  ;;  %22799 = vst [vmem:[#allocation298_spill] sm:$0xff] %v17276_v37  ;;  %v22861_v39 = vld [vmem:[#allocation67_spill] sm:$0xff] }
 0x413   :  { %9881 = vrot.lane.b32.xlu1 %v22803_v43, %s11592_s24  ;;  %v6423_v26 = vcombine.low %v22862_v41, %v22861_v39 }
 0x415   :  { %9959 = vrot.lane.b32.xlu0 %v2887_v51, %s11593_s25  ;;  %v17289_v8 = vpop.permute.xlu1 %9705  ;;  %v17291_v32 = vpop.permute.xlu0 %9719  ;;  %v22813_v51 = vld [vmem:[#allocation89_spill] sm:$0xff] }
 0x416   :  { %22806 = vst [vmem:[#allocation421_spill] sm:$0xff] %v17289_v8  ;;  %22807 = vst [vmem:[#allocation422_spill] sm:$0xff] %v17291_v32  ;;  %v3719_v43 = vcombine.low %v22814_v45, %v22813_v51  ;;  %v22855_v32 = vld [vmem:[#allocation123_spill] sm:$0xff] }
 0x417   :  { %9885 = vrot.lane.b32.xlu1 %v22810_v61, %s11592_s24  ;;  %v8976_v8 = vcombine.high %v22855_v32, %v22855_v32 }
 0x419   :  { %9963 = vrot.lane.b32.xlu0 %v3095_v50, %s11593_s25  ;;  %v17300_v38 = vpop.permute.xlu1 %9709  ;;  %v17302_v54 = vpop.permute.xlu0 %9723  ;;  %v22826_v50 = vld [vmem:[#allocation105_spill] sm:$0xff]  ;;  %v17407_v63 = vrot.slane %v8976_v8, %v11726_v13  ;;  %v22874_v8 = vld [vmem:[#allocation120_spill] sm:$0xff] }
 0x41a   :  { %22811 = vst [vmem:[#allocation330_spill] sm:$0xff] %v17300_v38  ;;  %22812 = vst [vmem:[#allocation331_spill] sm:$0xff] %v17302_v54  ;;  %v22851_v38 = vld [vmem:[#allocation144_spill] sm:$0xff]  ;;  %v5695_v23 = vcombine.low %v22874_v8, %v22873_v22 }
 0x41b   :  { %9889 = vrot.lane.b32.xlu1 %v22817_v14, %s11592_s24  ;;  %v22825_v14 = vld [vmem:[#allocation106_spill] sm:$0xff]  ;;  %22869 = vst [vmem:[#allocation161_spill] sm:$0xff] %v17407_v63  ;;  %v22882_v63 = vld [vmem:[#allocation160_spill] sm:$0xff] }
 0x41c   :  { %v2991_v28 = vcombine.low %v22826_v50, %v22825_v14 }
 0x41d   :  { %9967 = vrot.lane.b32.xlu0 %v3719_v43, %s11593_s25  ;;  %v17321_v61 = vpop.permute.xlu1 %9713  ;;  %v17323_v55 = vpop.permute.xlu0 %9727 }
 0x41e   :  { %22818 = vst [vmem:[#allocation70_spill] sm:$0xff] %v17321_v61  ;;  %22819 = vst [vmem:[#allocation400_spill] sm:$0xff] %v17323_v55  ;;  %v22847_v55 = vld [vmem:[#allocation81_spill] sm:$0xff]  ;;  %v22848_v61 = vld [vmem:[#allocation55_spill] sm:$0xff] }
 0x41f   :  { %9893 = vrot.lane.b32.xlu1 %v22822_v58, %s11592_s24  ;;  %v5591_v54 = vcombine.low %v22848_v61, %v22847_v55 }
 0x421   :  { %9971 = vrot.lane.b32.xlu0 %v3927_v12, %s11593_s25  ;;  %v17332_v34 = vpop.permute.xlu1 %9717  ;;  %v17334_v43 = vpop.permute.xlu0 %9731  ;;  %v22832_v12 = vld [vmem:[#allocation107_spill] sm:$0xff] }
 0x422   :  { %22823 = vst [vmem:[#allocation420_spill] sm:$0xff] %v17332_v34  ;;  %22824 = vst [vmem:[#allocation328_spill] sm:$0xff] %v17334_v43  ;;  %v3199_v58 = vcombine.low %v22832_v12, %v22831_v9  ;;  %v22846_v34 = vld [vmem:[#allocation128_spill] sm:$0xff]  ;;  %v22852_v43 = vld [vmem:[#allocation141_spill] sm:$0xff] }
 0x423   :  { %9961 = vrot.lane.b32.xlu1 %v2991_v28, %s11593_s25  ;;  %v22837_v28 = vld [vmem:[#allocation111_spill] sm:$0xff]  ;;  %v4655_v25 = vcombine.low %v22852_v43, %v22851_v38 }
 0x425   :  { %9975 = vrot.lane.b32.xlu0 %v4551_v53, %s11593_s25  ;;  %v17342_v15 = vpop.permute.xlu1 %9721  ;;  %v22838_v53 = vld [vmem:[#allocation110_spill] sm:$0xff] }
 0x426   :  { %22829 = vst [vmem:[#allocation72_spill] sm:$0xff] %v17342_v15  ;;  %v3823_v62 = vcombine.low %v22838_v53, %v22837_v28  ;;  %v22840_v15 = vld [vmem:[#allocation33_spill] sm:$0xff] }
 0x427   :  { %v17344_v48 = vpop.permute.xlu0 %9735  ;;  %9965 = vrot.lane.b32.xlu1 %v3199_v58, %s11593_s25 }
 0x428   :  { %22830 = vst [vmem:[#allocation71_spill] sm:$0xff] %v17344_v48  ;;  %v5383_v48 = vcombine.low %v22840_v15, %v22839_v46 }
 0x429   :  { %9979 = vrot.lane.b32.xlu0 %v4759_v36, %s11593_s25  ;;  %v17352_v31 = vpop.permute.xlu1 %9725 }
 0x42a   :  { %22835 = vst [vmem:[#allocation89_spill] sm:$0xff] %v17352_v31  ;;  %v22845_v31 = vld [vmem:[#allocation129_spill] sm:$0xff] }
 0x42b   :  { %v17354_v27 = vpop.permute.xlu0 %9739  ;;  %9969 = vrot.lane.b32.xlu1 %v3823_v62, %s11593_s25 }
 0x42c   :  { %22836 = vst [vmem:[#allocation88_spill] sm:$0xff] %v17354_v27  ;;  %v4031_v27 = vcombine.low %v22846_v34, %v22845_v31 }
 0x42d   :  { %9983 = vrot.lane.b32.xlu0 %v5383_v48, %s11593_s25  ;;  %v17364_v58 = vpop.permute.xlu1 %9729 }
 0x42e   :  { %22843 = vst [vmem:[#allocation92_spill] sm:$0xff] %v17364_v58  ;;  %v22853_v58 = vld [vmem:[#allocation249_spill] sm:$0xff] }
 0x42f   :  { %v17366_v36 = vpop.permute.xlu0 %9743  ;;  %9973 = vrot.lane.b32.xlu1 %v4031_v27, %s11593_s25  ;;  %v22856_v27 = vld [vmem:[#allocation122_spill] sm:$0xff] }
 0x430   :  { %22844 = vst [vmem:[#allocation91_spill] sm:$0xff] %v17366_v36  ;;  %v6215_v36 = vcombine.low %v22854_v6, %v22853_v58 }
 0x431   :  { %9987 = vrot.lane.b32.xlu0 %v5591_v54, %s11593_s25  ;;  %v17374_v62 = vpop.permute.xlu1 %9733  ;;  %v9008_v54 = vcombine.high %v22856_v27, %v22856_v27  ;;  %v22866_v27 = vld [vmem:[#allocation74_spill] sm:$0xff] }
 0x432   :  { %22849 = vst [vmem:[#allocation106_spill] sm:$0xff] %v17374_v62 }
 0x433   :  { %v17376_v48 = vpop.permute.xlu0 %9747  ;;  %9977 = vrot.lane.b32.xlu1 %v4655_v25, %s11593_s25  ;;  %v17410_v2 = vrot.slane %v9008_v54, %v11726_v13  ;;  %v22876_v13 = vld [vmem:[#allocation357_spill] sm:$0xff] }
 0x434   :  { %22850 = vst [vmem:[#allocation105_spill] sm:$0xff] %v17376_v48  ;;  %v22859_v48 = vld [vmem:[#allocation178_spill] sm:$0xff]  ;;  %v7255_v54 = vcombine.low %v22876_v13, %v22875_v40 }
 0x435   :  { %9991 = vrot.lane.b32.xlu0 %v6215_v36, %s11593_s25  ;;  %v17388_v42 = vpop.permute.xlu1 %9737  ;;  %v4863_v37 = vcombine.low %v22860_v5, %v22859_v48  ;;  %v22865_v36 = vld [vmem:[#allocation205_spill] sm:$0xff]  ;;  %22870 = vst [vmem:[#allocation159_spill] sm:$0xff] %v17410_v2 }
 0x436   :  { %22857 = vst [vmem:[#allocation127_spill] sm:$0xff] %v17388_v42  ;;  %v5487_v4 = vcombine.low %v22866_v27, %v22865_v36  ;;  %v22867_v42 = vld [vmem:[#allocation93_spill] sm:$0xff] }
 0x437   :  { %v17390_v62 = vpop.permute.xlu0 %9751  ;;  %9981 = vrot.lane.b32.xlu1 %v4863_v37, %s11593_s25  ;;  %v22880_v37 = vld [vmem:[#allocation65_spill] sm:$0xff] }
 0x438   :  { %22858 = vst [vmem:[#allocation125_spill] sm:$0xff] %v17390_v62  ;;  %v7047_v62 = vcombine.low %v22868_v49, %v22867_v42 }
 0x439   :  { %9995 = vrot.lane.b32.xlu0 %v6423_v26, %s11593_s25  ;;  %v17398_v25 = vpop.permute.xlu1 %9741  ;;  %v22879_v26 = vld [vmem:[#allocation57_spill] sm:$0xff] }
 0x43a   :  { %22863 = vst [vmem:[#allocation108_spill] sm:$0xff] %v17398_v25  ;;  %v6319_v2 = vcombine.low %v22880_v37, %v22879_v26 }
 0x43b   :  { %v17400_v32 = vpop.permute.xlu0 %9755  ;;  %9985 = vrot.lane.b32.xlu1 %v5487_v4, %s11593_s25 }
 0x43c   :  { %22864 = vst [vmem:[#allocation107_spill] sm:$0xff] %v17400_v32 }
 0x43d   :  { %9999 = vrot.lane.b32.xlu0 %v7047_v62, %s11593_s25  ;;  %v17418_v32 = vpop.permute.xlu1 %9745 }
 0x43e   :  { %22871 = vst [vmem:[#allocation111_spill] sm:$0xff] %v17418_v32  ;;  %v22881_v32 = vld [vmem:[#allocation158_spill] sm:$0xff] }
 0x43f   :  { %v17420_v25 = vpop.permute.xlu0 %9759  ;;  %9989 = vrot.lane.b32.xlu1 %v5695_v23, %s11593_s25  ;;  %v22885_v23 = vld [vmem:[#allocation87_spill] sm:$0xff] }
 0x440   :  { %22872 = vst [vmem:[#allocation110_spill] sm:$0xff] %v17420_v25  ;;  %v7879_v25 = vcombine.low %v22882_v63, %v22881_v32 }
 0x441   :  { %10003 = vrot.lane.b32.xlu0 %v7255_v54, %s11593_s25  ;;  %v17428_v4 = vpop.permute.xlu1 %9749  ;;  %v22886_v54 = vld [vmem:[#allocation90_spill] sm:$0xff] }
 0x442   :  { %22877 = vst [vmem:[#allocation194_spill] sm:$0xff] %v17428_v4  ;;  %v6527_v1 = vcombine.low %v22886_v54, %v22885_v23  ;;  %v22887_v4 = vld [vmem:[#allocation426_spill] sm:$0xff] }
 0x443   :  { %v17430_v62 = vpop.permute.xlu0 %9763  ;;  %9993 = vrot.lane.b32.xlu1 %v6319_v2, %s11593_s25  ;;  %v8087_v44 = vcombine.low %v22888_v3, %v22887_v4  ;;  %v22891_v2 = vld [vmem:[#allocation104_spill] sm:$0xff] }
 0x444   :  { %22878 = vst [vmem:[#allocation33_spill] sm:$0xff] %v17430_v62 }
 0x445   :  { %10007 = vrot.lane.b32.xlu0 %v7879_v25, %s11593_s25  ;;  %v17438_v19 = vpop.permute.xlu1 %9753  ;;  %v22892_v25 = vld [vmem:[#allocation109_spill] sm:$0xff] }
 0x446   :  { %22883 = vst [vmem:[#allocation129_spill] sm:$0xff] %v17438_v19  ;;  %v7151_v33 = vcombine.low %v22892_v25, %v22891_v2  ;;  %v22893_v19 = vld [vmem:[#allocation42_spill] sm:$0xff] }
 0x447   :  { %v17440_v59 = vpop.permute.xlu0 %9831  ;;  %9997 = vrot.lane.b32.xlu1 %v6527_v1, %s11593_s25  ;;  %v22897_v1 = vld [vmem:[#allocation374_spill] sm:$0xff] }
 0x448   :  { %22884 = vst [vmem:[#allocation128_spill] sm:$0xff] %v17440_v59  ;;  %v8711_v59 = vcombine.low %v22894_v35, %v22893_v19 }
 0x449   :  { %10011 = vrot.lane.b32.xlu0 %v8087_v44, %s11593_s25  ;;  %v17448_v24 = vpop.permute.xlu1 %9757  ;;  %v22898_v44 = vld [vmem:[#allocation373_spill] sm:$0xff] }
 0x44a   :  { %22889 = vst [vmem:[#allocation81_spill] sm:$0xff] %v17448_v24  ;;  %v7359_v18 = vcombine.low %v22898_v44, %v22897_v1  ;;  %v22899_v24 = vld [vmem:[#allocation475_spill] sm:$0xff] }
 0x44b   :  { %v17450_v16 = vpop.permute.xlu0 %9835  ;;  %10001 = vrot.lane.b32.xlu1 %v7151_v33, %s11593_s25  ;;  %v22903_v33 = vld [vmem:[#allocation406_spill] sm:$0xff] }
 0x44c   :  { %22890 = vst [vmem:[#allocation55_spill] sm:$0xff] %v17450_v16  ;;  %v8919_v16 = vcombine.low %v22900_v52, %v22899_v24  ;;  %v22909_v24 = vld [vmem:[#allocation486_spill] sm:$0xff] }
 0x44d   :  { %10015 = vrot.lane.b32.xlu0 %v8711_v59, %s11593_s25  ;;  %v17458_v62 = vpop.permute.xlu1 %9761  ;;  %v22904_v59 = vld [vmem:[#allocation405_spill] sm:$0xff] }
 0x44e   :  { %22895 = vst [vmem:[#allocation144_spill] sm:$0xff] %v17458_v62  ;;  %v7983_v19 = vcombine.low %v22904_v59, %v22903_v33  ;;  %v22905_v62 = vcombine.high %v22801_v29, %v22800_v56  ;;  %v22913_v56 = vld [vmem:[#allocation412_spill] sm:$0xff]  ;;  %v22914_v29 = vld [vmem:[#allocation134_spill] sm:$0xff] }
 0x44f   :  { %v17460_v47 = vpop.permute.xlu0 %9839  ;;  %10005 = vrot.lane.b32.xlu1 %v7359_v18, %s11593_s25 }
 0x450   :  { %22896 = vst [vmem:[#allocation141_spill] sm:$0xff] %v17460_v47 }
 0x451   :  { %10019 = vrot.lane.b32.xlu0 %v8919_v16, %s11593_s25  ;;  %v17468_v30 = vpop.permute.xlu1 %9765  ;;  %v22908_v16 = vld [vmem:[#allocation487_spill] sm:$0xff] }
 0x452   :  { %22901 = vst [vmem:[#allocation249_spill] sm:$0xff] %v17468_v30  ;;  %v8191_v30 = vcombine.low %v22909_v24, %v22908_v16 }
 0x453   :  { %v17470_v7 = vpop.permute.xlu0 %9843  ;;  %10009 = vrot.lane.b32.xlu1 %v7983_v19, %s11593_s25 }
 0x454   :  { %22902 = vst [vmem:[#allocation248_spill] sm:$0xff] %v17470_v7  ;;  %v22910_v7 = vcombine.high %v22809_v60, %v22808_v11  ;;  %v22918_v11 = vld [vmem:[#allocation56_spill] sm:$0xff] }
 0x455   :  { %10087 = vrot.lane.b32.xlu0 %v22905_v62, %s11594_s26  ;;  %v17479_v47 = vpop.permute.xlu1 %9833  ;;  %v8815_v62 = vcombine.low %v22914_v29, %v22913_v56 }
 0x456   :  { %22906 = vst [vmem:[#allocation123_spill] sm:$0xff] %v17479_v47 }
 0x457   :  { %v17481_v18 = vpop.permute.xlu0 %9847  ;;  %10013 = vrot.lane.b32.xlu1 %v8191_v30, %s11593_s25 }
 0x458   :  { %22907 = vst [vmem:[#allocation122_spill] sm:$0xff] %v17481_v18  ;;  %v22915_v18 = vcombine.high %v22814_v45, %v22813_v51  ;;  %v22923_v51 = vcombine.high %v22826_v50, %v22825_v14  ;;  %v22924_v45 = vcombine.high %v22828_v10, %v22827_v17  ;;  %v22931_v10 = vcombine.high %v22838_v53, %v22837_v28 }
 0x459   :  { %10091 = vrot.lane.b32.xlu0 %v22910_v7, %s11594_s26  ;;  %v17490_v19 = vpop.permute.xlu1 %9837  ;;  %v22919_v7 = vld [vmem:[#allocation100_spill] sm:$0xff]  ;;  %v22932_v17 = vcombine.high %v22840_v15, %v22839_v46  ;;  %v22939_v46 = vcombine.high %v22852_v43, %v22851_v38  ;;  %v22940_v15 = vcombine.high %v22854_v6, %v22853_v58  ;;  %v22947_v6 = vcombine.high %v22866_v27, %v22865_v36 }
 0x45a   :  { %22911 = vst [vmem:[#allocation178_spill] sm:$0xff] %v17490_v19  ;;  %v9023_v60 = vcombine.low %v22919_v7, %v22918_v11  ;;  %v22948_v58 = vcombine.high %v22868_v49, %v22867_v42  ;;  %v22955_v42 = vcombine.high %v22880_v37, %v22879_v26  ;;  %v22956_v49 = vcombine.high %v22882_v63, %v22881_v32  ;;  %v22964_v32 = vld [vmem:[#allocation42_spill] sm:$0xff] }
 0x45b   :  { %v17492_v33 = vpop.permute.xlu0 %9851  ;;  %10017 = vrot.lane.b32.xlu1 %v8815_v62, %s11593_s25  ;;  %v22963_v63 = vcombine.high %v22892_v25, %v22891_v2 }
 0x45c   :  { %22912 = vst [vmem:[#allocation176_spill] sm:$0xff] %v17492_v33  ;;  %v22920_v33 = vcombine.high %v22821_v0, %v22820_v20  ;;  %v22927_v20 = vcombine.high %v22832_v12, %v22831_v9  ;;  %v22928_v0 = vcombine.high %v22834_v21, %v22833_v57  ;;  %v22935_v57 = vcombine.high %v22846_v34, %v22845_v31 }
 0x45d   :  { %10095 = vrot.lane.b32.xlu0 %v22915_v18, %s11594_s26  ;;  %v17501_v30 = vpop.permute.xlu1 %9841  ;;  %v22936_v21 = vcombine.high %v22848_v61, %v22847_v55  ;;  %v22943_v61 = vcombine.high %v22860_v5, %v22859_v48  ;;  %v22944_v55 = vcombine.high %v22862_v41, %v22861_v39  ;;  %v22951_v41 = vcombine.high %v22874_v8, %v22873_v22 }
 0x45e   :  { %22916 = vst [vmem:[#allocation67_spill] sm:$0xff] %v17501_v30  ;;  %v22952_v39 = vcombine.high %v22876_v13, %v22875_v40  ;;  %v22959_v40 = vcombine.high %v22886_v54, %v22885_v23  ;;  %v22960_v13 = vcombine.high %v22888_v3, %v22887_v4  ;;  %v22968_v3 = vcombine.high %v22898_v44, %v22897_v1  ;;  %v22969_v4 = vld [vmem:[#allocation475_spill] sm:$0xff]  ;;  %v23074_v30 = vld [vmem:[#allocation97_spill] sm:$0xff] }
 0x45f   :  { %v17503_v47 = vpop.permute.xlu0 %9855  ;;  %10021 = vrot.lane.b32.xlu1 %v9023_v60, %s11593_s25 }
 0x460   :  { %22917 = vst [vmem:[#allocation69_spill] sm:$0xff] %v17503_v47  ;;  %v23073_v47 = vld [vmem:[#allocation209_spill] sm:$0xff] }
 0x461   :  { %10099 = vrot.lane.b32.xlu0 %v22920_v33, %s11594_s26  ;;  %v17512_v62 = vpop.permute.xlu1 %9845  ;;  %v22965_v33 = vcombine.high %v22894_v35, %v22964_v32  ;;  %v22973_v35 = vld [vmem:[#allocation406_spill] sm:$0xff] }
 0x462   :  { %22921 = vst [vmem:[#allocation205_spill] sm:$0xff] %v17512_v62  ;;  %v23002_v32 = vld [vmem:[#allocation246_spill] sm:$0xff] }
 0x463   :  { %v17514_v19 = vpop.permute.xlu0 %9859  ;;  %10089 = vrot.lane.b32.xlu1 %v22923_v51, %s11594_s26  ;;  %v22970_v51 = vcombine.high %v22900_v52, %v22969_v4  ;;  %v22980_v52 = vcombine.high %v22909_v24, %v22908_v16  ;;  %v23007_v4 = vld [vmem:[#allocation252_spill] sm:$0xff] }
 0x464   :  { %22922 = vst [vmem:[#allocation74_spill] sm:$0xff] %v17514_v19  ;;  %v23066_v19 = vld [vmem:[#allocation79_spill] sm:$0xff] }
 0x465   :  { %10103 = vrot.lane.b32.xlu0 %v22924_v45, %s11594_s26  ;;  %v17524_v18 = vpop.permute.xlu1 %9849  ;;  %v22974_v45 = vcombine.high %v22904_v59, %v22973_v35  ;;  %v23009_v35 = vld [vmem:[#allocation267_spill] sm:$0xff] }
 0x466   :  { %22925 = vst [vmem:[#allocation93_spill] sm:$0xff] %v17524_v18 }
 0x467   :  { %v17526_v60 = vpop.permute.xlu0 %9863  ;;  %10093 = vrot.lane.b32.xlu1 %v22927_v20, %s11594_s26  ;;  %v22975_v20 = vld [vmem:[#allocation142_spill] sm:$0xff] }
 0x468   :  { %22926 = vst [vmem:[#allocation102_spill] sm:$0xff] %v17526_v60  ;;  %v23058_v60 = vld [vmem:[#allocation460_spill] sm:$0xff] }
 0x469   :  { %10107 = vrot.lane.b32.xlu0 %v22928_v0, %s11594_s26  ;;  %v17536_v50 = vpop.permute.xlu1 %9853  ;;  %v22976_v0 = vld [vmem:[#allocation145_spill] sm:$0xff] }
 0x46a   :  { %22929 = vst [vmem:[#allocation229_spill] sm:$0xff] %v17536_v50  ;;  %v22977_v1 = vcombine.low %v22975_v20, %v22976_v0 }
 0x46b   :  { %v17538_v14 = vpop.permute.xlu0 %9867  ;;  %10097 = vrot.lane.b32.xlu1 %v22931_v10, %s11594_s26 }
 0x46c   :  { %22930 = vst [vmem:[#allocation120_spill] sm:$0xff] %v17538_v14  ;;  %v23050_v14 = vld [vmem:[#allocation434_spill] sm:$0xff] }
 0x46d   :  { %10111 = vrot.lane.b32.xlu0 %v22932_v17, %s11594_s26  ;;  %v17548_v9 = vpop.permute.xlu1 %9857  ;;  %v22981_v17 = vld [vmem:[#allocation179_spill] sm:$0xff] }
 0x46e   :  { %22933 = vst [vmem:[#allocation358_spill] sm:$0xff] %v17548_v9 }
 0x46f   :  { %v17550_v12 = vpop.permute.xlu0 %9871  ;;  %10101 = vrot.lane.b32.xlu1 %v22935_v57, %s11594_s26  ;;  %v22982_v57 = vld [vmem:[#allocation180_spill] sm:$0xff] }
 0x470   :  { %22934 = vst [vmem:[#allocation357_spill] sm:$0xff] %v17550_v12  ;;  %v22983_v59 = vcombine.low %v22981_v17, %v22982_v57  ;;  %v23042_v12 = vld [vmem:[#allocation402_spill] sm:$0xff] }
 0x471   :  { %10115 = vrot.lane.b32.xlu0 %v22936_v21, %s11594_s26  ;;  %v17560_v28 = vpop.permute.xlu1 %9861 }
 0x472   :  { %22937 = vst [vmem:[#allocation57_spill] sm:$0xff] %v17560_v28 }
 0x473   :  { %v17562_v53 = vpop.permute.xlu0 %9875  ;;  %10105 = vrot.lane.b32.xlu1 %v22939_v46, %s11594_s26 }
 0x474   :  { %22938 = vst [vmem:[#allocation65_spill] sm:$0xff] %v17562_v53  ;;  %v23034_v53 = vld [vmem:[#allocation371_spill] sm:$0xff] }
 0x475   :  { %10119 = vrot.lane.b32.xlu0 %v22940_v15, %s11594_s26  ;;  %v17572_v31 = vpop.permute.xlu1 %9865  ;;  %v22986_v15 = vcombine.high %v22914_v29, %v22913_v56 }
 0x476   :  { %22941 = vst [vmem:[#allocation158_spill] sm:$0xff] %v17572_v31  ;;  %v23033_v31 = vld [vmem:[#allocation370_spill] sm:$0xff] }
 0x477   :  { %v17574_v34 = vpop.permute.xlu0 %9879  ;;  %10109 = vrot.lane.b32.xlu1 %v22943_v61, %s11594_s26  ;;  %v22987_v61 = vld [vmem:[#allocation206_spill] sm:$0xff]  ;;  %v23035_v28 = vcombine.low %v23033_v31, %v23034_v53 }
 0x478   :  { %22942 = vst [vmem:[#allocation160_spill] sm:$0xff] %v17574_v34 }
 0x479   :  { %10123 = vrot.lane.b32.xlu0 %v22944_v55, %s11594_s26  ;;  %v17584_v38 = vpop.permute.xlu1 %9869  ;;  %v22988_v55 = vld [vmem:[#allocation207_spill] sm:$0xff] }
 0x47a   :  { %22945 = vst [vmem:[#allocation87_spill] sm:$0xff] %v17584_v38  ;;  %v23031_v38 = vld [vmem:[#allocation273_spill] sm:$0xff] }
 0x47b   :  { %v17586_v43 = vpop.permute.xlu0 %9883  ;;  %10113 = vrot.lane.b32.xlu1 %v22947_v6, %s11594_s26  ;;  %v22989_v6 = vcombine.low %v22987_v61, %v22988_v55 }
 0x47c   :  { %22946 = vst [vmem:[#allocation90_spill] sm:$0xff] %v17586_v43 }
 0x47d   :  { %10127 = vrot.lane.b32.xlu0 %v22948_v58, %s11594_s26  ;;  %v17596_v5 = vpop.permute.xlu1 %9873  ;;  %v22992_v58 = vcombine.high %v22919_v7, %v22918_v11 }
 0x47e   :  { %22949 = vst [vmem:[#allocation426_spill] sm:$0xff] %v17596_v5 }
 0x47f   :  { %v17598_v48 = vpop.permute.xlu0 %9887  ;;  %10117 = vrot.lane.b32.xlu1 %v22951_v41, %s11594_s26  ;;  %v22993_v41 = vld [vmem:[#allocation228_spill] sm:$0xff] }
 0x480   :  { %22950 = vst [vmem:[#allocation163_spill] sm:$0xff] %v17598_v48  ;;  %v23026_v48 = vld [vmem:[#allocation333_spill] sm:$0xff] }
 0x481   :  { %10131 = vrot.lane.b32.xlu0 %v22952_v39, %s11594_s26  ;;  %v17608_v36 = vpop.permute.xlu1 %9877  ;;  %v22994_v39 = vld [vmem:[#allocation230_spill] sm:$0xff] }
 0x482   :  { %22953 = vst [vmem:[#allocation104_spill] sm:$0xff] %v17608_v36  ;;  %v23025_v36 = vld [vmem:[#allocation332_spill] sm:$0xff] }
 0x483   :  { %v17610_v27 = vpop.permute.xlu0 %9891  ;;  %10121 = vrot.lane.b32.xlu1 %v22955_v42, %s11594_s26  ;;  %v22995_v42 = vcombine.low %v22993_v41, %v22994_v39  ;;  %v23027_v5 = vcombine.low %v23025_v36, %v23026_v48 }
 0x484   :  { %22954 = vst [vmem:[#allocation109_spill] sm:$0xff] %v17610_v27  ;;  %v23095_v27 = vld [vmem:[#allocation117_spill] sm:$0xff] }
 0x485   :  { %10135 = vrot.lane.b32.xlu0 %v22956_v49, %s11594_s26  ;;  %v17620_v22 = vpop.permute.xlu1 %9881  ;;  %v22998_v49 = vld [vmem:[#allocation232_spill] sm:$0xff] }
 0x486   :  { %22957 = vst [vmem:[#allocation203_spill] sm:$0xff] %v17620_v22 }
 0x487   :  { %v17622_v8 = vpop.permute.xlu0 %9959  ;;  %10125 = vrot.lane.b32.xlu1 %v22959_v40, %s11594_s26  ;;  %v22999_v40 = vld [vmem:[#allocation233_spill] sm:$0xff] }
 0x488   :  { %22958 = vst [vmem:[#allocation374_spill] sm:$0xff] %v17622_v8 }
 0x489   :  { %10139 = vrot.lane.b32.xlu0 %v22960_v13, %s11594_s26  ;;  %v17632_v26 = vpop.permute.xlu1 %9885  ;;  %v23000_v13 = vcombine.low %v22998_v49, %v22999_v40 }
 0x48a   :  { %22961 = vst [vmem:[#allocation373_spill] sm:$0xff] %v17632_v26  ;;  %v23023_v26 = vld [vmem:[#allocation270_spill] sm:$0xff] }
 0x48b   :  { %v17634_v37 = vpop.permute.xlu0 %9963  ;;  %10129 = vrot.lane.b32.xlu1 %v22963_v63, %s11594_s26  ;;  %v23001_v63 = vld [vmem:[#allocation245_spill] sm:$0xff] }
 0x48c   :  { %22962 = vst [vmem:[#allocation474_spill] sm:$0xff] %v17634_v37  ;;  %v23087_v37 = vld [vmem:[#allocation472_spill] sm:$0xff] }
 0x48d   :  { %10143 = vrot.lane.b32.xlu0 %v22965_v33, %s11594_s26  ;;  %v17644_v23 = vpop.permute.xlu1 %9889  ;;  %v23003_v33 = vcombine.low %v23001_v63, %v23002_v32 }
 0x48e   :  { %22966 = vst [vmem:[#allocation405_spill] sm:$0xff] %v17644_v23 }
 0x48f   :  { %v17646_v54 = vpop.permute.xlu0 %9967  ;;  %10133 = vrot.lane.b32.xlu1 %v22968_v3, %s11594_s26  ;;  %v23006_v3 = vld [vmem:[#allocation250_spill] sm:$0xff] }
 0x490   :  { %22967 = vst [vmem:[#allocation487_spill] sm:$0xff] %v17646_v54 }
 0x491   :  { %10147 = vrot.lane.b32.xlu0 %v22970_v51, %s11594_s26  ;;  %v17656_v2 = vpop.permute.xlu1 %9893  ;;  %v23008_v51 = vcombine.low %v23006_v3, %v23007_v4 }
 0x492   :  { %22971 = vst [vmem:[#allocation486_spill] sm:$0xff] %v17656_v2 }
 0x493   :  { %v17658_v25 = vpop.permute.xlu0 %9971  ;;  %10137 = vrot.lane.b32.xlu1 %v22974_v45, %s11594_s26  ;;  %v23010_v45 = vld [vmem:[#allocation268_spill] sm:$0xff] }
 0x494   :  { %22972 = vst [vmem:[#allocation412_spill] sm:$0xff] %v17658_v25  ;;  %v23082_v25 = vld [vmem:[#allocation303_spill] sm:$0xff] }
 0x495   :  { %10215 = vrot.lane.b32.xlu0 %v22977_v1, %s11595_s27  ;;  %v17668_v44 = vpop.permute.xlu1 %9961  ;;  %v23011_v1 = vcombine.low %v23009_v35, %v23010_v45 }
 0x496   :  { %22978 = vst [vmem:[#allocation134_spill] sm:$0xff] %v17668_v44  ;;  %v23081_v44 = vld [vmem:[#allocation305_spill] sm:$0xff] }
 0x497   :  { %v17670_v10 = vpop.permute.xlu0 %9975  ;;  %10141 = vrot.lane.b32.xlu1 %v22980_v52, %s11594_s26  ;;  %v23083_v2 = vcombine.low %v23081_v44, %v23082_v25 }
 0x498   :  { %22979 = vst [vmem:[#allocation56_spill] sm:$0xff] %v17670_v10  ;;  %v23079_v10 = vld [vmem:[#allocation450_spill] sm:$0xff] }
 0x499   :  { %10219 = vrot.lane.b32.xlu0 %v22983_v59, %s11595_s27  ;;  %v17680_v21 = vpop.permute.xlu1 %9965 }
 0x49a   :  { %22984 = vst [vmem:[#allocation100_spill] sm:$0xff] %v17680_v21 }
 0x49b   :  { %v17682_v46 = vpop.permute.xlu0 %9979  ;;  %10145 = vrot.lane.b32.xlu1 %v22986_v15, %s11594_s26  ;;  %v23014_v15 = vld [vmem:[#allocation254_spill] sm:$0xff] }
 0x49c   :  { %22985 = vst [vmem:[#allocation42_spill] sm:$0xff] %v17682_v46  ;;  %v23075_v46 = vcombine.low %v23073_v47, %v23074_v30 }
 0x49d   :  { %10223 = vrot.lane.b32.xlu0 %v22989_v6, %s11595_s27  ;;  %v17692_v24 = vpop.permute.xlu1 %9969  ;;  %v23015_v6 = vld [vmem:[#allocation255_spill] sm:$0xff] }
 0x49e   :  { %22990 = vst [vmem:[#allocation475_spill] sm:$0xff] %v17692_v24  ;;  %v23071_v24 = vld [vmem:[#allocation424_spill] sm:$0xff] }
 0x49f   :  { %v17694_v16 = vpop.permute.xlu0 %9983  ;;  %10149 = vrot.lane.b32.xlu1 %v22992_v58, %s11594_s26  ;;  %v23016_v58 = vcombine.low %v23014_v15, %v23015_v6 }
 0x4a0   :  { %22991 = vst [vmem:[#allocation406_spill] sm:$0xff] %v17694_v16 }
 0x4a1   :  { %10227 = vrot.lane.b32.xlu0 %v22995_v42, %s11595_s27  ;;  %v17704_v56 = vpop.permute.xlu1 %9973  ;;  %v23017_v42 = vld [vmem:[#allocation299_spill] sm:$0xff] }
 0x4a2   :  { %22996 = vst [vmem:[#allocation142_spill] sm:$0xff] %v17704_v56  ;;  %v23063_v56 = vld [vmem:[#allocation384_spill] sm:$0xff] }
 0x4a3   :  { %v17706_v29 = vpop.permute.xlu0 %9987  ;;  %10217 = vrot.lane.b32.xlu1 %v23000_v13, %s11595_s27  ;;  %v23018_v13 = vld [vmem:[#allocation300_spill] sm:$0xff] }
 0x4a4   :  { %22997 = vst [vmem:[#allocation145_spill] sm:$0xff] %v17706_v29 }
 0x4a5   :  { %10231 = vrot.lane.b32.xlu0 %v23003_v33, %s11595_s27  ;;  %v17716_v11 = vpop.permute.xlu1 %9977  ;;  %v23019_v33 = vcombine.low %v23017_v42, %v23018_v13 }
 0x4a6   :  { %23004 = vst [vmem:[#allocation179_spill] sm:$0xff] %v17716_v11  ;;  %v23055_v11 = vld [vmem:[#allocation354_spill] sm:$0xff] }
 0x4a7   :  { %v17718_v7 = vpop.permute.xlu0 %9991  ;;  %10221 = vrot.lane.b32.xlu1 %v23008_v51, %s11595_s27 }
 0x4a8   :  { %23005 = vst [vmem:[#allocation180_spill] sm:$0xff] %v17718_v7 }
 0x4a9   :  { %10235 = vrot.lane.b32.xlu0 %v23011_v1, %s11595_s27  ;;  %v17728_v52 = vpop.permute.xlu1 %9981  ;;  %v23022_v1 = vld [vmem:[#allocation269_spill] sm:$0xff] }
 0x4aa   :  { %23012 = vst [vmem:[#allocation206_spill] sm:$0xff] %v17728_v52  ;;  %v23024_v22 = vcombine.low %v23022_v1, %v23023_v26  ;;  %v23047_v52 = vld [vmem:[#allocation317_spill] sm:$0xff] }
 0x4ab   :  { %v17730_v59 = vpop.permute.xlu0 %9995  ;;  %10225 = vrot.lane.b32.xlu1 %v23016_v58, %s11595_s27 }
 0x4ac   :  { %23013 = vst [vmem:[#allocation207_spill] sm:$0xff] %v17730_v59 }
 0x4ad   :  { %10239 = vrot.lane.b32.xlu0 %v23019_v33, %s11595_s27  ;;  %v17740_v51 = vpop.permute.xlu1 %9985  ;;  %v23030_v33 = vld [vmem:[#allocation272_spill] sm:$0xff] }
 0x4ae   :  { %23020 = vst [vmem:[#allocation228_spill] sm:$0xff] %v17740_v51  ;;  %v23032_v34 = vcombine.low %v23030_v33, %v23031_v38  ;;  %v23039_v51 = vld [vmem:[#allocation285_spill] sm:$0xff] }
 0x4af   :  { %v17742_v23 = vpop.permute.xlu0 %9999  ;;  %10229 = vrot.lane.b32.xlu1 %v23024_v22, %s11595_s27 }
 0x4b0   :  { %23021 = vst [vmem:[#allocation230_spill] sm:$0xff] %v17742_v23 }
 0x4b1   :  { %10243 = vrot.lane.b32.xlu0 %v23027_v5, %s11595_s27  ;;  %v17752_v58 = vpop.permute.xlu1 %9989  ;;  %v23038_v5 = vld [vmem:[#allocation284_spill] sm:$0xff] }
 0x4b2   :  { %23028 = vst [vmem:[#allocation232_spill] sm:$0xff] %v17752_v58  ;;  %v23040_v58 = vcombine.low %v23038_v5, %v23039_v51 }
 0x4b3   :  { %v17754_v43 = vpop.permute.xlu0 %10003  ;;  %10233 = vrot.lane.b32.xlu1 %v23032_v34, %s11595_s27 }
 0x4b4   :  { %23029 = vst [vmem:[#allocation233_spill] sm:$0xff] %v17754_v43  ;;  %v23041_v43 = vld [vmem:[#allocation401_spill] sm:$0xff] }
 0x4b5   :  { %10247 = vrot.lane.b32.xlu0 %v23035_v28, %s11595_s27  ;;  %v17764_v22 = vpop.permute.xlu1 %9993  ;;  %v23043_v9 = vcombine.low %v23041_v43, %v23042_v12  ;;  %v23046_v28 = vld [vmem:[#allocation316_spill] sm:$0xff] }
 0x4b6   :  { %23036 = vst [vmem:[#allocation245_spill] sm:$0xff] %v17764_v22  ;;  %v23048_v22 = vcombine.low %v23046_v28, %v23047_v52 }
 0x4b7   :  { %v17766_v23 = vpop.permute.xlu0 %10007  ;;  %10237 = vrot.lane.b32.xlu1 %v23040_v58, %s11595_s27 }
 0x4b8   :  { %23037 = vst [vmem:[#allocation246_spill] sm:$0xff] %v17766_v23  ;;  %v23049_v23 = vld [vmem:[#allocation433_spill] sm:$0xff] }
 0x4b9   :  { %10251 = vrot.lane.b32.xlu0 %v23043_v9, %s11595_s27  ;;  %v17776_v34 = vpop.permute.xlu1 %9997  ;;  %v23051_v50 = vcombine.low %v23049_v23, %v23050_v14  ;;  %v23054_v9 = vld [vmem:[#allocation353_spill] sm:$0xff] }
 0x4ba   :  { %23044 = vst [vmem:[#allocation250_spill] sm:$0xff] %v17776_v34  ;;  %v23056_v34 = vcombine.low %v23054_v9, %v23055_v11 }
 0x4bb   :  { %v17778_v59 = vpop.permute.xlu0 %10011  ;;  %10241 = vrot.lane.b32.xlu1 %v23048_v22, %s11595_s27 }
 0x4bc   :  { %23045 = vst [vmem:[#allocation252_spill] sm:$0xff] %v17778_v59  ;;  %v23057_v59 = vld [vmem:[#allocation459_spill] sm:$0xff] }
 0x4bd   :  { %10255 = vrot.lane.b32.xlu0 %v23051_v50, %s11595_s27  ;;  %v17788_v58 = vpop.permute.xlu1 %10001  ;;  %v23059_v18 = vcombine.low %v23057_v59, %v23058_v60  ;;  %v23062_v50 = vld [vmem:[#allocation383_spill] sm:$0xff] }
 0x4be   :  { %23052 = vst [vmem:[#allocation267_spill] sm:$0xff] %v17788_v58  ;;  %v23064_v58 = vcombine.low %v23062_v50, %v23063_v56 }
 0x4bf   :  { %v17790_v7 = vpop.permute.xlu0 %10015  ;;  %10245 = vrot.lane.b32.xlu1 %v23056_v34, %s11595_s27 }
 0x4c0   :  { %23053 = vst [vmem:[#allocation268_spill] sm:$0xff] %v17790_v7  ;;  %v23065_v7 = vld [vmem:[#allocation482_spill] sm:$0xff] }
 0x4c1   :  { %10259 = vrot.lane.b32.xlu0 %v23059_v18, %s11595_s27  ;;  %v17800_v22 = vpop.permute.xlu1 %10005  ;;  %v23067_v62 = vcombine.low %v23065_v7, %v23066_v19  ;;  %v23070_v18 = vld [vmem:[#allocation423_spill] sm:$0xff] }
 0x4c2   :  { %23060 = vst [vmem:[#allocation254_spill] sm:$0xff] %v17800_v22  ;;  %v23072_v22 = vcombine.low %v23070_v18, %v23071_v24 }
 0x4c3   :  { %v17802_v29 = vpop.permute.xlu0 %10019  ;;  %10249 = vrot.lane.b32.xlu1 %v23064_v58, %s11595_s27 }
 0x4c4   :  { %23061 = vst [vmem:[#allocation255_spill] sm:$0xff] %v17802_v29 }
 0x4c5   :  { %10263 = vrot.lane.b32.xlu0 %v23067_v62, %s11595_s27  ;;  %v17812_v34 = vpop.permute.xlu1 %10009  ;;  %v23078_v62 = vld [vmem:[#allocation449_spill] sm:$0xff] }
 0x4c6   :  { %23068 = vst [vmem:[#allocation299_spill] sm:$0xff] %v17812_v34  ;;  %v23080_v34 = vcombine.low %v23078_v62, %v23079_v10 }
 0x4c7   :  { %v17814_v16 = vpop.permute.xlu0 %10087  ;;  %10253 = vrot.lane.b32.xlu1 %v23072_v22, %s11595_s27 }
 0x4c8   :  { %23069 = vst [vmem:[#allocation300_spill] sm:$0xff] %v17814_v16  ;;  %v23090_v16 = vld [vmem:[#allocation240_spill] sm:$0xff] }
 0x4c9   :  { %10267 = vrot.lane.b32.xlu0 %v23075_v46, %s11595_s27  ;;  %v17824_v58 = vpop.permute.xlu1 %10013  ;;  %v23086_v46 = vld [vmem:[#allocation471_spill] sm:$0xff] }
 0x4ca   :  { %23076 = vst [vmem:[#allocation269_spill] sm:$0xff] %v17824_v58  ;;  %v23088_v58 = vcombine.low %v23086_v46, %v23087_v37 }
 0x4cb   :  { %v17826_v21 = vpop.permute.xlu0 %10091  ;;  %10257 = vrot.lane.b32.xlu1 %v23080_v34, %s11595_s27 }
 0x4cc   :  { %23077 = vst [vmem:[#allocation270_spill] sm:$0xff] %v17826_v21  ;;  %v23089_v21 = vld [vmem:[#allocation238_spill] sm:$0xff] }
 0x4cd   :  { %10271 = vrot.lane.b32.xlu0 %v23083_v2, %s11595_s27  ;;  %v17836_v22 = vpop.permute.xlu1 %10017  ;;  %v23091_v8 = vcombine.low %v23089_v21, %v23090_v16  ;;  %v23094_v2 = vld [vmem:[#allocation251_spill] sm:$0xff] }
 0x4ce   :  { %23084 = vst [vmem:[#allocation332_spill] sm:$0xff] %v17836_v22  ;;  %v23096_v22 = vcombine.low %v23094_v2, %v23095_v27 }
 0x4cf   :  { %v17838_v54 = vpop.permute.xlu0 %10095  ;;  %10261 = vrot.lane.b32.xlu1 %v23088_v58, %s11595_s27 }
 0x4d0   :  { %23085 = vst [vmem:[#allocation333_spill] sm:$0xff] %v17838_v54  ;;  %v23097_v54 = vcombine.high %v22975_v20, %v22976_v0  ;;  %v23107_v20 = vld [vmem:[#allocation151_spill] sm:$0xff] }
 0x4d1   :  { %10275 = vrot.lane.b32.xlu0 %v23091_v8, %s11595_s27  ;;  %v17848_v34 = vpop.permute.xlu1 %10021  ;;  %v23100_v8 = vld [vmem:[#allocation467_spill] sm:$0xff] }
 0x4d2   :  { %23092 = vst [vmem:[#allocation272_spill] sm:$0xff] %v17848_v34  ;;  %v23101_v34 = vld [vmem:[#allocation364_spill] sm:$0xff] }
 0x4d3   :  { %v17850_v29 = vpop.permute.xlu0 %10099  ;;  %10265 = vrot.lane.b32.xlu1 %v23096_v22, %s11595_s27  ;;  %v23102_v16 = vcombine.low %v23100_v8, %v23101_v34 }
 0x4d4   :  { %23093 = vst [vmem:[#allocation273_spill] sm:$0xff] %v17850_v29  ;;  %v23103_v29 = vcombine.high %v22981_v17, %v22982_v57  ;;  %v23112_v17 = vld [vmem:[#allocation445_spill] sm:$0xff]  ;;  %v23113_v57 = vld [vmem:[#allocation398_spill] sm:$0xff] }
 0x4d5   :  { %10343 = vrot.lane.b32.xlu0 %v23097_v54, %s11596_s28  ;;  %v17860_v58 = vpop.permute.xlu1 %10089  ;;  %v23106_v54 = vld [vmem:[#allocation41_spill] sm:$0xff] }
 0x4d6   :  { %23098 = vst [vmem:[#allocation370_spill] sm:$0xff] %v17860_v58  ;;  %v23108_v0 = vcombine.low %v23106_v54, %v23107_v20 }
 0x4d7   :  { %v17862_v37 = vpop.permute.xlu0 %10103  ;;  %10269 = vrot.lane.b32.xlu1 %v23102_v16, %s11595_s27 }
 0x4d8   :  { %23099 = vst [vmem:[#allocation371_spill] sm:$0xff] %v17862_v37  ;;  %v23109_v37 = vcombine.high %v22987_v61, %v22988_v55  ;;  %v23119_v61 = vcombine.high %v23001_v63, %v23002_v32  ;;  %v23127_v63 = vcombine.high %v23017_v42, %v23018_v13  ;;  %v23135_v42 = vcombine.high %v23033_v31, %v23034_v53 }
 0x4d9   :  { %10347 = vrot.lane.b32.xlu0 %v23103_v29, %s11596_s28  ;;  %v17872_v22 = vpop.permute.xlu1 %10093  ;;  %v23114_v29 = vcombine.low %v23112_v17, %v23113_v57  ;;  %v23142_v53 = vcombine.high %v23046_v28, %v23047_v52  ;;  %v23143_v31 = vcombine.high %v23049_v23, %v23050_v14  ;;  %v23150_v14 = vcombine.high %v23062_v50, %v23063_v56 }
 0x4da   :  { %23104 = vst [vmem:[#allocation284_spill] sm:$0xff] %v17872_v22  ;;  %v23151_v23 = vcombine.high %v23065_v7, %v23066_v19  ;;  %v23158_v19 = vcombine.high %v23078_v62, %v23079_v10  ;;  %v23159_v7 = vcombine.high %v23081_v44, %v23082_v25  ;;  %v23168_v25 = vld [vmem:[#allocation214_spill] sm:$0xff] }
 0x4db   :  { %v17874_v27 = vpop.permute.xlu0 %10107  ;;  %10273 = vrot.lane.b32.xlu1 %v23108_v0, %s11595_s27  ;;  %v23169_v44 = vld [vmem:[#allocation154_spill] sm:$0xff] }
 0x4dc   :  { %23105 = vst [vmem:[#allocation285_spill] sm:$0xff] %v17874_v27  ;;  %v23115_v27 = vcombine.high %v22993_v41, %v22994_v39  ;;  %v23123_v41 = vcombine.high %v23009_v35, %v23010_v45  ;;  %v23131_v35 = vcombine.high %v23025_v36, %v23026_v48  ;;  %v23138_v48 = vcombine.high %v23038_v5, %v23039_v51 }
 0x4dd   :  { %10351 = vrot.lane.b32.xlu0 %v23109_v37, %s11596_s28  ;;  %v17884_v16 = vpop.permute.xlu1 %10097  ;;  %v23118_v37 = vcombine.high %v22998_v49, %v22999_v40  ;;  %v23126_v40 = vcombine.high %v23014_v15, %v23015_v6  ;;  %v23134_v6 = vcombine.high %v23030_v33, %v23031_v38  ;;  %v23139_v36 = vcombine.high %v23041_v43, %v23042_v12 }
 0x4de   :  { %23110 = vst [vmem:[#allocation401_spill] sm:$0xff] %v17884_v16  ;;  %v23146_v12 = vcombine.high %v23054_v9, %v23055_v11  ;;  %v23147_v43 = vcombine.high %v23057_v59, %v23058_v60  ;;  %v23154_v60 = vcombine.high %v23070_v18, %v23071_v24  ;;  %v23155_v59 = vcombine.high %v23073_v47, %v23074_v30  ;;  %v23162_v47 = vld [vmem:[#allocation472_spill] sm:$0xff]  ;;  %v23246_v16 = vld [vmem:[#allocation39_spill] sm:$0xff] }
 0x4df   :  { %v17886_v58 = vpop.permute.xlu0 %10111  ;;  %10277 = vrot.lane.b32.xlu1 %v23114_v29, %s11595_s27  ;;  %v23163_v30 = vcombine.high %v23086_v46, %v23162_v47  ;;  %v23164_v18 = vld [vmem:[#allocation240_spill] sm:$0xff] }
 0x4e0   :  { %23111 = vst [vmem:[#allocation402_spill] sm:$0xff] %v17886_v58 }
 0x4e1   :  { %10355 = vrot.lane.b32.xlu0 %v23115_v27, %s11596_s28  ;;  %v17896_v0 = vpop.permute.xlu1 %10101  ;;  %v23122_v27 = vcombine.high %v23006_v3, %v23007_v4  ;;  %v23130_v4 = vcombine.high %v23022_v1, %v23023_v26 }
 0x4e2   :  { %23116 = vst [vmem:[#allocation316_spill] sm:$0xff] %v17896_v0  ;;  %v23240_v0 = vld [vmem:[#allocation112_spill] sm:$0xff] }
 0x4e3   :  { %v17898_v22 = vpop.permute.xlu0 %10115  ;;  %10345 = vrot.lane.b32.xlu1 %v23118_v37, %s11596_s28  ;;  %v23165_v37 = vcombine.high %v23089_v21, %v23164_v18  ;;  %v23174_v21 = vld [vmem:[#allocation175_spill] sm:$0xff]  ;;  %v23196_v18 = vld [vmem:[#allocation341_spill] sm:$0xff] }
 0x4e4   :  { %23117 = vst [vmem:[#allocation317_spill] sm:$0xff] %v17898_v22 }
 0x4e5   :  { %10359 = vrot.lane.b32.xlu0 %v23119_v61, %s11596_s28  ;;  %v17908_v55 = vpop.permute.xlu1 %10105  ;;  %v2891_v61 = vcombine.low %v23169_v44, %v23168_v25 }
 0x4e6   :  { %23120 = vst [vmem:[#allocation433_spill] sm:$0xff] %v17908_v55  ;;  %v23234_v55 = vld [vmem:[#allocation231_spill] sm:$0xff] }
 0x4e7   :  { %v17910_v29 = vpop.permute.xlu0 %10119  ;;  %10349 = vrot.lane.b32.xlu1 %v23122_v27, %s11596_s28  ;;  %v23170_v27 = vld [vmem:[#allocation117_spill] sm:$0xff] }
 0x4e8   :  { %23121 = vst [vmem:[#allocation434_spill] sm:$0xff] %v17910_v29 }
 0x4e9   :  { %10363 = vrot.lane.b32.xlu0 %v23123_v41, %s11596_s28  ;;  %v17920_v39 = vpop.permute.xlu1 %10109  ;;  %v23171_v41 = vcombine.high %v23094_v2, %v23170_v27  ;;  %v23198_v27 = vld [vmem:[#allocation407_spill] sm:$0xff] }
 0x4ea   :  { %23124 = vst [vmem:[#allocation353_spill] sm:$0xff] %v17920_v39  ;;  %v23228_v39 = vld [vmem:[#allocation322_spill] sm:$0xff] }
 0x4eb   :  { %v17922_v49 = vpop.permute.xlu0 %10123  ;;  %10353 = vrot.lane.b32.xlu1 %v23126_v40, %s11596_s28 }
 0x4ec   :  { %23125 = vst [vmem:[#allocation354_spill] sm:$0xff] %v17922_v49 }
 0x4ed   :  { %10367 = vrot.lane.b32.xlu0 %v23127_v63, %s11596_s28  ;;  %v17932_v32 = vpop.permute.xlu1 %10113  ;;  %v23175_v63 = vld [vmem:[#allocation156_spill] sm:$0xff] }
 0x4ee   :  { %23128 = vst [vmem:[#allocation459_spill] sm:$0xff] %v17932_v32  ;;  %v23222_v32 = vld [vmem:[#allocation275_spill] sm:$0xff] }
 0x4ef   :  { %v17934_v3 = vpop.permute.xlu0 %10127  ;;  %10357 = vrot.lane.b32.xlu1 %v23130_v4, %s11596_s28  ;;  %v3099_v4 = vcombine.low %v23175_v63, %v23174_v21 }
 0x4f0   :  { %23129 = vst [vmem:[#allocation460_spill] sm:$0xff] %v17934_v3 }
 0x4f1   :  { %10371 = vrot.lane.b32.xlu0 %v23131_v35, %s11596_s28  ;;  %v17944_v45 = vpop.permute.xlu1 %10117  ;;  %v23176_v35 = vcombine.high %v23100_v8, %v23101_v34  ;;  %v23184_v8 = vld [vmem:[#allocation338_spill] sm:$0xff] }
 0x4f2   :  { %23132 = vst [vmem:[#allocation383_spill] sm:$0xff] %v17944_v45 }
 0x4f3   :  { %v17946_v15 = vpop.permute.xlu0 %10131  ;;  %10361 = vrot.lane.b32.xlu1 %v23134_v6, %s11596_s28 }
 0x4f4   :  { %23133 = vst [vmem:[#allocation384_spill] sm:$0xff] %v17946_v15  ;;  %v23216_v15 = vld [vmem:[#allocation481_spill] sm:$0xff] }
 0x4f5   :  { %10375 = vrot.lane.b32.xlu0 %v23135_v42, %s11596_s28  ;;  %v17956_v26 = vpop.permute.xlu1 %10121  ;;  %v23179_v42 = vld [vmem:[#allocation336_spill] sm:$0xff] }
 0x4f6   :  { %23136 = vst [vmem:[#allocation482_spill] sm:$0xff] %v17956_v26  ;;  %v23215_v26 = vld [vmem:[#allocation76_spill] sm:$0xff] }
 0x4f7   :  { %v17958_v13 = vpop.permute.xlu0 %10135  ;;  %10365 = vrot.lane.b32.xlu1 %v23138_v48, %s11596_s28  ;;  %v23180_v48 = vld [vmem:[#allocation204_spill] sm:$0xff]  ;;  %v6219_v45 = vcombine.low %v23216_v15, %v23215_v26 }
 0x4f8   :  { %23137 = vst [vmem:[#allocation79_spill] sm:$0xff] %v17958_v13 }
 0x4f9   :  { %10379 = vrot.lane.b32.xlu0 %v23139_v36, %s11596_s28  ;;  %v17968_v38 = vpop.permute.xlu1 %10125  ;;  %v3723_v36 = vcombine.low %v23180_v48, %v23179_v42 }
 0x4fa   :  { %23140 = vst [vmem:[#allocation423_spill] sm:$0xff] %v17968_v38 }
 0x4fb   :  { %v17970_v1 = vpop.permute.xlu0 %10139  ;;  %10369 = vrot.lane.b32.xlu1 %v23142_v53, %s11596_s28  ;;  %v23181_v53 = vcombine.high %v23106_v54, %v23107_v20  ;;  %v23189_v20 = vld [vmem:[#allocation340_spill] sm:$0xff] }
 0x4fc   :  { %23141 = vst [vmem:[#allocation424_spill] sm:$0xff] %v17970_v1 }
 0x4fd   :  { %10383 = vrot.lane.b32.xlu0 %v23143_v31, %s11596_s28  ;;  %v17980_v51 = vpop.permute.xlu1 %10129 }
 0x4fe   :  { %23144 = vst [vmem:[#allocation209_spill] sm:$0xff] %v17980_v51 }
 0x4ff   :  { %v17982_v33 = vpop.permute.xlu0 %10143  ;;  %10373 = vrot.lane.b32.xlu1 %v23146_v12, %s11596_s28  ;;  %v23185_v12 = vld [vmem:[#allocation337_spill] sm:$0xff] }
 0x500   :  { %23145 = vst [vmem:[#allocation97_spill] sm:$0xff] %v17982_v33  ;;  %v23210_v33 = vld [vmem:[#allocation463_spill] sm:$0xff] }
 0x501   :  { %10387 = vrot.lane.b32.xlu0 %v23147_v43, %s11596_s28  ;;  %v17992_v52 = vpop.permute.xlu1 %10133  ;;  %v3931_v43 = vcombine.low %v23185_v12, %v23184_v8 }
 0x502   :  { %23148 = vst [vmem:[#allocation449_spill] sm:$0xff] %v17992_v52  ;;  %v23209_v52 = vld [vmem:[#allocation464_spill] sm:$0xff] }
 0x503   :  { %v17994_v5 = vpop.permute.xlu0 %10147  ;;  %10377 = vrot.lane.b32.xlu1 %v23150_v14, %s11596_s28  ;;  %v23186_v14 = vcombine.high %v23112_v17, %v23113_v57  ;;  %v23195_v57 = vld [vmem:[#allocation342_spill] sm:$0xff]  ;;  %v5595_v51 = vcombine.low %v23210_v33, %v23209_v52 }
 0x504   :  { %23149 = vst [vmem:[#allocation450_spill] sm:$0xff] %v17994_v5 }
 0x505   :  { %10391 = vrot.lane.b32.xlu0 %v23151_v23, %s11596_s28  ;;  %v18004_v11 = vpop.permute.xlu1 %10137 }
 0x506   :  { %23152 = vst [vmem:[#allocation305_spill] sm:$0xff] %v18004_v11 }
 0x507   :  { %v18006_v28 = vpop.permute.xlu0 %10215  ;;  %10381 = vrot.lane.b32.xlu1 %v23154_v60, %s11596_s28  ;;  %v23190_v60 = vld [vmem:[#allocation339_spill] sm:$0xff] }
 0x508   :  { %23153 = vst [vmem:[#allocation303_spill] sm:$0xff] %v18006_v28  ;;  %v23258_v28 = vld [vmem:[#allocation462_spill] sm:$0xff] }
 0x509   :  { %10395 = vrot.lane.b32.xlu0 %v23155_v59, %s11596_s28  ;;  %v18016_v56 = vpop.permute.xlu1 %10141  ;;  %v2995_v59 = vcombine.low %v23190_v60, %v23189_v20 }
 0x50a   :  { %23156 = vst [vmem:[#allocation471_spill] sm:$0xff] %v18016_v56 }
 0x50b   :  { %v18018_v9 = vpop.permute.xlu0 %10219  ;;  %10385 = vrot.lane.b32.xlu1 %v23158_v19, %s11596_s28  ;;  %v23191_v19 = vld [vmem:[#allocation377_spill] sm:$0xff] }
 0x50c   :  { %23157 = vst [vmem:[#allocation238_spill] sm:$0xff] %v18018_v9 }
 0x50d   :  { %10399 = vrot.lane.b32.xlu0 %v23159_v7, %s11596_s28  ;;  %v18028_v24 = vpop.permute.xlu1 %10145  ;;  %v23192_v7 = vld [vmem:[#allocation376_spill] sm:$0xff] }
 0x50e   :  { %23160 = vst [vmem:[#allocation251_spill] sm:$0xff] %v18028_v24  ;;  %v4555_v47 = vcombine.low %v23192_v7, %v23191_v19 }
 0x50f   :  { %v18030_v50 = vpop.permute.xlu0 %10223  ;;  %10389 = vrot.lane.b32.xlu1 %v23163_v30, %s11596_s28 }
 0x510   :  { %23161 = vst [vmem:[#allocation467_spill] sm:$0xff] %v18030_v50 }
 0x511   :  { %10403 = vrot.lane.b32.xlu0 %v23165_v37, %s11596_s28  ;;  %v18040_v10 = vpop.permute.xlu1 %10149  ;;  %v3203_v37 = vcombine.low %v23196_v18, %v23195_v57 }
 0x512   :  { %23166 = vst [vmem:[#allocation364_spill] sm:$0xff] %v18040_v10 }
 0x513   :  { %v18042_v62 = vpop.permute.xlu0 %10227  ;;  %10393 = vrot.lane.b32.xlu1 %v23171_v41, %s11596_s28 }
 0x514   :  { %23167 = vst [vmem:[#allocation41_spill] sm:$0xff] %v18042_v62  ;;  %v23252_v62 = vld [vmem:[#allocation419_spill] sm:$0xff] }
 0x515   :  { %10471 = vrot.lane.b32.xlu0 %v2891_v61, %s11597_s29  ;;  %v18051_v46 = vpop.permute.xlu1 %10217  ;;  %v23197_v61 = vld [vmem:[#allocation408_spill] sm:$0xff] }
 0x516   :  { %23172 = vst [vmem:[#allocation151_spill] sm:$0xff] %v18051_v46  ;;  %v4763_v41 = vcombine.low %v23198_v27, %v23197_v61 }
 0x517   :  { %v18053_v40 = vpop.permute.xlu0 %10231  ;;  %10397 = vrot.lane.b32.xlu1 %v23176_v35, %s11596_s28 }
 0x518   :  { %23173 = vst [vmem:[#allocation445_spill] sm:$0xff] %v18053_v40 }
 0x519   :  { %10475 = vrot.lane.b32.xlu0 %v3099_v4, %s11597_s29  ;;  %v18062_v6 = vpop.permute.xlu1 %10221 }
 0x51a   :  { %23177 = vst [vmem:[#allocation398_spill] sm:$0xff] %v18062_v6 }
 0x51b   :  { %v18064_v2 = vpop.permute.xlu0 %10235  ;;  %10401 = vrot.lane.b32.xlu1 %v23181_v53, %s11596_s28  ;;  %v23202_v53 = vld [vmem:[#allocation359_spill] sm:$0xff] }
 0x51c   :  { %23178 = vst [vmem:[#allocation472_spill] sm:$0xff] %v18064_v2 }
 0x51d   :  { %10479 = vrot.lane.b32.xlu0 %v3723_v36, %s11597_s29  ;;  %v18073_v31 = vpop.permute.xlu1 %10225  ;;  %v23201_v36 = vld [vmem:[#allocation360_spill] sm:$0xff] }
 0x51e   :  { %23182 = vst [vmem:[#allocation240_spill] sm:$0xff] %v18073_v31 }
 0x51f   :  { %v18075_v34 = vpop.permute.xlu0 %10239  ;;  %10405 = vrot.lane.b32.xlu1 %v23186_v14, %s11596_s28  ;;  %v23203_v14 = vld [vmem:[#allocation32_spill] sm:$0xff] }
 0x520   :  { %23183 = vst [vmem:[#allocation214_spill] sm:$0xff] %v18075_v34 }
 0x521   :  { %10483 = vrot.lane.b32.xlu0 %v3931_v43, %s11597_s29  ;;  %v18084_v23 = vpop.permute.xlu1 %10229  ;;  %v3827_v43 = vcombine.low %v23202_v53, %v23201_v36 }
 0x522   :  { %23187 = vst [vmem:[#allocation154_spill] sm:$0xff] %v18084_v23 }
 0x523   :  { %v18086_v54 = vpop.permute.xlu0 %10243  ;;  %10473 = vrot.lane.b32.xlu1 %v2995_v59, %s11597_s29  ;;  %v23204_v59 = vld [vmem:[#allocation195_spill] sm:$0xff] }
 0x524   :  { %23188 = vst [vmem:[#allocation117_spill] sm:$0xff] %v18086_v54 }
 0x525   :  { %10487 = vrot.lane.b32.xlu0 %v4555_v47, %s11597_s29  ;;  %v18094_v30 = vpop.permute.xlu1 %10233  ;;  %v5387_v47 = vcombine.low %v23204_v59, %v23203_v14 }
 0x526   :  { %23193 = vst [vmem:[#allocation175_spill] sm:$0xff] %v18094_v30 }
 0x527   :  { %v18096_v17 = vpop.permute.xlu0 %10247  ;;  %10477 = vrot.lane.b32.xlu1 %v3203_v37, %s11597_s29  ;;  %v23207_v37 = vld [vmem:[#allocation363_spill] sm:$0xff] }
 0x528   :  { %23194 = vst [vmem:[#allocation156_spill] sm:$0xff] %v18096_v17 }
 0x529   :  { %10491 = vrot.lane.b32.xlu0 %v4763_v41, %s11597_s29  ;;  %v18104_v4 = vpop.permute.xlu1 %10237  ;;  %v23208_v41 = vld [vmem:[#allocation362_spill] sm:$0xff] }
 0x52a   :  { %23199 = vst [vmem:[#allocation336_spill] sm:$0xff] %v18104_v4  ;;  %v4035_v11 = vcombine.low %v23208_v41, %v23207_v37 }
 0x52b   :  { %v18106_v35 = vpop.permute.xlu0 %10251  ;;  %10481 = vrot.lane.b32.xlu1 %v3827_v43, %s11597_s29  ;;  %v23213_v43 = vld [vmem:[#allocation388_spill] sm:$0xff] }
 0x52c   :  { %23200 = vst [vmem:[#allocation204_spill] sm:$0xff] %v18106_v35 }
 0x52d   :  { %10495 = vrot.lane.b32.xlu0 %v5387_v47, %s11597_s29  ;;  %v18114_v24 = vpop.permute.xlu1 %10241  ;;  %v23214_v47 = vld [vmem:[#allocation387_spill] sm:$0xff] }
 0x52e   :  { %23205 = vst [vmem:[#allocation338_spill] sm:$0xff] %v18114_v24  ;;  %v4659_v13 = vcombine.low %v23214_v47, %v23213_v43 }
 0x52f   :  { %v18116_v56 = vpop.permute.xlu0 %10255  ;;  %10485 = vrot.lane.b32.xlu1 %v4035_v11, %s11597_s29  ;;  %v23219_v11 = vld [vmem:[#allocation427_spill] sm:$0xff] }
 0x530   :  { %23206 = vst [vmem:[#allocation337_spill] sm:$0xff] %v18116_v56 }
 0x531   :  { %10499 = vrot.lane.b32.xlu0 %v5595_v51, %s11597_s29  ;;  %v18124_v1 = vpop.permute.xlu1 %10245  ;;  %v23220_v51 = vld [vmem:[#allocation172_spill] sm:$0xff] }
 0x532   :  { %23211 = vst [vmem:[#allocation340_spill] sm:$0xff] %v18124_v1  ;;  %v4867_v3 = vcombine.low %v23220_v51, %v23219_v11  ;;  %v23221_v1 = vld [vmem:[#allocation274_spill] sm:$0xff] }
 0x533   :  { %v18126_v38 = vpop.permute.xlu0 %10259  ;;  %10489 = vrot.lane.b32.xlu1 %v4659_v13, %s11597_s29  ;;  %v23225_v13 = vld [vmem:[#allocation454_spill] sm:$0xff] }
 0x534   :  { %23212 = vst [vmem:[#allocation339_spill] sm:$0xff] %v18126_v38  ;;  %v6427_v38 = vcombine.low %v23222_v32, %v23221_v1 }
 0x535   :  { %10503 = vrot.lane.b32.xlu0 %v6219_v45, %s11597_s29  ;;  %v18134_v56 = vpop.permute.xlu1 %10249  ;;  %v23226_v45 = vld [vmem:[#allocation453_spill] sm:$0xff] }
 0x536   :  { %23217 = vst [vmem:[#allocation377_spill] sm:$0xff] %v18134_v56  ;;  %v5491_v49 = vcombine.low %v23226_v45, %v23225_v13  ;;  %v23227_v56 = vld [vmem:[#allocation439_spill] sm:$0xff] }
 0x537   :  { %v18136_v24 = vpop.permute.xlu0 %10263  ;;  %10493 = vrot.lane.b32.xlu1 %v4867_v3, %s11597_s29  ;;  %v23231_v3 = vld [vmem:[#allocation477_spill] sm:$0xff] }
 0x538   :  { %23218 = vst [vmem:[#allocation376_spill] sm:$0xff] %v18136_v24  ;;  %v7051_v24 = vcombine.low %v23228_v39, %v23227_v56 }
 0x539   :  { %10507 = vrot.lane.b32.xlu0 %v6427_v38, %s11597_s29  ;;  %v18144_v35 = vpop.permute.xlu1 %10253  ;;  %v23232_v38 = vld [vmem:[#allocation476_spill] sm:$0xff] }
 0x53a   :  { %23223 = vst [vmem:[#allocation342_spill] sm:$0xff] %v18144_v35  ;;  %v5699_v29 = vcombine.low %v23232_v38, %v23231_v3  ;;  %v23233_v35 = vld [vmem:[#allocation279_spill] sm:$0xff] }
 0x53b   :  { %v18146_v4 = vpop.permute.xlu0 %10267  ;;  %10497 = vrot.lane.b32.xlu1 %v5491_v49, %s11597_s29  ;;  %v23237_v49 = vld [vmem:[#allocation150_spill] sm:$0xff] }
 0x53c   :  { %23224 = vst [vmem:[#allocation341_spill] sm:$0xff] %v18146_v4  ;;  %v7259_v4 = vcombine.low %v23234_v55, %v23233_v35 }
 0x53d   :  { %10511 = vrot.lane.b32.xlu0 %v7051_v24, %s11597_s29  ;;  %v18154_v17 = vpop.permute.xlu1 %10257  ;;  %v23238_v24 = vld [vmem:[#allocation13_spill] sm:$0xff] }
 0x53e   :  { %23229 = vst [vmem:[#allocation408_spill] sm:$0xff] %v18154_v17  ;;  %v6323_v22 = vcombine.low %v23238_v24, %v23237_v49  ;;  %v23239_v17 = vld [vmem:[#allocation365_spill] sm:$0xff] }
 0x53f   :  { %v18156_v30 = vpop.permute.xlu0 %10271  ;;  %10501 = vrot.lane.b32.xlu1 %v5699_v29, %s11597_s29  ;;  %v23243_v29 = vld [vmem:[#allocation264_spill] sm:$0xff] }
 0x540   :  { %23230 = vst [vmem:[#allocation407_spill] sm:$0xff] %v18156_v30  ;;  %v7883_v30 = vcombine.low %v23240_v0, %v23239_v17 }
 0x541   :  { %10515 = vrot.lane.b32.xlu0 %v7259_v4, %s11597_s29  ;;  %v18164_v54 = vpop.permute.xlu1 %10261  ;;  %v23244_v4 = vld [vmem:[#allocation260_spill] sm:$0xff] }
 0x542   :  { %23235 = vst [vmem:[#allocation360_spill] sm:$0xff] %v18164_v54  ;;  %v6531_v58 = vcombine.low %v23244_v4, %v23243_v29  ;;  %v23245_v54 = vld [vmem:[#allocation152_spill] sm:$0xff] }
 0x543   :  { %v18166_v23 = vpop.permute.xlu0 %10275  ;;  %10505 = vrot.lane.b32.xlu1 %v6323_v22, %s11597_s29  ;;  %v8091_v2 = vcombine.low %v23246_v16, %v23245_v54  ;;  %v23249_v22 = vld [vmem:[#allocation491_spill] sm:$0xff] }
 0x544   :  { %23236 = vst [vmem:[#allocation359_spill] sm:$0xff] %v18166_v23 }
 0x545   :  { %10519 = vrot.lane.b32.xlu0 %v7883_v30, %s11597_s29  ;;  %v18174_v34 = vpop.permute.xlu1 %10265  ;;  %v23250_v30 = vld [vmem:[#allocation95_spill] sm:$0xff] }
 0x546   :  { %23241 = vst [vmem:[#allocation32_spill] sm:$0xff] %v18174_v34  ;;  %v7155_v46 = vcombine.low %v23250_v30, %v23249_v22  ;;  %v23251_v34 = vld [vmem:[#allocation399_spill] sm:$0xff] }
 0x547   :  { %v18176_v31 = vpop.permute.xlu0 %10343  ;;  %10509 = vrot.lane.b32.xlu1 %v6531_v58, %s11597_s29  ;;  %v8715_v10 = vcombine.low %v23252_v62, %v23251_v34  ;;  %v23255_v58 = vld [vmem:[#allocation219_spill] sm:$0xff] }
 0x548   :  { %23242 = vst [vmem:[#allocation195_spill] sm:$0xff] %v18176_v31 }
 0x549   :  { %10523 = vrot.lane.b32.xlu0 %v8091_v2, %s11597_s29  ;;  %v18184_v6 = vpop.permute.xlu1 %10269  ;;  %v23256_v2 = vld [vmem:[#allocation221_spill] sm:$0xff] }
 0x54a   :  { %23247 = vst [vmem:[#allocation363_spill] sm:$0xff] %v18184_v6  ;;  %v7363_v31 = vcombine.low %v23256_v2, %v23255_v58  ;;  %v23257_v6 = vld [vmem:[#allocation137_spill] sm:$0xff] }
 0x54b   :  { %v18186_v40 = vpop.permute.xlu0 %10347  ;;  %10513 = vrot.lane.b32.xlu1 %v7155_v46, %s11597_s29  ;;  %v23261_v46 = vld [vmem:[#allocation258_spill] sm:$0xff] }
 0x54c   :  { %23248 = vst [vmem:[#allocation362_spill] sm:$0xff] %v18186_v40  ;;  %v8923_v40 = vcombine.low %v23258_v28, %v23257_v6  ;;  %v23267_v6 = vld [vmem:[#allocation227_spill] sm:$0xff] }
 0x54d   :  { %10527 = vrot.lane.b32.xlu0 %v8715_v10, %s11597_s29  ;;  %v18194_v50 = vpop.permute.xlu1 %10273  ;;  %v23262_v10 = vld [vmem:[#allocation11_spill] sm:$0xff] }
 0x54e   :  { %23253 = vst [vmem:[#allocation464_spill] sm:$0xff] %v18194_v50  ;;  %v7987_v34 = vcombine.low %v23262_v10, %v23261_v46  ;;  %v23263_v50 = vcombine.high %v23169_v44, %v23168_v25  ;;  %v23271_v25 = vld [vmem:[#allocation469_spill] sm:$0xff] }
 0x54f   :  { %v18196_v9 = vpop.permute.xlu0 %10351  ;;  %10517 = vrot.lane.b32.xlu1 %v7363_v31, %s11597_s29 }
 0x550   :  { %23254 = vst [vmem:[#allocation463_spill] sm:$0xff] %v18196_v9 }
 0x551   :  { %10531 = vrot.lane.b32.xlu0 %v8923_v40, %s11597_s29  ;;  %v18204_v23 = vpop.permute.xlu1 %10277  ;;  %v23266_v40 = vld [vmem:[#allocation135_spill] sm:$0xff] }
 0x552   :  { %23259 = vst [vmem:[#allocation388_spill] sm:$0xff] %v18204_v23  ;;  %v8195_v23 = vcombine.low %v23267_v6, %v23266_v40 }
 0x553   :  { %v18206_v5 = vpop.permute.xlu0 %10355  ;;  %10521 = vrot.lane.b32.xlu1 %v7987_v34, %s11597_s29 }
 0x554   :  { %23260 = vst [vmem:[#allocation387_spill] sm:$0xff] %v18206_v5  ;;  %v23268_v5 = vcombine.high %v23175_v63, %v23174_v21  ;;  %v23274_v21 = vld [vmem:[#allocation63_spill] sm:$0xff] }
 0x555   :  { %10599 = vrot.lane.b32.xlu0 %v23263_v50, %s11598_s30  ;;  %v18215_v9 = vpop.permute.xlu1 %10345  ;;  %v23272_v50 = vld [vmem:[#allocation468_spill] sm:$0xff] }
 0x556   :  { %23264 = vst [vmem:[#allocation76_spill] sm:$0xff] %v18215_v9  ;;  %v8819_v44 = vcombine.low %v23272_v50, %v23271_v25 }
 0x557   :  { %v18217_v31 = vpop.permute.xlu0 %10359  ;;  %10525 = vrot.lane.b32.xlu1 %v8195_v23, %s11597_s29 }
 0x558   :  { %23265 = vst [vmem:[#allocation481_spill] sm:$0xff] %v18217_v31  ;;  %v23273_v31 = vcombine.high %v23180_v48, %v23179_v42  ;;  %v23279_v42 = vcombine.high %v23190_v60, %v23189_v20  ;;  %v23280_v48 = vcombine.high %v23192_v7, %v23191_v19  ;;  %v23287_v19 = vcombine.high %v23202_v53, %v23201_v36 }
 0x559   :  { %10603 = vrot.lane.b32.xlu0 %v23268_v5, %s11598_s30  ;;  %v18226_v34 = vpop.permute.xlu1 %10349  ;;  %v23275_v5 = vld [vmem:[#allocation66_spill] sm:$0xff]  ;;  %v23288_v7 = vcombine.high %v23204_v59, %v23203_v14  ;;  %v23295_v14 = vcombine.high %v23214_v47, %v23213_v43  ;;  %v23296_v59 = vcombine.high %v23216_v15, %v23215_v26  ;;  %v23303_v15 = vcombine.high %v23226_v45, %v23225_v13 }
 0x55a   :  { %23269 = vst [vmem:[#allocation427_spill] sm:$0xff] %v18226_v34  ;;  %v9027_v63 = vcombine.low %v23275_v5, %v23274_v21  ;;  %v23304_v26 = vcombine.high %v23228_v39, %v23227_v56  ;;  %v23310_v39 = vcombine.high %v23238_v24, %v23237_v49  ;;  %v23311_v56 = vcombine.high %v23240_v0, %v23239_v17  ;;  %v23317_v17 = vld [vmem:[#allocation399_spill] sm:$0xff] }
 0x55b   :  { %v18228_v46 = vpop.permute.xlu0 %10363  ;;  %10529 = vrot.lane.b32.xlu1 %v8819_v44, %s11597_s29  ;;  %v23316_v0 = vcombine.high %v23250_v30, %v23249_v22 }
 0x55c   :  { %23270 = vst [vmem:[#allocation172_spill] sm:$0xff] %v18228_v46  ;;  %v23276_v46 = vcombine.high %v23185_v12, %v23184_v8  ;;  %v23283_v8 = vcombine.high %v23196_v18, %v23195_v57  ;;  %v23284_v12 = vcombine.high %v23198_v27, %v23197_v61  ;;  %v23291_v61 = vcombine.high %v23208_v41, %v23207_v37 }
 0x55d   :  { %10607 = vrot.lane.b32.xlu0 %v23273_v31, %s11598_s30  ;;  %v18237_v23 = vpop.permute.xlu1 %10353  ;;  %v23292_v27 = vcombine.high %v23210_v33, %v23209_v52  ;;  %v23299_v33 = vcombine.high %v23220_v51, %v23219_v11  ;;  %v23300_v52 = vcombine.high %v23222_v32, %v23221_v1  ;;  %v23307_v32 = vcombine.high %v23232_v38, %v23231_v3 }
 0x55e   :  { %v23308_v1 = vcombine.high %v23234_v55, %v23233_v35  ;;  %v23313_v55 = vcombine.high %v23244_v4, %v23243_v29  ;;  %v23314_v35 = vcombine.high %v23246_v16, %v23245_v54  ;;  %v23320_v16 = vcombine.high %v23256_v2, %v23255_v58  ;;  %v23321_v54 = vld [vmem:[#allocation137_spill] sm:$0xff] }
 0x55f   :  { %v18239_v9 = vpop.permute.xlu0 %10367  ;;  %10533 = vrot.lane.b32.xlu1 %v9027_v63, %s11597_s29 }
 0x561   :  { %10611 = vrot.lane.b32.xlu0 %v23276_v46, %s11598_s30  ;;  %v18248_v44 = vpop.permute.xlu1 %10357  ;;  %v23318_v46 = vcombine.high %v23252_v62, %v23317_v17  ;;  %v23323_v62 = vld [vmem:[#allocation258_spill] sm:$0xff] }
 0x562   :  { %23277 = vst [vmem:[#allocation274_spill] sm:$0xff] %v18248_v44  ;;  %v23451_v44 = vld [vmem:[#allocation182_spill] sm:$0xff] }
 0x563   :  { %v18250_v34 = vpop.permute.xlu0 %10371  ;;  %10601 = vrot.lane.b32.xlu1 %v23279_v42, %s11598_s30  ;;  %v23322_v42 = vcombine.high %v23258_v28, %v23321_v54  ;;  %v23328_v28 = vcombine.high %v23267_v6, %v23266_v40  ;;  %v23340_v40 = vld [vmem:[#allocation38_spill] sm:$0xff]  ;;  %v23346_v54 = vld [vmem:[#allocation35_spill] sm:$0xff] }
 0x564   :  { %23278 = vst [vmem:[#allocation275_spill] sm:$0xff] %v18250_v34  ;;  %v23449_v34 = vld [vmem:[#allocation198_spill] sm:$0xff] }
 0x565   :  { %10615 = vrot.lane.b32.xlu0 %v23280_v48, %s11598_s30  ;;  %v18260_v31 = vpop.permute.xlu1 %10361  ;;  %v23324_v48 = vcombine.high %v23262_v10, %v23323_v62  ;;  %v23330_v10 = vld [vmem:[#allocation391_spill] sm:$0xff] }
 0x566   :  { %23281 = vst [vmem:[#allocation454_spill] sm:$0xff] %v18260_v31 }
 0x567   :  { %v18262_v63 = vpop.permute.xlu0 %10375  ;;  %10605 = vrot.lane.b32.xlu1 %v23283_v8, %s11598_s30  ;;  %v23325_v8 = vld [vmem:[#allocation256_spill] sm:$0xff] }
 0x568   :  { %23282 = vst [vmem:[#allocation453_spill] sm:$0xff] %v18262_v63 }
 0x569   :  { %10619 = vrot.lane.b32.xlu0 %v23284_v12, %s11598_s30  ;;  %v18272_v20 = vpop.permute.xlu1 %10365  ;;  %v23326_v12 = vld [vmem:[#allocation139_spill] sm:$0xff] }
 0x56a   :  { %23285 = vst [vmem:[#allocation439_spill] sm:$0xff] %v18272_v20  ;;  %v23327_v58 = vcombine.low %v23325_v8, %v23326_v12 }
 0x56b   :  { %v18274_v60 = vpop.permute.xlu0 %10379  ;;  %10609 = vrot.lane.b32.xlu1 %v23287_v19, %s11598_s30 }
 0x56c   :  { %23286 = vst [vmem:[#allocation322_spill] sm:$0xff] %v18274_v60 }
 0x56d   :  { %10623 = vrot.lane.b32.xlu0 %v23288_v7, %s11598_s30  ;;  %v18284_v57 = vpop.permute.xlu1 %10369  ;;  %v23329_v7 = vld [vmem:[#allocation390_spill] sm:$0xff] }
 0x56e   :  { %23289 = vst [vmem:[#allocation477_spill] sm:$0xff] %v18284_v57 }
 0x56f   :  { %v18286_v18 = vpop.permute.xlu0 %10383  ;;  %10613 = vrot.lane.b32.xlu1 %v23291_v61, %s11598_s30  ;;  %v23331_v61 = vcombine.low %v23329_v7, %v23330_v10 }
 0x570   :  { %23290 = vst [vmem:[#allocation476_spill] sm:$0xff] %v18286_v18  ;;  %v23419_v18 = vld [vmem:[#allocation310_spill] sm:$0xff] }
 0x571   :  { %10627 = vrot.lane.b32.xlu0 %v23292_v27, %s11598_s30  ;;  %v18296_v36 = vpop.permute.xlu1 %10373  ;;  %v23332_v27 = vld [vmem:[#allocation15_spill] sm:$0xff] }
 0x572   :  { %23293 = vst [vmem:[#allocation279_spill] sm:$0xff] %v18296_v36  ;;  %v23418_v36 = vld [vmem:[#allocation309_spill] sm:$0xff] }
 0x573   :  { %v18298_v53 = vpop.permute.xlu0 %10387  ;;  %10617 = vrot.lane.b32.xlu1 %v23295_v14, %s11598_s30  ;;  %v23333_v14 = vld [vmem:[#allocation10_spill] sm:$0xff]  ;;  %v23420_v57 = vcombine.low %v23418_v36, %v23419_v18  ;;  %v23434_v36 = vld [vmem:[#allocation289_spill] sm:$0xff] }
 0x574   :  { %23294 = vst [vmem:[#allocation231_spill] sm:$0xff] %v18298_v53  ;;  %v23417_v53 = vld [vmem:[#allocation308_spill] sm:$0xff] }
 0x575   :  { %10631 = vrot.lane.b32.xlu0 %v23296_v59, %s11598_s30  ;;  %v18308_v37 = vpop.permute.xlu1 %10377  ;;  %v23334_v59 = vld [vmem:[#allocation8_spill] sm:$0xff] }
 0x576   :  { %23297 = vst [vmem:[#allocation150_spill] sm:$0xff] %v18308_v37  ;;  %v23413_v37 = vld [vmem:[#allocation334_spill] sm:$0xff] }
 0x577   :  { %v18310_v41 = vpop.permute.xlu0 %10391  ;;  %10621 = vrot.lane.b32.xlu1 %v23299_v33, %s11598_s30  ;;  %v23335_v33 = vcombine.low %v23333_v14, %v23334_v59  ;;  %v23352_v14 = vld [vmem:[#allocation288_spill] sm:$0xff] }
 0x578   :  { %23298 = vst [vmem:[#allocation13_spill] sm:$0xff] %v18310_v41  ;;  %v23353_v59 = vld [vmem:[#allocation60_spill] sm:$0xff]  ;;  %v23409_v41 = vld [vmem:[#allocation429_spill] sm:$0xff] }
 0x579   :  { %10635 = vrot.lane.b32.xlu0 %v23300_v52, %s11598_s30  ;;  %v18320_v43 = vpop.permute.xlu1 %10381  ;;  %v10952_v52 = vsel %vm10951_vm0, %v23335_v33, %v23332_v27  ;;  %v23354_v33 = vld [vmem:[#allocation58_spill] sm:$0xff] }
 0x57a   :  { %23301 = vst [vmem:[#allocation365_spill] sm:$0xff] %v18320_v43 }
 0x57b   :  { %v18322_v47 = vpop.permute.xlu0 %10395  ;;  %10625 = vrot.lane.b32.xlu1 %v23303_v15, %s11598_s30  ;;  %v23336_v15 = vld [vmem:[#allocation271_spill] sm:$0xff] }
 0x57c   :  { %23302 = vst [vmem:[#allocation112_spill] sm:$0xff] %v18322_v47 }
 0x57d   :  { %10639 = vrot.lane.b32.xlu0 %v23304_v26, %s11598_s30  ;;  %v18332_v11 = vpop.permute.xlu1 %10385  ;;  %v23337_v26 = vld [vmem:[#allocation14_spill] sm:$0xff] }
 0x57e   :  { %23305 = vst [vmem:[#allocation264_spill] sm:$0xff] %v18332_v11 }
 0x57f   :  { %v18334_v51 = vpop.permute.xlu0 %10399  ;;  %10629 = vrot.lane.b32.xlu1 %v23307_v32, %s11598_s30  ;;  %v23338_v32 = vld [vmem:[#allocation12_spill] sm:$0xff] }
 0x580   :  { %23306 = vst [vmem:[#allocation260_spill] sm:$0xff] %v18334_v51 }
 0x581   :  { %10643 = vrot.lane.b32.xlu0 %v23308_v1, %s11598_s30  ;;  %v18344_v13 = vpop.permute.xlu1 %10389  ;;  %v23339_v1 = vcombine.low %v23337_v26, %v23338_v32  ;;  %v23356_v32 = vld [vmem:[#allocation259_spill] sm:$0xff] }
 0x582   :  { %23309 = vst [vmem:[#allocation152_spill] sm:$0xff] %v18344_v13 }
 0x583   :  { %v18346_v45 = vpop.permute.xlu0 %10403  ;;  %10633 = vrot.lane.b32.xlu1 %v23310_v39, %s11598_s30  ;;  %v10953_v39 = vsel %vm10951_vm0, %v23339_v1, %v23336_v15  ;;  %v23355_v15 = vcombine.low %v23353_v59, %v23354_v33  ;;  %v23357_v1 = vld [vmem:[#allocation78_spill] sm:$0xff] }
 0x584   :  { %v23369_v33 = vld [vmem:[#allocation410_spill] sm:$0xff] }
 0x585   :  { %10647 = vrot.lane.b32.xlu0 %v23311_v56, %s11598_s30  ;;  %v18356_v3 = vpop.permute.xlu1 %10393  ;;  %v10957_v26 = vsel %vm10951_vm0, %v23355_v15, %v23352_v14  ;;  %v23368_v14 = vcombine.high %v23272_v50, %v23271_v25  ;;  %v23370_v15 = vld [vmem:[#allocation44_spill] sm:$0xff]  ;;  %v23381_v25 = vld [vmem:[#allocation166_spill] sm:$0xff] }
 0x586   :  { %23312 = vst [vmem:[#allocation39_spill] sm:$0xff] %v18356_v3  ;;  %v23382_v50 = vld [vmem:[#allocation164_spill] sm:$0xff]  ;;  %v23386_v3 = vld [vmem:[#allocation183_spill] sm:$0xff] }
 0x587   :  { %v18358_v38 = vpop.permute.xlu0 %10471  ;;  %10637 = vrot.lane.b32.xlu1 %v23313_v55, %s11598_s30  ;;  %v23341_v55 = vld [vmem:[#allocation26_spill] sm:$0xff] }
 0x589   :  { %10651 = vrot.lane.b32.xlu0 %v23314_v35, %s11598_s30  ;;  %v18368_v49 = vpop.permute.xlu1 %10397  ;;  %v23342_v35 = vld [vmem:[#allocation24_spill] sm:$0xff] }
 0x58a   :  { %23315 = vst [vmem:[#allocation491_spill] sm:$0xff] %v18368_v49  ;;  %v23384_v49 = vld [vmem:[#allocation379_spill] sm:$0xff] }
 0x58b   :  { %v18370_v24 = vpop.permute.xlu0 %10475  ;;  %10641 = vrot.lane.b32.xlu1 %v23316_v0, %s11598_s30  ;;  %v23343_v0 = vcombine.low %v23341_v55, %v23342_v35 }
 0x58d   :  { %10655 = vrot.lane.b32.xlu0 %v23318_v46, %s11598_s30  ;;  %v18380_v29 = vpop.permute.xlu1 %10401  ;;  %v10954_v17 = vsel %vm10951_vm0, %v23343_v0, %v23340_v40  ;;  %v23344_v46 = vld [vmem:[#allocation287_spill] sm:$0xff]  ;;  %v23360_v0 = vld [vmem:[#allocation378_spill] sm:$0xff] }
 0x58e   :  { %23319 = vst [vmem:[#allocation95_spill] sm:$0xff] %v18380_v29  ;;  %v23358_v40 = vld [vmem:[#allocation75_spill] sm:$0xff] }
 0x58f   :  { %v18382_v4 = vpop.permute.xlu0 %10479  ;;  %10645 = vrot.lane.b32.xlu1 %v23320_v16, %s11598_s30  ;;  %v23345_v16 = vld [vmem:[#allocation37_spill] sm:$0xff]  ;;  %v23359_v55 = vcombine.low %v23357_v1, %v23358_v40  ;;  %v23372_v1 = vld [vmem:[#allocation302_spill] sm:$0xff] }
 0x590   :  { %v23373_v40 = vld [vmem:[#allocation133_spill] sm:$0xff] }
 0x591   :  { %10659 = vrot.lane.b32.xlu0 %v23322_v42, %s11598_s30  ;;  %v18392_v22 = vpop.permute.xlu1 %10405  ;;  %v23347_v42 = vcombine.low %v23345_v16, %v23346_v54  ;;  %v10958_v35 = vsel %vm10951_vm0, %v23359_v55, %v23356_v32  ;;  %v23362_v16 = vld [vmem:[#allocation94_spill] sm:$0xff]  ;;  %v23371_v32 = vcombine.low %v23369_v33, %v23370_v15  ;;  %v23374_v55 = vld [vmem:[#allocation131_spill] sm:$0xff] }
 0x593   :  { %v18394_v30 = vpop.permute.xlu0 %10483  ;;  %10649 = vrot.lane.b32.xlu1 %v23324_v48, %s11598_s30  ;;  %v10955_v62 = vsel %vm10951_vm0, %v23347_v42, %v23344_v46  ;;  %v23348_v48 = vld [vmem:[#allocation61_spill] sm:$0xff]  ;;  %v23361_v46 = vld [vmem:[#allocation96_spill] sm:$0xff] }
 0x594   :  { %v23363_v54 = vcombine.low %v23361_v46, %v23362_v16  ;;  %v23376_v16 = vld [vmem:[#allocation84_spill] sm:$0xff] }
 0x595   :  { %10727 = vrot.lane.b32.xlu0 %v23327_v58, %s11599_s2  ;;  %v18404_v2 = vpop.permute.xlu1 %10473  ;;  %v23349_v58 = vld [vmem:[#allocation49_spill] sm:$0xff] }
 0x596   :  { %v10959_v42 = vsel %vm10951_vm0, %v23363_v54, %v23360_v0  ;;  %v23375_v0 = vcombine.low %v23373_v40, %v23374_v55  ;;  %v23377_v54 = vld [vmem:[#allocation149_spill] sm:$0xff]  ;;  %v23388_v55 = vld [vmem:[#allocation307_spill] sm:$0xff] }
 0x597   :  { %v18406_v19 = vpop.permute.xlu0 %10487  ;;  %10653 = vrot.lane.b32.xlu1 %v23328_v28, %s11598_s30  ;;  %v23350_v28 = vld [vmem:[#allocation47_spill] sm:$0xff] }
 0x598   :  { %v10961_v46 = vsel %vm10951_vm0, %v23375_v0, %v23372_v1  ;;  %v23389_v1 = vld [vmem:[#allocation197_spill] sm:$0xff]  ;;  %v23390_v0 = vld [vmem:[#allocation34_spill] sm:$0xff] }
 0x599   :  { %10731 = vrot.lane.b32.xlu0 %v23331_v61, %s11599_s2  ;;  %v18426_v56 = vpop.permute.xlu1 %10477  ;;  %v23351_v61 = vcombine.low %v23349_v58, %v23350_v28  ;;  %v23364_v58 = vld [vmem:[#allocation276_spill] sm:$0xff]  ;;  %v23366_v28 = vld [vmem:[#allocation113_spill] sm:$0xff]  ;;  %v23391_v51 = vcombine.low %v23389_v1, %v23390_v0 }
 0x59b   :  { %v18428_v6 = vpop.permute.xlu0 %10491  ;;  %v10956_v27 = vsel %vm10951_vm0, %v23351_v61, %v23348_v48  ;;  %v23365_v48 = vld [vmem:[#allocation116_spill] sm:$0xff]  ;;  %10657 = vrot.lane.b32.xlu1 %v23368_v14, %s11598_s30  ;;  %v23383_v14 = vcombine.low %v23381_v25, %v23382_v50  ;;  %v23396_v50 = vld [vmem:[#allocation319_spill] sm:$0xff] }
 0x59c   :  { %v23367_v61 = vcombine.low %v23365_v48, %v23366_v28 }
 0x59d   :  { %10735 = vrot.lane.b32.xlu0 %v23371_v32, %s11599_s2  ;;  %v23385_v32 = vld [vmem:[#allocation185_spill] sm:$0xff]  ;;  %v18513_v0 = vpop.permute.xlu1 %10481 }
 0x59e   :  { %v10960_v59 = vsel %vm10951_vm0, %v23367_v61, %v23364_v58  ;;  %v23378_v58 = vld [vmem:[#allocation147_spill] sm:$0xff]  ;;  %v23380_v61 = vld [vmem:[#allocation396_spill] sm:$0xff]  ;;  %v23387_v13 = vcombine.low %v23385_v32, %v23386_v3  ;;  %v23400_v32 = vld [vmem:[#allocation397_spill] sm:$0xff] }
 0x59f   :  { %v23379_v48 = vcombine.low %v23377_v54, %v23378_v58  ;;  %v10963_v29 = vsel %vm10951_vm0, %v23383_v14, %v23380_v61  ;;  %v10965_v54 = vsel %vm10951_vm0, %v23391_v51, %v23388_v55  ;;  %v23392_v58 = vld [vmem:[#allocation291_spill] sm:$0xff]  ;;  %v23397_v61 = vld [vmem:[#allocation220_spill] sm:$0xff]  ;;  %v23398_v14 = vld [vmem:[#allocation218_spill] sm:$0xff]  ;;  %v18515_v51 = vpop.permute.xlu0 %10495 }
 0x5a0   :  { %v10964_v40 = vsel %vm10951_vm0, %v23387_v13, %v23384_v49  ;;  %v23399_v47 = vcombine.low %v23397_v61, %v23398_v14  ;;  %v23401_v13 = vld [vmem:[#allocation237_spill] sm:$0xff]  ;;  %v23402_v49 = vld [vmem:[#allocation239_spill] sm:$0xff]  ;;  %23404 = vst [vmem:[#allocation419_spill] sm:$0xff] %v18515_v51  ;;  %v23411_v14 = vld [vmem:[#allocation278_spill] sm:$0xff] }
 0x5a1   :  { %v10962_v28 = vsel %vm10951_vm0, %v23379_v48, %v23376_v16  ;;  %v23393_v16 = vld [vmem:[#allocation210_spill] sm:$0xff]  ;;  %v23394_v48 = vld [vmem:[#allocation208_spill] sm:$0xff]  ;;  %v23403_v43 = vcombine.low %v23401_v13, %v23402_v49  ;;  %v23405_v55 = vld [vmem:[#allocation181_spill] sm:$0xff] }
 0x5a2   :  { %v23395_v11 = vcombine.low %v23393_v16, %v23394_v48  ;;  %v10967_v3 = vsel %vm10951_vm0, %v23399_v47, %v23396_v50  ;;  %v23406_v16 = vld [vmem:[#allocation257_spill] sm:$0xff]  ;;  %v23407_v48 = vld [vmem:[#allocation263_spill] sm:$0xff]  ;;  %v23414_v13 = vld [vmem:[#allocation292_spill] sm:$0xff] }
 0x5a3   :  { %v10968_v1 = vsel %vm10951_vm0, %v23403_v43, %v23400_v32  ;;  %v23410_v61 = vld [vmem:[#allocation277_spill] sm:$0xff] }
 0x5a4   :  { %v10966_v25 = vsel %vm10951_vm0, %v23395_v11, %v23392_v58  ;;  %v23408_v11 = vcombine.low %v23406_v16, %v23407_v48  ;;  %v23412_v47 = vcombine.low %v23410_v61, %v23411_v14  ;;  %v23415_v49 = vld [vmem:[#allocation293_spill] sm:$0xff]  ;;  %v10972_v16 = vsel %vm10951_vm0, %v23420_v57, %v23417_v53  ;;  %v23421_v48 = vld [vmem:[#allocation224_spill] sm:$0xff] }
 0x5a5   :  { %v23416_v43 = vcombine.low %v23414_v13, %v23415_v49  ;;  %v23425_v14 = vld [vmem:[#allocation320_spill] sm:$0xff]  ;;  %v23429_v49 = vld [vmem:[#allocation83_spill] sm:$0xff]  ;;  %v23433_v57 = vcombine.high %v23275_v5, %v23274_v21  ;;  %v23447_v5 = vld [vmem:[#allocation417_spill] sm:$0xff] }
 0x5a6   :  { %v10969_v58 = vsel %vm10951_vm0, %v23408_v11, %v23405_v55  ;;  %v10970_v50 = vsel %vm10951_vm0, %v23412_v47, %v23409_v41  ;;  %v23422_v55 = vld [vmem:[#allocation324_spill] sm:$0xff]  ;;  %v23423_v11 = vld [vmem:[#allocation326_spill] sm:$0xff]  ;;  %v23427_v47 = vld [vmem:[#allocation347_spill] sm:$0xff] }
 0x5a7   :  { %v10971_v32 = vsel %vm10951_vm0, %v23416_v43, %v23413_v37  ;;  %v23424_v60 = vcombine.low %v23422_v55, %v23423_v11  ;;  %v23426_v41 = vld [vmem:[#allocation346_spill] sm:$0xff]  ;;  %v23431_v43 = vld [vmem:[#allocation124_spill] sm:$0xff]  ;;  %10661 = vrot.lane.b32.xlu1 %v23433_v57, %s11598_s30  ;;  %v23438_v55 = vld [vmem:[#allocation153_spill] sm:$0xff] }
 0x5a8   :  { %v23428_v20 = vcombine.low %v23426_v41, %v23427_v47  ;;  %v23430_v37 = vld [vmem:[#allocation126_spill] sm:$0xff]  ;;  %v23441_v41 = vld [vmem:[#allocation311_spill] sm:$0xff] }
 0x5a9   :  { %v10973_v61 = vsel %vm10951_vm0, %v23424_v60, %v23421_v48  ;;  %v23432_v63 = vcombine.low %v23430_v37, %v23431_v43  ;;  %v23435_v60 = vld [vmem:[#allocation290_spill] sm:$0xff]  ;;  %v23437_v48 = vld [vmem:[#allocation323_spill] sm:$0xff] }
 0x5aa   :  { %v10974_v13 = vsel %vm10951_vm0, %v23428_v20, %v23425_v14  ;;  %v23436_v53 = vcombine.low %v23434_v36, %v23435_v60  ;;  %v23439_v11 = vld [vmem:[#allocation146_spill] sm:$0xff]  ;;  %v23443_v37 = vld [vmem:[#allocation395_spill] sm:$0xff] }
 0x5ab   :  { %v10975_v18 = vsel %vm10951_vm0, %v23432_v63, %v23429_v49  ;;  %v23440_v20 = vcombine.low %v23438_v55, %v23439_v11  ;;  %v23442_v47 = vld [vmem:[#allocation394_spill] sm:$0xff]  ;;  %v23445_v43 = vld [vmem:[#allocation335_spill] sm:$0xff]  ;;  %v23455_v11 = vld [vmem:[#allocation441_spill] sm:$0xff] }
 0x5ac   :  { %10739 = vrot.lane.b32.xlu0 %v23436_v53, %s11599_s2  ;;  %v23444_v63 = vcombine.low %v23442_v47, %v23443_v37  ;;  %v23446_v21 = vld [vmem:[#allocation415_spill] sm:$0xff]  ;;  %v23450_v53 = vld [vmem:[#allocation306_spill] sm:$0xff] }
 0x5ad   :  { %v10976_v14 = vsel %vm10951_vm0, %v23440_v20, %v23437_v48  ;;  %v23448_v57 = vcombine.low %v23446_v21, %v23447_v5  ;;  %v23452_v60 = vcombine.low %v23450_v53, %v23451_v44  ;;  %v23454_v48 = vld [vmem:[#allocation132_spill] sm:$0xff]  ;;  %v23456_v20 = vld [vmem:[#allocation443_spill] sm:$0xff]  ;;  %v23466_v53 = vld [vmem:[#allocation349_spill] sm:$0xff] }
 0x5ae   :  { %v10977_v49 = vsel %vm10951_vm0, %v23444_v63, %v23441_v41  ;;  %v23457_v36 = vcombine.low %v23455_v11, %v23456_v20  ;;  %v23458_v41 = vld [vmem:[#allocation280_spill] sm:$0xff]  ;;  %v23459_v37 = vld [vmem:[#allocation115_spill] sm:$0xff]  ;;  %v23460_v63 = vld [vmem:[#allocation234_spill] sm:$0xff]  ;;  %v10989_v11 = vsel %vm10984_vm1, %v10956_v27, %v23466_v53 }
 0x5af   :  { %v10978_v31 = vsel %vm10951_vm0, %v23448_v57, %v23445_v43  ;;  %v18580_v55 = vsel %vm10951_vm0, %v23452_v60, %v23449_v34  ;;  %v23461_v51 = vcombine.low %v23459_v37, %v23460_v63  ;;  %v23462_v43 = vld [vmem:[#allocation312_spill] sm:$0xff]  ;;  %v18596_v34 = vpop.permute.xlu1 %10485  ;;  %v18598_v60 = vpop.permute.xlu0 %10499  ;;  %v23469_v20 = vld [vmem:[#allocation25_spill] sm:$0xff]  ;;  %v23476_v53 = vld [vmem:[#allocation162_spill] sm:$0xff] }
 0x5b0   :  { %23453 = vst [vmem:[#allocation219_spill] sm:$0xff] %v18580_v55  ;;  %v10980_v47 = vsel %vm10951_vm0, %v23457_v36, %v23454_v48  ;;  %v10985_v5 = vsel %vm10984_vm1, %v10952_v52, %v23462_v43  ;;  %v23463_v57 = vld [vmem:[#allocation196_spill] sm:$0xff]  ;;  %23464 = vst [vmem:[#allocation221_spill] sm:$0xff] %v18596_v34  ;;  %v23468_v48 = vld [vmem:[#allocation143_spill] sm:$0xff] }
 0x5b1   :  { %v10982_v21 = vsel %vm10951_vm0, %v23461_v51, %v23458_v41  ;;  %v10987_v44 = vsel %vm10984_vm1, %v10954_v17, %v23463_v57  ;;  %23465 = vst [vmem:[#allocation462_spill] sm:$0xff] %v18598_v60  ;;  %v23467_v36 = vld [vmem:[#allocation356_spill] sm:$0xff]  ;;  %v23470_v55 = vcombine.low %v23468_v48, %v23469_v20  ;;  %v23471_v51 = vld [vmem:[#allocation345_spill] sm:$0xff]  ;;  %v23473_v17 = vld [vmem:[#allocation418_spill] sm:$0xff] }
 0x5b2   :  { %v10991_v41 = vsel %vm10984_vm1, %v10958_v35, %v23471_v51  ;;  %v23472_v52 = vld [vmem:[#allocation416_spill] sm:$0xff]  ;;  %v10993_v43 = vsel %vm10984_vm1, %v10960_v59, %v23473_v17  ;;  %v23474_v57 = vld [vmem:[#allocation294_spill] sm:$0xff]  ;;  %v23475_v34 = vld [vmem:[#allocation295_spill] sm:$0xff] }
 0x5b3   :  { %v10983_v37 = vsel %vm10951_vm0, %v23470_v55, %v23467_v36  ;;  %v10986_v63 = vsel %vm10984_vm1, %v10953_v39, %v23472_v52  ;;  %v10988_v60 = vsel %vm10984_vm1, %v10955_v62, %v23474_v57  ;;  %v10995_v27 = vsel %vm10984_vm1, %v10962_v28, %v23475_v34  ;;  %v23477_v48 = vld [vmem:[#allocation174_spill] sm:$0xff]  ;;  %v23479_v35 = vld [vmem:[#allocation431_spill] sm:$0xff]  ;;  %v23482_v39 = vld [vmem:[#allocation325_spill] sm:$0xff] }
 0x5b4   :  { %v23478_v55 = vcombine.low %v23476_v53, %v23477_v48  ;;  %v23480_v36 = vld [vmem:[#allocation435_spill] sm:$0xff]  ;;  %v10990_v59 = vsel %vm10984_vm1, %v10957_v26, %v23482_v39  ;;  %v23484_v52 = vld [vmem:[#allocation16_spill] sm:$0xff]  ;;  %v23485_v34 = vld [vmem:[#allocation17_spill] sm:$0xff]  ;;  %v18641_v39 = vpop.permute.xlu1 %10489 }
 0x5b5   :  { %v23481_v20 = vcombine.low %v23479_v35, %v23480_v36  ;;  %v23483_v51 = vld [vmem:[#allocation327_spill] sm:$0xff]  ;;  %v10992_v28 = vsel %vm10984_vm1, %v10959_v42, %v23484_v52  ;;  %v10999_v17 = vsel %vm10984_vm1, %v10966_v25, %v23485_v34  ;;  %v23486_v57 = vld [vmem:[#allocation130_spill] sm:$0xff]  ;;  %v23488_v36 = vld [vmem:[#allocation28_spill] sm:$0xff]  ;;  %23490 = vst [vmem:[#allocation11_spill] sm:$0xff] %v18641_v39 }
 0x5b6   :  { %10729 = vrot.lane.b32.xlu1 %v23478_v55, %s11599_s2  ;;  %v10997_v62 = vsel %vm10984_vm1, %v10964_v40, %v23483_v51  ;;  %v10994_v55 = vsel %vm10984_vm1, %v10961_v46, %v23486_v57  ;;  %v23487_v48 = vld [vmem:[#allocation375_spill] sm:$0xff]  ;;  %v23489_v35 = vld [vmem:[#allocation29_spill] sm:$0xff]  ;;  %v18643_v40 = vpop.permute.xlu0 %10503  ;;  %v23493_v25 = vld [vmem:[#allocation52_spill] sm:$0xff] }
 0x5b7   :  { %10743 = vrot.lane.b32.xlu0 %v23481_v20, %s11599_s2  ;;  %v11001_v53 = vsel %vm10984_vm1, %v10968_v1, %v23487_v48  ;;  %v10996_v20 = vsel %vm10984_vm1, %v10963_v29, %v23488_v36  ;;  %v11003_v26 = vsel %vm10984_vm1, %v10970_v50, %v23489_v35  ;;  %23491 = vst [vmem:[#allocation135_spill] sm:$0xff] %v18643_v40  ;;  %v23492_v42 = vld [vmem:[#allocation51_spill] sm:$0xff]  ;;  %v23494_v46 = vld [vmem:[#allocation80_spill] sm:$0xff]  ;;  %v23495_v1 = vld [vmem:[#allocation82_spill] sm:$0xff] }
 0x5b8   :  { %v10998_v51 = vsel %vm10984_vm1, %v10965_v54, %v23492_v42  ;;  %v11005_v52 = vsel %vm10984_vm1, %v10972_v16, %v23493_v25  ;;  %v11000_v34 = vsel %vm10984_vm1, %v10967_v3, %v23494_v46  ;;  %v11007_v48 = vsel %vm10984_vm1, %v10974_v13, %v23495_v1  ;;  %v23496_v29 = vld [vmem:[#allocation118_spill] sm:$0xff]  ;;  %v23497_v50 = vld [vmem:[#allocation119_spill] sm:$0xff]  ;;  %v23499_v54 = vld [vmem:[#allocation192_spill] sm:$0xff] }
 0x5b9   :  { %v11002_v36 = vsel %vm10984_vm1, %v10969_v58, %v23496_v29  ;;  %v11009_v35 = vsel %vm10984_vm1, %v10976_v14, %v23497_v50  ;;  %v23498_v57 = vld [vmem:[#allocation386_spill] sm:$0xff]  ;;  %v23502_v16 = vld [vmem:[#allocation343_spill] sm:$0xff]  ;;  %v23505_v13 = vld [vmem:[#allocation140_spill] sm:$0xff] }
 0x5ba   :  { %v11004_v40 = vsel %vm10984_vm1, %v10971_v32, %v23498_v57  ;;  %v23500_v42 = vld [vmem:[#allocation438_spill] sm:$0xff]  ;;  %v23503_v3 = vld [vmem:[#allocation455_spill] sm:$0xff]  ;;  %v11011_v46 = vsel %vm10984_vm1, %v10978_v31, %v23505_v13  ;;  %v23506_v58 = vld [vmem:[#allocation392_spill] sm:$0xff] }
 0x5bb   :  { %v23501_v39 = vcombine.low %v23499_v54, %v23500_v42  ;;  %v23504_v25 = vcombine.low %v23502_v16, %v23503_v3  ;;  %v11006_v1 = vsel %vm10984_vm1, %v10973_v61, %v23506_v58  ;;  %v23507_v14 = vld [vmem:[#allocation389_spill] sm:$0xff]  ;;  %v23508_v32 = vld [vmem:[#allocation62_spill] sm:$0xff]  ;;  %v23509_v57 = vld [vmem:[#allocation64_spill] sm:$0xff]  ;;  %v18685_v61 = vpop.permute.xlu1 %10493  ;;  %v18687_v58 = vpop.permute.xlu0 %10507 }
 0x5bc   :  { %v11013_v29 = vsel %vm10984_vm1, %v10980_v47, %v23507_v14  ;;  %v11008_v50 = vsel %vm10984_vm1, %v10975_v18, %v23508_v32  ;;  %v23510_v42 = vld [vmem:[#allocation98_spill] sm:$0xff]  ;;  %v23513_v31 = vld [vmem:[#allocation213_spill] sm:$0xff]  ;;  %23514 = vst [vmem:[#allocation469_spill] sm:$0xff] %v18685_v61  ;;  %23515 = vst [vmem:[#allocation468_spill] sm:$0xff] %v18687_v58 }
 0x5bd   :  { %10733 = vrot.lane.b32.xlu1 %v23501_v39, %s11599_s2  ;;  %10747 = vrot.lane.b32.xlu0 %v23504_v25, %s11599_s2  ;;  %v11015_v39 = vsel %vm10984_vm1, %v10982_v21, %v23509_v57  ;;  %v18679_v54 = vsel %vm10984_vm1, %v10977_v49, %v23510_v42  ;;  %v23512_v25 = vld [vmem:[#allocation101_spill] sm:$0xff]  ;;  %v11020_v13 = vsel %vm11017_vm2, %v10987_v44, %v23513_v31  ;;  %v23517_v14 = vld [vmem:[#allocation404_spill] sm:$0xff]  ;;  %v23519_v42 = vld [vmem:[#allocation59_spill] sm:$0xff] }
 0x5be   :  { %23511 = vst [vmem:[#allocation227_spill] sm:$0xff] %v18679_v54  ;;  %v11018_v3 = vsel %vm11017_vm2, %v10985_v5, %v23512_v25  ;;  %v23516_v47 = vld [vmem:[#allocation241_spill] sm:$0xff]  ;;  %v11016_v21 = vsel %vm10984_vm1, %v10983_v37, %v23517_v14  ;;  %v11019_v57 = vsel %vm11017_vm2, %v10986_v63, %v23519_v42  ;;  %v23520_v5 = vld [vmem:[#allocation211_spill] sm:$0xff]  ;;  %v23521_v44 = vld [vmem:[#allocation222_spill] sm:$0xff] }
 0x5bf   :  { %v11022_v18 = vsel %vm11017_vm2, %v10989_v11, %v23516_v47  ;;  %v23518_v32 = vld [vmem:[#allocation393_spill] sm:$0xff]  ;;  %v11026_v25 = vsel %vm11017_vm2, %v10993_v43, %v23520_v5  ;;  %v11021_v31 = vsel %vm11017_vm2, %v10988_v60, %v23521_v44  ;;  %v23527_v14 = vld [vmem:[#allocation478_spill] sm:$0xff]  ;;  %v23529_v63 = vld [vmem:[#allocation296_spill] sm:$0xff] }
 0x5c0   :  { %v11024_v49 = vsel %vm11017_vm2, %v10991_v41, %v23518_v32  ;;  %v23522_v54 = vld [vmem:[#allocation225_spill] sm:$0xff]  ;;  %v11023_v43 = vsel %vm11017_vm2, %v10990_v59, %v23529_v63  ;;  %v23533_v61 = vld [vmem:[#allocation430_spill] sm:$0xff]  ;;  %v18727_v63 = vpop.permute.xlu1 %10497 }
 0x5c1   :  { %v11028_v58 = vsel %vm11017_vm2, %v10995_v27, %v23522_v54  ;;  %v23523_v11 = vld [vmem:[#allocation73_spill] sm:$0xff]  ;;  %23537 = vst [vmem:[#allocation63_spill] sm:$0xff] %v18727_v63 }
 0x5c2   :  { %v23524_v47 = vld [vmem:[#allocation77_spill] sm:$0xff] }
 0x5c3   :  { %v23525_v37 = vcombine.low %v23523_v11, %v23524_v47  ;;  %v23526_v41 = vld [vmem:[#allocation9_spill] sm:$0xff] }
 0x5c4   :  { %v23528_v32 = vcombine.low %v23526_v41, %v23527_v14  ;;  %v23530_v42 = vld [vmem:[#allocation297_spill] sm:$0xff]  ;;  %v23535_v14 = vld [vmem:[#allocation456_spill] sm:$0xff] }
 0x5c5   :  { %10737 = vrot.lane.b32.xlu1 %v23525_v37, %s11599_s2  ;;  %v11030_v60 = vsel %vm11017_vm2, %v10997_v62, %v23530_v42  ;;  %v23531_v5 = vld [vmem:[#allocation437_spill] sm:$0xff]  ;;  %v11027_v37 = vsel %vm11017_vm2, %v10994_v55, %v23533_v61  ;;  %v18729_v62 = vpop.permute.xlu0 %10511  ;;  %v23541_v55 = vld [vmem:[#allocation494_spill] sm:$0xff] }
 0x5c6   :  { %10751 = vrot.lane.b32.xlu0 %v23528_v32, %s11599_s2  ;;  %v11025_v27 = vsel %vm11017_vm2, %v10992_v28, %v23531_v5  ;;  %v23532_v54 = vld [vmem:[#allocation173_spill] sm:$0xff]  ;;  %v11029_v32 = vsel %vm11017_vm2, %v10996_v20, %v23535_v14  ;;  %23538 = vst [vmem:[#allocation66_spill] sm:$0xff] %v18729_v62  ;;  %v23539_v28 = vld [vmem:[#allocation50_spill] sm:$0xff]  ;;  %v11033_v61 = vsel %vm11017_vm2, %v11000_v34, %v23541_v55 }
 0x5c7   :  { %v11032_v44 = vsel %vm11017_vm2, %v10999_v17, %v23532_v54  ;;  %v23534_v47 = vld [vmem:[#allocation189_spill] sm:$0xff]  ;;  %v11031_v42 = vsel %vm11017_vm2, %v10998_v51, %v23539_v28  ;;  %v23540_v17 = vld [vmem:[#allocation479_spill] sm:$0xff]  ;;  %v23547_v28 = vld [vmem:[#allocation466_spill] sm:$0xff] }
 0x5c8   :  { %v11034_v11 = vsel %vm11017_vm2, %v11001_v53, %v23534_v47  ;;  %v23536_v41 = vld [vmem:[#allocation457_spill] sm:$0xff]  ;;  %v11038_v5 = vsel %vm11017_vm2, %v11005_v52, %v23540_v17  ;;  %v23542_v53 = vld [vmem:[#allocation495_spill] sm:$0xff]  ;;  %v23549_v52 = vld [vmem:[#allocation36_spill] sm:$0xff] }
 0x5c9   :  { %v11036_v59 = vsel %vm11017_vm2, %v11003_v26, %v23536_v41  ;;  %v11040_v47 = vsel %vm11017_vm2, %v11007_v48, %v23542_v53  ;;  %v23543_v20 = vld [vmem:[#allocation425_spill] sm:$0xff]  ;;  %v23544_v26 = vld [vmem:[#allocation414_spill] sm:$0xff]  ;;  %v23552_v48 = vld [vmem:[#allocation428_spill] sm:$0xff] }
 0x5ca   :  { %v11035_v14 = vsel %vm11017_vm2, %v11002_v36, %v23543_v20  ;;  %v11042_v41 = vsel %vm11017_vm2, %v11009_v35, %v23544_v26  ;;  %v23545_v54 = vld [vmem:[#allocation177_spill] sm:$0xff]  ;;  %v23550_v34 = vld [vmem:[#allocation186_spill] sm:$0xff]  ;;  %v11044_v55 = vsel %vm11017_vm2, %v11011_v46, %v23552_v48  ;;  %v23554_v35 = vld [vmem:[#allocation344_spill] sm:$0xff]  ;;  %v18769_v48 = vpop.permute.xlu1 %10501 }
 0x5cb   :  { %v11037_v62 = vsel %vm11017_vm2, %v11004_v40, %v23545_v54  ;;  %v23546_v51 = vld [vmem:[#allocation465_spill] sm:$0xff]  ;;  %v23551_v17 = vcombine.low %v23549_v52, %v23550_v34  ;;  %v11046_v20 = vsel %vm11017_vm2, %v11013_v29, %v23554_v35  ;;  %v23555_v40 = vld [vmem:[#allocation170_spill] sm:$0xff]  ;;  %v23556_v54 = vld [vmem:[#allocation168_spill] sm:$0xff]  ;;  %23560 = vst [vmem:[#allocation399_spill] sm:$0xff] %v18769_v48 }
 0x5cc   :  { %v23548_v63 = vcombine.low %v23546_v51, %v23547_v28  ;;  %v23553_v36 = vld [vmem:[#allocation461_spill] sm:$0xff]  ;;  %v11041_v26 = vsel %vm11017_vm2, %v11008_v50, %v23555_v40  ;;  %v23558_v34 = vld [vmem:[#allocation199_spill] sm:$0xff]  ;;  %v23563_v50 = vld [vmem:[#allocation350_spill] sm:$0xff] }
 0x5cd   :  { %10755 = vrot.lane.b32.xlu0 %v23551_v17, %s11599_s2  ;;  %v11039_v53 = vsel %vm11017_vm2, %v11006_v1, %v23553_v36  ;;  %v23557_v28 = vld [vmem:[#allocation281_spill] sm:$0xff]  ;;  %v11053_v17 = vsel %vm11050_vm3, %v11020_v13, %v23558_v34  ;;  %v18771_v1 = vpop.permute.xlu0 %10515  ;;  %v23562_v29 = vld [vmem:[#allocation351_spill] sm:$0xff]  ;;  %v11057_v35 = vsel %vm11050_vm3, %v11024_v49, %v23563_v50  ;;  %v23573_v50 = vld [vmem:[#allocation444_spill] sm:$0xff] }
 0x5ce   :  { %10741 = vrot.lane.b32.xlu1 %v23548_v63, %s11599_s2  ;;  %v11048_v63 = vsel %vm11017_vm2, %v11015_v39, %v23556_v54  ;;  %v11051_v51 = vsel %vm11050_vm3, %v11018_v3, %v23557_v28  ;;  %v23559_v52 = vld [vmem:[#allocation313_spill] sm:$0xff]  ;;  %23561 = vst [vmem:[#allocation137_spill] sm:$0xff] %v18771_v1  ;;  %v11049_v36 = vsel %vm11017_vm2, %v11016_v21, %v23562_v29  ;;  %v23565_v3 = vld [vmem:[#allocation380_spill] sm:$0xff]  ;;  %v23568_v54 = vld [vmem:[#allocation366_spill] sm:$0xff] }
 0x5cf   :  { %v11055_v46 = vsel %vm11050_vm3, %v11022_v18, %v23559_v52  ;;  %v23564_v39 = vld [vmem:[#allocation381_spill] sm:$0xff]  ;;  %v11059_v28 = vsel %vm11050_vm3, %v11026_v25, %v23565_v3  ;;  %v23567_v18 = vld [vmem:[#allocation446_spill] sm:$0xff]  ;;  %v11056_v1 = vsel %vm11050_vm3, %v11023_v43, %v23568_v54  ;;  %v23569_v21 = vld [vmem:[#allocation27_spill] sm:$0xff] }
 0x5d0   :  { %v11052_v40 = vsel %vm11050_vm3, %v11019_v57, %v23564_v39  ;;  %v23566_v13 = vld [vmem:[#allocation329_spill] sm:$0xff]  ;;  %v11061_v52 = vsel %vm11050_vm3, %v11028_v58, %v23567_v18  ;;  %v23570_v29 = vld [vmem:[#allocation48_spill] sm:$0xff]  ;;  %v23572_v57 = vld [vmem:[#allocation442_spill] sm:$0xff] }
 0x5d1   :  { %v11054_v34 = vsel %vm11050_vm3, %v11021_v31, %v23566_v13  ;;  %v23571_v49 = vcombine.low %v23569_v21, %v23570_v29  ;;  %v23574_v39 = vcombine.low %v23572_v57, %v23573_v50  ;;  %v23575_v25 = vld [vmem:[#allocation367_spill] sm:$0xff]  ;;  %v23577_v13 = vld [vmem:[#allocation440_spill] sm:$0xff]  ;;  %v23578_v18 = vld [vmem:[#allocation45_spill] sm:$0xff] }
 0x5d2   :  { %v11063_v31 = vsel %vm11050_vm3, %v11030_v60, %v23575_v25  ;;  %v23576_v3 = vld [vmem:[#allocation451_spill] sm:$0xff]  ;;  %v11065_v43 = vsel %vm11050_vm3, %v11032_v44, %v23577_v13  ;;  %v11060_v54 = vsel %vm11050_vm3, %v11027_v37, %v23578_v18  ;;  %v23579_v48 = vld [vmem:[#allocation452_spill] sm:$0xff]  ;;  %v23581_v50 = vld [vmem:[#allocation21_spill] sm:$0xff]  ;;  %v18811_v25 = vpop.permute.xlu1 %10505 }
 0x5d3   :  { %10745 = vrot.lane.b32.xlu1 %v23571_v49, %s11599_s2  ;;  %10759 = vrot.lane.b32.xlu0 %v23574_v39, %s11599_s2  ;;  %v11058_v58 = vsel %vm11050_vm3, %v11025_v27, %v23576_v3  ;;  %v11067_v49 = vsel %vm11050_vm3, %v11034_v11, %v23579_v48  ;;  %v23580_v29 = vld [vmem:[#allocation20_spill] sm:$0xff]  ;;  %v11069_v39 = vsel %vm11050_vm3, %v11036_v59, %v23581_v50  ;;  %v23582_v57 = vld [vmem:[#allocation31_spill] sm:$0xff]  ;;  %v18813_v27 = vpop.permute.xlu0 %10519  ;;  %v23584_v44 = vld [vmem:[#allocation30_spill] sm:$0xff] }
 0x5d4   :  { %v11062_v21 = vsel %vm11050_vm3, %v11029_v32, %v23580_v29  ;;  %v11064_v60 = vsel %vm11050_vm3, %v11031_v42, %v23582_v57  ;;  %23583 = vst [vmem:[#allocation258_spill] sm:$0xff] %v18813_v27  ;;  %v11071_v3 = vsel %vm11050_vm3, %v11038_v5, %v23584_v44  ;;  %v23585_v37 = vld [vmem:[#allocation54_spill] sm:$0xff]  ;;  %v23586_v11 = vld [vmem:[#allocation53_spill] sm:$0xff]  ;;  %v23588_v59 = vld [vmem:[#allocation23_spill] sm:$0xff] }
 0x5d5   :  { %v11066_v13 = vsel %vm11050_vm3, %v11033_v61, %v23585_v37  ;;  %v11073_v48 = vsel %vm11050_vm3, %v11040_v47, %v23586_v11  ;;  %v23587_v32 = vld [vmem:[#allocation22_spill] sm:$0xff]  ;;  %v11075_v50 = vsel %vm11050_vm3, %v11042_v41, %v23588_v59  ;;  %v23589_v42 = vld [vmem:[#allocation43_spill] sm:$0xff]  ;;  %v23590_v18 = vld [vmem:[#allocation40_spill] sm:$0xff] }
 0x5d6   :  { %v11068_v29 = vsel %vm11050_vm3, %v11035_v14, %v23587_v32  ;;  %v18827_v57 = vsel %vm11050_vm3, %v11037_v62, %v23589_v42  ;;  %v18831_v27 = vsel %vm11050_vm3, %v11044_v55, %v23590_v18  ;;  %v23591_v5 = vld [vmem:[#allocation484_spill] sm:$0xff]  ;;  %v23592_v61 = vld [vmem:[#allocation485_spill] sm:$0xff]  ;;  %v23598_v62 = vld [vmem:[#allocation155_spill] sm:$0xff] }
 0x5d7   :  { %v23593_v44 = vcombine.low %v23591_v5, %v23592_v61  ;;  %v23594_v47 = vld [vmem:[#allocation492_spill] sm:$0xff]  ;;  %v23595_v14 = vld [vmem:[#allocation493_spill] sm:$0xff]  ;;  %v18847_v32 = vsel %vm11050_vm3, %v11046_v20, %v23598_v62  ;;  %v23599_v55 = vld [vmem:[#allocation191_spill] sm:$0xff]  ;;  %v18867_v62 = vpop.permute.xlu1 %10509 }
 0x5d8   :  { %v23596_v37 = vcombine.low %v23594_v47, %v23595_v14  ;;  %v23597_v41 = vld [vmem:[#allocation157_spill] sm:$0xff]  ;;  %v18851_v59 = vsel %vm11050_vm3, %v11041_v26, %v23599_v55  ;;  %v23600_v42 = vld [vmem:[#allocation190_spill] sm:$0xff]  ;;  %v23602_v14 = vld [vmem:[#allocation216_spill] sm:$0xff]  ;;  %23605 = vst [vmem:[#allocation256_spill] sm:$0xff] %v18867_v62  ;;  %v18869_v26 = vpop.permute.xlu0 %10523 }
 0x5d9   :  { %10749 = vrot.lane.b32.xlu1 %v23593_v44, %s11599_s2  ;;  %v18843_v11 = vsel %vm11050_vm3, %v11039_v53, %v23597_v41  ;;  %v11081_v18 = vsel %vm11050_vm3, %v11048_v63, %v23600_v42  ;;  %v23601_v44 = vld [vmem:[#allocation99_spill] sm:$0xff]  ;;  %v23603_v47 = vld [vmem:[#allocation253_spill] sm:$0xff]  ;;  %v23604_v41 = vld [vmem:[#allocation184_spill] sm:$0xff]  ;;  %23606 = vst [vmem:[#allocation139_spill] sm:$0xff] %v18869_v26 }
 0x5da   :  { %10763 = vrot.lane.b32.xlu0 %v23596_v37, %s11599_s2  ;;  %v11084_v61 = vsel %vm11083_vm4, %v11051_v51, %v23601_v44  ;;  %v11086_v37 = vsel %vm11083_vm4, %v11053_v17, %v23602_v14  ;;  %v18861_v53 = vsel %vm11083_vm4, %v11055_v46, %v23603_v47  ;;  %v18865_v20 = vsel %vm11050_vm3, %v11049_v36, %v23604_v41  ;;  %v23607_v55 = vld [vmem:[#allocation148_spill] sm:$0xff]  ;;  %v23608_v51 = vld [vmem:[#allocation138_spill] sm:$0xff]  ;;  %v23610_v47 = vld [vmem:[#allocation243_spill] sm:$0xff] }
 0x5db   :  { %v18873_v63 = vsel %vm11083_vm4, %v11057_v35, %v23607_v55  ;;  %v18877_v42 = vsel %vm11083_vm4, %v11052_v40, %v23608_v51  ;;  %v23609_v17 = vld [vmem:[#allocation136_spill] sm:$0xff]  ;;  %v18885_v36 = vsel %vm11083_vm4, %v11054_v34, %v23610_v47  ;;  %v23612_v41 = vld [vmem:[#allocation171_spill] sm:$0xff]  ;;  %v23617_v34 = vld [vmem:[#allocation121_spill] sm:$0xff] }
 0x5dc   :  { %v18881_v46 = vsel %vm11083_vm4, %v11059_v28, %v23609_v17  ;;  %v23611_v14 = vld [vmem:[#allocation244_spill] sm:$0xff]  ;;  %v18893_v35 = vsel %vm11083_vm4, %v11056_v1, %v23612_v41  ;;  %v23614_v51 = vld [vmem:[#allocation247_spill] sm:$0xff]  ;;  %v23618_v47 = vld [vmem:[#allocation361_spill] sm:$0xff] }
 0x5dd   :  { %v18889_v44 = vsel %vm11083_vm4, %v11061_v52, %v23611_v14  ;;  %v23613_v55 = vld [vmem:[#allocation432_spill] sm:$0xff]  ;;  %v23619_v26 = vcombine.low %v23617_v34, %v23618_v47  ;;  %v23620_v52 = vld [vmem:[#allocation169_spill] sm:$0xff]  ;;  %v23621_v1 = vld [vmem:[#allocation286_spill] sm:$0xff] }
 0x5de   :  { %v11114_v40 = vsel %vm11083_vm4, %v11081_v18, %v23613_v55  ;;  %v23615_v28 = vld [vmem:[#allocation236_spill] sm:$0xff]  ;;  %v18907_v14 = vsel %vm11083_vm4, %v11063_v31, %v23620_v52  ;;  %v18911_v41 = vsel %vm11083_vm4, %v11058_v58, %v23621_v1  ;;  %v23622_v18 = vld [vmem:[#allocation283_spill] sm:$0xff]  ;;  %v23623_v62 = vld [vmem:[#allocation33_spill] sm:$0xff]  ;;  %v18929_v58 = vpop.permute.xlu1 %10513  ;;  %v18931_v1 = vpop.permute.xlu0 %10527 }
 0x5df   :  { %v23616_v17 = vcombine.low %v23614_v51, %v23615_v28  ;;  %10767 = vrot.lane.b32.xlu0 %v23619_v26, %s11599_s2  ;;  %v18915_v55 = vsel %vm11083_vm4, %v11065_v43, %v23622_v18  ;;  %v23624_v28 = vld [vmem:[#allocation202_spill] sm:$0xff]  ;;  %v23625_v26 = vld [vmem:[#allocation200_spill] sm:$0xff]  ;;  %v23626_v31 = vld [vmem:[#allocation109_spill] sm:$0xff]  ;;  %23627 = vst [vmem:[#allocation390_spill] sm:$0xff] %v18929_v58 }
 0x5e0   :  { %v18921_v51 = vsel %vm11083_vm4, %v11060_v54, %v23624_v28  ;;  %v18925_v47 = vsel %vm11083_vm4, %v11067_v49, %v23625_v26  ;;  %23628 = vst [vmem:[#allocation391_spill] sm:$0xff] %v18931_v1  ;;  %v23629_v43 = vld [vmem:[#allocation318_spill] sm:$0xff]  ;;  %v23641_v34 = vld [vmem:[#allocation223_spill] sm:$0xff] }
 0x5e1   :  { %10753 = vrot.lane.b32.xlu1 %v23616_v17, %s11599_s2  ;;  %v11147_v17 = vsel %vm11116_vm5, %v11114_v40, %v23623_v62  ;;  %v18935_v18 = vsel %vm11083_vm4, %v11062_v21, %v23629_v43  ;;  %v23630_v62 = vld [vmem:[#allocation315_spill] sm:$0xff]  ;;  %v23632_v28 = vld [vmem:[#allocation226_spill] sm:$0xff]  ;;  %v23635_v21 = vld [vmem:[#allocation413_spill] sm:$0xff] }
 0x5e2   :  { %v11180_v52 = vsel %vm11149_vm6, %v11147_v17, %v23626_v31  ;;  %v18939_v54 = vsel %vm11083_vm4, %v11069_v39, %v23630_v62  ;;  %v23631_v40 = vld [vmem:[#allocation255_spill] sm:$0xff]  ;;  %v18945_v17 = vsel %vm11083_vm4, %v11064_v60, %v23632_v28  ;;  %v23633_v26 = vld [vmem:[#allocation458_spill] sm:$0xff]  ;;  %v23636_v43 = vld [vmem:[#allocation488_spill] sm:$0xff]  ;;  %v18961_v60 = vsel %vm11083_vm4, %v11071_v3, %v23641_v34  ;;  %v18975_v3 = vpop.permute.xlu1 %10517  ;;  %v10532_v34 = vpop.permute.xlu0 %10531 }
 0x5e3   :  { %v11213_v49 = vsel %vm11182_vm7, %v11180_v52, %v23631_v40  ;;  %v11117_v31 = vsel %vm11116_vm5, %v11084_v61, %v23633_v26  ;;  %v23634_v1 = vld [vmem:[#allocation450_spill] sm:$0xff]  ;;  %v23637_v39 = vcombine.low %v23635_v21, %v23636_v43  ;;  %v23639_v52 = vld [vmem:[#allocation19_spill] sm:$0xff]  ;;  %v23642_v28 = vld [vmem:[#allocation128_spill] sm:$0xff]  ;;  %23646 = vst [vmem:[#allocation15_spill] sm:$0xff] %v18975_v3 }
 0x5e4   :  { %v11246_v58 = vsel %vm11215_vm8, %v11213_v49, %v23634_v1  ;;  %v23638_v62 = vld [vmem:[#allocation18_spill] sm:$0xff]  ;;  %v11150_v61 = vsel %vm11149_vm6, %v11117_v31, %v23642_v28  ;;  %v23643_v26 = vld [vmem:[#allocation359_spill] sm:$0xff] }
 0x5e5   :  { %10757 = vrot.lane.b32.xlu1 %v23637_v39, %s11599_s2  ;;  %v23640_v40 = vcombine.low %v23638_v62, %v23639_v52  ;;  %v11279_v1 = vsel %vm11248_vm9, %v11246_v58, %v23643_v26  ;;  %v23644_v49 = vld [vmem:[#allocation355_spill] sm:$0xff]  ;;  %v23645_v39 = vld [vmem:[#allocation374_spill] sm:$0xff]  ;;  %v23647_v52 = vld [vmem:[#allocation352_spill] sm:$0xff] }
 0x5e6   :  { %v18969_v43 = vsel %vm11083_vm4, %v11066_v13, %v23644_v49  ;;  %v11183_v21 = vsel %vm11182_vm7, %v11150_v61, %v23645_v39  ;;  %v18979_v31 = vsel %vm11083_vm4, %v11073_v48, %v23647_v52  ;;  %v23648_v58 = vld [vmem:[#allocation385_spill] sm:$0xff]  ;;  %v23649_v13 = vld [vmem:[#allocation300_spill] sm:$0xff]  ;;  %v23652_v3 = vld [vmem:[#allocation303_spill] sm:$0xff] }
 0x5e7   :  { %10771 = vrot.lane.b32.xlu0 %v23640_v40, %s11599_s2  ;;  %v11312_v40 = vsel %vm11281_vm10, %v11279_v1, %v18346_v45  ;;  %v18983_v28 = vsel %vm11083_vm4, %v11068_v29, %v23648_v58  ;;  %v11216_v26 = vsel %vm11215_vm8, %v11183_v21, %v23649_v13  ;;  %v23650_v49 = vld [vmem:[#allocation301_spill] sm:$0xff]  ;;  %v23651_v1 = vld [vmem:[#allocation483_spill] sm:$0xff]  ;;  %v23654_v29 = vld [vmem:[#allocation490_spill] sm:$0xff] }
 0x5e8   :  { %v18988_v61 = vsel %vm11314_vm11, %v11312_v40, %v10532_v34  ;;  %v18992_v45 = vsel %vm11083_vm4, %v11075_v50, %v23650_v49  ;;  %v11119_v39 = vsel %vm11116_vm5, %v11086_v37, %v23651_v1  ;;  %v11249_v48 = vsel %vm11248_vm9, %v11216_v26, %v23652_v3  ;;  %v23653_v52 = vld [vmem:[#allocation489_spill] sm:$0xff]  ;;  %v23656_v21 = vld [vmem:[#allocation411_spill] sm:$0xff]  ;;  %v23660_v37 = vld [vmem:[#allocation448_spill] sm:$0xff] }
 0x5e9   :  { %v23655_v58 = vcombine.low %v23653_v52, %v23654_v29  ;;  %v23657_v13 = vld [vmem:[#allocation409_spill] sm:$0xff]  ;;  %v23659_v34 = vld [vmem:[#allocation447_spill] sm:$0xff]  ;;  %v19014_v3 = vsel %vm11083_vm4, %v18831_v27, %v23660_v37 }
 0x5ea   :  { %v23658_v40 = vcombine.low %v23656_v21, %v23657_v13  ;;  %v19009_v50 = vsel %vm11083_vm4, %v18827_v57, %v23659_v34  ;;  %v23661_v26 = vld [vmem:[#allocation55_spill] sm:$0xff]  ;;  %v23663_v29 = vld [vmem:[#allocation473_spill] sm:$0xff]  ;;  %v23665_v34 = vld [vmem:[#allocation474_spill] sm:$0xff] }
 0x5eb   :  { %10761 = vrot.lane.b32.xlu1 %v23655_v58, %s11599_s2  ;;  %v11152_v49 = vsel %vm11149_vm6, %v11119_v39, %v23661_v26  ;;  %v23662_v1 = vld [vmem:[#allocation195_spill] sm:$0xff]  ;;  %v19034_v39 = vpop.permute.xlu1 %10521  ;;  %v10600_v26 = vpop.permute.xlu0 %10599 }
 0x5ec   :  { %10775 = vrot.lane.b32.xlu0 %v23658_v40, %s11599_s2  ;;  %v11282_v58 = vsel %vm11281_vm10, %v11249_v48, %v23662_v1  ;;  %v19023_v40 = vsel %vm11083_vm4, %v18843_v11, %v23663_v29  ;;  %v23664_v13 = vld [vmem:[#allocation403_spill] sm:$0xff]  ;;  %v11185_v27 = vsel %vm11182_vm7, %v11152_v49, %v23665_v34  ;;  %23666 = vst [vmem:[#allocation10_spill] sm:$0xff] %v19034_v39  ;;  %v23667_v48 = vld [vmem:[#allocation436_spill] sm:$0xff]  ;;  %v23668_v11 = vld [vmem:[#allocation266_spill] sm:$0xff] }
 0x5ed   :  { %v19028_v57 = vsel %vm11083_vm4, %v18847_v32, %v23664_v13  ;;  %v11315_v37 = vsel %vm11314_vm11, %v11282_v58, %v18358_v38  ;;  %v19039_v1 = vsel %vm11083_vm4, %v18851_v59, %v23667_v48  ;;  %v11121_v29 = vsel %vm11116_vm5, %v18861_v53, %v23668_v11  ;;  %v23669_v32 = vld [vmem:[#allocation270_spill] sm:$0xff]  ;;  %v23674_v21 = vld [vmem:[#allocation167_spill] sm:$0xff]  ;;  %v23675_v53 = vld [vmem:[#allocation165_spill] sm:$0xff] }
 0x5ee   :  { %v11218_v13 = vsel %vm11215_vm8, %v11185_v27, %v23669_v32  ;;  %v19047_v49 = vsel %vm11347_vm12, %v11315_v37, %v10600_v26  ;;  %v23671_v34 = vld [vmem:[#allocation382_spill] sm:$0xff]  ;;  %v23676_v11 = vcombine.low %v23674_v21, %v23675_v53  ;;  %v23677_v27 = vld [vmem:[#allocation496_spill] sm:$0xff]  ;;  %v23678_v37 = vld [vmem:[#allocation497_spill] sm:$0xff] }
 0x5ef   :  { %23670 = vst [vmem:[#allocation8_spill] sm:$0xff] %v19047_v49  ;;  %v11115_v38 = vsel %vm11083_vm4, %v18865_v20, %v23671_v34  ;;  %v23672_v58 = vld [vmem:[#allocation298_spill] sm:$0xff]  ;;  %v23679_v26 = vcombine.low %v23677_v27, %v23678_v37  ;;  %v23680_v32 = vld [vmem:[#allocation421_spill] sm:$0xff]  ;;  %v23685_v37 = vld [vmem:[#allocation331_spill] sm:$0xff] }
 0x5f0   :  { %v11123_v39 = vsel %vm11116_vm5, %v18873_v63, %v23672_v58  ;;  %v23673_v59 = vld [vmem:[#allocation238_spill] sm:$0xff]  ;;  %10765 = vrot.lane.b32.xlu1 %v23676_v11, %s11599_s2  ;;  %v11118_v20 = vsel %vm11116_vm5, %v18877_v42, %v23680_v32  ;;  %v23682_v58 = vld [vmem:[#allocation141_spill] sm:$0xff]  ;;  %v23686_v27 = vld [vmem:[#allocation487_spill] sm:$0xff]  ;;  %v19085_v32 = vpop.permute.xlu1 %10525 }
 0x5f1   :  { %v11251_v48 = vsel %vm11248_vm9, %v11218_v13, %v23673_v59  ;;  %10779 = vrot.lane.b32.xlu0 %v23679_v26, %s11599_s2  ;;  %v23681_v34 = vld [vmem:[#allocation422_spill] sm:$0xff]  ;;  %v11154_v13 = vsel %vm11149_vm6, %v11121_v29, %v23682_v58  ;;  %v11127_v26 = vsel %vm11116_vm5, %v18889_v44, %v23685_v37  ;;  %v10604_v29 = vpop.permute.xlu0 %10603  ;;  %v23688_v58 = vld [vmem:[#allocation400_spill] sm:$0xff]  ;;  %v23689_v44 = vld [vmem:[#allocation333_spill] sm:$0xff] }
 0x5f2   :  { %v11125_v63 = vsel %vm11116_vm5, %v18881_v46, %v23681_v34  ;;  %v23683_v59 = vld [vmem:[#allocation362_spill] sm:$0xff]  ;;  %v11187_v42 = vsel %vm11182_vm7, %v11154_v13, %v23686_v27  ;;  %v23692_v13 = vld [vmem:[#allocation328_spill] sm:$0xff] }
 0x5f3   :  { %v11284_v49 = vsel %vm11281_vm10, %v11251_v48, %v23683_v59  ;;  %v23684_v11 = vld [vmem:[#allocation330_spill] sm:$0xff]  ;;  %v11220_v37 = vsel %vm11215_vm8, %v11187_v42, %v23689_v44  ;;  %v23693_v59 = vld [vmem:[#allocation467_spill] sm:$0xff] }
 0x5f4   :  { %v11120_v53 = vsel %vm11116_vm5, %v18885_v36, %v23684_v11  ;;  %v11317_v46 = vsel %vm11314_vm11, %v11284_v49, %v18370_v24  ;;  %v23687_v34 = vld [vmem:[#allocation70_spill] sm:$0xff]  ;;  %v19095_v36 = vsel %vm11116_vm5, %v18907_v14, %v23688_v58  ;;  %v23691_v24 = vld [vmem:[#allocation420_spill] sm:$0xff]  ;;  %v11253_v14 = vsel %vm11248_vm9, %v11220_v37, %v23693_v59  ;;  %v23703_v59 = vld [vmem:[#allocation463_spill] sm:$0xff] }
 0x5f5   :  { %v19090_v48 = vsel %vm11116_vm5, %v18893_v35, %v23687_v34  ;;  %v19100_v27 = vsel %vm11347_vm12, %v11317_v46, %v10604_v29  ;;  %v19105_v49 = vsel %vm11116_vm5, %v18911_v41, %v23691_v24  ;;  %v19110_v35 = vsel %vm11116_vm5, %v18915_v55, %v23692_v13  ;;  %v23694_v11 = vld [vmem:[#allocation372_spill] sm:$0xff]  ;;  %v23695_v34 = vld [vmem:[#allocation235_spill] sm:$0xff]  ;;  %v23697_v46 = vld [vmem:[#allocation261_spill] sm:$0xff] }
 0x5f6   :  { %23690 = vst [vmem:[#allocation271_spill] sm:$0xff] %v19100_v27  ;;  %v23696_v42 = vcombine.low %v23694_v11, %v23695_v34  ;;  %v23698_v29 = vld [vmem:[#allocation265_spill] sm:$0xff]  ;;  %v23700_v41 = vld [vmem:[#allocation72_spill] sm:$0xff]  ;;  %v11286_v27 = vsel %vm11281_vm10, %v11253_v14, %v23703_v59 }
 0x5f7   :  { %v23699_v58 = vcombine.low %v23697_v46, %v23698_v29  ;;  %v19125_v44 = vsel %vm11116_vm5, %v18921_v51, %v23700_v41  ;;  %v23701_v55 = vld [vmem:[#allocation249_spill] sm:$0xff]  ;;  %v23702_v13 = vld [vmem:[#allocation248_spill] sm:$0xff]  ;;  %v19144_v41 = vpop.permute.xlu1 %10529 }
 0x5f8   :  { %10769 = vrot.lane.b32.xlu1 %v23696_v42, %s11599_s2  ;;  %v11148_v24 = vsel %vm11116_vm5, %v11115_v38, %v23701_v55  ;;  %v11156_v37 = vsel %vm11149_vm6, %v11123_v39, %v23702_v13  ;;  %v23704_v42 = vld [vmem:[#allocation71_spill] sm:$0xff]  ;;  %v23706_v46 = vld [vmem:[#allocation412_spill] sm:$0xff]  ;;  %v11319_v38 = vsel %vm11314_vm11, %v11286_v27, %v18382_v4  ;;  %23707 = vst [vmem:[#allocation14_spill] sm:$0xff] %v19144_v41  ;;  %v10608_v39 = vpop.permute.xlu0 %10607  ;;  %v23708_v55 = vld [vmem:[#allocation89_spill] sm:$0xff] }
 0x5f9   :  { %10783 = vrot.lane.b32.xlu0 %v23699_v58, %s11599_s2  ;;  %v19136_v34 = vsel %vm11116_vm5, %v18925_v47, %v23704_v42  ;;  %v23705_v58 = vld [vmem:[#allocation486_spill] sm:$0xff]  ;;  %v11189_v51 = vsel %vm11182_vm7, %v11156_v37, %v23706_v46  ;;  %v19149_v14 = vsel %vm11116_vm5, %v18935_v18, %v23708_v55  ;;  %v23709_v13 = vld [vmem:[#allocation272_spill] sm:$0xff]  ;;  %v23710_v59 = vld [vmem:[#allocation273_spill] sm:$0xff]  ;;  %v19156_v42 = vsel %vm11347_vm12, %v11319_v38, %v10608_v39 }
 0x5fa   :  { %v11181_v29 = vsel %vm11149_vm6, %v11148_v24, %v23705_v58  ;;  %v11222_v24 = vsel %vm11215_vm8, %v11189_v51, %v23710_v59  ;;  %23711 = vst [vmem:[#allocation12_spill] sm:$0xff] %v19156_v42  ;;  %v23712_v46 = vld [vmem:[#allocation88_spill] sm:$0xff]  ;;  %v23714_v58 = vld [vmem:[#allocation41_spill] sm:$0xff]  ;;  %v23715_v55 = vld [vmem:[#allocation187_spill] sm:$0xff] }
 0x5fb   :  { %v11214_v47 = vsel %vm11182_vm7, %v11181_v29, %v23709_v13  ;;  %v19161_v4 = vsel %vm11116_vm5, %v18939_v54, %v23712_v46  ;;  %v23713_v27 = vld [vmem:[#allocation364_spill] sm:$0xff]  ;;  %v11255_v18 = vsel %vm11248_vm9, %v11222_v24, %v23714_v58  ;;  %v23718_v51 = vld [vmem:[#allocation86_spill] sm:$0xff]  ;;  %v23719_v38 = vld [vmem:[#allocation85_spill] sm:$0xff] }
 0x5fc   :  { %v11247_v37 = vsel %vm11215_vm8, %v11214_v47, %v23713_v27  ;;  %v23716_v29 = vld [vmem:[#allocation188_spill] sm:$0xff]  ;;  %v23720_v39 = vcombine.low %v23718_v51, %v23719_v38  ;;  %v23721_v59 = vld [vmem:[#allocation123_spill] sm:$0xff]  ;;  %v23722_v46 = vld [vmem:[#allocation122_spill] sm:$0xff] }
 0x5fd   :  { %v23717_v13 = vcombine.low %v23715_v55, %v23716_v29  ;;  %v11151_v54 = vsel %vm11149_vm6, %v11118_v20, %v23721_v59  ;;  %v11158_v42 = vsel %vm11149_vm6, %v11125_v63, %v23722_v46  ;;  %v23723_v47 = vld [vmem:[#allocation388_spill] sm:$0xff]  ;;  %v23724_v24 = vld [vmem:[#allocation387_spill] sm:$0xff]  ;;  %v23725_v41 = vld [vmem:[#allocation134_spill] sm:$0xff]  ;;  %v10534_v59 = vpop.permute.xlu1 %10533  ;;  %v10612_v63 = vpop.permute.xlu0 %10611 }
 0x5fe   :  { %10787 = vrot.lane.b32.xlu0 %v23720_v39, %s11599_s2  ;;  %v11280_v27 = vsel %vm11248_vm9, %v11247_v37, %v23723_v47  ;;  %v11288_v58 = vsel %vm11281_vm10, %v11255_v18, %v23724_v24  ;;  %v23726_v29 = vld [vmem:[#allocation56_spill] sm:$0xff]  ;;  %v23727_v46 = vld [vmem:[#allocation370_spill] sm:$0xff]  ;;  %v23728_v47 = vld [vmem:[#allocation371_spill] sm:$0xff] }
 0x5ff   :  { %10773 = vrot.lane.b32.xlu1 %v23717_v13, %s11599_s2  ;;  %v11184_v13 = vsel %vm11182_vm7, %v11151_v54, %v23725_v41  ;;  %v11191_v55 = vsel %vm11182_vm7, %v11158_v42, %v23726_v29  ;;  %v11313_v39 = vsel %vm11281_vm10, %v11280_v27, %v18392_v22  ;;  %v11321_v20 = vsel %vm11314_vm11, %v11288_v58, %v18394_v30  ;;  %v23729_v42 = vld [vmem:[#allocation92_spill] sm:$0xff]  ;;  %v23730_v30 = vld [vmem:[#allocation151_spill] sm:$0xff]  ;;  %v23731_v54 = vld [vmem:[#allocation445_spill] sm:$0xff] }
 0x600   :  { %v11217_v37 = vsel %vm11215_vm8, %v11184_v13, %v23727_v46  ;;  %v11224_v18 = vsel %vm11215_vm8, %v11191_v55, %v23728_v47  ;;  %v19196_v24 = vsel %vm11314_vm11, %v11313_v39, %v10534_v59  ;;  %v19199_v41 = vsel %vm11347_vm12, %v11321_v20, %v10612_v63  ;;  %v23732_v58 = vld [vmem:[#allocation321_spill] sm:$0xff]  ;;  %v23736_v20 = vld [vmem:[#allocation178_spill] sm:$0xff]  ;;  %v23737_v59 = vld [vmem:[#allocation176_spill] sm:$0xff] }
 0x601   :  { %v19204_v22 = vsel %vm11116_vm5, %v18945_v17, %v23729_v42  ;;  %v11250_v29 = vsel %vm11248_vm9, %v11217_v37, %v23730_v30  ;;  %v11257_v27 = vsel %vm11248_vm9, %v11224_v18, %v23731_v54  ;;  %v23733_v55 = vld [vmem:[#allocation193_spill] sm:$0xff]  ;;  %v23735_v39 = vcombine.high %v23325_v8, %v23326_v12  ;;  %v23738_v46 = vld [vmem:[#allocation76_spill] sm:$0xff]  ;;  %v23741_v54 = vld [vmem:[#allocation42_spill] sm:$0xff] }
 0x602   :  { %v23734_v13 = vcombine.low %v23732_v58, %v23733_v55  ;;  %v11153_v17 = vsel %vm11149_vm6, %v11120_v53, %v23736_v20  ;;  %v11160_v63 = vsel %vm11149_vm6, %v11127_v26, %v23737_v59  ;;  %v11283_v37 = vsel %vm11281_vm10, %v11250_v29, %v23738_v46  ;;  %v23739_v47 = vld [vmem:[#allocation481_spill] sm:$0xff]  ;;  %v23740_v42 = vld [vmem:[#allocation100_spill] sm:$0xff]  ;;  %v10602_v53 = vpop.permute.xlu1 %10601  ;;  %v10616_v26 = vpop.permute.xlu0 %10615 }
 0x603   :  { %10855 = vrot.lane.b32.xlu0 %v23735_v39, %s11600_s3  ;;  %v11290_v18 = vsel %vm11281_vm10, %v11257_v27, %v23739_v47  ;;  %v11186_v30 = vsel %vm11182_vm7, %v11153_v17, %v23740_v42  ;;  %v11316_v8 = vsel %vm11314_vm11, %v11283_v37, %v18404_v2  ;;  %v23742_v39 = vld [vmem:[#allocation284_spill] sm:$0xff]  ;;  %v23743_v20 = vld [vmem:[#allocation285_spill] sm:$0xff] }
 0x604   :  { %10777 = vrot.lane.b32.xlu1 %v23734_v13, %s11599_s2  ;;  %v11193_v13 = vsel %vm11182_vm7, %v11160_v63, %v23741_v54  ;;  %v11323_v12 = vsel %vm11314_vm11, %v11290_v18, %v18406_v19  ;;  %v11219_v29 = vsel %vm11215_vm8, %v11186_v30, %v23742_v39  ;;  %v19239_v59 = vsel %vm11347_vm12, %v11316_v8, %v10602_v53  ;;  %v23744_v63 = vld [vmem:[#allocation91_spill] sm:$0xff]  ;;  %v23745_v19 = vld [vmem:[#allocation398_spill] sm:$0xff]  ;;  %v23746_v37 = vld [vmem:[#allocation472_spill] sm:$0xff] }
 0x605   :  { %v11226_v27 = vsel %vm11215_vm8, %v11193_v13, %v23743_v20  ;;  %v19242_v17 = vsel %vm11347_vm12, %v11323_v12, %v10616_v26  ;;  %v19247_v2 = vsel %vm11116_vm5, %v18961_v60, %v23744_v63  ;;  %v11252_v46 = vsel %vm11248_vm9, %v11219_v29, %v23745_v19  ;;  %v23747_v18 = vld [vmem:[#allocation368_spill] sm:$0xff]  ;;  %v23748_v42 = vld [vmem:[#allocation369_spill] sm:$0xff]  ;;  %v23751_v13 = vld [vmem:[#allocation67_spill] sm:$0xff] }
 0x606   :  { %v11259_v47 = vsel %vm11248_vm9, %v11226_v27, %v23746_v37  ;;  %v23749_v30 = vcombine.low %v23747_v18, %v23748_v42  ;;  %v23750_v54 = vcombine.high %v23329_v7, %v23330_v10  ;;  %v11155_v60 = vsel %vm11149_vm6, %v19090_v48, %v23751_v13  ;;  %v23752_v8 = vld [vmem:[#allocation69_spill] sm:$0xff]  ;;  %v23753_v53 = vld [vmem:[#allocation427_spill] sm:$0xff]  ;;  %v23754_v39 = vld [vmem:[#allocation172_spill] sm:$0xff]  ;;  %v10606_v19 = vpop.permute.xlu1 %10605 }
 0x607   :  { %v11162_v12 = vsel %vm11149_vm6, %v19095_v36, %v23752_v8  ;;  %v11285_v26 = vsel %vm11281_vm10, %v11252_v46, %v23753_v53  ;;  %v11292_v29 = vsel %vm11281_vm10, %v11259_v47, %v23754_v39  ;;  %v23755_v20 = vld [vmem:[#allocation475_spill] sm:$0xff]  ;;  %v23756_v63 = vld [vmem:[#allocation406_spill] sm:$0xff]  ;;  %v10620_v36 = vpop.permute.xlu0 %10619  ;;  %v23757_v37 = vld [vmem:[#allocation401_spill] sm:$0xff] }
 0x608   :  { %10781 = vrot.lane.b32.xlu1 %v23749_v30, %s11599_s2  ;;  %10859 = vrot.lane.b32.xlu0 %v23750_v54, %s11600_s3  ;;  %v11188_v27 = vsel %vm11182_vm7, %v11155_v60, %v23755_v20  ;;  %v11195_v7 = vsel %vm11182_vm7, %v11162_v12, %v23756_v63  ;;  %v11318_v10 = vsel %vm11314_vm11, %v11285_v26, %v18426_v56  ;;  %v23758_v30 = vld [vmem:[#allocation402_spill] sm:$0xff]  ;;  %v23763_v39 = vld [vmem:[#allocation68_spill] sm:$0xff] }
 0x609   :  { %v11325_v48 = vsel %vm11314_vm11, %v11292_v29, %v18428_v6  ;;  %v11221_v46 = vsel %vm11215_vm8, %v11188_v27, %v23757_v37  ;;  %v11228_v47 = vsel %vm11215_vm8, %v11195_v7, %v23758_v30  ;;  %v19284_v54 = vsel %vm11347_vm12, %v11318_v10, %v10606_v19  ;;  %v23759_v60 = vld [vmem:[#allocation106_spill] sm:$0xff]  ;;  %v23760_v6 = vld [vmem:[#allocation240_spill] sm:$0xff]  ;;  %v23766_v27 = vld [vmem:[#allocation205_spill] sm:$0xff] }
 0x60a   :  { %v19287_v13 = vsel %vm11347_vm12, %v11325_v48, %v10620_v36  ;;  %v19292_v56 = vsel %vm11116_vm5, %v18969_v43, %v23759_v60  ;;  %v11254_v8 = vsel %vm11248_vm9, %v11221_v46, %v23760_v6  ;;  %v23761_v12 = vld [vmem:[#allocation214_spill] sm:$0xff]  ;;  %v23765_v20 = vcombine.high %v23369_v33, %v23370_v15  ;;  %v23769_v37 = vld [vmem:[#allocation145_spill] sm:$0xff]  ;;  %v10610_v30 = vpop.permute.xlu1 %10609 }
 0x60b   :  { %v11261_v53 = vsel %vm11248_vm9, %v11228_v47, %v23761_v12  ;;  %v23762_v26 = vld [vmem:[#allocation470_spill] sm:$0xff]  ;;  %v11157_v43 = vsel %vm11149_vm6, %v19105_v49, %v23766_v27  ;;  %v11287_v10 = vsel %vm11281_vm10, %v11254_v8, %v18237_v23  ;;  %v23770_v49 = vld [vmem:[#allocation419_spill] sm:$0xff]  ;;  %v23771_v47 = vld [vmem:[#allocation316_spill] sm:$0xff] }
 0x60c   :  { %v23764_v29 = vcombine.low %v23762_v26, %v23763_v39  ;;  %10863 = vrot.lane.b32.xlu0 %v23765_v20, %s11600_s3  ;;  %v23767_v63 = vld [vmem:[#allocation74_spill] sm:$0xff]  ;;  %v11294_v48 = vsel %vm11281_vm10, %v11261_v53, %v18239_v9  ;;  %v11320_v15 = vsel %vm11314_vm11, %v11287_v10, %v18513_v0  ;;  %v23772_v60 = vld [vmem:[#allocation317_spill] sm:$0xff] }
 0x60d   :  { %v11164_v7 = vsel %vm11149_vm6, %v19110_v35, %v23767_v63  ;;  %v23768_v19 = vld [vmem:[#allocation142_spill] sm:$0xff]  ;;  %v11327_v46 = vsel %vm11314_vm11, %v11294_v48, %v23770_v49  ;;  %v10624_v35 = vpop.permute.xlu0 %10623  ;;  %v19329_v6 = vsel %vm11347_vm12, %v11320_v15, %v10610_v30  ;;  %v23773_v12 = vld [vmem:[#allocation105_spill] sm:$0xff]  ;;  %v23777_v63 = vld [vmem:[#allocation159_spill] sm:$0xff] }
 0x60e   :  { %10785 = vrot.lane.b32.xlu1 %v23764_v29, %s11599_s2  ;;  %v11190_v36 = vsel %vm11182_vm7, %v11157_v43, %v23768_v19  ;;  %v11197_v33 = vsel %vm11182_vm7, %v11164_v7, %v23769_v37  ;;  %v19332_v8 = vsel %vm11347_vm12, %v11327_v46, %v10624_v35  ;;  %v19337_v0 = vsel %vm11116_vm5, %v18979_v31, %v23773_v12  ;;  %v23774_v53 = vld [vmem:[#allocation154_spill] sm:$0xff]  ;;  %v23775_v20 = vld [vmem:[#allocation117_spill] sm:$0xff]  ;;  %v23785_v46 = vld [vmem:[#allocation275_spill] sm:$0xff] }
 0x60f   :  { %v11223_v23 = vsel %vm11215_vm8, %v11190_v36, %v23771_v47  ;;  %v11230_v9 = vsel %vm11215_vm8, %v11197_v33, %v23772_v60  ;;  %v23776_v43 = vld [vmem:[#allocation161_spill] sm:$0xff]  ;;  %v23780_v48 = vld [vmem:[#allocation290_spill] sm:$0xff]  ;;  %v23786_v35 = vld [vmem:[#allocation179_spill] sm:$0xff] }
 0x610   :  { %v11256_v29 = vsel %vm11248_vm9, %v11223_v23, %v23774_v53  ;;  %v11263_v27 = vsel %vm11248_vm9, %v11230_v9, %v23775_v20  ;;  %v23778_v7 = vcombine.low %v23776_v43, %v23777_v63  ;;  %v23779_v10 = vld [vmem:[#allocation289_spill] sm:$0xff]  ;;  %v23783_v37 = vld [vmem:[#allocation102_spill] sm:$0xff]  ;;  %v23787_v23 = vld [vmem:[#allocation180_spill] sm:$0xff]  ;;  %v10614_v20 = vpop.permute.xlu1 %10613 }
 0x611   :  { %v23781_v19 = vcombine.high %v23779_v10, %v23780_v48  ;;  %v23782_v36 = vld [vmem:[#allocation93_spill] sm:$0xff]  ;;  %v11166_v33 = vsel %vm11149_vm6, %v19136_v34, %v23783_v37  ;;  %v23784_v15 = vld [vmem:[#allocation274_spill] sm:$0xff]  ;;  %v11296_v30 = vsel %vm11281_vm10, %v11263_v27, %v23785_v46  ;;  %v10628_v34 = vpop.permute.xlu0 %10627  ;;  %v23793_v37 = vld [vmem:[#allocation175_spill] sm:$0xff] }
 0x612   :  { %10789 = vrot.lane.b32.xlu1 %v23778_v7, %s11599_s2  ;;  %v11159_v31 = vsel %vm11149_vm6, %v19125_v44, %v23782_v36  ;;  %v11289_v49 = vsel %vm11281_vm10, %v11256_v29, %v23784_v15  ;;  %v11199_v60 = vsel %vm11182_vm7, %v11166_v33, %v23787_v23  ;;  %v23788_v9 = vld [vmem:[#allocation221_spill] sm:$0xff]  ;;  %v23789_v44 = vld [vmem:[#allocation462_spill] sm:$0xff]  ;;  %v23792_v36 = vld [vmem:[#allocation127_spill] sm:$0xff] }
 0x613   :  { %10867 = vrot.lane.b32.xlu0 %v23781_v19, %s11600_s3  ;;  %v11192_v47 = vsel %vm11182_vm7, %v11159_v31, %v23786_v35  ;;  %v11322_v12 = vsel %vm11314_vm11, %v11289_v49, %v23788_v9  ;;  %v11329_v53 = vsel %vm11314_vm11, %v11296_v30, %v23789_v44  ;;  %v23790_v7 = vld [vmem:[#allocation433_spill] sm:$0xff]  ;;  %v23791_v10 = vld [vmem:[#allocation434_spill] sm:$0xff]  ;;  %v19382_v31 = vsel %vm11116_vm5, %v18983_v28, %v23792_v36  ;;  %v23794_v15 = vld [vmem:[#allocation156_spill] sm:$0xff] }
 0x614   :  { %v11225_v29 = vsel %vm11215_vm8, %v11192_v47, %v23790_v7  ;;  %v11232_v27 = vsel %vm11215_vm8, %v11199_v60, %v23791_v10  ;;  %v19374_v48 = vsel %vm11347_vm12, %v11322_v12, %v10614_v20  ;;  %v19377_v19 = vsel %vm11347_vm12, %v11329_v53, %v10628_v34  ;;  %v23795_v46 = vld [vmem:[#allocation162_spill] sm:$0xff]  ;;  %v23798_v47 = vld [vmem:[#allocation431_spill] sm:$0xff]  ;;  %v23801_v9 = vld [vmem:[#allocation229_spill] sm:$0xff] }
 0x615   :  { %v11258_v33 = vsel %vm11248_vm9, %v11225_v29, %v23793_v37  ;;  %v11265_v49 = vsel %vm11248_vm9, %v11232_v27, %v23794_v15  ;;  %v23796_v30 = vld [vmem:[#allocation174_spill] sm:$0xff]  ;;  %v23799_v23 = vld [vmem:[#allocation435_spill] sm:$0xff]  ;;  %v11161_v28 = vsel %vm11149_vm6, %v19149_v14, %v23801_v9  ;;  %v23802_v12 = vld [vmem:[#allocation120_spill] sm:$0xff] }
 0x616   :  { %v23797_v35 = vcombine.high %v23795_v46, %v23796_v30  ;;  %v23800_v60 = vcombine.high %v23798_v47, %v23799_v23  ;;  %v11168_v44 = vsel %vm11149_vm6, %v19161_v4, %v23802_v12  ;;  %v23803_v53 = vld [vmem:[#allocation454_spill] sm:$0xff]  ;;  %v23804_v34 = vld [vmem:[#allocation453_spill] sm:$0xff]  ;;  %v23806_v27 = vld [vmem:[#allocation207_spill] sm:$0xff]  ;;  %v10618_v30 = vpop.permute.xlu1 %10617  ;;  %v10632_v4 = vpop.permute.xlu0 %10631 }
 0x617   :  { %v11291_v20 = vsel %vm11281_vm10, %v11258_v33, %v23803_v53  ;;  %v11298_v7 = vsel %vm11281_vm10, %v11265_v49, %v23804_v34  ;;  %v23805_v29 = vld [vmem:[#allocation206_spill] sm:$0xff]  ;;  %v11201_v36 = vsel %vm11182_vm7, %v11168_v44, %v23806_v27  ;;  %v23807_v37 = vld [vmem:[#allocation11_spill] sm:$0xff]  ;;  %v23811_v9 = vld [vmem:[#allocation125_spill] sm:$0xff] }
 0x618   :  { %10857 = vrot.lane.b32.xlu1 %v23797_v35, %s11600_s3  ;;  %10871 = vrot.lane.b32.xlu0 %v23800_v60, %s11600_s3  ;;  %v11194_v10 = vsel %vm11182_vm7, %v11161_v28, %v23805_v29  ;;  %v11324_v15 = vsel %vm11314_vm11, %v11291_v20, %v23807_v37  ;;  %v23808_v14 = vld [vmem:[#allocation135_spill] sm:$0xff]  ;;  %v23809_v35 = vld [vmem:[#allocation353_spill] sm:$0xff]  ;;  %v23810_v47 = vld [vmem:[#allocation354_spill] sm:$0xff]  ;;  %v11141_v28 = vsel %vm11116_vm5, %v18992_v45, %v23811_v9 }
 0x619   :  { %v11331_v46 = vsel %vm11314_vm11, %v11298_v7, %v23808_v14  ;;  %v11227_v33 = vsel %vm11215_vm8, %v11194_v10, %v23809_v35  ;;  %v11234_v49 = vsel %vm11215_vm8, %v11201_v36, %v23810_v47  ;;  %v19419_v23 = vsel %vm11347_vm12, %v11324_v15, %v10618_v30  ;;  %v23812_v12 = vld [vmem:[#allocation336_spill] sm:$0xff]  ;;  %v23815_v7 = vld [vmem:[#allocation438_spill] sm:$0xff]  ;;  %v23817_v10 = vld [vmem:[#allocation455_spill] sm:$0xff] }
 0x61a   :  { %v19422_v60 = vsel %vm11347_vm12, %v11331_v46, %v10632_v4  ;;  %v11260_v44 = vsel %vm11248_vm9, %v11227_v33, %v23812_v12  ;;  %v23813_v53 = vld [vmem:[#allocation204_spill] sm:$0xff]  ;;  %v23818_v27 = vcombine.high %v23502_v16, %v23817_v10  ;;  %v23819_v36 = vld [vmem:[#allocation358_spill] sm:$0xff]  ;;  %v23820_v37 = vld [vmem:[#allocation357_spill] sm:$0xff] }
 0x61b   :  { %v11267_v20 = vsel %vm11248_vm9, %v11234_v49, %v23813_v53  ;;  %v23814_v34 = vld [vmem:[#allocation192_spill] sm:$0xff]  ;;  %v11163_v45 = vsel %vm11149_vm6, %v19204_v22, %v23819_v36  ;;  %v11170_v15 = vsel %vm11149_vm6, %v19247_v2, %v23820_v37  ;;  %v23821_v14 = vld [vmem:[#allocation439_spill] sm:$0xff]  ;;  %v23822_v30 = vld [vmem:[#allocation322_spill] sm:$0xff]  ;;  %v10622_v53 = vpop.permute.xlu1 %10621  ;;  %v10636_v2 = vpop.permute.xlu0 %10635 }
 0x61c   :  { %v23816_v29 = vcombine.high %v23814_v34, %v23815_v7  ;;  %10875 = vrot.lane.b32.xlu0 %v23818_v27, %s11600_s3  ;;  %v11293_v46 = vsel %vm11281_vm10, %v11260_v44, %v23821_v14  ;;  %v11300_v4 = vsel %vm11281_vm10, %v11267_v20, %v23822_v30  ;;  %v23823_v35 = vld [vmem:[#allocation228_spill] sm:$0xff]  ;;  %v23824_v47 = vld [vmem:[#allocation230_spill] sm:$0xff]  ;;  %v23825_v49 = vld [vmem:[#allocation469_spill] sm:$0xff] }
 0x61d   :  { %v11196_v33 = vsel %vm11182_vm7, %v11163_v45, %v23823_v35  ;;  %v11203_v16 = vsel %vm11182_vm7, %v11170_v15, %v23824_v47  ;;  %v11326_v9 = vsel %vm11314_vm11, %v11293_v46, %v23825_v49  ;;  %v23826_v22 = vld [vmem:[#allocation468_spill] sm:$0xff]  ;;  %v23827_v34 = vld [vmem:[#allocation459_spill] sm:$0xff]  ;;  %v23830_v45 = vld [vmem:[#allocation338_spill] sm:$0xff] }
 0x61e   :  { %10861 = vrot.lane.b32.xlu1 %v23816_v29, %s11600_s3  ;;  %v11333_v12 = vsel %vm11314_vm11, %v11300_v4, %v23826_v22  ;;  %v11229_v44 = vsel %vm11215_vm8, %v11196_v33, %v23827_v34  ;;  %v23828_v7 = vld [vmem:[#allocation460_spill] sm:$0xff]  ;;  %v19462_v29 = vsel %vm11347_vm12, %v11326_v9, %v10622_v53  ;;  %v23831_v15 = vld [vmem:[#allocation337_spill] sm:$0xff]  ;;  %v23836_v33 = vld [vmem:[#allocation478_spill] sm:$0xff] }
 0x61f   :  { %v11236_v20 = vsel %vm11215_vm8, %v11203_v16, %v23828_v7  ;;  %v19465_v10 = vsel %vm11347_vm12, %v11333_v12, %v10636_v2  ;;  %v23829_v27 = vld [vmem:[#allocation108_spill] sm:$0xff]  ;;  %v11262_v37 = vsel %vm11248_vm9, %v11229_v44, %v23830_v45  ;;  %v23832_v46 = vld [vmem:[#allocation73_spill] sm:$0xff] }
 0x620   :  { %v11136_v36 = vsel %vm11116_vm5, %v19009_v50, %v23829_v27  ;;  %v11269_v14 = vsel %vm11248_vm9, %v11236_v20, %v23831_v15  ;;  %v23833_v30 = vld [vmem:[#allocation77_spill] sm:$0xff]  ;;  %v23841_v53 = vld [vmem:[#allocation476_spill] sm:$0xff]  ;;  %v23844_v27 = vld [vmem:[#allocation63_spill] sm:$0xff] }
 0x621   :  { %v23834_v4 = vcombine.high %v23832_v46, %v23833_v30  ;;  %v23835_v35 = vld [vmem:[#allocation9_spill] sm:$0xff]  ;;  %v11302_v2 = vsel %vm11281_vm10, %v11269_v14, %v23841_v53  ;;  %v23842_v34 = vld [vmem:[#allocation232_spill] sm:$0xff]  ;;  %v10626_v46 = vpop.permute.xlu1 %10625  ;;  %v23846_v30 = vld [vmem:[#allocation383_spill] sm:$0xff] }
 0x622   :  { %v23837_v47 = vcombine.high %v23835_v35, %v23836_v33  ;;  %v23838_v16 = vld [vmem:[#allocation57_spill] sm:$0xff]  ;;  %v23852_v53 = vld [vmem:[#allocation466_spill] sm:$0xff] }
 0x623   :  { %10865 = vrot.lane.b32.xlu1 %v23834_v4, %s11600_s3  ;;  %v11165_v50 = vsel %vm11149_vm6, %v19292_v56, %v23838_v16  ;;  %v23839_v49 = vld [vmem:[#allocation65_spill] sm:$0xff]  ;;  %v23845_v56 = vld [vmem:[#allocation66_spill] sm:$0xff]  ;;  %v23847_v4 = vld [vmem:[#allocation384_spill] sm:$0xff] }
 0x624   :  { %10879 = vrot.lane.b32.xlu0 %v23837_v47, %s11600_s3  ;;  %v11172_v9 = vsel %vm11149_vm6, %v19337_v0, %v23839_v49  ;;  %v23840_v22 = vld [vmem:[#allocation477_spill] sm:$0xff]  ;;  %v11198_v44 = vsel %vm11182_vm7, %v11165_v50, %v23842_v34  ;;  %v11335_v15 = vsel %vm11314_vm11, %v11302_v2, %v23845_v56  ;;  %v10640_v0 = vpop.permute.xlu0 %10639  ;;  %v23848_v47 = vld [vmem:[#allocation107_spill] sm:$0xff]  ;;  %v23849_v50 = vld [vmem:[#allocation340_spill] sm:$0xff] }
 0x625   :  { %v11295_v12 = vsel %vm11281_vm10, %v11262_v37, %v23840_v22  ;;  %v23843_v7 = vld [vmem:[#allocation233_spill] sm:$0xff]  ;;  %v11231_v37 = vsel %vm11215_vm8, %v11198_v44, %v23846_v30  ;;  %v19508_v33 = vsel %vm11347_vm12, %v11335_v15, %v10640_v0  ;;  %v11143_v16 = vsel %vm11116_vm5, %v19014_v3, %v23848_v47  ;;  %v23854_v34 = vld [vmem:[#allocation36_spill] sm:$0xff]  ;;  %v23855_v44 = vld [vmem:[#allocation186_spill] sm:$0xff] }
 0x626   :  { %v11205_v20 = vsel %vm11182_vm7, %v11172_v9, %v23843_v7  ;;  %v11328_v45 = vsel %vm11314_vm11, %v11295_v12, %v23844_v27  ;;  %v11264_v49 = vsel %vm11248_vm9, %v11231_v37, %v23849_v50  ;;  %v23850_v9 = vld [vmem:[#allocation339_spill] sm:$0xff]  ;;  %v23851_v12 = vld [vmem:[#allocation465_spill] sm:$0xff]  ;;  %v23856_v7 = vcombine.high %v23854_v34, %v23855_v44  ;;  %v23858_v27 = vld [vmem:[#allocation160_spill] sm:$0xff] }
 0x627   :  { %v11238_v14 = vsel %vm11215_vm8, %v11205_v20, %v23847_v4  ;;  %v19505_v35 = vsel %vm11347_vm12, %v11328_v45, %v10626_v46  ;;  %v23853_v2 = vcombine.high %v23851_v12, %v23852_v53  ;;  %v23857_v20 = vld [vmem:[#allocation158_spill] sm:$0xff]  ;;  %v11174_v45 = vsel %vm11149_vm6, %v11141_v28, %v23858_v27  ;;  %v23859_v56 = vld [vmem:[#allocation279_spill] sm:$0xff]  ;;  %v23861_v30 = vld [vmem:[#allocation245_spill] sm:$0xff]  ;;  %v10630_v12 = vpop.permute.xlu1 %10629 }
 0x628   :  { %v11271_v22 = vsel %vm11248_vm9, %v11238_v14, %v23850_v9  ;;  %10883 = vrot.lane.b32.xlu0 %v23856_v7, %s11600_s3  ;;  %v11167_v3 = vsel %vm11149_vm6, %v19382_v31, %v23857_v20  ;;  %v11297_v15 = vsel %vm11281_vm10, %v11264_v49, %v23859_v56  ;;  %v23860_v46 = vld [vmem:[#allocation231_spill] sm:$0xff]  ;;  %v23862_v4 = vld [vmem:[#allocation246_spill] sm:$0xff]  ;;  %v23864_v9 = vld [vmem:[#allocation137_spill] sm:$0xff]  ;;  %v10644_v28 = vpop.permute.xlu0 %10643 }
 0x629   :  { %10869 = vrot.lane.b32.xlu1 %v23853_v2, %s11600_s3  ;;  %v11304_v0 = vsel %vm11281_vm10, %v11271_v22, %v23860_v46  ;;  %v11200_v37 = vsel %vm11182_vm7, %v11167_v3, %v23861_v30  ;;  %v11207_v14 = vsel %vm11182_vm7, %v11174_v45, %v23862_v4  ;;  %v23863_v47 = vld [vmem:[#allocation399_spill] sm:$0xff]  ;;  %v23865_v53 = vld [vmem:[#allocation482_spill] sm:$0xff]  ;;  %v23868_v3 = vld [vmem:[#allocation377_spill] sm:$0xff] }
 0x62a   :  { %v11330_v50 = vsel %vm11314_vm11, %v11297_v15, %v23863_v47  ;;  %v11337_v31 = vsel %vm11314_vm11, %v11304_v0, %v23864_v9  ;;  %v11233_v49 = vsel %vm11215_vm8, %v11200_v37, %v23865_v53  ;;  %v23866_v2 = vld [vmem:[#allocation79_spill] sm:$0xff]  ;;  %v23869_v45 = vld [vmem:[#allocation376_spill] sm:$0xff]  ;;  %v23873_v30 = vld [vmem:[#allocation442_spill] sm:$0xff] }
 0x62b   :  { %v11240_v22 = vsel %vm11215_vm8, %v11207_v14, %v23866_v2  ;;  %v19547_v34 = vsel %vm11347_vm12, %v11330_v50, %v10630_v12  ;;  %v19550_v44 = vsel %vm11347_vm12, %v11337_v31, %v10644_v28  ;;  %v23867_v7 = vld [vmem:[#allocation111_spill] sm:$0xff]  ;;  %v11266_v27 = vsel %vm11248_vm9, %v11233_v49, %v23868_v3  ;;  %v23871_v46 = vld [vmem:[#allocation48_spill] sm:$0xff]  ;;  %v23878_v9 = vld [vmem:[#allocation150_spill] sm:$0xff] }
 0x62c   :  { %v11138_v20 = vsel %vm11116_vm5, %v19023_v40, %v23867_v7  ;;  %v11273_v56 = vsel %vm11248_vm9, %v11240_v22, %v23869_v45  ;;  %v23870_v15 = vld [vmem:[#allocation27_spill] sm:$0xff]  ;;  %v23874_v37 = vld [vmem:[#allocation444_spill] sm:$0xff]  ;;  %v23877_v40 = vld [vmem:[#allocation90_spill] sm:$0xff]  ;;  %v11299_v31 = vsel %vm11281_vm10, %v11266_v27, %v23878_v9  ;;  %v10634_v45 = vpop.permute.xlu1 %10633 }
 0x62d   :  { %v23872_v0 = vcombine.high %v23870_v15, %v23871_v46  ;;  %v23875_v4 = vcombine.high %v23873_v30, %v23874_v37  ;;  %v23876_v14 = vld [vmem:[#allocation87_spill] sm:$0xff]  ;;  %v11176_v50 = vsel %vm11149_vm6, %v11143_v16, %v23877_v40  ;;  %v23879_v12 = vld [vmem:[#allocation13_spill] sm:$0xff]  ;;  %v23880_v53 = vld [vmem:[#allocation250_spill] sm:$0xff]  ;;  %v11332_v7 = vsel %vm11314_vm11, %v11299_v31, %v18811_v25  ;;  %v10648_v16 = vpop.permute.xlu0 %10647 }
 0x62e   :  { %v11169_v47 = vsel %vm11149_vm6, %v11136_v36, %v23876_v14  ;;  %v11306_v28 = vsel %vm11281_vm10, %v11273_v56, %v23879_v12  ;;  %v23881_v2 = vld [vmem:[#allocation252_spill] sm:$0xff]  ;;  %v23882_v3 = vld [vmem:[#allocation258_spill] sm:$0xff]  ;;  %v23883_v15 = vld [vmem:[#allocation423_spill] sm:$0xff] }
 0x62f   :  { %10873 = vrot.lane.b32.xlu1 %v23872_v0, %s11600_s3  ;;  %10887 = vrot.lane.b32.xlu0 %v23875_v4, %s11600_s3  ;;  %v11202_v49 = vsel %vm11182_vm7, %v11169_v47, %v23880_v53  ;;  %v11209_v22 = vsel %vm11182_vm7, %v11176_v50, %v23881_v2  ;;  %v11339_v36 = vsel %vm11314_vm11, %v11306_v28, %v23882_v3  ;;  %v23884_v46 = vld [vmem:[#allocation424_spill] sm:$0xff]  ;;  %v23885_v37 = vld [vmem:[#allocation110_spill] sm:$0xff]  ;;  %v23887_v47 = vld [vmem:[#allocation341_spill] sm:$0xff] }
 0x630   :  { %v11235_v27 = vsel %vm11215_vm8, %v11202_v49, %v23883_v15  ;;  %v11242_v56 = vsel %vm11215_vm8, %v11209_v22, %v23884_v46  ;;  %v19588_v0 = vsel %vm11347_vm12, %v11332_v7, %v10634_v45  ;;  %v19591_v30 = vsel %vm11347_vm12, %v11339_v36, %v10648_v16  ;;  %v23886_v4 = vld [vmem:[#allocation342_spill] sm:$0xff]  ;;  %v23888_v50 = vld [vmem:[#allocation485_spill] sm:$0xff]  ;;  %v23890_v31 = vld [vmem:[#allocation492_spill] sm:$0xff] }
 0x631   :  { %v11145_v25 = vsel %vm11116_vm5, %v19028_v57, %v23885_v37  ;;  %v11268_v14 = vsel %vm11248_vm9, %v11235_v27, %v23886_v4  ;;  %v11275_v40 = vsel %vm11248_vm9, %v11242_v56, %v23887_v47  ;;  %v23889_v9 = vcombine.high %v23591_v5, %v23888_v50  ;;  %v23891_v12 = vld [vmem:[#allocation493_spill] sm:$0xff]  ;;  %v23893_v53 = vld [vmem:[#allocation426_spill] sm:$0xff]  ;;  %v23894_v57 = vld [vmem:[#allocation163_spill] sm:$0xff]  ;;  %v10638_v37 = vpop.permute.xlu1 %10637 }
 0x632   :  { %v23892_v28 = vcombine.high %v23890_v31, %v23891_v12  ;;  %v11171_v49 = vsel %vm11149_vm6, %v11138_v20, %v23893_v53  ;;  %v11178_v2 = vsel %vm11149_vm6, %v11145_v25, %v23894_v57  ;;  %v23895_v22 = vld [vmem:[#allocation365_spill] sm:$0xff]  ;;  %v23896_v3 = vld [vmem:[#allocation112_spill] sm:$0xff]  ;;  %v23897_v45 = vld [vmem:[#allocation267_spill] sm:$0xff]  ;;  %v10652_v25 = vpop.permute.xlu0 %10651 }
 0x633   :  { %10877 = vrot.lane.b32.xlu1 %v23889_v9, %s11600_s3  ;;  %v11301_v7 = vsel %vm11281_vm10, %v11268_v14, %v23895_v22  ;;  %v11308_v36 = vsel %vm11281_vm10, %v11275_v40, %v23896_v3  ;;  %v11204_v5 = vsel %vm11182_vm7, %v11171_v49, %v23897_v45  ;;  %v23898_v16 = vld [vmem:[#allocation268_spill] sm:$0xff]  ;;  %v23900_v56 = vld [vmem:[#allocation139_spill] sm:$0xff]  ;;  %v23901_v4 = vld [vmem:[#allocation209_spill] sm:$0xff] }
 0x634   :  { %10891 = vrot.lane.b32.xlu0 %v23892_v28, %s11600_s3  ;;  %v11211_v15 = vsel %vm11182_vm7, %v11178_v2, %v23898_v16  ;;  %v23899_v27 = vld [vmem:[#allocation256_spill] sm:$0xff]  ;;  %v11341_v20 = vsel %vm11314_vm11, %v11308_v36, %v23900_v56  ;;  %v11237_v14 = vsel %vm11215_vm8, %v11204_v5, %v23901_v4  ;;  %v23902_v47 = vld [vmem:[#allocation97_spill] sm:$0xff]  ;;  %v23903_v31 = vld [vmem:[#allocation194_spill] sm:$0xff] }
 0x635   :  { %v11334_v46 = vsel %vm11314_vm11, %v11301_v7, %v23899_v27  ;;  %v11244_v40 = vsel %vm11215_vm8, %v11211_v15, %v23902_v47  ;;  %v19632_v9 = vsel %vm11347_vm12, %v11341_v20, %v10652_v25  ;;  %v11140_v12 = vsel %vm11116_vm5, %v19039_v1, %v23903_v31  ;;  %v23904_v28 = vld [vmem:[#allocation408_spill] sm:$0xff]  ;;  %v23905_v49 = vld [vmem:[#allocation407_spill] sm:$0xff]  ;;  %v23909_v3 = vld [vmem:[#allocation121_spill] sm:$0xff] }
 0x636   :  { %v19629_v50 = vsel %vm11347_vm12, %v11334_v46, %v10638_v37  ;;  %v11270_v53 = vsel %vm11248_vm9, %v11237_v14, %v23904_v28  ;;  %v11277_v57 = vsel %vm11248_vm9, %v11244_v40, %v23905_v49  ;;  %v23906_v2 = vld [vmem:[#allocation247_spill] sm:$0xff]  ;;  %v23907_v22 = vld [vmem:[#allocation236_spill] sm:$0xff]  ;;  %v23910_v36 = vld [vmem:[#allocation361_spill] sm:$0xff] }
 0x637   :  { %v23908_v7 = vcombine.high %v23906_v2, %v23907_v22  ;;  %v23911_v45 = vcombine.high %v23909_v3, %v23910_v36  ;;  %v23912_v5 = vld [vmem:[#allocation282_spill] sm:$0xff]  ;;  %v23913_v16 = vld [vmem:[#allocation227_spill] sm:$0xff]  ;;  %v23914_v15 = vld [vmem:[#allocation104_spill] sm:$0xff]  ;;  %v10642_v2 = vpop.permute.xlu1 %10641 }
 0x638   :  { %v11043_v1 = vsel %vm11017_vm2, %v23913_v16, %v23912_v5  ;;  %v11173_v27 = vsel %vm11149_vm6, %v11140_v12, %v23914_v15  ;;  %v23915_v46 = vld [vmem:[#allocation264_spill] sm:$0xff]  ;;  %v23917_v25 = vld [vmem:[#allocation103_spill] sm:$0xff]  ;;  %v23918_v14 = vld [vmem:[#allocation254_spill] sm:$0xff]  ;;  %v10656_v12 = vpop.permute.xlu0 %10655 }
 0x639   :  { %10881 = vrot.lane.b32.xlu1 %v23908_v7, %s11600_s3  ;;  %10895 = vrot.lane.b32.xlu0 %v23911_v45, %s11600_s3  ;;  %v11303_v56 = vsel %vm11281_vm10, %v11270_v53, %v23915_v46  ;;  %v23916_v20 = vld [vmem:[#allocation260_spill] sm:$0xff]  ;;  %v11076_v4 = vsel %vm11050_vm3, %v11043_v1, %v23917_v25  ;;  %v11206_v47 = vsel %vm11182_vm7, %v11173_v27, %v23918_v14  ;;  %v23919_v40 = vld [vmem:[#allocation390_spill] sm:$0xff]  ;;  %v23920_v28 = vld [vmem:[#allocation391_spill] sm:$0xff] }
 0x63a   :  { %v11310_v37 = vsel %vm11281_vm10, %v11277_v57, %v23916_v20  ;;  %v11336_v31 = vsel %vm11314_vm11, %v11303_v56, %v23919_v40  ;;  %v23921_v22 = vld [vmem:[#allocation304_spill] sm:$0xff]  ;;  %v23922_v7 = vld [vmem:[#allocation449_spill] sm:$0xff]  ;;  %v23924_v5 = vld [vmem:[#allocation219_spill] sm:$0xff] }
 0x63b   :  { %v11343_v49 = vsel %vm11314_vm11, %v11310_v37, %v23920_v28  ;;  %v11109_v53 = vsel %vm11083_vm4, %v11076_v4, %v23921_v22  ;;  %v11239_v57 = vsel %vm11215_vm8, %v11206_v47, %v23922_v7  ;;  %v19671_v3 = vsel %vm11347_vm12, %v11336_v31, %v10642_v2  ;;  %v23923_v45 = vld [vmem:[#allocation212_spill] sm:$0xff]  ;;  %v23925_v1 = vld [vmem:[#allocation129_spill] sm:$0xff]  ;;  %v23930_v25 = vld [vmem:[#allocation19_spill] sm:$0xff] }
 0x63c   :  { %v19674_v36 = vsel %vm11347_vm12, %v11343_v49, %v10656_v12  ;;  %v11012_v16 = vsel %vm10984_vm1, %v23924_v5, %v23923_v45  ;;  %v11142_v15 = vsel %vm11116_vm5, %v11109_v53, %v23925_v1  ;;  %v23926_v27 = vld [vmem:[#allocation360_spill] sm:$0xff]  ;;  %v23927_v56 = vld [vmem:[#allocation413_spill] sm:$0xff]  ;;  %v23931_v4 = vcombine.high %v23638_v62, %v23930_v25  ;;  %v23933_v40 = vld [vmem:[#allocation203_spill] sm:$0xff] }
 0x63d   :  { %v11272_v46 = vsel %vm11248_vm9, %v11239_v57, %v23926_v27  ;;  %v23928_v20 = vld [vmem:[#allocation488_spill] sm:$0xff]  ;;  %v23932_v14 = vld [vmem:[#allocation201_spill] sm:$0xff]  ;;  %v11175_v31 = vsel %vm11149_vm6, %v11142_v15, %v23933_v40  ;;  %v23936_v12 = vld [vmem:[#allocation215_spill] sm:$0xff]  ;;  %v10646_v27 = vpop.permute.xlu1 %10645  ;;  %v10660_v15 = vpop.permute.xlu0 %10659 }
 0x63e   :  { %v23929_v37 = vcombine.high %v23927_v56, %v23928_v20  ;;  %10899 = vrot.lane.b32.xlu0 %v23931_v4, %s11600_s3  ;;  %v11045_v47 = vsel %vm11017_vm2, %v11012_v16, %v23932_v14  ;;  %v23934_v28 = vld [vmem:[#allocation152_spill] sm:$0xff]  ;;  %v23937_v22 = vld [vmem:[#allocation46_spill] sm:$0xff]  ;;  %v23939_v57 = vld [vmem:[#allocation217_spill] sm:$0xff]  ;;  %v19717_v4 = vsel %vm11347_vm12, %v18988_v61, %v10660_v15 }
 0x63f   :  { %v11305_v49 = vsel %vm11281_vm10, %v11272_v46, %v23934_v28  ;;  %v23935_v2 = vld [vmem:[#allocation348_spill] sm:$0xff]  ;;  %v23938_v53 = vcombine.low %v23936_v12, %v23937_v22  ;;  %v11078_v45 = vsel %vm11050_vm3, %v11045_v47, %v23939_v57  ;;  %v23940_v62 = vld [vmem:[#allocation299_spill] sm:$0xff]  ;;  %v23943_v20 = vld [vmem:[#allocation305_spill] sm:$0xff] }
 0x640   :  { %10885 = vrot.lane.b32.xlu1 %v23929_v37, %s11600_s3  ;;  %v11208_v5 = vsel %vm11182_vm7, %v11175_v31, %v23940_v62  ;;  %v23941_v1 = vld [vmem:[#allocation15_spill] sm:$0xff]  ;;  %v23942_v56 = vld [vmem:[#allocation480_spill] sm:$0xff]  ;;  %v23944_v14 = vld [vmem:[#allocation242_spill] sm:$0xff] }
 0x641   :  { %v10981_v7 = vsel %vm10951_vm0, %v23938_v53, %v23935_v2  ;;  %v11338_v16 = vsel %vm11314_vm11, %v11305_v49, %v23941_v1  ;;  %v11111_v46 = vsel %vm11083_vm4, %v11078_v45, %v23942_v56  ;;  %v11241_v37 = vsel %vm11215_vm8, %v11208_v5, %v23943_v20  ;;  %v23945_v40 = vld [vmem:[#allocation81_spill] sm:$0xff]  ;;  %v23946_v28 = vld [vmem:[#allocation32_spill] sm:$0xff]  ;;  %v23947_v2 = vld [vmem:[#allocation490_spill] sm:$0xff]  ;;  %v10650_v20 = vpop.permute.xlu1 %10649 }
 0x642   :  { %v19713_v25 = vsel %vm11347_vm12, %v11338_v16, %v10646_v27  ;;  %v11014_v47 = vsel %vm10984_vm1, %v10981_v7, %v23944_v14  ;;  %v11144_v31 = vsel %vm11116_vm5, %v11111_v46, %v23945_v40  ;;  %v11274_v49 = vsel %vm11248_vm9, %v11241_v37, %v23946_v28  ;;  %v23949_v22 = vld [vmem:[#allocation411_spill] sm:$0xff]  ;;  %v23950_v53 = vld [vmem:[#allocation409_spill] sm:$0xff]  ;;  %v23952_v61 = vld [vmem:[#allocation314_spill] sm:$0xff]  ;;  %v10728_v37 = vpop.permute.xlu0 %10727 }
 0x643   :  { %v23948_v12 = vcombine.high %v23653_v52, %v23947_v2  ;;  %v23951_v57 = vcombine.high %v23949_v22, %v23950_v53  ;;  %v11047_v45 = vsel %vm11017_vm2, %v11014_v47, %v23952_v61  ;;  %v23953_v7 = vld [vmem:[#allocation373_spill] sm:$0xff]  ;;  %v23954_v5 = vld [vmem:[#allocation39_spill] sm:$0xff]  ;;  %v23955_v16 = vld [vmem:[#allocation114_spill] sm:$0xff] }
 0x644   :  { %v11177_v62 = vsel %vm11149_vm6, %v11144_v31, %v23953_v7  ;;  %v11307_v1 = vsel %vm11281_vm10, %v11274_v49, %v23954_v5  ;;  %v11080_v27 = vsel %vm11050_vm3, %v11047_v45, %v23955_v16  ;;  %v23956_v15 = vld [vmem:[#allocation269_spill] sm:$0xff]  ;;  %v23957_v56 = vld [vmem:[#allocation10_spill] sm:$0xff]  ;;  %v23959_v40 = vld [vmem:[#allocation471_spill] sm:$0xff] }
 0x645   :  { %10889 = vrot.lane.b32.xlu1 %v23948_v12, %s11600_s3  ;;  %10903 = vrot.lane.b32.xlu0 %v23951_v57, %s11600_s3  ;;  %v11210_v52 = vsel %vm11182_vm7, %v11177_v62, %v23956_v15  ;;  %v11340_v46 = vsel %vm11314_vm11, %v11307_v1, %v23957_v56  ;;  %v23958_v14 = vld [vmem:[#allocation262_spill] sm:$0xff]  ;;  %v23961_v49 = vld [vmem:[#allocation144_spill] sm:$0xff]  ;;  %v23962_v12 = vld [vmem:[#allocation363_spill] sm:$0xff]  ;;  %v10654_v56 = vpop.permute.xlu1 %10653 }
 0x646   :  { %v11113_v47 = vsel %vm11083_vm4, %v11080_v27, %v23958_v14  ;;  %v11243_v31 = vsel %vm11215_vm8, %v11210_v52, %v23959_v40  ;;  %v19750_v28 = vsel %vm11347_vm12, %v11340_v46, %v10650_v20  ;;  %v23963_v53 = vld [vmem:[#allocation165_spill] sm:$0xff]  ;;  %v23965_v61 = vld [vmem:[#allocation496_spill] sm:$0xff]  ;;  %v23969_v1 = vld [vmem:[#allocation491_spill] sm:$0xff] }
 0x647   :  { %23960 = vst [vmem:[#allocation38_spill] sm:$0xff] %v19750_v28  ;;  %v11146_v2 = vsel %vm11116_vm5, %v11113_v47, %v23961_v49  ;;  %v11276_v22 = vsel %vm11248_vm9, %v11243_v31, %v23962_v12  ;;  %v23964_v57 = vcombine.high %v23674_v21, %v23963_v53  ;;  %v23966_v45 = vld [vmem:[#allocation497_spill] sm:$0xff]  ;;  %v23970_v27 = vld [vmem:[#allocation332_spill] sm:$0xff]  ;;  %v10732_v21 = vpop.permute.xlu0 %10731  ;;  %v23971_v46 = vld [vmem:[#allocation251_spill] sm:$0xff] }
 0x648   :  { %v23967_v7 = vcombine.high %v23965_v61, %v23966_v45  ;;  %v23968_v62 = vld [vmem:[#allocation405_spill] sm:$0xff]  ;;  %v11309_v16 = vsel %vm11281_vm10, %v11276_v22, %v23969_v1  ;;  %v23973_v47 = vld [vmem:[#allocation464_spill] sm:$0xff]  ;;  %v23974_v31 = vld [vmem:[#allocation235_spill] sm:$0xff] }
 0x649   :  { %10893 = vrot.lane.b32.xlu1 %v23964_v57, %s11600_s3  ;;  %v11179_v5 = vsel %vm11149_vm6, %v11146_v2, %v23968_v62  ;;  %v11342_v52 = vsel %vm11314_vm11, %v11309_v16, %v19085_v32  ;;  %v23975_v49 = vcombine.high %v23694_v11, %v23974_v31  ;;  %v23976_v2 = vld [vmem:[#allocation261_spill] sm:$0xff]  ;;  %v23979_v22 = vld [vmem:[#allocation95_spill] sm:$0xff]  ;;  %v23980_v57 = vld [vmem:[#allocation14_spill] sm:$0xff]  ;;  %v10658_v45 = vpop.permute.xlu1 %10657  ;;  %v23985_v16 = vcombine.high %v23718_v51, %v23719_v38 }
 0x64a   :  { %10907 = vrot.lane.b32.xlu0 %v23967_v7, %s11600_s3  ;;  %v11212_v15 = vsel %vm11182_vm7, %v11179_v5, %v23970_v27  ;;  %v19775_v14 = vsel %vm11347_vm12, %v11342_v52, %v10654_v56  ;;  %v23977_v12 = vld [vmem:[#allocation265_spill] sm:$0xff]  ;;  %v23982_v5 = vld [vmem:[#allocation187_spill] sm:$0xff]  ;;  %v23983_v11 = vld [vmem:[#allocation188_spill] sm:$0xff]  ;;  %v23987_v56 = vcombine.high %v23732_v58, %v23733_v55  ;;  %v23990_v58 = vcombine.high %v23776_v43, %v23777_v63 }
 0x64b   :  { %v11245_v20 = vsel %vm11215_vm8, %v11212_v15, %v23971_v46  ;;  %23972 = vst [vmem:[#allocation26_spill] sm:$0xff] %v19775_v14  ;;  %v23978_v32 = vcombine.high %v23976_v2, %v23977_v12  ;;  %v10736_v7 = vpop.permute.xlu0 %10735  ;;  %v23984_v1 = vcombine.high %v23982_v5, %v23983_v11  ;;  %v23994_v28 = vld [vmem:[#allocation12_spill] sm:$0xff] }
 0x64c   :  { %v11278_v40 = vsel %vm11248_vm9, %v11245_v20, %v23973_v47  ;;  %v23988_v47 = vcombine.high %v23747_v18, %v23748_v42 }
 0x64d   :  { %10897 = vrot.lane.b32.xlu1 %v23975_v49, %s11600_s3  ;;  %v11311_v53 = vsel %vm11281_vm10, %v11278_v40, %v23979_v22  ;;  %v10662_v27 = vpop.permute.xlu1 %10661  ;;  %v23989_v40 = vcombine.high %v23762_v26, %v23763_v39 }
 0x64e   :  { %10911 = vrot.lane.b32.xlu0 %v23978_v32, %s11600_s3  ;;  %v11344_v61 = vsel %vm11314_vm11, %v11311_v53, %v23980_v57  ;;  %v19804_v52 = vsel %vm11347_vm12, %v19196_v24, %v10662_v27 }
 0x64f   :  { %v19792_v62 = vsel %vm11347_vm12, %v11344_v61, %v10658_v45  ;;  %v10740_v15 = vpop.permute.xlu0 %10739  ;;  %23986 = vst [vmem:[#allocation287_spill] sm:$0xff] %v19804_v52 }
 0x650   :  { %23981 = vst [vmem:[#allocation24_spill] sm:$0xff] %v19792_v62 }
 0x651   :  { %10901 = vrot.lane.b32.xlu1 %v23984_v1, %s11600_s3  ;;  %v10730_v46 = vpop.permute.xlu1 %10729  ;;  %v23991_v1 = vld [vmem:[#allocation8_spill] sm:$0xff] }
 0x652   :  { %10915 = vrot.lane.b32.xlu0 %v23985_v16, %s11600_s3  ;;  %v11381_v16 = vsel %vm11380_vm13, %v23991_v1, %v10728_v37  ;;  %v11385_v37 = vsel %vm11380_vm13, %v23994_v28, %v10736_v7  ;;  %v11382_v28 = vsel %vm11380_vm13, %v19239_v59, %v10730_v46 }
 0x653   :  { %v10744_v20 = vpop.permute.xlu0 %10743 }
 0x655   :  { %10905 = vrot.lane.b32.xlu1 %v23987_v56, %s11600_s3  ;;  %v10734_v51 = vpop.permute.xlu1 %10733 }
 0x657   :  { %v10748_v38 = vpop.permute.xlu0 %10747 }
 0x659   :  { %10909 = vrot.lane.b32.xlu1 %v23988_v47, %s11600_s3  ;;  %v10738_v24 = vpop.permute.xlu1 %10737 }
 0x65b   :  { %v10752_v31 = vpop.permute.xlu0 %10751 }
 0x65d   :  { %10913 = vrot.lane.b32.xlu1 %v23989_v40, %s11600_s3  ;;  %v19822_v55 = vpop.permute.xlu1 %10741  ;;  %v23993_v40 = vld [vmem:[#allocation271_spill] sm:$0xff] }
 0x65f   :  { %v19824_v49 = vpop.permute.xlu0 %10755 }
 0x661   :  { %10917 = vrot.lane.b32.xlu1 %v23990_v58, %s11600_s3  ;;  %v19826_v18 = vpop.permute.xlu1 %10745  ;;  %v11383_v58 = vsel %vm11380_vm13, %v23993_v40, %v10732_v21  ;;  %v11387_v21 = vsel %vm11380_vm13, %v19199_v41, %v10740_v15  ;;  %v11384_v41 = vsel %vm11380_vm13, %v19284_v54, %v10734_v51  ;;  %v11391_v15 = vsel %vm11380_vm13, %v19287_v13, %v10748_v38 }
 0x663   :  { %v19828_v42 = vpop.permute.xlu0 %10759 }
 0x665   :  { %v19830_v2 = vpop.permute.xlu1 %10749 }
 0x667   :  { %v19832_v12 = vpop.permute.xlu0 %10763 }
 0x669   :  { %v19834_v26 = vpop.permute.xlu1 %10753 }
 0x66b   :  { %v19836_v39 = vpop.permute.xlu0 %10767 }
 0x66d   :  { %v19838_v32 = vpop.permute.xlu1 %10757 }
 0x66f   :  { %v19840_v43 = vpop.permute.xlu0 %10771 }
 0x671   :  { %v19842_v63 = vpop.permute.xlu1 %10761 }
 0x673   :  { %v19844_v22 = vpop.permute.xlu0 %10775 }
 0x675   :  { %v19846_v53 = vpop.permute.xlu1 %10765 }
 0x677   :  { %v19848_v57 = vpop.permute.xlu0 %10779 }
 0x679   :  { %v19850_v61 = vpop.permute.xlu1 %10769 }
 0x67b   :  { %v19852_v45 = vpop.permute.xlu0 %10783 }
 0x67d   :  { %v19854_v5 = vpop.permute.xlu1 %10773 }
 0x67f   :  { %v19856_v11 = vpop.permute.xlu0 %10787 }
 0x681   :  { %v19860_v27 = vpop.permute.xlu1 %10777 }
 0x682   :  { %23992 = vst [vmem:[#allocation37_spill] sm:$0xff] %v19860_v27 }
 0x683   :  { %v10856_v56 = vpop.permute.xlu0 %10855 }
 0x684   :  { %v11414_v47 = vsel %vm11413_vm14, %v11381_v16, %v10856_v56 }
 0x685   :  { %11447 = vst.msk [vmem:[#allocation5] sm:$0xff] %vm11446_vm15, %v11414_v47  ;;  %v19866_v52 = vpop.permute.xlu1 %10781 }
 0x687   :  { %v10860_v62 = vpop.permute.xlu0 %10859 }
 0x688   :  { %v11416_v14 = vsel %vm11413_vm14, %v11383_v58, %v10860_v62 }
 0x689   :  { %11449 = vst.msk [vmem:[#allocation5 + $0x10] sm:$0xff] %vm11446_vm15, %v11416_v14  ;;  %v19872_v1 = vpop.permute.xlu1 %10785  ;;  %v11389_v14 = vsel %vm11380_vm13, %v19242_v17, %v10744_v20 }
 0x68b   :  { %v10864_v27 = vpop.permute.xlu0 %10863 }
 0x68c   :  { %v11418_v16 = vsel %vm11413_vm14, %v11385_v37, %v10864_v27  ;;  %v11386_v37 = vsel %vm11380_vm13, %v19329_v6, %v10738_v24  ;;  %v11395_v6 = vsel %vm11380_vm13, %v19377_v19, %v19824_v49 }
 0x68d   :  { %11451 = vst.msk [vmem:[#allocation5 + $0x20] sm:$0xff] %vm11446_vm15, %v11418_v16  ;;  %v19878_v56 = vpop.permute.xlu1 %10789  ;;  %v11393_v16 = vsel %vm11380_vm13, %v19332_v8, %v10752_v31 }
 0x68f   :  { %v10868_v47 = vpop.permute.xlu0 %10867 }
 0x690   :  { %v11420_v62 = vsel %vm11413_vm14, %v11387_v21, %v10868_v47  ;;  %v11388_v21 = vsel %vm11380_vm13, %v19374_v48, %v19822_v55  ;;  %v11397_v48 = vsel %vm11380_vm13, %v19422_v60, %v19828_v42 }
 0x691   :  { %11453 = vst.msk [vmem:[#allocation5 + $0x30] sm:$0xff] %vm11446_vm15, %v11420_v62  ;;  %v10858_v7 = vpop.permute.xlu1 %10857  ;;  %v11390_v62 = vsel %vm11380_vm13, %v19419_v23, %v19826_v18  ;;  %v11399_v23 = vsel %vm11380_vm13, %v19465_v10, %v19832_v12 }
 0x692   :  { %v11415_v40 = vsel %vm11413_vm14, %v11382_v28, %v10858_v7 }
 0x693   :  { %v10872_v27 = vpop.permute.xlu0 %10871  ;;  %11448 = vst.msk [vmem:[#allocation5 + $0x8] sm:$0xff] %vm11446_vm15, %v11415_v40 }
 0x694   :  { %v11422_v58 = vsel %vm11413_vm14, %v11389_v14, %v10872_v27  ;;  %v11392_v14 = vsel %vm11380_vm13, %v19462_v29, %v19830_v2  ;;  %v11394_v27 = vsel %vm11380_vm13, %v19505_v35, %v19834_v26  ;;  %v11401_v29 = vsel %vm11380_vm13, %v19508_v33, %v19836_v39 }
 0x695   :  { %11455 = vst.msk [vmem:[#allocation5 + $0x40] sm:$0xff] %vm11446_vm15, %v11422_v58  ;;  %v10862_v59 = vpop.permute.xlu1 %10861  ;;  %v11396_v58 = vsel %vm11380_vm13, %v19547_v34, %v19838_v32  ;;  %v11403_v35 = vsel %vm11380_vm13, %v19550_v44, %v19840_v43  ;;  %v11405_v34 = vsel %vm11380_vm13, %v19591_v30, %v19844_v22 }
 0x696   :  { %v11417_v17 = vsel %vm11413_vm14, %v11384_v41, %v10862_v59 }
 0x697   :  { %v10876_v46 = vpop.permute.xlu0 %10875  ;;  %11450 = vst.msk [vmem:[#allocation5 + $0x18] sm:$0xff] %vm11446_vm15, %v11417_v17 }
 0x698   :  { %v11424_v20 = vsel %vm11413_vm14, %v11391_v15, %v10876_v46  ;;  %v11398_v15 = vsel %vm11380_vm13, %v19588_v0, %v19842_v63  ;;  %v11400_v46 = vsel %vm11380_vm13, %v19629_v50, %v19846_v53  ;;  %v11407_v0 = vsel %vm11380_vm13, %v19632_v9, %v19848_v57 }
 0x699   :  { %11457 = vst.msk [vmem:[#allocation5 + $0x50] sm:$0xff] %vm11446_vm15, %v11424_v20  ;;  %v10866_v54 = vpop.permute.xlu1 %10865  ;;  %v11402_v20 = vsel %vm11380_vm13, %v19671_v3, %v19850_v61  ;;  %v11409_v50 = vsel %vm11380_vm13, %v19674_v36, %v19852_v45  ;;  %v11411_v3 = vsel %vm11380_vm13, %v19717_v4, %v19856_v11  ;;  %v23997_v4 = vld [vmem:[#allocation26_spill] sm:$0xff] }
 0x69a   :  { %v11419_v13 = vsel %vm11413_vm14, %v11386_v37, %v10866_v54 }
 0x69b   :  { %v10880_v51 = vpop.permute.xlu0 %10879  ;;  %11452 = vst.msk [vmem:[#allocation5 + $0x28] sm:$0xff] %vm11446_vm15, %v11419_v13  ;;  %v23996_v13 = vld [vmem:[#allocation38_spill] sm:$0xff] }
 0x69c   :  { %v11426_v38 = vsel %vm11413_vm14, %v11393_v16, %v10880_v51  ;;  %v11404_v16 = vsel %vm11380_vm13, %v19713_v25, %v19854_v5  ;;  %v23995_v51 = vld [vmem:[#allocation37_spill] sm:$0xff]  ;;  %v11408_v5 = vsel %vm11380_vm13, %v23997_v4, %v19866_v52 }
 0x69d   :  { %11459 = vst.msk [vmem:[#allocation5 + $0x60] sm:$0xff] %vm11446_vm15, %v11426_v38  ;;  %v10870_v24 = vpop.permute.xlu1 %10869  ;;  %v11406_v38 = vsel %vm11380_vm13, %v23996_v13, %v23995_v51 }
 0x69e   :  { %v11421_v31 = vsel %vm11413_vm14, %v11388_v21, %v10870_v24  ;;  %v23998_v24 = vld [vmem:[#allocation24_spill] sm:$0xff] }
 0x69f   :  { %v10884_v8 = vpop.permute.xlu0 %10883  ;;  %11454 = vst.msk [vmem:[#allocation5 + $0x38] sm:$0xff] %vm11446_vm15, %v11421_v31 }
 0x6a0   :  { %v11428_v47 = vsel %vm11413_vm14, %v11395_v6, %v10884_v8  ;;  %v11410_v8 = vsel %vm11380_vm13, %v23998_v24, %v19872_v1 }
 0x6a1   :  { %11461 = vst.msk [vmem:[#allocation5 + $0x70] sm:$0xff] %vm11446_vm15, %v11428_v47  ;;  %v10874_v55 = vpop.permute.xlu1 %10873 }
 0x6a2   :  { %v11423_v49 = vsel %vm11413_vm14, %v11390_v62, %v10874_v55  ;;  %v23999_v62 = vld [vmem:[#allocation287_spill] sm:$0xff] }
 0x6a3   :  { %v10888_v19 = vpop.permute.xlu0 %10887  ;;  %11456 = vst.msk [vmem:[#allocation5 + $0x48] sm:$0xff] %vm11446_vm15, %v11423_v49  ;;  %v11412_v52 = vsel %vm11380_vm13, %v23999_v62, %v19878_v56 }
 0x6a4   :  { %v11430_v28 = vsel %vm11413_vm14, %v11397_v48, %v10888_v19 }
 0x6a5   :  { %11463 = vst.msk [vmem:[#allocation5 + $0x80] sm:$0xff] %vm11446_vm15, %v11430_v28  ;;  %v10878_v18 = vpop.permute.xlu1 %10877 }
 0x6a6   :  { %v11425_v42 = vsel %vm11413_vm14, %v11392_v14, %v10878_v18 }
 0x6a7   :  { %v10892_v60 = vpop.permute.xlu0 %10891  ;;  %11458 = vst.msk [vmem:[#allocation5 + $0x58] sm:$0xff] %vm11446_vm15, %v11425_v42 }
 0x6a8   :  { %v11432_v7 = vsel %vm11413_vm14, %v11399_v23, %v10892_v60 }
 0x6a9   :  { %11465 = vst.msk [vmem:[#allocation5 + $0x90] sm:$0xff] %vm11446_vm15, %v11432_v7 }
 0x6ab   :  { %v10882_v2 = vpop.permute.xlu1 %10881  ;;  %v10896_v10 = vpop.permute.xlu0 %10895 }
 0x6ac   :  { %v11427_v12 = vsel %vm11413_vm14, %v11394_v27, %v10882_v2  ;;  %v11434_v40 = vsel %vm11413_vm14, %v11401_v29, %v10896_v10 }
 0x6ad   :  { %11460 = vst.msk [vmem:[#allocation5 + $0x68] sm:$0xff] %vm11446_vm15, %v11427_v12  ;;  %11467 = vst.msk [vmem:[#allocation5 + $0xa0] sm:$0xff] %vm11446_vm15, %v11434_v40 }
 0x6b0   :  { %v10900_v33 = vpop.permute.xlu0 %10899 }
 0x6b1   :  { %v11436_v41 = vsel %vm11413_vm14, %v11403_v35, %v10900_v33 }
 0x6b2   :  { %v10886_v26 = vpop.permute.xlu1 %10885  ;;  %11469 = vst.msk [vmem:[#allocation5 + $0xb0] sm:$0xff] %vm11446_vm15, %v11436_v41 }
 0x6b3   :  { %v11429_v39 = vsel %vm11413_vm14, %v11396_v58, %v10886_v26 }
 0x6b4   :  { %11462 = vst.msk [vmem:[#allocation5 + $0x78] sm:$0xff] %vm11446_vm15, %v11429_v39 }
 0x6b7   :  { %v10890_v32 = vpop.permute.xlu1 %10889  ;;  %v10904_v44 = vpop.permute.xlu0 %10903 }
 0x6b8   :  { %v11431_v43 = vsel %vm11413_vm14, %v11398_v15, %v10890_v32  ;;  %v11438_v59 = vsel %vm11413_vm14, %v11405_v34, %v10904_v44 }
 0x6b9   :  { %11464 = vst.msk [vmem:[#allocation5 + $0x88] sm:$0xff] %vm11446_vm15, %v11431_v43  ;;  %11471 = vst.msk [vmem:[#allocation5 + $0xc0] sm:$0xff] %vm11446_vm15, %v11438_v59 }
 0x6bb   :  { %v10894_v63 = vpop.permute.xlu1 %10893 }
 0x6bc   :  { %v10908_v30 = vpop.permute.xlu0 %10907  ;;  %v11433_v22 = vsel %vm11413_vm14, %v11400_v46, %v10894_v63 }
 0x6bd   :  { %v11440_v17 = vsel %vm11413_vm14, %v11407_v0, %v10908_v30  ;;  %11466 = vst.msk [vmem:[#allocation5 + $0x98] sm:$0xff] %vm11446_vm15, %v11433_v22 }
 0x6be   :  { %11473 = vst.msk [vmem:[#allocation5 + $0xd0] sm:$0xff] %vm11446_vm15, %v11440_v17 }
 0x6bf   :  { %v10898_v53 = vpop.permute.xlu1 %10897 }
 0x6c0   :  { %v10912_v9 = vpop.permute.xlu0 %10911  ;;  %v11435_v57 = vsel %vm11413_vm14, %v11402_v20, %v10898_v53 }
 0x6c1   :  { %v11442_v37 = vsel %vm11413_vm14, %v11409_v50, %v10912_v9  ;;  %11468 = vst.msk [vmem:[#allocation5 + $0xa8] sm:$0xff] %vm11446_vm15, %v11435_v57 }
 0x6c2   :  { %11475 = vst.msk [vmem:[#allocation5 + $0xe0] sm:$0xff] %vm11446_vm15, %v11442_v37 }
 0x6c3   :  { %v10902_v61 = vpop.permute.xlu1 %10901 }
 0x6c4   :  { %v10916_v36 = vpop.permute.xlu0 %10915  ;;  %v11437_v45 = vsel %vm11413_vm14, %v11404_v16, %v10902_v61 }
 0x6c5   :  { %v11444_v54 = vsel %vm11413_vm14, %v11411_v3, %v10916_v36  ;;  %11470 = vst.msk [vmem:[#allocation5 + $0xb8] sm:$0xff] %vm11446_vm15, %v11437_v45 }
 0x6c6   :  { %11477 = vst.msk [vmem:[#allocation5 + $0xf0] sm:$0xff] %vm11446_vm15, %v11444_v54 }
 0x6c7   :  { %v10906_v21 = vpop.permute.xlu1 %10905 }
 0x6c8   :  { %v11439_v25 = vsel %vm11413_vm14, %v11406_v38, %v10906_v21 }
 0x6c9   :  { %11472 = vst.msk [vmem:[#allocation5 + $0xc8] sm:$0xff] %vm11446_vm15, %v11439_v25 }
 0x6cb   :  { %v10910_v11 = vpop.permute.xlu1 %10909 }
 0x6cc   :  { %v11441_v6 = vsel %vm11413_vm14, %v11408_v5, %v10910_v11 }
 0x6cd   :  { %11474 = vst.msk [vmem:[#allocation5 + $0xd8] sm:$0xff] %vm11446_vm15, %v11441_v6 }
 0x6cf   :  { %v10914_v31 = vpop.permute.xlu1 %10913 }
 0x6d0   :  { %v11443_v47 = vsel %vm11413_vm14, %v11410_v8, %v10914_v31 }
 0x6d1   :  { %11476 = vst.msk [vmem:[#allocation5 + $0xe8] sm:$0xff] %vm11446_vm15, %v11443_v47 }
 0x6d3   :  { %v10918_v48 = vpop.permute.xlu1 %10917 }
 0x6d4   :  { %v11445_v55 = vsel %vm11413_vm14, %v11412_v52, %v10918_v48 }
 0x6d5   :  { %11478 = vst.msk [vmem:[#allocation5 + $0xf8] sm:$0xff] %vm11446_vm15, %v11445_v55 }
 0x6d6   :  { %11566 = shalt.err (!%p11563_p12)
}
 0x6d7   :  { %s11567_s9 = scalar_lea.hbm %s20032_s1, 4096 }
 0x6d8   :  { %p11568_p13 = scmp.ne.s32.totalorder %s20032_s1, %s11567_s9  ;;  %p11571_p0 = scmp.lt.u32.totalorder %s11567_s9, %s20032_s1 }
 0x6da   :  { %p11573_p1 = pnand %p11571_p0, %p11568_p13 }
 0x6dc   :  { %11576 = shalt.err (!%p11573_p1)
}
 0x6dd   :  { %11490 = dma.vmem_to_hbm [thread:$0]  %s11485_s5, 4096, %s20032_s1, [#allocation4], %s11582_s16, %s11582_s16, %s11583_s17  }
 0x6de   :  { %11579 = dma.done.wait [#allocation4], 4096  }
 0x6df   :  { %11580 = vsyncadd [#allocation4], 4294963200 }
 0x6e0   :  { %11494 = vsyncpa [#allocation3], 1 }
 0x6e1   :  { %11495 = vsyncpa [#allocation4], 1 }

</bundles_post_ra>
